<compile_context>
chip_gen: v6e
topology: v6e:2x2x1
jax: 0.10.0
libtpu: 0.0.40
codegen_flags: <defaults>
</compile_context>

<pallas_src>
import numpy as np
import jax
import jax.numpy as jnp
from jax.experimental import pallas as pl
from jax.experimental.pallas import tpu as pltpu

# ----------------------------- model hyper-params (small) -----------------------------
B, T, C = 2, 1, 3            # batch, time (t=1), channels
IMG = 16                     # H = W = 16
PATCH = 4                    # decoder.patch_size
D = 32                       # encoder model dim == decoder d_model
N_HEADS = 4
N_LAYERS_ENC = 2
N_LAYERS_DEC = 2
D_MLP = 64
N_CLS = 5
N_CLS_PAD = 8                # padded class rows for lane-dense final store
LN_EPS = 1e-6
MXU_DTYPE = jnp.bfloat16     # MXU operand dtype (accumulation is always f32)

BT = B * T
GH = GW = IMG // PATCH       # 4 x 4 patch grid
N_TOK = GH * GW              # 16 encoder tokens
S_DEC = 24                   # decoder sequence, padded from 21 (=N_TOK+N_CLS) to a sublane multiple
HW = IMG * IMG               # 256 output pixels
CPP = C * PATCH * PATCH      # 48 im2col columns
CPP_PAD = 64                 # padded so patch_w stacks with the (D_MLP, D) fc2 weights

# ----------------------------- packed "vectors" array row map (VEC_ROWS x 128, f32) ----
_BLK_ROWS = 8                # per transformer block: ln1_g, ln1_b, bqkv, bo, ln2_g, ln2_b, b1, b2
ROW_PATCH_B = 32
ROW_PROJ_DEC_B = 33
ROW_DEC_NORM_G = 34
ROW_DEC_NORM_B = 35
ROW_MASK_NORM = 36           # 8 rows; col 0 = gamma, col 1 = beta (rows 5..7 pad)
ROW_KEY_BIAS = 44            # decoder key-mask bias row (0 for real keys, -1e9 for pads)
ROW_POS_EMB = 48             # 16 rows
ROW_CLS_EMB = 64             # 8 rows (rows 5..7 zero)
VEC_ROWS = 72
VEC_COLS = 128

# stacked-weight indices (stack order for blocks: enc0, enc1, dec0, dec1)
IDX_PROJ_DEC = 4             # in w_dd
IDX_PROJ_PATCH = 5           # in w_dd
IDX_PROJ_CLASSES = 6         # in w_dd
IDX_PATCH_W = 4              # in w_kd


# ----------------------------- in-kernel helpers (trace-time, pure jnp) ----------------

def _mm(a, w, bias=None):
    """bf16 MXU matmul with f32 accumulation; bias add skipped when absent."""
    out = jnp.dot(a.astype(w.dtype), w, preferred_element_type=jnp.float32)
    if bias is not None:
        out = out + bias
    return out


def _layernorm(x, g, b):
    mu = jnp.mean(x, axis=-1, keepdims=True)
    xc = x - mu
    var = jnp.mean(xc * xc, axis=-1, keepdims=True)
    return xc * jax.lax.rsqrt(var + LN_EPS) * g + b


def _gelu(x):
    # TODO(synk): tanh-approx GELU (EUP slot); PyTorch reference uses exact erf (~1e-3 rel diff).
    return jax.nn.gelu(x, approximate=True)


def _l2norm(x):
    # x / max(||x||, tiny)  (clamp only protects exact-zero rows), rsqrt on the EUP.
    ss = jnp.sum(x * x, axis=-1, keepdims=True)
    return x * jax.lax.rsqrt(jnp.maximum(ss, 1e-24))


def _mha(x, wqkv, bqkv, wo, bo, key_bias=None):
    """Multi-head self-attention, heads fully unrolled.

    1/sqrt(dh) is pre-folded into the Q columns of `wqkv`.  No head concat: each head's output
    is accumulated through the matching (dh, D) slice of `wo`.
    """
    s_len, d = x.shape
    dh = d // N_HEADS
    qkv = _mm(x, wqkv, bqkv)                                     # (S, 3D) f32
    out = bo                                                     # (1, D), broadcasts on first add
    for h in range(N_HEADS):
        q = qkv[:, h * dh:(h + 1) * dh]
        k = qkv[:, d + h * dh: d + (h + 1) * dh]
        v = qkv[:, 2 * d + h * dh: 2 * d + (h + 1) * dh]
        s = jax.lax.dot_general(q, k, (((1,), (1,)), ((), ())),
                                preferred_element_type=jnp.float32)   # (S, S)
        if key_bias is not None:
            s = s + key_bias                                     # mask padded keys
        s = s - jnp.max(s, axis=-1, keepdims=True)
        e = jnp.exp(s)
        p = e / jnp.sum(e, axis=-1, keepdims=True)               # exact softmax (parity-safe)
        hv = jnp.dot(p, v, preferred_element_type=jnp.float32)   # (S, dh)
        out = out + _mm(hv, wo[h * dh:(h + 1) * dh, :])          # accumulate via wo slice
    return out


def _block(x, b, wqkv_ref, wdd_ref, wfc1_ref, wkd_ref, vecs_ref, key_bias=None):
    """Pre-norm transformer block b (0,1 = encoder; 2,3 = decoder)."""
    r = b * _BLK_ROWS

    def row(i, width):
        return vecs_ref[r + i:r + i + 1, 0:width]                # (1, width) static slice

    h = _layernorm(x, row(0, D), row(1, D))
    x = x + _mha(h, wqkv_ref[b], row(2, 3 * D), wdd_ref[b], row(3, D), key_bias)
    h = _layernorm(x, row(4, D), row(5, D))
    h = _mm(_gelu(_mm(h, wfc1_ref[b], row(6, D_MLP))), wkd_ref[b], row(7, D))
    return x + h


# ----------------------------- the single fused kernel ---------------------------------

def _presegmenter_kernel(patches_ref, bilin_ref, wqkv_ref, wdd_ref, wfc1_ref, wkd_ref,
                         vecs_ref, out_ref):
    # Small resident params, sliced once and reused by both images.
    pos_emb = vecs_ref[ROW_POS_EMB:ROW_POS_EMB + N_TOK, 0:D]          # (16, 32)
    cls_emb = vecs_ref[ROW_CLS_EMB:ROW_CLS_EMB + N_CLS_PAD, 0:D]      # (8, 32), rows 5..7 zero
    patch_b = vecs_ref[ROW_PATCH_B:ROW_PATCH_B + 1, 0:D]
    proj_dec_b = vecs_ref[ROW_PROJ_DEC_B:ROW_PROJ_DEC_B + 1, 0:D]
    dec_norm_g = vecs_ref[ROW_DEC_NORM_G:ROW_DEC_NORM_G + 1, 0:D]
    dec_norm_b = vecs_ref[ROW_DEC_NORM_B:ROW_DEC_NORM_B + 1, 0:D]
    mask_g = vecs_ref[ROW_MASK_NORM:ROW_MASK_NORM + N_CLS_PAD, 0:1]   # (8, 1)
    mask_b = vecs_ref[ROW_MASK_NORM:ROW_MASK_NORM + N_CLS_PAD, 1:2]   # (8, 1)
    key_bias = vecs_ref[ROW_KEY_BIAS:ROW_KEY_BIAS + 1, 0:S_DEC]       # (1, 24)
    bilin = bilin_ref[...]                                            # (16, 256)

    # Both images unrolled into one schedule (independent chains interleave in the VLIW).
    for img in range(BT):
        # Patch embedding (stride-P conv as im2col matmul) + learned 1D positional embedding.
        x = _mm(patches_ref[img], wkd_ref[IDX_PATCH_W], patch_b) + pos_emb   # (16, 32)

        # ViT encoder.
        for b in range(N_LAYERS_ENC):
            x = _block(x, b, wqkv_ref, wdd_ref, wfc1_ref, wkd_ref, vecs_ref)

        # MaskTransformer decoder: project, append (padded) class tokens, 2 blocks with key mask.
        x = _mm(x, wdd_ref[IDX_PROJ_DEC], proj_dec_b)
        x = jnp.concatenate([x, cls_emb], axis=0)                            # (24, 32)
        for b in range(N_LAYERS_DEC):
            x = _block(x, N_LAYERS_ENC + b, wqkv_ref, wdd_ref, wfc1_ref, wkd_ref,
                       vecs_ref, key_bias=key_bias)
        x = _layernorm(x, dec_norm_g, dec_norm_b)

        patch_feat = _l2norm(_mm(x[:N_TOK], wdd_ref[IDX_PROJ_PATCH]))        # (16, 32)
        cls_feat = _l2norm(_mm(x[N_TOK:], wdd_ref[IDX_PROJ_CLASSES]))        # (8, 32)

        # masks^T: (classes, tokens) so the mask-norm and upsample stay lane-dense.
        masks_t = jax.lax.dot_general(cls_feat, patch_feat, (((1,), (1,)), ((), ())),
                                      preferred_element_type=jnp.float32)    # (8, 16)

        # mask_norm = LayerNorm over the class axis; statistics from the 5 real classes only.
        real = masks_t[:N_CLS]
        mu = jnp.mean(real, axis=0, keepdims=True)
        var = jnp.mean((real - mu) * (real - mu), axis=0, keepdims=True)
        masks_t = (masks_t - mu) * jax.lax.rsqrt(var + LN_EPS) * mask_g + mask_b

        # Bilinear (align_corners=True) upsample fused into one lane-dense (8,16)@(16,256) matmul.
        out_ref[img] = jnp.dot(masks_t, bilin, preferred_element_type=jnp.float32)


# ----------------------------- host-side glue -------------------------------------------

def _interp_matrix(in_size, out_size):
    """Row-stochastic bilinear (align_corners=True) interpolation matrix (out, in)."""
    A = np.zeros((out_size, in_size), dtype=np.float32)
    if in_size == 1 or out_size == 1:
        A[:, 0] = 1.0
        return A
    scale = (in_size - 1) / (out_size - 1)
    for i in range(out_size):
        src = i * scale
        i0 = min(int(np.floor(src)), in_size - 1)
        i1 = min(i0 + 1, in_size - 1)
        w1 = src - i0
        A[i, i0] += 1.0 - w1
        A[i, i1] += w1
    return A


def _full_spec(shape):
    nd = len(shape)
    return pl.BlockSpec(shape, lambda i, _nd=nd: (0,) * _nd)


def pre_segmenter_forward(im, packed):
    """im: (B, T, C, H, W) float32 -> masks (B*T, n_cls, H_ori, W_ori)."""
    Bz, Tz, Cz, H0, W0 = im.shape
    # padding(im, patch_size): pad right/bottom with zeros to multiples of PATCH.
    pad_h = (-H0) % PATCH
    pad_w = (-W0) % PATCH
    im_p = jnp.pad(im, ((0, 0), (0, 0), (0, 0), (0, pad_h), (0, pad_w)))
    H, W = H0 + pad_h, W0 + pad_w
    bt = Bz * Tz
    gh, gw = H // PATCH, W // PATCH
    n_tok = gh * gw
    cpp = Cz * PATCH * PATCH
    assert bt == BT and n_tok == N_TOK and cpp == CPP and H * W == HW, "shape/constant mismatch"

    # TODO(synk): multi_temporal=True uses TemporalPatchEmb (definition not provided); the
    #             standard Conv2d patch-embedding path is implemented instead.
    x = im_p.reshape(bt, Cz, H, W)

    # im2col for the stride=PATCH conv (pure relayout -> XLA glue, not kernel work), padded to 64.
    patches = (x.reshape(bt, Cz, gh, PATCH, gw, PATCH)
               .transpose(0, 2, 4, 1, 3, 5)
               .reshape(bt, n_tok, cpp)).astype(jnp.float32)
    patches = jnp.pad(patches, ((0, 0), (0, 0), (0, CPP_PAD - cpp)))

    # Fused separable bilinear operator: kron(Ah, Aw)^T of shape (n_tok, H*W).
    bilin_t = jnp.asarray(np.kron(_interp_matrix(gh, H), _interp_matrix(gw, W)).T,
                          dtype=jnp.float32)

    w_qkv, w_dd, w_fc1, w_kd, vecs = packed
    args = (patches, bilin_t, w_qkv, w_dd, w_fc1, w_kd, vecs)

    masks = pl.pallas_call(
        _presegmenter_kernel,
        grid=(1,),
        in_specs=[_full_spec(a.shape) for a in args],
        out_specs=_full_spec((bt, N_CLS_PAD, H * W)),
        out_shape=jax.ShapeDtypeStruct((bt, N_CLS_PAD, H * W), jnp.float32),
        compiler_params=pltpu.CompilerParams(dimension_semantics=("arbitrary",)),
    )(*args)

    masks = masks[:, :N_CLS].reshape(bt, N_CLS, H, W)
    # unpadding to original size (applying it again, as the PyTorch code does, is a no-op).
    return masks[:, :, :H0, :W0]


# ----------------------------- deterministic parameter init + packing -------------------

def init_params(key):
    keys = iter(jax.random.split(key, 64))

    def nrm(shape, std=0.02):
        return (std * jax.random.normal(next(keys), shape)).astype(jnp.float32)

    p = {}
    # Conv2d patch embedding: PyTorch weight (D, C, P, P) -> (C*P*P, D) for x @ W.
    conv_w = nrm((D, C, PATCH, PATCH))
    p["patch_w"] = conv_w.reshape(D, CPP).T
    p["patch_b"] = jnp.zeros((D,), jnp.float32)
    p["pos_emb"] = nrm((N_TOK, D))
    p["cls_emb"] = nrm((N_CLS, D))

    for i in range(N_LAYERS_ENC + N_LAYERS_DEC):
        pre = f"blk{i}_"
        p[pre + "ln1_g"] = jnp.ones((D,), jnp.float32)
        p[pre + "ln1_b"] = jnp.zeros((D,), jnp.float32)
        p[pre + "wq"] = nrm((D, D)); p[pre + "wk"] = nrm((D, D)); p[pre + "wv"] = nrm((D, D))
        p[pre + "bq"] = jnp.zeros((D,), jnp.float32)
        p[pre + "bk"] = jnp.zeros((D,), jnp.float32)
        p[pre + "bv"] = jnp.zeros((D,), jnp.float32)
        p[pre + "wo"] = nrm((D, D)); p[pre + "bo"] = jnp.zeros((D,), jnp.float32)
        p[pre + "ln2_g"] = jnp.ones((D,), jnp.float32)
        p[pre + "ln2_b"] = jnp.zeros((D,), jnp.float32)
        p[pre + "w1"] = nrm((D, D_MLP)); p[pre + "b1"] = jnp.zeros((D_MLP,), jnp.float32)
        p[pre + "w2"] = nrm((D_MLP, D)); p[pre + "b2"] = jnp.zeros((D,), jnp.float32)

    p["proj_dec_w"] = nrm((D, D)); p["proj_dec_b"] = jnp.zeros((D,), jnp.float32)
    p["dec_norm_g"] = jnp.ones((D,), jnp.float32)
    p["dec_norm_b"] = jnp.zeros((D,), jnp.float32)
    scale = D ** -0.5
    p["proj_patch"] = (scale * jax.random.normal(next(keys), (D, D))).astype(jnp.float32)
    p["proj_classes"] = (scale * jax.random.normal(next(keys), (D, D))).astype(jnp.float32)
    p["mask_norm_g"] = jnp.ones((N_CLS,), jnp.float32)
    p["mask_norm_b"] = jnp.zeros((N_CLS,), jnp.float32)
    return p


def pack_params(p):
    """Pack natural params into 4 bf16 weight stacks + 1 packed f32 vectors array (7 kernel refs)."""
    n_blk = N_LAYERS_ENC + N_LAYERS_DEC
    att_scale = 1.0 / np.sqrt(D // N_HEADS)

    wqkv, wdd, wfc1, wkd = [], [], [], []
    vecs = np.zeros((VEC_ROWS, VEC_COLS), np.float32)

    for i in range(n_blk):
        pre = f"blk{i}_"
        # Fused QKV weight; fold the 1/sqrt(dh) attention scale into the Q columns (and Q bias).
        wq = np.asarray(p[pre + "wq"]) * att_scale
        wqkv.append(np.concatenate([wq, np.asarray(p[pre + "wk"]), np.asarray(p[pre + "wv"])], 1))
        wdd.append(np.asarray(p[pre + "wo"]))
        wfc1.append(np.asarray(p[pre + "w1"]))
        wkd.append(np.asarray(p[pre + "w2"]))
        r = i * _BLK_ROWS
        vecs[r + 0, :D] = np.asarray(p[pre + "ln1_g"])
        vecs[r + 1, :D] = np.asarray(p[pre + "ln1_b"])
        vecs[r + 2, :D] = np.asarray(p[pre + "bq"]) * att_scale
        vecs[r + 2, D:2 * D] = np.asarray(p[pre + "bk"])
        vecs[r + 2, 2 * D:3 * D] = np.asarray(p[pre + "bv"])
        vecs[r + 3, :D] = np.asarray(p[pre + "bo"])
        vecs[r + 4, :D] = np.asarray(p[pre + "ln2_g"])
        vecs[r + 5, :D] = np.asarray(p[pre + "ln2_b"])
        vecs[r + 6, :D_MLP] = np.asarray(p[pre + "b1"])
        vecs[r + 7, :D] = np.asarray(p[pre + "b2"])

    wdd += [np.asarray(p["proj_dec_w"]), np.asarray(p["proj_patch"]), np.asarray(p["proj_classes"])]
    patch_w_pad = np.zeros((CPP_PAD, D), np.float32)
    patch_w_pad[:CPP] = np.asarray(p["patch_w"])
    wkd.append(patch_w_pad)

    vecs[ROW_PATCH_B, :D] = np.asarray(p["patch_b"])
    vecs[ROW_PROJ_DEC_B, :D] = np.asarray(p["proj_dec_b"])
    vecs[ROW_DEC_NORM_G, :D] = np.asarray(p["dec_norm_g"])
    vecs[ROW_DEC_NORM_B, :D] = np.asarray(p["dec_norm_b"])
    vecs[ROW_MASK_NORM:ROW_MASK_NORM + N_CLS, 0] = np.asarray(p["mask_norm_g"])
    vecs[ROW_MASK_NORM + N_CLS:ROW_MASK_NORM + N_CLS_PAD, 0] = 1.0   # pad-class gamma (discarded)
    vecs[ROW_MASK_NORM:ROW_MASK_NORM + N_CLS, 1] = np.asarray(p["mask_norm_b"])
    vecs[ROW_KEY_BIAS, N_TOK + N_CLS:S_DEC] = -1e9                   # mask the 3 decoder pad keys
    vecs[ROW_POS_EMB:ROW_POS_EMB + N_TOK, :D] = np.asarray(p["pos_emb"])
    vecs[ROW_CLS_EMB:ROW_CLS_EMB + N_CLS, :D] = np.asarray(p["cls_emb"])

    return (jnp.asarray(np.stack(wqkv), MXU_DTYPE),
            jnp.asarray(np.stack(wdd), MXU_DTYPE),
            jnp.asarray(np.stack(wfc1), MXU_DTYPE),
            jnp.asarray(np.stack(wkd), MXU_DTYPE),
            jnp.asarray(vecs))


# ----------------------------- main ------------------------------------------------------

if __name__ == "__main__":
    key = jax.random.PRNGKey(0)
    k_im, k_par = jax.random.split(key)
    im = jax.random.normal(k_im, (B, T, C, IMG, IMG), dtype=jnp.float32)
    packed = pack_params(init_params(k_par))

    fwd = jax.jit(pre_segmenter_forward)
    masks = jax.block_until_ready(fwd(im, packed))

    assert masks.shape == (B * T, N_CLS, IMG, IMG), masks.shape
    assert bool(jnp.all(jnp.isfinite(masks)))
    print("KERNEL_OK")
</pallas_src>

<mosaic_0001>
module attributes {stable_mosaic.version = 11 : i64} {
  func.func @_presegmenter_kernel(%arg0: i32, %arg1: memref<2x16x64xf32, #tpu.memory_space<vmem>>, %arg2: memref<16x256xf32, #tpu.memory_space<vmem>>, %arg3: memref<4x32x96xbf16, #tpu.memory_space<vmem>>, %arg4: memref<7x32x32xbf16, #tpu.memory_space<vmem>>, %arg5: memref<4x32x64xbf16, #tpu.memory_space<vmem>>, %arg6: memref<5x64x32xbf16, #tpu.memory_space<vmem>>, %arg7: memref<72x128xf32, #tpu.memory_space<vmem>>, %arg8: memref<2x8x256xf32, #tpu.memory_space<vmem>>) attributes {dimension_semantics = [#tpu.dimension_semantics<arbitrary>], iteration_bounds = array<i64: 1>, scalar_prefetch = 0 : i64, scratch_operands = 0 : i64, tpu.core_type = #tpu.core_type<tc>, window_params = [{pipeline_mode = #tpu.pipeline_mode<synchronous>, transform_indices = @transform_0, window_bounds = array<i64: 2, 16, 64>}, {pipeline_mode = #tpu.pipeline_mode<synchronous>, transform_indices = @transform_1, window_bounds = array<i64: 16, 256>}, {pipeline_mode = #tpu.pipeline_mode<synchronous>, transform_indices = @transform_2, window_bounds = array<i64: 4, 32, 96>}, {pipeline_mode = #tpu.pipeline_mode<synchronous>, transform_indices = @transform_3, window_bounds = array<i64: 7, 32, 32>}, {pipeline_mode = #tpu.pipeline_mode<synchronous>, transform_indices = @transform_4, window_bounds = array<i64: 4, 32, 64>}, {pipeline_mode = #tpu.pipeline_mode<synchronous>, transform_indices = @transform_5, window_bounds = array<i64: 5, 64, 32>}, {pipeline_mode = #tpu.pipeline_mode<synchronous>, transform_indices = @transform_6, window_bounds = array<i64: 72, 128>}, {pipeline_mode = #tpu.pipeline_mode<synchronous>, transform_indices = @transform_7, window_bounds = array<i64: 2, 8, 256>}]} {
    %c48 = arith.constant 48 : index
    %c0 = arith.constant 0 : index
    %0 = vector.load %arg7[%c48, %c0] : memref<72x128xf32, #tpu.memory_space<vmem>>, vector<16x32xf32>
    %c64 = arith.constant 64 : index
    %c0_0 = arith.constant 0 : index
    %1 = vector.load %arg7[%c64, %c0_0] : memref<72x128xf32, #tpu.memory_space<vmem>>, vector<8x32xf32>
    %c32 = arith.constant 32 : index
    %c0_1 = arith.constant 0 : index
    %2 = vector.load %arg7[%c32, %c0_1] : memref<72x128xf32, #tpu.memory_space<vmem>>, vector<1x32xf32>
    %c33 = arith.constant 33 : index
    %c0_2 = arith.constant 0 : index
    %3 = vector.load %arg7[%c33, %c0_2] : memref<72x128xf32, #tpu.memory_space<vmem>>, vector<1x32xf32>
    %c34 = arith.constant 34 : index
    %c0_3 = arith.constant 0 : index
    %4 = vector.load %arg7[%c34, %c0_3] : memref<72x128xf32, #tpu.memory_space<vmem>>, vector<1x32xf32>
    %c35 = arith.constant 35 : index
    %c0_4 = arith.constant 0 : index
    %5 = vector.load %arg7[%c35, %c0_4] : memref<72x128xf32, #tpu.memory_space<vmem>>, vector<1x32xf32>
    %c36 = arith.constant 36 : index
    %c0_5 = arith.constant 0 : index
    %6 = vector.load %arg7[%c36, %c0_5] : memref<72x128xf32, #tpu.memory_space<vmem>>, vector<8x1xf32>
    %c36_6 = arith.constant 36 : index
    %c1 = arith.constant 1 : index
    %7 = vector.load %arg7[%c36_6, %c1] : memref<72x128xf32, #tpu.memory_space<vmem>>, vector<8x1xf32>
    %c44 = arith.constant 44 : index
    %c0_7 = arith.constant 0 : index
    %8 = vector.load %arg7[%c44, %c0_7] : memref<72x128xf32, #tpu.memory_space<vmem>>, vector<1x24xf32>
    %c0_8 = arith.constant 0 : index
    %c0_9 = arith.constant 0 : index
    %9 = vector.load %arg2[%c0_8, %c0_9] : memref<16x256xf32, #tpu.memory_space<vmem>>, vector<16x256xf32>
    %c0_10 = arith.constant 0 : index
    %c0_11 = arith.constant 0 : index
    %c0_12 = arith.constant 0 : index
    %10 = vector.load %arg1[%c0_10, %c0_11, %c0_12] : memref<2x16x64xf32, #tpu.memory_space<vmem>>, vector<1x16x64xf32>
    %11 = vector.shape_cast %10 : vector<1x16x64xf32> to vector<16x64xf32>
    %c4 = arith.constant 4 : index
    %c0_13 = arith.constant 0 : index
    %c0_14 = arith.constant 0 : index
    %12 = vector.load %arg6[%c4, %c0_13, %c0_14] : memref<5x64x32xbf16, #tpu.memory_space<vmem>>, vector<1x64x32xbf16>
    %13 = vector.shape_cast %12 : vector<1x64x32xbf16> to vector<64x32xbf16>
    %14 = arith.truncf %11 : vector<16x64xf32> to vector<16x64xbf16>
    %cst = arith.constant dense<0.000000e+00> : vector<16x32xf32>
    %15 = tpu.matmul %14, %13, %cst {dimension_numbers = #tpu.dot_dimension_numbers<[1], [0], [0], [1], [0, 0, 1, 1], [], []>} : vector<16x64xbf16>, vector<64x32xbf16>, vector<16x32xf32> -> vector<16x32xf32>
    %16 = vector.broadcast %2 : vector<1x32xf32> to vector<16x32xf32>
    %17 = arith.addf %15, %16 : vector<16x32xf32>
    %18 = arith.addf %17, %0 : vector<16x32xf32>
    %c0_15 = arith.constant 0 : index
    %c0_16 = arith.constant 0 : index
    %19 = vector.load %arg7[%c0_15, %c0_16] : memref<72x128xf32, #tpu.memory_space<vmem>>, vector<1x32xf32>
    %c1_17 = arith.constant 1 : index
    %c0_18 = arith.constant 0 : index
    %20 = vector.load %arg7[%c1_17, %c0_18] : memref<72x128xf32, #tpu.memory_space<vmem>>, vector<1x32xf32>
    %cst_19 = arith.constant dense<0.000000e+00> : vector<16xf32>
    %21 = vector.multi_reduction <add>, %18, %cst_19 [1] : vector<16x32xf32> to vector<16xf32>
    %22 = vector.shape_cast %21 : vector<16xf32> to vector<16x1xf32>
    %cst_20 = arith.constant 3.200000e+01 : f32
    %23 = vector.broadcast %cst_20 : f32 to vector<16x1xf32>
    %24 = arith.divf %22, %23 : vector<16x1xf32>
    %25 = vector.broadcast %24 : vector<16x1xf32> to vector<16x32xf32>
    %26 = arith.subf %18, %25 : vector<16x32xf32>
    %27 = arith.mulf %26, %26 : vector<16x32xf32>
    %cst_21 = arith.constant dense<0.000000e+00> : vector<16xf32>
    %28 = vector.multi_reduction <add>, %27, %cst_21 [1] : vector<16x32xf32> to vector<16xf32>
    %29 = vector.shape_cast %28 : vector<16xf32> to vector<16x1xf32>
    %cst_22 = arith.constant 3.200000e+01 : f32
    %30 = vector.broadcast %cst_22 : f32 to vector<16x1xf32>
    %31 = arith.divf %29, %30 : vector<16x1xf32>
    %cst_23 = arith.constant 9.99999997E-7 : f32
    %32 = vector.broadcast %cst_23 : f32 to vector<16x1xf32>
    %33 = arith.addf %31, %32 : vector<16x1xf32>
    %34 = math.rsqrt %33 : vector<16x1xf32>
    %35 = vector.broadcast %34 : vector<16x1xf32> to vector<16x32xf32>
    %36 = arith.mulf %26, %35 : vector<16x32xf32>
    %37 = vector.broadcast %19 : vector<1x32xf32> to vector<16x32xf32>
    %38 = arith.mulf %36, %37 : vector<16x32xf32>
    %39 = vector.broadcast %20 : vector<1x32xf32> to vector<16x32xf32>
    %40 = arith.addf %38, %39 : vector<16x32xf32>
    %c0_24 = arith.constant 0 : index
    %c0_25 = arith.constant 0 : index
    %c0_26 = arith.constant 0 : index
    %41 = vector.load %arg3[%c0_24, %c0_25, %c0_26] : memref<4x32x96xbf16, #tpu.memory_space<vmem>>, vector<1x32x96xbf16>
    %42 = vector.shape_cast %41 : vector<1x32x96xbf16> to vector<32x96xbf16>
    %c2 = arith.constant 2 : index
    %c0_27 = arith.constant 0 : index
    %43 = vector.load %arg7[%c2, %c0_27] : memref<72x128xf32, #tpu.memory_space<vmem>>, vector<1x96xf32>
    %c0_28 = arith.constant 0 : index
    %c0_29 = arith.constant 0 : index
    %c0_30 = arith.constant 0 : index
    %44 = vector.load %arg4[%c0_28, %c0_29, %c0_30] : memref<7x32x32xbf16, #tpu.memory_space<vmem>>, vector<1x32x32xbf16>
    %45 = vector.shape_cast %44 : vector<1x32x32xbf16> to vector<32x32xbf16>
    %c3 = arith.constant 3 : index
    %c0_31 = arith.constant 0 : index
    %46 = vector.load %arg7[%c3, %c0_31] : memref<72x128xf32, #tpu.memory_space<vmem>>, vector<1x32xf32>
    %47 = arith.truncf %40 : vector<16x32xf32> to vector<16x32xbf16>
    %cst_32 = arith.constant dense<0.000000e+00> : vector<16x96xf32>
    %48 = tpu.matmul %47, %42, %cst_32 {dimension_numbers = #tpu.dot_dimension_numbers<[1], [0], [0], [1], [0, 0, 1, 1], [], []>} : vector<16x32xbf16>, vector<32x96xbf16>, vector<16x96xf32> -> vector<16x96xf32>
    %49 = vector.broadcast %43 : vector<1x96xf32> to vector<16x96xf32>
    %50 = arith.addf %48, %49 : vector<16x96xf32>
    %51 = vector.extract_strided_slice %50 {offsets = [0, 0], sizes = [16, 8], strides = [1, 1]} : vector<16x96xf32> to vector<16x8xf32>
    %52 = vector.extract_strided_slice %50 {offsets = [0, 32], sizes = [16, 8], strides = [1, 1]} : vector<16x96xf32> to vector<16x8xf32>
    %53 = vector.extract_strided_slice %50 {offsets = [0, 64], sizes = [16, 8], strides = [1, 1]} : vector<16x96xf32> to vector<16x8xf32>
    %cst_33 = arith.constant dense<0.000000e+00> : vector<16x16xf32>
    %54 = tpu.matmul %51, %52, %cst_33 {dimension_numbers = #tpu.dot_dimension_numbers<[1], [1], [0], [0], [0, 0, 1, 0], [], []>} : vector<16x8xf32>, vector<16x8xf32>, vector<16x16xf32> -> vector<16x16xf32>
    %cst_34 = arith.constant dense<0xFF800000> : vector<16xf32>
    %55 = vector.multi_reduction <maximumf>, %54, %cst_34 [1] : vector<16x16xf32> to vector<16xf32>
    %56 = vector.shape_cast %55 : vector<16xf32> to vector<16x1xf32>
    %57 = vector.broadcast %56 : vector<16x1xf32> to vector<16x16xf32>
    %58 = arith.subf %54, %57 : vector<16x16xf32>
    %59 = math.exp %58 : vector<16x16xf32>
    %cst_35 = arith.constant dense<0.000000e+00> : vector<16xf32>
    %60 = vector.multi_reduction <add>, %59, %cst_35 [1] : vector<16x16xf32> to vector<16xf32>
    %61 = vector.shape_cast %60 : vector<16xf32> to vector<16x1xf32>
    %62 = vector.broadcast %61 : vector<16x1xf32> to vector<16x16xf32>
    %63 = arith.divf %59, %62 : vector<16x16xf32>
    %cst_36 = arith.constant dense<0.000000e+00> : vector<16x8xf32>
    %64 = tpu.matmul %63, %53, %cst_36 {dimension_numbers = #tpu.dot_dimension_numbers<[1], [0], [0], [1], [0, 0, 1, 1], [], []>} : vector<16x16xf32>, vector<16x8xf32>, vector<16x8xf32> -> vector<16x8xf32>
    %65 = vector.extract_strided_slice %45 {offsets = [0, 0], sizes = [8, 32], strides = [1, 1]} : vector<32x32xbf16> to vector<8x32xbf16>
    %66 = arith.truncf %64 : vector<16x8xf32> to vector<16x8xbf16>
    %cst_37 = arith.constant dense<0.000000e+00> : vector<16x32xf32>
    %67 = tpu.matmul %66, %65, %cst_37 {dimension_numbers = #tpu.dot_dimension_numbers<[1], [0], [0], [1], [0, 0, 1, 1], [], []>} : vector<16x8xbf16>, vector<8x32xbf16>, vector<16x32xf32> -> vector<16x32xf32>
    %68 = vector.broadcast %46 : vector<1x32xf32> to vector<16x32xf32>
    %69 = arith.addf %68, %67 : vector<16x32xf32>
    %70 = vector.extract_strided_slice %50 {offsets = [0, 8], sizes = [16, 8], strides = [1, 1]} : vector<16x96xf32> to vector<16x8xf32>
    %71 = vector.extract_strided_slice %50 {offsets = [0, 40], sizes = [16, 8], strides = [1, 1]} : vector<16x96xf32> to vector<16x8xf32>
    %72 = vector.extract_strided_slice %50 {offsets = [0, 72], sizes = [16, 8], strides = [1, 1]} : vector<16x96xf32> to vector<16x8xf32>
    %cst_38 = arith.constant dense<0.000000e+00> : vector<16x16xf32>
    %73 = tpu.matmul %70, %71, %cst_38 {dimension_numbers = #tpu.dot_dimension_numbers<[1], [1], [0], [0], [0, 0, 1, 0], [], []>} : vector<16x8xf32>, vector<16x8xf32>, vector<16x16xf32> -> vector<16x16xf32>
    %cst_39 = arith.constant dense<0xFF800000> : vector<16xf32>
    %74 = vector.multi_reduction <maximumf>, %73, %cst_39 [1] : vector<16x16xf32> to vector<16xf32>
    %75 = vector.shape_cast %74 : vector<16xf32> to vector<16x1xf32>
    %76 = vector.broadcast %75 : vector<16x1xf32> to vector<16x16xf32>
    %77 = arith.subf %73, %76 : vector<16x16xf32>
    %78 = math.exp %77 : vector<16x16xf32>
    %cst_40 = arith.constant dense<0.000000e+00> : vector<16xf32>
    %79 = vector.multi_reduction <add>, %78, %cst_40 [1] : vector<16x16xf32> to vector<16xf32>
    %80 = vector.shape_cast %79 : vector<16xf32> to vector<16x1xf32>
    %81 = vector.broadcast %80 : vector<16x1xf32> to vector<16x16xf32>
    %82 = arith.divf %78, %81 : vector<16x16xf32>
    %cst_41 = arith.constant dense<0.000000e+00> : vector<16x8xf32>
    %83 = tpu.matmul %82, %72, %cst_41 {dimension_numbers = #tpu.dot_dimension_numbers<[1], [0], [0], [1], [0, 0, 1, 1], [], []>} : vector<16x16xf32>, vector<16x8xf32>, vector<16x8xf32> -> vector<16x8xf32>
    %84 = vector.extract_strided_slice %45 {offsets = [8, 0], sizes = [8, 32], strides = [1, 1]} : vector<32x32xbf16> to vector<8x32xbf16>
    %85 = arith.truncf %83 : vector<16x8xf32> to vector<16x8xbf16>
    %cst_42 = arith.constant dense<0.000000e+00> : vector<16x32xf32>
    %86 = tpu.matmul %85, %84, %cst_42 {dimension_numbers = #tpu.dot_dimension_numbers<[1], [0], [0], [1], [0, 0, 1, 1], [], []>} : vector<16x8xbf16>, vector<8x32xbf16>, vector<16x32xf32> -> vector<16x32xf32>
    %87 = arith.addf %69, %86 : vector<16x32xf32>
    %88 = vector.extract_strided_slice %50 {offsets = [0, 16], sizes = [16, 8], strides = [1, 1]} : vector<16x96xf32> to vector<16x8xf32>
    %89 = vector.extract_strided_slice %50 {offsets = [0, 48], sizes = [16, 8], strides = [1, 1]} : vector<16x96xf32> to vector<16x8xf32>
    %90 = vector.extract_strided_slice %50 {offsets = [0, 80], sizes = [16, 8], strides = [1, 1]} : vector<16x96xf32> to vector<16x8xf32>
    %cst_43 = arith.constant dense<0.000000e+00> : vector<16x16xf32>
    %91 = tpu.matmul %88, %89, %cst_43 {dimension_numbers = #tpu.dot_dimension_numbers<[1], [1], [0], [0], [0, 0, 1, 0], [], []>} : vector<16x8xf32>, vector<16x8xf32>, vector<16x16xf32> -> vector<16x16xf32>
    %cst_44 = arith.constant dense<0xFF800000> : vector<16xf32>
    %92 = vector.multi_reduction <maximumf>, %91, %cst_44 [1] : vector<16x16xf32> to vector<16xf32>
    %93 = vector.shape_cast %92 : vector<16xf32> to vector<16x1xf32>
    %94 = vector.broadcast %93 : vector<16x1xf32> to vector<16x16xf32>
    %95 = arith.subf %91, %94 : vector<16x16xf32>
    %96 = math.exp %95 : vector<16x16xf32>
    %cst_45 = arith.constant dense<0.000000e+00> : vector<16xf32>
    %97 = vector.multi_reduction <add>, %96, %cst_45 [1] : vector<16x16xf32> to vector<16xf32>
    %98 = vector.shape_cast %97 : vector<16xf32> to vector<16x1xf32>
    %99 = vector.broadcast %98 : vector<16x1xf32> to vector<16x16xf32>
    %100 = arith.divf %96, %99 : vector<16x16xf32>
    %cst_46 = arith.constant dense<0.000000e+00> : vector<16x8xf32>
    %101 = tpu.matmul %100, %90, %cst_46 {dimension_numbers = #tpu.dot_dimension_numbers<[1], [0], [0], [1], [0, 0, 1, 1], [], []>} : vector<16x16xf32>, vector<16x8xf32>, vector<16x8xf32> -> vector<16x8xf32>
    %102 = vector.extract_strided_slice %45 {offsets = [16, 0], sizes = [8, 32], strides = [1, 1]} : vector<32x32xbf16> to vector<8x32xbf16>
    %103 = arith.truncf %101 : vector<16x8xf32> to vector<16x8xbf16>
    %cst_47 = arith.constant dense<0.000000e+00> : vector<16x32xf32>
    %104 = tpu.matmul %103, %102, %cst_47 {dimension_numbers = #tpu.dot_dimension_numbers<[1], [0], [0], [1], [0, 0, 1, 1], [], []>} : vector<16x8xbf16>, vector<8x32xbf16>, vector<16x32xf32> -> vector<16x32xf32>
    %105 = arith.addf %87, %104 : vector<16x32xf32>
    %106 = vector.extract_strided_slice %50 {offsets = [0, 24], sizes = [16, 8], strides = [1, 1]} : vector<16x96xf32> to vector<16x8xf32>
    %107 = vector.extract_strided_slice %50 {offsets = [0, 56], sizes = [16, 8], strides = [1, 1]} : vector<16x96xf32> to vector<16x8xf32>
    %108 = vector.extract_strided_slice %50 {offsets = [0, 88], sizes = [16, 8], strides = [1, 1]} : vector<16x96xf32> to vector<16x8xf32>
    %cst_48 = arith.constant dense<0.000000e+00> : vector<16x16xf32>
    %109 = tpu.matmul %106, %107, %cst_48 {dimension_numbers = #tpu.dot_dimension_numbers<[1], [1], [0], [0], [0, 0, 1, 0], [], []>} : vector<16x8xf32>, vector<16x8xf32>, vector<16x16xf32> -> vector<16x16xf32>
    %cst_49 = arith.constant dense<0xFF800000> : vector<16xf32>
    %110 = vector.multi_reduction <maximumf>, %109, %cst_49 [1] : vector<16x16xf32> to vector<16xf32>
    %111 = vector.shape_cast %110 : vector<16xf32> to vector<16x1xf32>
    %112 = vector.broadcast %111 : vector<16x1xf32> to vector<16x16xf32>
    %113 = arith.subf %109, %112 : vector<16x16xf32>
    %114 = math.exp %113 : vector<16x16xf32>
    %cst_50 = arith.constant dense<0.000000e+00> : vector<16xf32>
    %115 = vector.multi_reduction <add>, %114, %cst_50 [1] : vector<16x16xf32> to vector<16xf32>
    %116 = vector.shape_cast %115 : vector<16xf32> to vector<16x1xf32>
    %117 = vector.broadcast %116 : vector<16x1xf32> to vector<16x16xf32>
    %118 = arith.divf %114, %117 : vector<16x16xf32>
    %cst_51 = arith.constant dense<0.000000e+00> : vector<16x8xf32>
    %119 = tpu.matmul %118, %108, %cst_51 {dimension_numbers = #tpu.dot_dimension_numbers<[1], [0], [0], [1], [0, 0, 1, 1], [], []>} : vector<16x16xf32>, vector<16x8xf32>, vector<16x8xf32> -> vector<16x8xf32>
    %120 = vector.extract_strided_slice %45 {offsets = [24, 0], sizes = [8, 32], strides = [1, 1]} : vector<32x32xbf16> to vector<8x32xbf16>
    %121 = arith.truncf %119 : vector<16x8xf32> to vector<16x8xbf16>
    %cst_52 = arith.constant dense<0.000000e+00> : vector<16x32xf32>
    %122 = tpu.matmul %121, %120, %cst_52 {dimension_numbers = #tpu.dot_dimension_numbers<[1], [0], [0], [1], [0, 0, 1, 1], [], []>} : vector<16x8xbf16>, vector<8x32xbf16>, vector<16x32xf32> -> vector<16x32xf32>
    %123 = arith.addf %105, %122 : vector<16x32xf32>
    %124 = arith.addf %18, %123 : vector<16x32xf32>
    %c4_53 = arith.constant 4 : index
    %c0_54 = arith.constant 0 : index
    %125 = vector.load %arg7[%c4_53, %c0_54] : memref<72x128xf32, #tpu.memory_space<vmem>>, vector<1x32xf32>
    %c5 = arith.constant 5 : index
    %c0_55 = arith.constant 0 : index
    %126 = vector.load %arg7[%c5, %c0_55] : memref<72x128xf32, #tpu.memory_space<vmem>>, vector<1x32xf32>
    %cst_56 = arith.constant dense<0.000000e+00> : vector<16xf32>
    %127 = vector.multi_reduction <add>, %124, %cst_56 [1] : vector<16x32xf32> to vector<16xf32>
    %128 = vector.shape_cast %127 : vector<16xf32> to vector<16x1xf32>
    %cst_57 = arith.constant 3.200000e+01 : f32
    %129 = vector.broadcast %cst_57 : f32 to vector<16x1xf32>
    %130 = arith.divf %128, %129 : vector<16x1xf32>
    %131 = vector.broadcast %130 : vector<16x1xf32> to vector<16x32xf32>
    %132 = arith.subf %124, %131 : vector<16x32xf32>
    %133 = arith.mulf %132, %132 : vector<16x32xf32>
    %cst_58 = arith.constant dense<0.000000e+00> : vector<16xf32>
    %134 = vector.multi_reduction <add>, %133, %cst_58 [1] : vector<16x32xf32> to vector<16xf32>
    %135 = vector.shape_cast %134 : vector<16xf32> to vector<16x1xf32>
    %cst_59 = arith.constant 3.200000e+01 : f32
    %136 = vector.broadcast %cst_59 : f32 to vector<16x1xf32>
    %137 = arith.divf %135, %136 : vector<16x1xf32>
    %cst_60 = arith.constant 9.99999997E-7 : f32
    %138 = vector.broadcast %cst_60 : f32 to vector<16x1xf32>
    %139 = arith.addf %137, %138 : vector<16x1xf32>
    %140 = math.rsqrt %139 : vector<16x1xf32>
    %141 = vector.broadcast %140 : vector<16x1xf32> to vector<16x32xf32>
    %142 = arith.mulf %132, %141 : vector<16x32xf32>
    %143 = vector.broadcast %125 : vector<1x32xf32> to vector<16x32xf32>
    %144 = arith.mulf %142, %143 : vector<16x32xf32>
    %145 = vector.broadcast %126 : vector<1x32xf32> to vector<16x32xf32>
    %146 = arith.addf %144, %145 : vector<16x32xf32>
    %c0_61 = arith.constant 0 : index
    %c0_62 = arith.constant 0 : index
    %c0_63 = arith.constant 0 : index
    %147 = vector.load %arg5[%c0_61, %c0_62, %c0_63] : memref<4x32x64xbf16, #tpu.memory_space<vmem>>, vector<1x32x64xbf16>
    %148 = vector.shape_cast %147 : vector<1x32x64xbf16> to vector<32x64xbf16>
    %c6 = arith.constant 6 : index
    %c0_64 = arith.constant 0 : index
    %149 = vector.load %arg7[%c6, %c0_64] : memref<72x128xf32, #tpu.memory_space<vmem>>, vector<1x64xf32>
    %150 = arith.truncf %146 : vector<16x32xf32> to vector<16x32xbf16>
    %cst_65 = arith.constant dense<0.000000e+00> : vector<16x64xf32>
    %151 = tpu.matmul %150, %148, %cst_65 {dimension_numbers = #tpu.dot_dimension_numbers<[1], [0], [0], [1], [0, 0, 1, 1], [], []>} : vector<16x32xbf16>, vector<32x64xbf16>, vector<16x64xf32> -> vector<16x64xf32>
    %152 = vector.broadcast %149 : vector<1x64xf32> to vector<16x64xf32>
    %153 = arith.addf %151, %152 : vector<16x64xf32>
    %154 = arith.mulf %153, %153 : vector<16x64xf32>
    %155 = arith.mulf %153, %154 : vector<16x64xf32>
    %cst_66 = arith.constant 4.471500e-02 : f32
    %156 = vector.broadcast %cst_66 : f32 to vector<16x64xf32>
    %157 = arith.mulf %156, %155 : vector<16x64xf32>
    %158 = arith.addf %153, %157 : vector<16x64xf32>
    %cst_67 = arith.constant 0.797884583 : f32
    %159 = vector.broadcast %cst_67 : f32 to vector<16x64xf32>
    %160 = arith.mulf %159, %158 : vector<16x64xf32>
    %161 = math.tanh %160 : vector<16x64xf32>
    %cst_68 = arith.constant 1.000000e+00 : f32
    %162 = vector.broadcast %cst_68 : f32 to vector<16x64xf32>
    %163 = arith.addf %162, %161 : vector<16x64xf32>
    %cst_69 = arith.constant 5.000000e-01 : f32
    %164 = vector.broadcast %cst_69 : f32 to vector<16x64xf32>
    %165 = arith.mulf %164, %163 : vector<16x64xf32>
    %166 = arith.mulf %153, %165 : vector<16x64xf32>
    %c0_70 = arith.constant 0 : index
    %c0_71 = arith.constant 0 : index
    %c0_72 = arith.constant 0 : index
    %167 = vector.load %arg6[%c0_70, %c0_71, %c0_72] : memref<5x64x32xbf16, #tpu.memory_space<vmem>>, vector<1x64x32xbf16>
    %168 = vector.shape_cast %167 : vector<1x64x32xbf16> to vector<64x32xbf16>
    %c7 = arith.constant 7 : index
    %c0_73 = arith.constant 0 : index
    %169 = vector.load %arg7[%c7, %c0_73] : memref<72x128xf32, #tpu.memory_space<vmem>>, vector<1x32xf32>
    %170 = arith.truncf %166 : vector<16x64xf32> to vector<16x64xbf16>
    %cst_74 = arith.constant dense<0.000000e+00> : vector<16x32xf32>
    %171 = tpu.matmul %170, %168, %cst_74 {dimension_numbers = #tpu.dot_dimension_numbers<[1], [0], [0], [1], [0, 0, 1, 1], [], []>} : vector<16x64xbf16>, vector<64x32xbf16>, vector<16x32xf32> -> vector<16x32xf32>
    %172 = vector.broadcast %169 : vector<1x32xf32> to vector<16x32xf32>
    %173 = arith.addf %171, %172 : vector<16x32xf32>
    %174 = arith.addf %124, %173 : vector<16x32xf32>
    %c8 = arith.constant 8 : index
    %c0_75 = arith.constant 0 : index
    %175 = vector.load %arg7[%c8, %c0_75] : memref<72x128xf32, #tpu.memory_space<vmem>>, vector<1x32xf32>
    %c9 = arith.constant 9 : index
    %c0_76 = arith.constant 0 : index
    %176 = vector.load %arg7[%c9, %c0_76] : memref<72x128xf32, #tpu.memory_space<vmem>>, vector<1x32xf32>
    %cst_77 = arith.constant dense<0.000000e+00> : vector<16xf32>
    %177 = vector.multi_reduction <add>, %174, %cst_77 [1] : vector<16x32xf32> to vector<16xf32>
    %178 = vector.shape_cast %177 : vector<16xf32> to vector<16x1xf32>
    %cst_78 = arith.constant 3.200000e+01 : f32
    %179 = vector.broadcast %cst_78 : f32 to vector<16x1xf32>
    %180 = arith.divf %178, %179 : vector<16x1xf32>
    %181 = vector.broadcast %180 : vector<16x1xf32> to vector<16x32xf32>
    %182 = arith.subf %174, %181 : vector<16x32xf32>
    %183 = arith.mulf %182, %182 : vector<16x32xf32>
    %cst_79 = arith.constant dense<0.000000e+00> : vector<16xf32>
    %184 = vector.multi_reduction <add>, %183, %cst_79 [1] : vector<16x32xf32> to vector<16xf32>
    %185 = vector.shape_cast %184 : vector<16xf32> to vector<16x1xf32>
    %cst_80 = arith.constant 3.200000e+01 : f32
    %186 = vector.broadcast %cst_80 : f32 to vector<16x1xf32>
    %187 = arith.divf %185, %186 : vector<16x1xf32>
    %cst_81 = arith.constant 9.99999997E-7 : f32
    %188 = vector.broadcast %cst_81 : f32 to vector<16x1xf32>
    %189 = arith.addf %187, %188 : vector<16x1xf32>
    %190 = math.rsqrt %189 : vector<16x1xf32>
    %191 = vector.broadcast %190 : vector<16x1xf32> to vector<16x32xf32>
    %192 = arith.mulf %182, %191 : vector<16x32xf32>
    %193 = vector.broadcast %175 : vector<1x32xf32> to vector<16x32xf32>
    %194 = arith.mulf %192, %193 : vector<16x32xf32>
    %195 = vector.broadcast %176 : vector<1x32xf32> to vector<16x32xf32>
    %196 = arith.addf %194, %195 : vector<16x32xf32>
    %c1_82 = arith.constant 1 : index
    %c0_83 = arith.constant 0 : index
    %c0_84 = arith.constant 0 : index
    %197 = vector.load %arg3[%c1_82, %c0_83, %c0_84] : memref<4x32x96xbf16, #tpu.memory_space<vmem>>, vector<1x32x96xbf16>
    %198 = vector.shape_cast %197 : vector<1x32x96xbf16> to vector<32x96xbf16>
    %c10 = arith.constant 10 : index
    %c0_85 = arith.constant 0 : index
    %199 = vector.load %arg7[%c10, %c0_85] : memref<72x128xf32, #tpu.memory_space<vmem>>, vector<1x96xf32>
    %c1_86 = arith.constant 1 : index
    %c0_87 = arith.constant 0 : index
    %c0_88 = arith.constant 0 : index
    %200 = vector.load %arg4[%c1_86, %c0_87, %c0_88] : memref<7x32x32xbf16, #tpu.memory_space<vmem>>, vector<1x32x32xbf16>
    %201 = vector.shape_cast %200 : vector<1x32x32xbf16> to vector<32x32xbf16>
    %c11 = arith.constant 11 : index
    %c0_89 = arith.constant 0 : index
    %202 = vector.load %arg7[%c11, %c0_89] : memref<72x128xf32, #tpu.memory_space<vmem>>, vector<1x32xf32>
    %203 = arith.truncf %196 : vector<16x32xf32> to vector<16x32xbf16>
    %cst_90 = arith.constant dense<0.000000e+00> : vector<16x96xf32>
    %204 = tpu.matmul %203, %198, %cst_90 {dimension_numbers = #tpu.dot_dimension_numbers<[1], [0], [0], [1], [0, 0, 1, 1], [], []>} : vector<16x32xbf16>, vector<32x96xbf16>, vector<16x96xf32> -> vector<16x96xf32>
    %205 = vector.broadcast %199 : vector<1x96xf32> to vector<16x96xf32>
    %206 = arith.addf %204, %205 : vector<16x96xf32>
    %207 = vector.extract_strided_slice %206 {offsets = [0, 0], sizes = [16, 8], strides = [1, 1]} : vector<16x96xf32> to vector<16x8xf32>
    %208 = vector.extract_strided_slice %206 {offsets = [0, 32], sizes = [16, 8], strides = [1, 1]} : vector<16x96xf32> to vector<16x8xf32>
    %209 = vector.extract_strided_slice %206 {offsets = [0, 64], sizes = [16, 8], strides = [1, 1]} : vector<16x96xf32> to vector<16x8xf32>
    %cst_91 = arith.constant dense<0.000000e+00> : vector<16x16xf32>
    %210 = tpu.matmul %207, %208, %cst_91 {dimension_numbers = #tpu.dot_dimension_numbers<[1], [1], [0], [0], [0, 0, 1, 0], [], []>} : vector<16x8xf32>, vector<16x8xf32>, vector<16x16xf32> -> vector<16x16xf32>
    %cst_92 = arith.constant dense<0xFF800000> : vector<16xf32>
    %211 = vector.multi_reduction <maximumf>, %210, %cst_92 [1] : vector<16x16xf32> to vector<16xf32>
    %212 = vector.shape_cast %211 : vector<16xf32> to vector<16x1xf32>
    %213 = vector.broadcast %212 : vector<16x1xf32> to vector<16x16xf32>
    %214 = arith.subf %210, %213 : vector<16x16xf32>
    %215 = math.exp %214 : vector<16x16xf32>
    %cst_93 = arith.constant dense<0.000000e+00> : vector<16xf32>
    %216 = vector.multi_reduction <add>, %215, %cst_93 [1] : vector<16x16xf32> to vector<16xf32>
    %217 = vector.shape_cast %216 : vector<16xf32> to vector<16x1xf32>
    %218 = vector.broadcast %217 : vector<16x1xf32> to vector<16x16xf32>
    %219 = arith.divf %215, %218 : vector<16x16xf32>
    %cst_94 = arith.constant dense<0.000000e+00> : vector<16x8xf32>
    %220 = tpu.matmul %219, %209, %cst_94 {dimension_numbers = #tpu.dot_dimension_numbers<[1], [0], [0], [1], [0, 0, 1, 1], [], []>} : vector<16x16xf32>, vector<16x8xf32>, vector<16x8xf32> -> vector<16x8xf32>
    %221 = vector.extract_strided_slice %201 {offsets = [0, 0], sizes = [8, 32], strides = [1, 1]} : vector<32x32xbf16> to vector<8x32xbf16>
    %222 = arith.truncf %220 : vector<16x8xf32> to vector<16x8xbf16>
    %cst_95 = arith.constant dense<0.000000e+00> : vector<16x32xf32>
    %223 = tpu.matmul %222, %221, %cst_95 {dimension_numbers = #tpu.dot_dimension_numbers<[1], [0], [0], [1], [0, 0, 1, 1], [], []>} : vector<16x8xbf16>, vector<8x32xbf16>, vector<16x32xf32> -> vector<16x32xf32>
    %224 = vector.broadcast %202 : vector<1x32xf32> to vector<16x32xf32>
    %225 = arith.addf %224, %223 : vector<16x32xf32>
    %226 = vector.extract_strided_slice %206 {offsets = [0, 8], sizes = [16, 8], strides = [1, 1]} : vector<16x96xf32> to vector<16x8xf32>
    %227 = vector.extract_strided_slice %206 {offsets = [0, 40], sizes = [16, 8], strides = [1, 1]} : vector<16x96xf32> to vector<16x8xf32>
    %228 = vector.extract_strided_slice %206 {offsets = [0, 72], sizes = [16, 8], strides = [1, 1]} : vector<16x96xf32> to vector<16x8xf32>
    %cst_96 = arith.constant dense<0.000000e+00> : vector<16x16xf32>
    %229 = tpu.matmul %226, %227, %cst_96 {dimension_numbers = #tpu.dot_dimension_numbers<[1], [1], [0], [0], [0, 0, 1, 0], [], []>} : vector<16x8xf32>, vector<16x8xf32>, vector<16x16xf32> -> vector<16x16xf32>
    %cst_97 = arith.constant dense<0xFF800000> : vector<16xf32>
    %230 = vector.multi_reduction <maximumf>, %229, %cst_97 [1] : vector<16x16xf32> to vector<16xf32>
    %231 = vector.shape_cast %230 : vector<16xf32> to vector<16x1xf32>
    %232 = vector.broadcast %231 : vector<16x1xf32> to vector<16x16xf32>
    %233 = arith.subf %229, %232 : vector<16x16xf32>
    %234 = math.exp %233 : vector<16x16xf32>
    %cst_98 = arith.constant dense<0.000000e+00> : vector<16xf32>
    %235 = vector.multi_reduction <add>, %234, %cst_98 [1] : vector<16x16xf32> to vector<16xf32>
    %236 = vector.shape_cast %235 : vector<16xf32> to vector<16x1xf32>
    %237 = vector.broadcast %236 : vector<16x1xf32> to vector<16x16xf32>
    %238 = arith.divf %234, %237 : vector<16x16xf32>
    %cst_99 = arith.constant dense<0.000000e+00> : vector<16x8xf32>
    %239 = tpu.matmul %238, %228, %cst_99 {dimension_numbers = #tpu.dot_dimension_numbers<[1], [0], [0], [1], [0, 0, 1, 1], [], []>} : vector<16x16xf32>, vector<16x8xf32>, vector<16x8xf32> -> vector<16x8xf32>
    %240 = vector.extract_strided_slice %201 {offsets = [8, 0], sizes = [8, 32], strides = [1, 1]} : vector<32x32xbf16> to vector<8x32xbf16>
    %241 = arith.truncf %239 : vector<16x8xf32> to vector<16x8xbf16>
    %cst_100 = arith.constant dense<0.000000e+00> : vector<16x32xf32>
    %242 = tpu.matmul %241, %240, %cst_100 {dimension_numbers = #tpu.dot_dimension_numbers<[1], [0], [0], [1], [0, 0, 1, 1], [], []>} : vector<16x8xbf16>, vector<8x32xbf16>, vector<16x32xf32> -> vector<16x32xf32>
    %243 = arith.addf %225, %242 : vector<16x32xf32>
    %244 = vector.extract_strided_slice %206 {offsets = [0, 16], sizes = [16, 8], strides = [1, 1]} : vector<16x96xf32> to vector<16x8xf32>
    %245 = vector.extract_strided_slice %206 {offsets = [0, 48], sizes = [16, 8], strides = [1, 1]} : vector<16x96xf32> to vector<16x8xf32>
    %246 = vector.extract_strided_slice %206 {offsets = [0, 80], sizes = [16, 8], strides = [1, 1]} : vector<16x96xf32> to vector<16x8xf32>
    %cst_101 = arith.constant dense<0.000000e+00> : vector<16x16xf32>
    %247 = tpu.matmul %244, %245, %cst_101 {dimension_numbers = #tpu.dot_dimension_numbers<[1], [1], [0], [0], [0, 0, 1, 0], [], []>} : vector<16x8xf32>, vector<16x8xf32>, vector<16x16xf32> -> vector<16x16xf32>
    %cst_102 = arith.constant dense<0xFF800000> : vector<16xf32>
    %248 = vector.multi_reduction <maximumf>, %247, %cst_102 [1] : vector<16x16xf32> to vector<16xf32>
    %249 = vector.shape_cast %248 : vector<16xf32> to vector<16x1xf32>
    %250 = vector.broadcast %249 : vector<16x1xf32> to vector<16x16xf32>
    %251 = arith.subf %247, %250 : vector<16x16xf32>
    %252 = math.exp %251 : vector<16x16xf32>
    %cst_103 = arith.constant dense<0.000000e+00> : vector<16xf32>
    %253 = vector.multi_reduction <add>, %252, %cst_103 [1] : vector<16x16xf32> to vector<16xf32>
    %254 = vector.shape_cast %253 : vector<16xf32> to vector<16x1xf32>
    %255 = vector.broadcast %254 : vector<16x1xf32> to vector<16x16xf32>
    %256 = arith.divf %252, %255 : vector<16x16xf32>
    %cst_104 = arith.constant dense<0.000000e+00> : vector<16x8xf32>
    %257 = tpu.matmul %256, %246, %cst_104 {dimension_numbers = #tpu.dot_dimension_numbers<[1], [0], [0], [1], [0, 0, 1, 1], [], []>} : vector<16x16xf32>, vector<16x8xf32>, vector<16x8xf32> -> vector<16x8xf32>
    %258 = vector.extract_strided_slice %201 {offsets = [16, 0], sizes = [8, 32], strides = [1, 1]} : vector<32x32xbf16> to vector<8x32xbf16>
    %259 = arith.truncf %257 : vector<16x8xf32> to vector<16x8xbf16>
    %cst_105 = arith.constant dense<0.000000e+00> : vector<16x32xf32>
    %260 = tpu.matmul %259, %258, %cst_105 {dimension_numbers = #tpu.dot_dimension_numbers<[1], [0], [0], [1], [0, 0, 1, 1], [], []>} : vector<16x8xbf16>, vector<8x32xbf16>, vector<16x32xf32> -> vector<16x32xf32>
    %261 = arith.addf %243, %260 : vector<16x32xf32>
    %262 = vector.extract_strided_slice %206 {offsets = [0, 24], sizes = [16, 8], strides = [1, 1]} : vector<16x96xf32> to vector<16x8xf32>
    %263 = vector.extract_strided_slice %206 {offsets = [0, 56], sizes = [16, 8], strides = [1, 1]} : vector<16x96xf32> to vector<16x8xf32>
    %264 = vector.extract_strided_slice %206 {offsets = [0, 88], sizes = [16, 8], strides = [1, 1]} : vector<16x96xf32> to vector<16x8xf32>
    %cst_106 = arith.constant dense<0.000000e+00> : vector<16x16xf32>
    %265 = tpu.matmul %262, %263, %cst_106 {dimension_numbers = #tpu.dot_dimension_numbers<[1], [1], [0], [0], [0, 0, 1, 0], [], []>} : vector<16x8xf32>, vector<16x8xf32>, vector<16x16xf32> -> vector<16x16xf32>
    %cst_107 = arith.constant dense<0xFF800000> : vector<16xf32>
    %266 = vector.multi_reduction <maximumf>, %265, %cst_107 [1] : vector<16x16xf32> to vector<16xf32>
    %267 = vector.shape_cast %266 : vector<16xf32> to vector<16x1xf32>
    %268 = vector.broadcast %267 : vector<16x1xf32> to vector<16x16xf32>
    %269 = arith.subf %265, %268 : vector<16x16xf32>
    %270 = math.exp %269 : vector<16x16xf32>
    %cst_108 = arith.constant dense<0.000000e+00> : vector<16xf32>
    %271 = vector.multi_reduction <add>, %270, %cst_108 [1] : vector<16x16xf32> to vector<16xf32>
    %272 = vector.shape_cast %271 : vector<16xf32> to vector<16x1xf32>
    %273 = vector.broadcast %272 : vector<16x1xf32> to vector<16x16xf32>
    %274 = arith.divf %270, %273 : vector<16x16xf32>
    %cst_109 = arith.constant dense<0.000000e+00> : vector<16x8xf32>
    %275 = tpu.matmul %274, %264, %cst_109 {dimension_numbers = #tpu.dot_dimension_numbers<[1], [0], [0], [1], [0, 0, 1, 1], [], []>} : vector<16x16xf32>, vector<16x8xf32>, vector<16x8xf32> -> vector<16x8xf32>
    %276 = vector.extract_strided_slice %201 {offsets = [24, 0], sizes = [8, 32], strides = [1, 1]} : vector<32x32xbf16> to vector<8x32xbf16>
    %277 = arith.truncf %275 : vector<16x8xf32> to vector<16x8xbf16>
    %cst_110 = arith.constant dense<0.000000e+00> : vector<16x32xf32>
    %278 = tpu.matmul %277, %276, %cst_110 {dimension_numbers = #tpu.dot_dimension_numbers<[1], [0], [0], [1], [0, 0, 1, 1], [], []>} : vector<16x8xbf16>, vector<8x32xbf16>, vector<16x32xf32> -> vector<16x32xf32>
    %279 = arith.addf %261, %278 : vector<16x32xf32>
    %280 = arith.addf %174, %279 : vector<16x32xf32>
    %c12 = arith.constant 12 : index
    %c0_111 = arith.constant 0 : index
    %281 = vector.load %arg7[%c12, %c0_111] : memref<72x128xf32, #tpu.memory_space<vmem>>, vector<1x32xf32>
    %c13 = arith.constant 13 : index
    %c0_112 = arith.constant 0 : index
    %282 = vector.load %arg7[%c13, %c0_112] : memref<72x128xf32, #tpu.memory_space<vmem>>, vector<1x32xf32>
    %cst_113 = arith.constant dense<0.000000e+00> : vector<16xf32>
    %283 = vector.multi_reduction <add>, %280, %cst_113 [1] : vector<16x32xf32> to vector<16xf32>
    %284 = vector.shape_cast %283 : vector<16xf32> to vector<16x1xf32>
    %cst_114 = arith.constant 3.200000e+01 : f32
    %285 = vector.broadcast %cst_114 : f32 to vector<16x1xf32>
    %286 = arith.divf %284, %285 : vector<16x1xf32>
    %287 = vector.broadcast %286 : vector<16x1xf32> to vector<16x32xf32>
    %288 = arith.subf %280, %287 : vector<16x32xf32>
    %289 = arith.mulf %288, %288 : vector<16x32xf32>
    %cst_115 = arith.constant dense<0.000000e+00> : vector<16xf32>
    %290 = vector.multi_reduction <add>, %289, %cst_115 [1] : vector<16x32xf32> to vector<16xf32>
    %291 = vector.shape_cast %290 : vector<16xf32> to vector<16x1xf32>
    %cst_116 = arith.constant 3.200000e+01 : f32
    %292 = vector.broadcast %cst_116 : f32 to vector<16x1xf32>
    %293 = arith.divf %291, %292 : vector<16x1xf32>
    %cst_117 = arith.constant 9.99999997E-7 : f32
    %294 = vector.broadcast %cst_117 : f32 to vector<16x1xf32>
    %295 = arith.addf %293, %294 : vector<16x1xf32>
    %296 = math.rsqrt %295 : vector<16x1xf32>
    %297 = vector.broadcast %296 : vector<16x1xf32> to vector<16x32xf32>
    %298 = arith.mulf %288, %297 : vector<16x32xf32>
    %299 = vector.broadcast %281 : vector<1x32xf32> to vector<16x32xf32>
    %300 = arith.mulf %298, %299 : vector<16x32xf32>
    %301 = vector.broadcast %282 : vector<1x32xf32> to vector<16x32xf32>
    %302 = arith.addf %300, %301 : vector<16x32xf32>
    %c1_118 = arith.constant 1 : index
    %c0_119 = arith.constant 0 : index
    %c0_120 = arith.constant 0 : index
    %303 = vector.load %arg5[%c1_118, %c0_119, %c0_120] : memref<4x32x64xbf16, #tpu.memory_space<vmem>>, vector<1x32x64xbf16>
    %304 = vector.shape_cast %303 : vector<1x32x64xbf16> to vector<32x64xbf16>
    %c14 = arith.constant 14 : index
    %c0_121 = arith.constant 0 : index
    %305 = vector.load %arg7[%c14, %c0_121] : memref<72x128xf32, #tpu.memory_space<vmem>>, vector<1x64xf32>
    %306 = arith.truncf %302 : vector<16x32xf32> to vector<16x32xbf16>
    %cst_122 = arith.constant dense<0.000000e+00> : vector<16x64xf32>
    %307 = tpu.matmul %306, %304, %cst_122 {dimension_numbers = #tpu.dot_dimension_numbers<[1], [0], [0], [1], [0, 0, 1, 1], [], []>} : vector<16x32xbf16>, vector<32x64xbf16>, vector<16x64xf32> -> vector<16x64xf32>
    %308 = vector.broadcast %305 : vector<1x64xf32> to vector<16x64xf32>
    %309 = arith.addf %307, %308 : vector<16x64xf32>
    %310 = arith.mulf %309, %309 : vector<16x64xf32>
    %311 = arith.mulf %309, %310 : vector<16x64xf32>
    %cst_123 = arith.constant 4.471500e-02 : f32
    %312 = vector.broadcast %cst_123 : f32 to vector<16x64xf32>
    %313 = arith.mulf %312, %311 : vector<16x64xf32>
    %314 = arith.addf %309, %313 : vector<16x64xf32>
    %cst_124 = arith.constant 0.797884583 : f32
    %315 = vector.broadcast %cst_124 : f32 to vector<16x64xf32>
    %316 = arith.mulf %315, %314 : vector<16x64xf32>
    %317 = math.tanh %316 : vector<16x64xf32>
    %cst_125 = arith.constant 1.000000e+00 : f32
    %318 = vector.broadcast %cst_125 : f32 to vector<16x64xf32>
    %319 = arith.addf %318, %317 : vector<16x64xf32>
    %cst_126 = arith.constant 5.000000e-01 : f32
    %320 = vector.broadcast %cst_126 : f32 to vector<16x64xf32>
    %321 = arith.mulf %320, %319 : vector<16x64xf32>
    %322 = arith.mulf %309, %321 : vector<16x64xf32>
    %c1_127 = arith.constant 1 : index
    %c0_128 = arith.constant 0 : index
    %c0_129 = arith.constant 0 : index
    %323 = vector.load %arg6[%c1_127, %c0_128, %c0_129] : memref<5x64x32xbf16, #tpu.memory_space<vmem>>, vector<1x64x32xbf16>
    %324 = vector.shape_cast %323 : vector<1x64x32xbf16> to vector<64x32xbf16>
    %c15 = arith.constant 15 : index
    %c0_130 = arith.constant 0 : index
    %325 = vector.load %arg7[%c15, %c0_130] : memref<72x128xf32, #tpu.memory_space<vmem>>, vector<1x32xf32>
    %326 = arith.truncf %322 : vector<16x64xf32> to vector<16x64xbf16>
    %cst_131 = arith.constant dense<0.000000e+00> : vector<16x32xf32>
    %327 = tpu.matmul %326, %324, %cst_131 {dimension_numbers = #tpu.dot_dimension_numbers<[1], [0], [0], [1], [0, 0, 1, 1], [], []>} : vector<16x64xbf16>, vector<64x32xbf16>, vector<16x32xf32> -> vector<16x32xf32>
    %328 = vector.broadcast %325 : vector<1x32xf32> to vector<16x32xf32>
    %329 = arith.addf %327, %328 : vector<16x32xf32>
    %330 = arith.addf %280, %329 : vector<16x32xf32>
    %c4_132 = arith.constant 4 : index
    %c0_133 = arith.constant 0 : index
    %c0_134 = arith.constant 0 : index
    %331 = vector.load %arg4[%c4_132, %c0_133, %c0_134] : memref<7x32x32xbf16, #tpu.memory_space<vmem>>, vector<1x32x32xbf16>
    %332 = vector.shape_cast %331 : vector<1x32x32xbf16> to vector<32x32xbf16>
    %333 = arith.truncf %330 : vector<16x32xf32> to vector<16x32xbf16>
    %cst_135 = arith.constant dense<0.000000e+00> : vector<16x32xf32>
    %334 = tpu.matmul %333, %332, %cst_135 {dimension_numbers = #tpu.dot_dimension_numbers<[1], [0], [0], [1], [0, 0, 1, 1], [], []>} : vector<16x32xbf16>, vector<32x32xbf16>, vector<16x32xf32> -> vector<16x32xf32>
    %335 = vector.broadcast %3 : vector<1x32xf32> to vector<16x32xf32>
    %336 = arith.addf %334, %335 : vector<16x32xf32>
    %337 = tpu.concatenate %336, %1 in 0 : vector<16x32xf32>, vector<8x32xf32> -> vector<24x32xf32>
    %c16 = arith.constant 16 : index
    %c0_136 = arith.constant 0 : index
    %338 = vector.load %arg7[%c16, %c0_136] : memref<72x128xf32, #tpu.memory_space<vmem>>, vector<1x32xf32>
    %c17 = arith.constant 17 : index
    %c0_137 = arith.constant 0 : index
    %339 = vector.load %arg7[%c17, %c0_137] : memref<72x128xf32, #tpu.memory_space<vmem>>, vector<1x32xf32>
    %cst_138 = arith.constant dense<0.000000e+00> : vector<24xf32>
    %340 = vector.multi_reduction <add>, %337, %cst_138 [1] : vector<24x32xf32> to vector<24xf32>
    %341 = vector.shape_cast %340 : vector<24xf32> to vector<24x1xf32>
    %cst_139 = arith.constant 3.200000e+01 : f32
    %342 = vector.broadcast %cst_139 : f32 to vector<24x1xf32>
    %343 = arith.divf %341, %342 : vector<24x1xf32>
    %344 = vector.broadcast %343 : vector<24x1xf32> to vector<24x32xf32>
    %345 = arith.subf %337, %344 : vector<24x32xf32>
    %346 = arith.mulf %345, %345 : vector<24x32xf32>
    %cst_140 = arith.constant dense<0.000000e+00> : vector<24xf32>
    %347 = vector.multi_reduction <add>, %346, %cst_140 [1] : vector<24x32xf32> to vector<24xf32>
    %348 = vector.shape_cast %347 : vector<24xf32> to vector<24x1xf32>
    %cst_141 = arith.constant 3.200000e+01 : f32
    %349 = vector.broadcast %cst_141 : f32 to vector<24x1xf32>
    %350 = arith.divf %348, %349 : vector<24x1xf32>
    %cst_142 = arith.constant 9.99999997E-7 : f32
    %351 = vector.broadcast %cst_142 : f32 to vector<24x1xf32>
    %352 = arith.addf %350, %351 : vector<24x1xf32>
    %353 = math.rsqrt %352 : vector<24x1xf32>
    %354 = vector.broadcast %353 : vector<24x1xf32> to vector<24x32xf32>
    %355 = arith.mulf %345, %354 : vector<24x32xf32>
    %356 = vector.broadcast %338 : vector<1x32xf32> to vector<24x32xf32>
    %357 = arith.mulf %355, %356 : vector<24x32xf32>
    %358 = vector.broadcast %339 : vector<1x32xf32> to vector<24x32xf32>
    %359 = arith.addf %357, %358 : vector<24x32xf32>
    %c2_143 = arith.constant 2 : index
    %c0_144 = arith.constant 0 : index
    %c0_145 = arith.constant 0 : index
    %360 = vector.load %arg3[%c2_143, %c0_144, %c0_145] : memref<4x32x96xbf16, #tpu.memory_space<vmem>>, vector<1x32x96xbf16>
    %361 = vector.shape_cast %360 : vector<1x32x96xbf16> to vector<32x96xbf16>
    %c18 = arith.constant 18 : index
    %c0_146 = arith.constant 0 : index
    %362 = vector.load %arg7[%c18, %c0_146] : memref<72x128xf32, #tpu.memory_space<vmem>>, vector<1x96xf32>
    %c2_147 = arith.constant 2 : index
    %c0_148 = arith.constant 0 : index
    %c0_149 = arith.constant 0 : index
    %363 = vector.load %arg4[%c2_147, %c0_148, %c0_149] : memref<7x32x32xbf16, #tpu.memory_space<vmem>>, vector<1x32x32xbf16>
    %364 = vector.shape_cast %363 : vector<1x32x32xbf16> to vector<32x32xbf16>
    %c19 = arith.constant 19 : index
    %c0_150 = arith.constant 0 : index
    %365 = vector.load %arg7[%c19, %c0_150] : memref<72x128xf32, #tpu.memory_space<vmem>>, vector<1x32xf32>
    %366 = arith.truncf %359 : vector<24x32xf32> to vector<24x32xbf16>
    %cst_151 = arith.constant dense<0.000000e+00> : vector<24x96xf32>
    %367 = tpu.matmul %366, %361, %cst_151 {dimension_numbers = #tpu.dot_dimension_numbers<[1], [0], [0], [1], [0, 0, 1, 1], [], []>} : vector<24x32xbf16>, vector<32x96xbf16>, vector<24x96xf32> -> vector<24x96xf32>
    %368 = vector.broadcast %362 : vector<1x96xf32> to vector<24x96xf32>
    %369 = arith.addf %367, %368 : vector<24x96xf32>
    %370 = vector.extract_strided_slice %369 {offsets = [0, 0], sizes = [24, 8], strides = [1, 1]} : vector<24x96xf32> to vector<24x8xf32>
    %371 = vector.extract_strided_slice %369 {offsets = [0, 32], sizes = [24, 8], strides = [1, 1]} : vector<24x96xf32> to vector<24x8xf32>
    %372 = vector.extract_strided_slice %369 {offsets = [0, 64], sizes = [24, 8], strides = [1, 1]} : vector<24x96xf32> to vector<24x8xf32>
    %cst_152 = arith.constant dense<0.000000e+00> : vector<24x24xf32>
    %373 = tpu.matmul %370, %371, %cst_152 {dimension_numbers = #tpu.dot_dimension_numbers<[1], [1], [0], [0], [0, 0, 1, 0], [], []>} : vector<24x8xf32>, vector<24x8xf32>, vector<24x24xf32> -> vector<24x24xf32>
    %374 = vector.broadcast %8 : vector<1x24xf32> to vector<24x24xf32>
    %375 = arith.addf %373, %374 : vector<24x24xf32>
    %cst_153 = arith.constant dense<0xFF800000> : vector<24xf32>
    %376 = vector.multi_reduction <maximumf>, %375, %cst_153 [1] : vector<24x24xf32> to vector<24xf32>
    %377 = vector.shape_cast %376 : vector<24xf32> to vector<24x1xf32>
    %378 = vector.broadcast %377 : vector<24x1xf32> to vector<24x24xf32>
    %379 = arith.subf %375, %378 : vector<24x24xf32>
    %380 = math.exp %379 : vector<24x24xf32>
    %cst_154 = arith.constant dense<0.000000e+00> : vector<24xf32>
    %381 = vector.multi_reduction <add>, %380, %cst_154 [1] : vector<24x24xf32> to vector<24xf32>
    %382 = vector.shape_cast %381 : vector<24xf32> to vector<24x1xf32>
    %383 = vector.broadcast %382 : vector<24x1xf32> to vector<24x24xf32>
    %384 = arith.divf %380, %383 : vector<24x24xf32>
    %cst_155 = arith.constant dense<0.000000e+00> : vector<24x8xf32>
    %385 = tpu.matmul %384, %372, %cst_155 {dimension_numbers = #tpu.dot_dimension_numbers<[1], [0], [0], [1], [0, 0, 1, 1], [], []>} : vector<24x24xf32>, vector<24x8xf32>, vector<24x8xf32> -> vector<24x8xf32>
    %386 = vector.extract_strided_slice %364 {offsets = [0, 0], sizes = [8, 32], strides = [1, 1]} : vector<32x32xbf16> to vector<8x32xbf16>
    %387 = arith.truncf %385 : vector<24x8xf32> to vector<24x8xbf16>
    %cst_156 = arith.constant dense<0.000000e+00> : vector<24x32xf32>
    %388 = tpu.matmul %387, %386, %cst_156 {dimension_numbers = #tpu.dot_dimension_numbers<[1], [0], [0], [1], [0, 0, 1, 1], [], []>} : vector<24x8xbf16>, vector<8x32xbf16>, vector<24x32xf32> -> vector<24x32xf32>
    %389 = vector.broadcast %365 : vector<1x32xf32> to vector<24x32xf32>
    %390 = arith.addf %389, %388 : vector<24x32xf32>
    %391 = vector.extract_strided_slice %369 {offsets = [0, 8], sizes = [24, 8], strides = [1, 1]} : vector<24x96xf32> to vector<24x8xf32>
    %392 = vector.extract_strided_slice %369 {offsets = [0, 40], sizes = [24, 8], strides = [1, 1]} : vector<24x96xf32> to vector<24x8xf32>
    %393 = vector.extract_strided_slice %369 {offsets = [0, 72], sizes = [24, 8], strides = [1, 1]} : vector<24x96xf32> to vector<24x8xf32>
    %cst_157 = arith.constant dense<0.000000e+00> : vector<24x24xf32>
    %394 = tpu.matmul %391, %392, %cst_157 {dimension_numbers = #tpu.dot_dimension_numbers<[1], [1], [0], [0], [0, 0, 1, 0], [], []>} : vector<24x8xf32>, vector<24x8xf32>, vector<24x24xf32> -> vector<24x24xf32>
    %395 = vector.broadcast %8 : vector<1x24xf32> to vector<24x24xf32>
    %396 = arith.addf %394, %395 : vector<24x24xf32>
    %cst_158 = arith.constant dense<0xFF800000> : vector<24xf32>
    %397 = vector.multi_reduction <maximumf>, %396, %cst_158 [1] : vector<24x24xf32> to vector<24xf32>
    %398 = vector.shape_cast %397 : vector<24xf32> to vector<24x1xf32>
    %399 = vector.broadcast %398 : vector<24x1xf32> to vector<24x24xf32>
    %400 = arith.subf %396, %399 : vector<24x24xf32>
    %401 = math.exp %400 : vector<24x24xf32>
    %cst_159 = arith.constant dense<0.000000e+00> : vector<24xf32>
    %402 = vector.multi_reduction <add>, %401, %cst_159 [1] : vector<24x24xf32> to vector<24xf32>
    %403 = vector.shape_cast %402 : vector<24xf32> to vector<24x1xf32>
    %404 = vector.broadcast %403 : vector<24x1xf32> to vector<24x24xf32>
    %405 = arith.divf %401, %404 : vector<24x24xf32>
    %cst_160 = arith.constant dense<0.000000e+00> : vector<24x8xf32>
    %406 = tpu.matmul %405, %393, %cst_160 {dimension_numbers = #tpu.dot_dimension_numbers<[1], [0], [0], [1], [0, 0, 1, 1], [], []>} : vector<24x24xf32>, vector<24x8xf32>, vector<24x8xf32> -> vector<24x8xf32>
    %407 = vector.extract_strided_slice %364 {offsets = [8, 0], sizes = [8, 32], strides = [1, 1]} : vector<32x32xbf16> to vector<8x32xbf16>
    %408 = arith.truncf %406 : vector<24x8xf32> to vector<24x8xbf16>
    %cst_161 = arith.constant dense<0.000000e+00> : vector<24x32xf32>
    %409 = tpu.matmul %408, %407, %cst_161 {dimension_numbers = #tpu.dot_dimension_numbers<[1], [0], [0], [1], [0, 0, 1, 1], [], []>} : vector<24x8xbf16>, vector<8x32xbf16>, vector<24x32xf32> -> vector<24x32xf32>
    %410 = arith.addf %390, %409 : vector<24x32xf32>
    %411 = vector.extract_strided_slice %369 {offsets = [0, 16], sizes = [24, 8], strides = [1, 1]} : vector<24x96xf32> to vector<24x8xf32>
    %412 = vector.extract_strided_slice %369 {offsets = [0, 48], sizes = [24, 8], strides = [1, 1]} : vector<24x96xf32> to vector<24x8xf32>
    %413 = vector.extract_strided_slice %369 {offsets = [0, 80], sizes = [24, 8], strides = [1, 1]} : vector<24x96xf32> to vector<24x8xf32>
    %cst_162 = arith.constant dense<0.000000e+00> : vector<24x24xf32>
    %414 = tpu.matmul %411, %412, %cst_162 {dimension_numbers = #tpu.dot_dimension_numbers<[1], [1], [0], [0], [0, 0, 1, 0], [], []>} : vector<24x8xf32>, vector<24x8xf32>, vector<24x24xf32> -> vector<24x24xf32>
    %415 = vector.broadcast %8 : vector<1x24xf32> to vector<24x24xf32>
    %416 = arith.addf %414, %415 : vector<24x24xf32>
    %cst_163 = arith.constant dense<0xFF800000> : vector<24xf32>
    %417 = vector.multi_reduction <maximumf>, %416, %cst_163 [1] : vector<24x24xf32> to vector<24xf32>
    %418 = vector.shape_cast %417 : vector<24xf32> to vector<24x1xf32>
    %419 = vector.broadcast %418 : vector<24x1xf32> to vector<24x24xf32>
    %420 = arith.subf %416, %419 : vector<24x24xf32>
    %421 = math.exp %420 : vector<24x24xf32>
    %cst_164 = arith.constant dense<0.000000e+00> : vector<24xf32>
    %422 = vector.multi_reduction <add>, %421, %cst_164 [1] : vector<24x24xf32> to vector<24xf32>
    %423 = vector.shape_cast %422 : vector<24xf32> to vector<24x1xf32>
    %424 = vector.broadcast %423 : vector<24x1xf32> to vector<24x24xf32>
    %425 = arith.divf %421, %424 : vector<24x24xf32>
    %cst_165 = arith.constant dense<0.000000e+00> : vector<24x8xf32>
    %426 = tpu.matmul %425, %413, %cst_165 {dimension_numbers = #tpu.dot_dimension_numbers<[1], [0], [0], [1], [0, 0, 1, 1], [], []>} : vector<24x24xf32>, vector<24x8xf32>, vector<24x8xf32> -> vector<24x8xf32>
    %427 = vector.extract_strided_slice %364 {offsets = [16, 0], sizes = [8, 32], strides = [1, 1]} : vector<32x32xbf16> to vector<8x32xbf16>
    %428 = arith.truncf %426 : vector<24x8xf32> to vector<24x8xbf16>
    %cst_166 = arith.constant dense<0.000000e+00> : vector<24x32xf32>
    %429 = tpu.matmul %428, %427, %cst_166 {dimension_numbers = #tpu.dot_dimension_numbers<[1], [0], [0], [1], [0, 0, 1, 1], [], []>} : vector<24x8xbf16>, vector<8x32xbf16>, vector<24x32xf32> -> vector<24x32xf32>
    %430 = arith.addf %410, %429 : vector<24x32xf32>
    %431 = vector.extract_strided_slice %369 {offsets = [0, 24], sizes = [24, 8], strides = [1, 1]} : vector<24x96xf32> to vector<24x8xf32>
    %432 = vector.extract_strided_slice %369 {offsets = [0, 56], sizes = [24, 8], strides = [1, 1]} : vector<24x96xf32> to vector<24x8xf32>
    %433 = vector.extract_strided_slice %369 {offsets = [0, 88], sizes = [24, 8], strides = [1, 1]} : vector<24x96xf32> to vector<24x8xf32>
    %cst_167 = arith.constant dense<0.000000e+00> : vector<24x24xf32>
    %434 = tpu.matmul %431, %432, %cst_167 {dimension_numbers = #tpu.dot_dimension_numbers<[1], [1], [0], [0], [0, 0, 1, 0], [], []>} : vector<24x8xf32>, vector<24x8xf32>, vector<24x24xf32> -> vector<24x24xf32>
    %435 = vector.broadcast %8 : vector<1x24xf32> to vector<24x24xf32>
    %436 = arith.addf %434, %435 : vector<24x24xf32>
    %cst_168 = arith.constant dense<0xFF800000> : vector<24xf32>
    %437 = vector.multi_reduction <maximumf>, %436, %cst_168 [1] : vector<24x24xf32> to vector<24xf32>
    %438 = vector.shape_cast %437 : vector<24xf32> to vector<24x1xf32>
    %439 = vector.broadcast %438 : vector<24x1xf32> to vector<24x24xf32>
    %440 = arith.subf %436, %439 : vector<24x24xf32>
    %441 = math.exp %440 : vector<24x24xf32>
    %cst_169 = arith.constant dense<0.000000e+00> : vector<24xf32>
    %442 = vector.multi_reduction <add>, %441, %cst_169 [1] : vector<24x24xf32> to vector<24xf32>
    %443 = vector.shape_cast %442 : vector<24xf32> to vector<24x1xf32>
    %444 = vector.broadcast %443 : vector<24x1xf32> to vector<24x24xf32>
    %445 = arith.divf %441, %444 : vector<24x24xf32>
    %cst_170 = arith.constant dense<0.000000e+00> : vector<24x8xf32>
    %446 = tpu.matmul %445, %433, %cst_170 {dimension_numbers = #tpu.dot_dimension_numbers<[1], [0], [0], [1], [0, 0, 1, 1], [], []>} : vector<24x24xf32>, vector<24x8xf32>, vector<24x8xf32> -> vector<24x8xf32>
    %447 = vector.extract_strided_slice %364 {offsets = [24, 0], sizes = [8, 32], strides = [1, 1]} : vector<32x32xbf16> to vector<8x32xbf16>
    %448 = arith.truncf %446 : vector<24x8xf32> to vector<24x8xbf16>
    %cst_171 = arith.constant dense<0.000000e+00> : vector<24x32xf32>
    %449 = tpu.matmul %448, %447, %cst_171 {dimension_numbers = #tpu.dot_dimension_numbers<[1], [0], [0], [1], [0, 0, 1, 1], [], []>} : vector<24x8xbf16>, vector<8x32xbf16>, vector<24x32xf32> -> vector<24x32xf32>
    %450 = arith.addf %430, %449 : vector<24x32xf32>
    %451 = arith.addf %337, %450 : vector<24x32xf32>
    %c20 = arith.constant 20 : index
    %c0_172 = arith.constant 0 : index
    %452 = vector.load %arg7[%c20, %c0_172] : memref<72x128xf32, #tpu.memory_space<vmem>>, vector<1x32xf32>
    %c21 = arith.constant 21 : index
    %c0_173 = arith.constant 0 : index
    %453 = vector.load %arg7[%c21, %c0_173] : memref<72x128xf32, #tpu.memory_space<vmem>>, vector<1x32xf32>
    %cst_174 = arith.constant dense<0.000000e+00> : vector<24xf32>
    %454 = vector.multi_reduction <add>, %451, %cst_174 [1] : vector<24x32xf32> to vector<24xf32>
    %455 = vector.shape_cast %454 : vector<24xf32> to vector<24x1xf32>
    %cst_175 = arith.constant 3.200000e+01 : f32
    %456 = vector.broadcast %cst_175 : f32 to vector<24x1xf32>
    %457 = arith.divf %455, %456 : vector<24x1xf32>
    %458 = vector.broadcast %457 : vector<24x1xf32> to vector<24x32xf32>
    %459 = arith.subf %451, %458 : vector<24x32xf32>
    %460 = arith.mulf %459, %459 : vector<24x32xf32>
    %cst_176 = arith.constant dense<0.000000e+00> : vector<24xf32>
    %461 = vector.multi_reduction <add>, %460, %cst_176 [1] : vector<24x32xf32> to vector<24xf32>
    %462 = vector.shape_cast %461 : vector<24xf32> to vector<24x1xf32>
    %cst_177 = arith.constant 3.200000e+01 : f32
    %463 = vector.broadcast %cst_177 : f32 to vector<24x1xf32>
    %464 = arith.divf %462, %463 : vector<24x1xf32>
    %cst_178 = arith.constant 9.99999997E-7 : f32
    %465 = vector.broadcast %cst_178 : f32 to vector<24x1xf32>
    %466 = arith.addf %464, %465 : vector<24x1xf32>
    %467 = math.rsqrt %466 : vector<24x1xf32>
    %468 = vector.broadcast %467 : vector<24x1xf32> to vector<24x32xf32>
    %469 = arith.mulf %459, %468 : vector<24x32xf32>
    %470 = vector.broadcast %452 : vector<1x32xf32> to vector<24x32xf32>
    %471 = arith.mulf %469, %470 : vector<24x32xf32>
    %472 = vector.broadcast %453 : vector<1x32xf32> to vector<24x32xf32>
    %473 = arith.addf %471, %472 : vector<24x32xf32>
    %c2_179 = arith.constant 2 : index
    %c0_180 = arith.constant 0 : index
    %c0_181 = arith.constant 0 : index
    %474 = vector.load %arg5[%c2_179, %c0_180, %c0_181] : memref<4x32x64xbf16, #tpu.memory_space<vmem>>, vector<1x32x64xbf16>
    %475 = vector.shape_cast %474 : vector<1x32x64xbf16> to vector<32x64xbf16>
    %c22 = arith.constant 22 : index
    %c0_182 = arith.constant 0 : index
    %476 = vector.load %arg7[%c22, %c0_182] : memref<72x128xf32, #tpu.memory_space<vmem>>, vector<1x64xf32>
    %477 = arith.truncf %473 : vector<24x32xf32> to vector<24x32xbf16>
    %cst_183 = arith.constant dense<0.000000e+00> : vector<24x64xf32>
    %478 = tpu.matmul %477, %475, %cst_183 {dimension_numbers = #tpu.dot_dimension_numbers<[1], [0], [0], [1], [0, 0, 1, 1], [], []>} : vector<24x32xbf16>, vector<32x64xbf16>, vector<24x64xf32> -> vector<24x64xf32>
    %479 = vector.broadcast %476 : vector<1x64xf32> to vector<24x64xf32>
    %480 = arith.addf %478, %479 : vector<24x64xf32>
    %481 = arith.mulf %480, %480 : vector<24x64xf32>
    %482 = arith.mulf %480, %481 : vector<24x64xf32>
    %cst_184 = arith.constant 4.471500e-02 : f32
    %483 = vector.broadcast %cst_184 : f32 to vector<24x64xf32>
    %484 = arith.mulf %483, %482 : vector<24x64xf32>
    %485 = arith.addf %480, %484 : vector<24x64xf32>
    %cst_185 = arith.constant 0.797884583 : f32
    %486 = vector.broadcast %cst_185 : f32 to vector<24x64xf32>
    %487 = arith.mulf %486, %485 : vector<24x64xf32>
    %488 = math.tanh %487 : vector<24x64xf32>
    %cst_186 = arith.constant 1.000000e+00 : f32
    %489 = vector.broadcast %cst_186 : f32 to vector<24x64xf32>
    %490 = arith.addf %489, %488 : vector<24x64xf32>
    %cst_187 = arith.constant 5.000000e-01 : f32
    %491 = vector.broadcast %cst_187 : f32 to vector<24x64xf32>
    %492 = arith.mulf %491, %490 : vector<24x64xf32>
    %493 = arith.mulf %480, %492 : vector<24x64xf32>
    %c2_188 = arith.constant 2 : index
    %c0_189 = arith.constant 0 : index
    %c0_190 = arith.constant 0 : index
    %494 = vector.load %arg6[%c2_188, %c0_189, %c0_190] : memref<5x64x32xbf16, #tpu.memory_space<vmem>>, vector<1x64x32xbf16>
    %495 = vector.shape_cast %494 : vector<1x64x32xbf16> to vector<64x32xbf16>
    %c23 = arith.constant 23 : index
    %c0_191 = arith.constant 0 : index
    %496 = vector.load %arg7[%c23, %c0_191] : memref<72x128xf32, #tpu.memory_space<vmem>>, vector<1x32xf32>
    %497 = arith.truncf %493 : vector<24x64xf32> to vector<24x64xbf16>
    %cst_192 = arith.constant dense<0.000000e+00> : vector<24x32xf32>
    %498 = tpu.matmul %497, %495, %cst_192 {dimension_numbers = #tpu.dot_dimension_numbers<[1], [0], [0], [1], [0, 0, 1, 1], [], []>} : vector<24x64xbf16>, vector<64x32xbf16>, vector<24x32xf32> -> vector<24x32xf32>
    %499 = vector.broadcast %496 : vector<1x32xf32> to vector<24x32xf32>
    %500 = arith.addf %498, %499 : vector<24x32xf32>
    %501 = arith.addf %451, %500 : vector<24x32xf32>
    %c24 = arith.constant 24 : index
    %c0_193 = arith.constant 0 : index
    %502 = vector.load %arg7[%c24, %c0_193] : memref<72x128xf32, #tpu.memory_space<vmem>>, vector<1x32xf32>
    %c25 = arith.constant 25 : index
    %c0_194 = arith.constant 0 : index
    %503 = vector.load %arg7[%c25, %c0_194] : memref<72x128xf32, #tpu.memory_space<vmem>>, vector<1x32xf32>
    %cst_195 = arith.constant dense<0.000000e+00> : vector<24xf32>
    %504 = vector.multi_reduction <add>, %501, %cst_195 [1] : vector<24x32xf32> to vector<24xf32>
    %505 = vector.shape_cast %504 : vector<24xf32> to vector<24x1xf32>
    %cst_196 = arith.constant 3.200000e+01 : f32
    %506 = vector.broadcast %cst_196 : f32 to vector<24x1xf32>
    %507 = arith.divf %505, %506 : vector<24x1xf32>
    %508 = vector.broadcast %507 : vector<24x1xf32> to vector<24x32xf32>
    %509 = arith.subf %501, %508 : vector<24x32xf32>
    %510 = arith.mulf %509, %509 : vector<24x32xf32>
    %cst_197 = arith.constant dense<0.000000e+00> : vector<24xf32>
    %511 = vector.multi_reduction <add>, %510, %cst_197 [1] : vector<24x32xf32> to vector<24xf32>
    %512 = vector.shape_cast %511 : vector<24xf32> to vector<24x1xf32>
    %cst_198 = arith.constant 3.200000e+01 : f32
    %513 = vector.broadcast %cst_198 : f32 to vector<24x1xf32>
    %514 = arith.divf %512, %513 : vector<24x1xf32>
    %cst_199 = arith.constant 9.99999997E-7 : f32
    %515 = vector.broadcast %cst_199 : f32 to vector<24x1xf32>
    %516 = arith.addf %514, %515 : vector<24x1xf32>
    %517 = math.rsqrt %516 : vector<24x1xf32>
    %518 = vector.broadcast %517 : vector<24x1xf32> to vector<24x32xf32>
    %519 = arith.mulf %509, %518 : vector<24x32xf32>
    %520 = vector.broadcast %502 : vector<1x32xf32> to vector<24x32xf32>
    %521 = arith.mulf %519, %520 : vector<24x32xf32>
    %522 = vector.broadcast %503 : vector<1x32xf32> to vector<24x32xf32>
    %523 = arith.addf %521, %522 : vector<24x32xf32>
    %c3_200 = arith.constant 3 : index
    %c0_201 = arith.constant 0 : index
    %c0_202 = arith.constant 0 : index
    %524 = vector.load %arg3[%c3_200, %c0_201, %c0_202] : memref<4x32x96xbf16, #tpu.memory_space<vmem>>, vector<1x32x96xbf16>
    %525 = vector.shape_cast %524 : vector<1x32x96xbf16> to vector<32x96xbf16>
    %c26 = arith.constant 26 : index
    %c0_203 = arith.constant 0 : index
    %526 = vector.load %arg7[%c26, %c0_203] : memref<72x128xf32, #tpu.memory_space<vmem>>, vector<1x96xf32>
    %c3_204 = arith.constant 3 : index
    %c0_205 = arith.constant 0 : index
    %c0_206 = arith.constant 0 : index
    %527 = vector.load %arg4[%c3_204, %c0_205, %c0_206] : memref<7x32x32xbf16, #tpu.memory_space<vmem>>, vector<1x32x32xbf16>
    %528 = vector.shape_cast %527 : vector<1x32x32xbf16> to vector<32x32xbf16>
    %c27 = arith.constant 27 : index
    %c0_207 = arith.constant 0 : index
    %529 = vector.load %arg7[%c27, %c0_207] : memref<72x128xf32, #tpu.memory_space<vmem>>, vector<1x32xf32>
    %530 = arith.truncf %523 : vector<24x32xf32> to vector<24x32xbf16>
    %cst_208 = arith.constant dense<0.000000e+00> : vector<24x96xf32>
    %531 = tpu.matmul %530, %525, %cst_208 {dimension_numbers = #tpu.dot_dimension_numbers<[1], [0], [0], [1], [0, 0, 1, 1], [], []>} : vector<24x32xbf16>, vector<32x96xbf16>, vector<24x96xf32> -> vector<24x96xf32>
    %532 = vector.broadcast %526 : vector<1x96xf32> to vector<24x96xf32>
    %533 = arith.addf %531, %532 : vector<24x96xf32>
    %534 = vector.extract_strided_slice %533 {offsets = [0, 0], sizes = [24, 8], strides = [1, 1]} : vector<24x96xf32> to vector<24x8xf32>
    %535 = vector.extract_strided_slice %533 {offsets = [0, 32], sizes = [24, 8], strides = [1, 1]} : vector<24x96xf32> to vector<24x8xf32>
    %536 = vector.extract_strided_slice %533 {offsets = [0, 64], sizes = [24, 8], strides = [1, 1]} : vector<24x96xf32> to vector<24x8xf32>
    %cst_209 = arith.constant dense<0.000000e+00> : vector<24x24xf32>
    %537 = tpu.matmul %534, %535, %cst_209 {dimension_numbers = #tpu.dot_dimension_numbers<[1], [1], [0], [0], [0, 0, 1, 0], [], []>} : vector<24x8xf32>, vector<24x8xf32>, vector<24x24xf32> -> vector<24x24xf32>
    %538 = vector.broadcast %8 : vector<1x24xf32> to vector<24x24xf32>
    %539 = arith.addf %537, %538 : vector<24x24xf32>
    %cst_210 = arith.constant dense<0xFF800000> : vector<24xf32>
    %540 = vector.multi_reduction <maximumf>, %539, %cst_210 [1] : vector<24x24xf32> to vector<24xf32>
    %541 = vector.shape_cast %540 : vector<24xf32> to vector<24x1xf32>
    %542 = vector.broadcast %541 : vector<24x1xf32> to vector<24x24xf32>
    %543 = arith.subf %539, %542 : vector<24x24xf32>
    %544 = math.exp %543 : vector<24x24xf32>
    %cst_211 = arith.constant dense<0.000000e+00> : vector<24xf32>
    %545 = vector.multi_reduction <add>, %544, %cst_211 [1] : vector<24x24xf32> to vector<24xf32>
    %546 = vector.shape_cast %545 : vector<24xf32> to vector<24x1xf32>
    %547 = vector.broadcast %546 : vector<24x1xf32> to vector<24x24xf32>
    %548 = arith.divf %544, %547 : vector<24x24xf32>
    %cst_212 = arith.constant dense<0.000000e+00> : vector<24x8xf32>
    %549 = tpu.matmul %548, %536, %cst_212 {dimension_numbers = #tpu.dot_dimension_numbers<[1], [0], [0], [1], [0, 0, 1, 1], [], []>} : vector<24x24xf32>, vector<24x8xf32>, vector<24x8xf32> -> vector<24x8xf32>
    %550 = vector.extract_strided_slice %528 {offsets = [0, 0], sizes = [8, 32], strides = [1, 1]} : vector<32x32xbf16> to vector<8x32xbf16>
    %551 = arith.truncf %549 : vector<24x8xf32> to vector<24x8xbf16>
    %cst_213 = arith.constant dense<0.000000e+00> : vector<24x32xf32>
    %552 = tpu.matmul %551, %550, %cst_213 {dimension_numbers = #tpu.dot_dimension_numbers<[1], [0], [0], [1], [0, 0, 1, 1], [], []>} : vector<24x8xbf16>, vector<8x32xbf16>, vector<24x32xf32> -> vector<24x32xf32>
    %553 = vector.broadcast %529 : vector<1x32xf32> to vector<24x32xf32>
    %554 = arith.addf %553, %552 : vector<24x32xf32>
    %555 = vector.extract_strided_slice %533 {offsets = [0, 8], sizes = [24, 8], strides = [1, 1]} : vector<24x96xf32> to vector<24x8xf32>
    %556 = vector.extract_strided_slice %533 {offsets = [0, 40], sizes = [24, 8], strides = [1, 1]} : vector<24x96xf32> to vector<24x8xf32>
    %557 = vector.extract_strided_slice %533 {offsets = [0, 72], sizes = [24, 8], strides = [1, 1]} : vector<24x96xf32> to vector<24x8xf32>
    %cst_214 = arith.constant dense<0.000000e+00> : vector<24x24xf32>
    %558 = tpu.matmul %555, %556, %cst_214 {dimension_numbers = #tpu.dot_dimension_numbers<[1], [1], [0], [0], [0, 0, 1, 0], [], []>} : vector<24x8xf32>, vector<24x8xf32>, vector<24x24xf32> -> vector<24x24xf32>
    %559 = vector.broadcast %8 : vector<1x24xf32> to vector<24x24xf32>
    %560 = arith.addf %558, %559 : vector<24x24xf32>
    %cst_215 = arith.constant dense<0xFF800000> : vector<24xf32>
    %561 = vector.multi_reduction <maximumf>, %560, %cst_215 [1] : vector<24x24xf32> to vector<24xf32>
    %562 = vector.shape_cast %561 : vector<24xf32> to vector<24x1xf32>
    %563 = vector.broadcast %562 : vector<24x1xf32> to vector<24x24xf32>
    %564 = arith.subf %560, %563 : vector<24x24xf32>
    %565 = math.exp %564 : vector<24x24xf32>
    %cst_216 = arith.constant dense<0.000000e+00> : vector<24xf32>
    %566 = vector.multi_reduction <add>, %565, %cst_216 [1] : vector<24x24xf32> to vector<24xf32>
    %567 = vector.shape_cast %566 : vector<24xf32> to vector<24x1xf32>
    %568 = vector.broadcast %567 : vector<24x1xf32> to vector<24x24xf32>
    %569 = arith.divf %565, %568 : vector<24x24xf32>
    %cst_217 = arith.constant dense<0.000000e+00> : vector<24x8xf32>
    %570 = tpu.matmul %569, %557, %cst_217 {dimension_numbers = #tpu.dot_dimension_numbers<[1], [0], [0], [1], [0, 0, 1, 1], [], []>} : vector<24x24xf32>, vector<24x8xf32>, vector<24x8xf32> -> vector<24x8xf32>
    %571 = vector.extract_strided_slice %528 {offsets = [8, 0], sizes = [8, 32], strides = [1, 1]} : vector<32x32xbf16> to vector<8x32xbf16>
    %572 = arith.truncf %570 : vector<24x8xf32> to vector<24x8xbf16>
    %cst_218 = arith.constant dense<0.000000e+00> : vector<24x32xf32>
    %573 = tpu.matmul %572, %571, %cst_218 {dimension_numbers = #tpu.dot_dimension_numbers<[1], [0], [0], [1], [0, 0, 1, 1], [], []>} : vector<24x8xbf16>, vector<8x32xbf16>, vector<24x32xf32> -> vector<24x32xf32>
    %574 = arith.addf %554, %573 : vector<24x32xf32>
    %575 = vector.extract_strided_slice %533 {offsets = [0, 16], sizes = [24, 8], strides = [1, 1]} : vector<24x96xf32> to vector<24x8xf32>
    %576 = vector.extract_strided_slice %533 {offsets = [0, 48], sizes = [24, 8], strides = [1, 1]} : vector<24x96xf32> to vector<24x8xf32>
    %577 = vector.extract_strided_slice %533 {offsets = [0, 80], sizes = [24, 8], strides = [1, 1]} : vector<24x96xf32> to vector<24x8xf32>
    %cst_219 = arith.constant dense<0.000000e+00> : vector<24x24xf32>
    %578 = tpu.matmul %575, %576, %cst_219 {dimension_numbers = #tpu.dot_dimension_numbers<[1], [1], [0], [0], [0, 0, 1, 0], [], []>} : vector<24x8xf32>, vector<24x8xf32>, vector<24x24xf32> -> vector<24x24xf32>
    %579 = vector.broadcast %8 : vector<1x24xf32> to vector<24x24xf32>
    %580 = arith.addf %578, %579 : vector<24x24xf32>
    %cst_220 = arith.constant dense<0xFF800000> : vector<24xf32>
    %581 = vector.multi_reduction <maximumf>, %580, %cst_220 [1] : vector<24x24xf32> to vector<24xf32>
    %582 = vector.shape_cast %581 : vector<24xf32> to vector<24x1xf32>
    %583 = vector.broadcast %582 : vector<24x1xf32> to vector<24x24xf32>
    %584 = arith.subf %580, %583 : vector<24x24xf32>
    %585 = math.exp %584 : vector<24x24xf32>
    %cst_221 = arith.constant dense<0.000000e+00> : vector<24xf32>
    %586 = vector.multi_reduction <add>, %585, %cst_221 [1] : vector<24x24xf32> to vector<24xf32>
    %587 = vector.shape_cast %586 : vector<24xf32> to vector<24x1xf32>
    %588 = vector.broadcast %587 : vector<24x1xf32> to vector<24x24xf32>
    %589 = arith.divf %585, %588 : vector<24x24xf32>
    %cst_222 = arith.constant dense<0.000000e+00> : vector<24x8xf32>
    %590 = tpu.matmul %589, %577, %cst_222 {dimension_numbers = #tpu.dot_dimension_numbers<[1], [0], [0], [1], [0, 0, 1, 1], [], []>} : vector<24x24xf32>, vector<24x8xf32>, vector<24x8xf32> -> vector<24x8xf32>
    %591 = vector.extract_strided_slice %528 {offsets = [16, 0], sizes = [8, 32], strides = [1, 1]} : vector<32x32xbf16> to vector<8x32xbf16>
    %592 = arith.truncf %590 : vector<24x8xf32> to vector<24x8xbf16>
    %cst_223 = arith.constant dense<0.000000e+00> : vector<24x32xf32>
    %593 = tpu.matmul %592, %591, %cst_223 {dimension_numbers = #tpu.dot_dimension_numbers<[1], [0], [0], [1], [0, 0, 1, 1], [], []>} : vector<24x8xbf16>, vector<8x32xbf16>, vector<24x32xf32> -> vector<24x32xf32>
    %594 = arith.addf %574, %593 : vector<24x32xf32>
    %595 = vector.extract_strided_slice %533 {offsets = [0, 24], sizes = [24, 8], strides = [1, 1]} : vector<24x96xf32> to vector<24x8xf32>
    %596 = vector.extract_strided_slice %533 {offsets = [0, 56], sizes = [24, 8], strides = [1, 1]} : vector<24x96xf32> to vector<24x8xf32>
    %597 = vector.extract_strided_slice %533 {offsets = [0, 88], sizes = [24, 8], strides = [1, 1]} : vector<24x96xf32> to vector<24x8xf32>
    %cst_224 = arith.constant dense<0.000000e+00> : vector<24x24xf32>
    %598 = tpu.matmul %595, %596, %cst_224 {dimension_numbers = #tpu.dot_dimension_numbers<[1], [1], [0], [0], [0, 0, 1, 0], [], []>} : vector<24x8xf32>, vector<24x8xf32>, vector<24x24xf32> -> vector<24x24xf32>
    %599 = vector.broadcast %8 : vector<1x24xf32> to vector<24x24xf32>
    %600 = arith.addf %598, %599 : vector<24x24xf32>
    %cst_225 = arith.constant dense<0xFF800000> : vector<24xf32>
    %601 = vector.multi_reduction <maximumf>, %600, %cst_225 [1] : vector<24x24xf32> to vector<24xf32>
    %602 = vector.shape_cast %601 : vector<24xf32> to vector<24x1xf32>
    %603 = vector.broadcast %602 : vector<24x1xf32> to vector<24x24xf32>
    %604 = arith.subf %600, %603 : vector<24x24xf32>
    %605 = math.exp %604 : vector<24x24xf32>
    %cst_226 = arith.constant dense<0.000000e+00> : vector<24xf32>
    %606 = vector.multi_reduction <add>, %605, %cst_226 [1] : vector<24x24xf32> to vector<24xf32>
    %607 = vector.shape_cast %606 : vector<24xf32> to vector<24x1xf32>
    %608 = vector.broadcast %607 : vector<24x1xf32> to vector<24x24xf32>
    %609 = arith.divf %605, %608 : vector<24x24xf32>
    %cst_227 = arith.constant dense<0.000000e+00> : vector<24x8xf32>
    %610 = tpu.matmul %609, %597, %cst_227 {dimension_numbers = #tpu.dot_dimension_numbers<[1], [0], [0], [1], [0, 0, 1, 1], [], []>} : vector<24x24xf32>, vector<24x8xf32>, vector<24x8xf32> -> vector<24x8xf32>
    %611 = vector.extract_strided_slice %528 {offsets = [24, 0], sizes = [8, 32], strides = [1, 1]} : vector<32x32xbf16> to vector<8x32xbf16>
    %612 = arith.truncf %610 : vector<24x8xf32> to vector<24x8xbf16>
    %cst_228 = arith.constant dense<0.000000e+00> : vector<24x32xf32>
    %613 = tpu.matmul %612, %611, %cst_228 {dimension_numbers = #tpu.dot_dimension_numbers<[1], [0], [0], [1], [0, 0, 1, 1], [], []>} : vector<24x8xbf16>, vector<8x32xbf16>, vector<24x32xf32> -> vector<24x32xf32>
    %614 = arith.addf %594, %613 : vector<24x32xf32>
    %615 = arith.addf %501, %614 : vector<24x32xf32>
    %c28 = arith.constant 28 : index
    %c0_229 = arith.constant 0 : index
    %616 = vector.load %arg7[%c28, %c0_229] : memref<72x128xf32, #tpu.memory_space<vmem>>, vector<1x32xf32>
    %c29 = arith.constant 29 : index
    %c0_230 = arith.constant 0 : index
    %617 = vector.load %arg7[%c29, %c0_230] : memref<72x128xf32, #tpu.memory_space<vmem>>, vector<1x32xf32>
    %cst_231 = arith.constant dense<0.000000e+00> : vector<24xf32>
    %618 = vector.multi_reduction <add>, %615, %cst_231 [1] : vector<24x32xf32> to vector<24xf32>
    %619 = vector.shape_cast %618 : vector<24xf32> to vector<24x1xf32>
    %cst_232 = arith.constant 3.200000e+01 : f32
    %620 = vector.broadcast %cst_232 : f32 to vector<24x1xf32>
    %621 = arith.divf %619, %620 : vector<24x1xf32>
    %622 = vector.broadcast %621 : vector<24x1xf32> to vector<24x32xf32>
    %623 = arith.subf %615, %622 : vector<24x32xf32>
    %624 = arith.mulf %623, %623 : vector<24x32xf32>
    %cst_233 = arith.constant dense<0.000000e+00> : vector<24xf32>
    %625 = vector.multi_reduction <add>, %624, %cst_233 [1] : vector<24x32xf32> to vector<24xf32>
    %626 = vector.shape_cast %625 : vector<24xf32> to vector<24x1xf32>
    %cst_234 = arith.constant 3.200000e+01 : f32
    %627 = vector.broadcast %cst_234 : f32 to vector<24x1xf32>
    %628 = arith.divf %626, %627 : vector<24x1xf32>
    %cst_235 = arith.constant 9.99999997E-7 : f32
    %629 = vector.broadcast %cst_235 : f32 to vector<24x1xf32>
    %630 = arith.addf %628, %629 : vector<24x1xf32>
    %631 = math.rsqrt %630 : vector<24x1xf32>
    %632 = vector.broadcast %631 : vector<24x1xf32> to vector<24x32xf32>
    %633 = arith.mulf %623, %632 : vector<24x32xf32>
    %634 = vector.broadcast %616 : vector<1x32xf32> to vector<24x32xf32>
    %635 = arith.mulf %633, %634 : vector<24x32xf32>
    %636 = vector.broadcast %617 : vector<1x32xf32> to vector<24x32xf32>
    %637 = arith.addf %635, %636 : vector<24x32xf32>
    %c3_236 = arith.constant 3 : index
    %c0_237 = arith.constant 0 : index
    %c0_238 = arith.constant 0 : index
    %638 = vector.load %arg5[%c3_236, %c0_237, %c0_238] : memref<4x32x64xbf16, #tpu.memory_space<vmem>>, vector<1x32x64xbf16>
    %639 = vector.shape_cast %638 : vector<1x32x64xbf16> to vector<32x64xbf16>
    %c30 = arith.constant 30 : index
    %c0_239 = arith.constant 0 : index
    %640 = vector.load %arg7[%c30, %c0_239] : memref<72x128xf32, #tpu.memory_space<vmem>>, vector<1x64xf32>
    %641 = arith.truncf %637 : vector<24x32xf32> to vector<24x32xbf16>
    %cst_240 = arith.constant dense<0.000000e+00> : vector<24x64xf32>
    %642 = tpu.matmul %641, %639, %cst_240 {dimension_numbers = #tpu.dot_dimension_numbers<[1], [0], [0], [1], [0, 0, 1, 1], [], []>} : vector<24x32xbf16>, vector<32x64xbf16>, vector<24x64xf32> -> vector<24x64xf32>
    %643 = vector.broadcast %640 : vector<1x64xf32> to vector<24x64xf32>
    %644 = arith.addf %642, %643 : vector<24x64xf32>
    %645 = arith.mulf %644, %644 : vector<24x64xf32>
    %646 = arith.mulf %644, %645 : vector<24x64xf32>
    %cst_241 = arith.constant 4.471500e-02 : f32
    %647 = vector.broadcast %cst_241 : f32 to vector<24x64xf32>
    %648 = arith.mulf %647, %646 : vector<24x64xf32>
    %649 = arith.addf %644, %648 : vector<24x64xf32>
    %cst_242 = arith.constant 0.797884583 : f32
    %650 = vector.broadcast %cst_242 : f32 to vector<24x64xf32>
    %651 = arith.mulf %650, %649 : vector<24x64xf32>
    %652 = math.tanh %651 : vector<24x64xf32>
    %cst_243 = arith.constant 1.000000e+00 : f32
    %653 = vector.broadcast %cst_243 : f32 to vector<24x64xf32>
    %654 = arith.addf %653, %652 : vector<24x64xf32>
    %cst_244 = arith.constant 5.000000e-01 : f32
    %655 = vector.broadcast %cst_244 : f32 to vector<24x64xf32>
    %656 = arith.mulf %655, %654 : vector<24x64xf32>
    %657 = arith.mulf %644, %656 : vector<24x64xf32>
    %c3_245 = arith.constant 3 : index
    %c0_246 = arith.constant 0 : index
    %c0_247 = arith.constant 0 : index
    %658 = vector.load %arg6[%c3_245, %c0_246, %c0_247] : memref<5x64x32xbf16, #tpu.memory_space<vmem>>, vector<1x64x32xbf16>
    %659 = vector.shape_cast %658 : vector<1x64x32xbf16> to vector<64x32xbf16>
    %c31 = arith.constant 31 : index
    %c0_248 = arith.constant 0 : index
    %660 = vector.load %arg7[%c31, %c0_248] : memref<72x128xf32, #tpu.memory_space<vmem>>, vector<1x32xf32>
    %661 = arith.truncf %657 : vector<24x64xf32> to vector<24x64xbf16>
    %cst_249 = arith.constant dense<0.000000e+00> : vector<24x32xf32>
    %662 = tpu.matmul %661, %659, %cst_249 {dimension_numbers = #tpu.dot_dimension_numbers<[1], [0], [0], [1], [0, 0, 1, 1], [], []>} : vector<24x64xbf16>, vector<64x32xbf16>, vector<24x32xf32> -> vector<24x32xf32>
    %663 = vector.broadcast %660 : vector<1x32xf32> to vector<24x32xf32>
    %664 = arith.addf %662, %663 : vector<24x32xf32>
    %665 = arith.addf %615, %664 : vector<24x32xf32>
    %cst_250 = arith.constant dense<0.000000e+00> : vector<24xf32>
    %666 = vector.multi_reduction <add>, %665, %cst_250 [1] : vector<24x32xf32> to vector<24xf32>
    %667 = vector.shape_cast %666 : vector<24xf32> to vector<24x1xf32>
    %cst_251 = arith.constant 3.200000e+01 : f32
    %668 = vector.broadcast %cst_251 : f32 to vector<24x1xf32>
    %669 = arith.divf %667, %668 : vector<24x1xf32>
    %670 = vector.broadcast %669 : vector<24x1xf32> to vector<24x32xf32>
    %671 = arith.subf %665, %670 : vector<24x32xf32>
    %672 = arith.mulf %671, %671 : vector<24x32xf32>
    %cst_252 = arith.constant dense<0.000000e+00> : vector<24xf32>
    %673 = vector.multi_reduction <add>, %672, %cst_252 [1] : vector<24x32xf32> to vector<24xf32>
    %674 = vector.shape_cast %673 : vector<24xf32> to vector<24x1xf32>
    %cst_253 = arith.constant 3.200000e+01 : f32
    %675 = vector.broadcast %cst_253 : f32 to vector<24x1xf32>
    %676 = arith.divf %674, %675 : vector<24x1xf32>
    %cst_254 = arith.constant 9.99999997E-7 : f32
    %677 = vector.broadcast %cst_254 : f32 to vector<24x1xf32>
    %678 = arith.addf %676, %677 : vector<24x1xf32>
    %679 = math.rsqrt %678 : vector<24x1xf32>
    %680 = vector.broadcast %679 : vector<24x1xf32> to vector<24x32xf32>
    %681 = arith.mulf %671, %680 : vector<24x32xf32>
    %682 = vector.broadcast %4 : vector<1x32xf32> to vector<24x32xf32>
    %683 = arith.mulf %681, %682 : vector<24x32xf32>
    %684 = vector.broadcast %5 : vector<1x32xf32> to vector<24x32xf32>
    %685 = arith.addf %683, %684 : vector<24x32xf32>
    %686 = vector.extract_strided_slice %685 {offsets = [0, 0], sizes = [16, 32], strides = [1, 1]} : vector<24x32xf32> to vector<16x32xf32>
    %c5_255 = arith.constant 5 : index
    %c0_256 = arith.constant 0 : index
    %c0_257 = arith.constant 0 : index
    %687 = vector.load %arg4[%c5_255, %c0_256, %c0_257] : memref<7x32x32xbf16, #tpu.memory_space<vmem>>, vector<1x32x32xbf16>
    %688 = vector.shape_cast %687 : vector<1x32x32xbf16> to vector<32x32xbf16>
    %689 = arith.truncf %686 : vector<16x32xf32> to vector<16x32xbf16>
    %cst_258 = arith.constant dense<0.000000e+00> : vector<16x32xf32>
    %690 = tpu.matmul %689, %688, %cst_258 {dimension_numbers = #tpu.dot_dimension_numbers<[1], [0], [0], [1], [0, 0, 1, 1], [], []>} : vector<16x32xbf16>, vector<32x32xbf16>, vector<16x32xf32> -> vector<16x32xf32>
    %691 = arith.mulf %690, %690 : vector<16x32xf32>
    %cst_259 = arith.constant dense<0.000000e+00> : vector<16xf32>
    %692 = vector.multi_reduction <add>, %691, %cst_259 [1] : vector<16x32xf32> to vector<16xf32>
    %693 = vector.shape_cast %692 : vector<16xf32> to vector<16x1xf32>
    %cst_260 = arith.constant 1.000000e-24 : f32
    %694 = vector.broadcast %cst_260 : f32 to vector<16x1xf32>
    %695 = arith.maximumf %693, %694 : vector<16x1xf32>
    %696 = math.rsqrt %695 : vector<16x1xf32>
    %697 = vector.broadcast %696 : vector<16x1xf32> to vector<16x32xf32>
    %698 = arith.mulf %690, %697 : vector<16x32xf32>
    %699 = vector.extract_strided_slice %685 {offsets = [16, 0], sizes = [8, 32], strides = [1, 1]} : vector<24x32xf32> to vector<8x32xf32>
    %c6_261 = arith.constant 6 : index
    %c0_262 = arith.constant 0 : index
    %c0_263 = arith.constant 0 : index
    %700 = vector.load %arg4[%c6_261, %c0_262, %c0_263] : memref<7x32x32xbf16, #tpu.memory_space<vmem>>, vector<1x32x32xbf16>
    %701 = vector.shape_cast %700 : vector<1x32x32xbf16> to vector<32x32xbf16>
    %702 = arith.truncf %699 : vector<8x32xf32> to vector<8x32xbf16>
    %cst_264 = arith.constant dense<0.000000e+00> : vector<8x32xf32>
    %703 = tpu.matmul %702, %701, %cst_264 {dimension_numbers = #tpu.dot_dimension_numbers<[1], [0], [0], [1], [0, 0, 1, 1], [], []>} : vector<8x32xbf16>, vector<32x32xbf16>, vector<8x32xf32> -> vector<8x32xf32>
    %704 = arith.mulf %703, %703 : vector<8x32xf32>
    %cst_265 = arith.constant dense<0.000000e+00> : vector<8xf32>
    %705 = vector.multi_reduction <add>, %704, %cst_265 [1] : vector<8x32xf32> to vector<8xf32>
    %706 = vector.shape_cast %705 : vector<8xf32> to vector<8x1xf32>
    %cst_266 = arith.constant 1.000000e-24 : f32
    %707 = vector.broadcast %cst_266 : f32 to vector<8x1xf32>
    %708 = arith.maximumf %706, %707 : vector<8x1xf32>
    %709 = math.rsqrt %708 : vector<8x1xf32>
    %710 = vector.broadcast %709 : vector<8x1xf32> to vector<8x32xf32>
    %711 = arith.mulf %703, %710 : vector<8x32xf32>
    %cst_267 = arith.constant dense<0.000000e+00> : vector<8x16xf32>
    %712 = tpu.matmul %711, %698, %cst_267 {dimension_numbers = #tpu.dot_dimension_numbers<[1], [1], [0], [0], [0, 0, 1, 0], [], []>} : vector<8x32xf32>, vector<16x32xf32>, vector<8x16xf32> -> vector<8x16xf32>
    %713 = vector.extract_strided_slice %712 {offsets = [0, 0], sizes = [5, 16], strides = [1, 1]} : vector<8x16xf32> to vector<5x16xf32>
    %cst_268 = arith.constant dense<0.000000e+00> : vector<16xf32>
    %714 = vector.multi_reduction <add>, %713, %cst_268 [0] : vector<5x16xf32> to vector<16xf32>
    %715 = vector.shape_cast %714 : vector<16xf32> to vector<1x16xf32>
    %cst_269 = arith.constant 5.000000e+00 : f32
    %716 = vector.broadcast %cst_269 : f32 to vector<1x16xf32>
    %717 = arith.divf %715, %716 : vector<1x16xf32>
    %718 = vector.broadcast %717 : vector<1x16xf32> to vector<5x16xf32>
    %719 = arith.subf %713, %718 : vector<5x16xf32>
    %720 = vector.broadcast %717 : vector<1x16xf32> to vector<5x16xf32>
    %721 = arith.subf %713, %720 : vector<5x16xf32>
    %722 = arith.mulf %719, %721 : vector<5x16xf32>
    %cst_270 = arith.constant dense<0.000000e+00> : vector<16xf32>
    %723 = vector.multi_reduction <add>, %722, %cst_270 [0] : vector<5x16xf32> to vector<16xf32>
    %724 = vector.shape_cast %723 : vector<16xf32> to vector<1x16xf32>
    %cst_271 = arith.constant 5.000000e+00 : f32
    %725 = vector.broadcast %cst_271 : f32 to vector<1x16xf32>
    %726 = arith.divf %724, %725 : vector<1x16xf32>
    %727 = vector.broadcast %717 : vector<1x16xf32> to vector<8x16xf32>
    %728 = arith.subf %712, %727 : vector<8x16xf32>
    %cst_272 = arith.constant 9.99999997E-7 : f32
    %729 = vector.broadcast %cst_272 : f32 to vector<1x16xf32>
    %730 = arith.addf %726, %729 : vector<1x16xf32>
    %731 = math.rsqrt %730 : vector<1x16xf32>
    %732 = vector.broadcast %731 : vector<1x16xf32> to vector<8x16xf32>
    %733 = arith.mulf %728, %732 : vector<8x16xf32>
    %734 = vector.broadcast %6 : vector<8x1xf32> to vector<8x16xf32>
    %735 = arith.mulf %733, %734 : vector<8x16xf32>
    %736 = vector.broadcast %7 : vector<8x1xf32> to vector<8x16xf32>
    %737 = arith.addf %735, %736 : vector<8x16xf32>
    %cst_273 = arith.constant dense<0.000000e+00> : vector<8x256xf32>
    %738 = tpu.matmul %737, %9, %cst_273 {dimension_numbers = #tpu.dot_dimension_numbers<[1], [0], [0], [1], [0, 0, 1, 1], [], []>} : vector<8x16xf32>, vector<16x256xf32>, vector<8x256xf32> -> vector<8x256xf32>
    %c0_274 = arith.constant 0 : index
    %c0_275 = arith.constant 0 : index
    %c0_276 = arith.constant 0 : index
    %739 = vector.load %arg8[%c0_274, %c0_275, %c0_276] : memref<2x8x256xf32, #tpu.memory_space<vmem>>, vector<1x8x256xf32>
    %740 = vector.shape_cast %739 : vector<1x8x256xf32> to vector<8x256xf32>
    %741 = vector.shape_cast %738 : vector<8x256xf32> to vector<1x8x256xf32>
    tpu.vector_store %arg8[%c0_274, %c0_275, %c0_276], %741 {strides = array<i32>} : memref<2x8x256xf32, #tpu.memory_space<vmem>>, vector<1x8x256xf32>,
    %c1_277 = arith.constant 1 : index
    %c0_278 = arith.constant 0 : index
    %c0_279 = arith.constant 0 : index
    %742 = vector.load %arg1[%c1_277, %c0_278, %c0_279] : memref<2x16x64xf32, #tpu.memory_space<vmem>>, vector<1x16x64xf32>
    %743 = vector.shape_cast %742 : vector<1x16x64xf32> to vector<16x64xf32>
    %c4_280 = arith.constant 4 : index
    %c0_281 = arith.constant 0 : index
    %c0_282 = arith.constant 0 : index
    %744 = vector.load %arg6[%c4_280, %c0_281, %c0_282] : memref<5x64x32xbf16, #tpu.memory_space<vmem>>, vector<1x64x32xbf16>
    %745 = vector.shape_cast %744 : vector<1x64x32xbf16> to vector<64x32xbf16>
    %746 = arith.truncf %743 : vector<16x64xf32> to vector<16x64xbf16>
    %cst_283 = arith.constant dense<0.000000e+00> : vector<16x32xf32>
    %747 = tpu.matmul %746, %745, %cst_283 {dimension_numbers = #tpu.dot_dimension_numbers<[1], [0], [0], [1], [0, 0, 1, 1], [], []>} : vector<16x64xbf16>, vector<64x32xbf16>, vector<16x32xf32> -> vector<16x32xf32>
    %748 = vector.broadcast %2 : vector<1x32xf32> to vector<16x32xf32>
    %749 = arith.addf %747, %748 : vector<16x32xf32>
    %750 = arith.addf %749, %0 : vector<16x32xf32>
    %c0_284 = arith.constant 0 : index
    %c0_285 = arith.constant 0 : index
    %751 = vector.load %arg7[%c0_284, %c0_285] : memref<72x128xf32, #tpu.memory_space<vmem>>, vector<1x32xf32>
    %c1_286 = arith.constant 1 : index
    %c0_287 = arith.constant 0 : index
    %752 = vector.load %arg7[%c1_286, %c0_287] : memref<72x128xf32, #tpu.memory_space<vmem>>, vector<1x32xf32>
    %cst_288 = arith.constant dense<0.000000e+00> : vector<16xf32>
    %753 = vector.multi_reduction <add>, %750, %cst_288 [1] : vector<16x32xf32> to vector<16xf32>
    %754 = vector.shape_cast %753 : vector<16xf32> to vector<16x1xf32>
    %cst_289 = arith.constant 3.200000e+01 : f32
    %755 = vector.broadcast %cst_289 : f32 to vector<16x1xf32>
    %756 = arith.divf %754, %755 : vector<16x1xf32>
    %757 = vector.broadcast %756 : vector<16x1xf32> to vector<16x32xf32>
    %758 = arith.subf %750, %757 : vector<16x32xf32>
    %759 = arith.mulf %758, %758 : vector<16x32xf32>
    %cst_290 = arith.constant dense<0.000000e+00> : vector<16xf32>
    %760 = vector.multi_reduction <add>, %759, %cst_290 [1] : vector<16x32xf32> to vector<16xf32>
    %761 = vector.shape_cast %760 : vector<16xf32> to vector<16x1xf32>
    %cst_291 = arith.constant 3.200000e+01 : f32
    %762 = vector.broadcast %cst_291 : f32 to vector<16x1xf32>
    %763 = arith.divf %761, %762 : vector<16x1xf32>
    %cst_292 = arith.constant 9.99999997E-7 : f32
    %764 = vector.broadcast %cst_292 : f32 to vector<16x1xf32>
    %765 = arith.addf %763, %764 : vector<16x1xf32>
    %766 = math.rsqrt %765 : vector<16x1xf32>
    %767 = vector.broadcast %766 : vector<16x1xf32> to vector<16x32xf32>
    %768 = arith.mulf %758, %767 : vector<16x32xf32>
    %769 = vector.broadcast %751 : vector<1x32xf32> to vector<16x32xf32>
    %770 = arith.mulf %768, %769 : vector<16x32xf32>
    %771 = vector.broadcast %752 : vector<1x32xf32> to vector<16x32xf32>
    %772 = arith.addf %770, %771 : vector<16x32xf32>
    %c0_293 = arith.constant 0 : index
    %c0_294 = arith.constant 0 : index
    %c0_295 = arith.constant 0 : index
    %773 = vector.load %arg3[%c0_293, %c0_294, %c0_295] : memref<4x32x96xbf16, #tpu.memory_space<vmem>>, vector<1x32x96xbf16>
    %774 = vector.shape_cast %773 : vector<1x32x96xbf16> to vector<32x96xbf16>
    %c2_296 = arith.constant 2 : index
    %c0_297 = arith.constant 0 : index
    %775 = vector.load %arg7[%c2_296, %c0_297] : memref<72x128xf32, #tpu.memory_space<vmem>>, vector<1x96xf32>
    %c0_298 = arith.constant 0 : index
    %c0_299 = arith.constant 0 : index
    %c0_300 = arith.constant 0 : index
    %776 = vector.load %arg4[%c0_298, %c0_299, %c0_300] : memref<7x32x32xbf16, #tpu.memory_space<vmem>>, vector<1x32x32xbf16>
    %777 = vector.shape_cast %776 : vector<1x32x32xbf16> to vector<32x32xbf16>
    %c3_301 = arith.constant 3 : index
    %c0_302 = arith.constant 0 : index
    %778 = vector.load %arg7[%c3_301, %c0_302] : memref<72x128xf32, #tpu.memory_space<vmem>>, vector<1x32xf32>
    %779 = arith.truncf %772 : vector<16x32xf32> to vector<16x32xbf16>
    %cst_303 = arith.constant dense<0.000000e+00> : vector<16x96xf32>
    %780 = tpu.matmul %779, %774, %cst_303 {dimension_numbers = #tpu.dot_dimension_numbers<[1], [0], [0], [1], [0, 0, 1, 1], [], []>} : vector<16x32xbf16>, vector<32x96xbf16>, vector<16x96xf32> -> vector<16x96xf32>
    %781 = vector.broadcast %775 : vector<1x96xf32> to vector<16x96xf32>
    %782 = arith.addf %780, %781 : vector<16x96xf32>
    %783 = vector.extract_strided_slice %782 {offsets = [0, 0], sizes = [16, 8], strides = [1, 1]} : vector<16x96xf32> to vector<16x8xf32>
    %784 = vector.extract_strided_slice %782 {offsets = [0, 32], sizes = [16, 8], strides = [1, 1]} : vector<16x96xf32> to vector<16x8xf32>
    %785 = vector.extract_strided_slice %782 {offsets = [0, 64], sizes = [16, 8], strides = [1, 1]} : vector<16x96xf32> to vector<16x8xf32>
    %cst_304 = arith.constant dense<0.000000e+00> : vector<16x16xf32>
    %786 = tpu.matmul %783, %784, %cst_304 {dimension_numbers = #tpu.dot_dimension_numbers<[1], [1], [0], [0], [0, 0, 1, 0], [], []>} : vector<16x8xf32>, vector<16x8xf32>, vector<16x16xf32> -> vector<16x16xf32>
    %cst_305 = arith.constant dense<0xFF800000> : vector<16xf32>
    %787 = vector.multi_reduction <maximumf>, %786, %cst_305 [1] : vector<16x16xf32> to vector<16xf32>
    %788 = vector.shape_cast %787 : vector<16xf32> to vector<16x1xf32>
    %789 = vector.broadcast %788 : vector<16x1xf32> to vector<16x16xf32>
    %790 = arith.subf %786, %789 : vector<16x16xf32>
    %791 = math.exp %790 : vector<16x16xf32>
    %cst_306 = arith.constant dense<0.000000e+00> : vector<16xf32>
    %792 = vector.multi_reduction <add>, %791, %cst_306 [1] : vector<16x16xf32> to vector<16xf32>
    %793 = vector.shape_cast %792 : vector<16xf32> to vector<16x1xf32>
    %794 = vector.broadcast %793 : vector<16x1xf32> to vector<16x16xf32>
    %795 = arith.divf %791, %794 : vector<16x16xf32>
    %cst_307 = arith.constant dense<0.000000e+00> : vector<16x8xf32>
    %796 = tpu.matmul %795, %785, %cst_307 {dimension_numbers = #tpu.dot_dimension_numbers<[1], [0], [0], [1], [0, 0, 1, 1], [], []>} : vector<16x16xf32>, vector<16x8xf32>, vector<16x8xf32> -> vector<16x8xf32>
    %797 = vector.extract_strided_slice %777 {offsets = [0, 0], sizes = [8, 32], strides = [1, 1]} : vector<32x32xbf16> to vector<8x32xbf16>
    %798 = arith.truncf %796 : vector<16x8xf32> to vector<16x8xbf16>
    %cst_308 = arith.constant dense<0.000000e+00> : vector<16x32xf32>
    %799 = tpu.matmul %798, %797, %cst_308 {dimension_numbers = #tpu.dot_dimension_numbers<[1], [0], [0], [1], [0, 0, 1, 1], [], []>} : vector<16x8xbf16>, vector<8x32xbf16>, vector<16x32xf32> -> vector<16x32xf32>
    %800 = vector.broadcast %778 : vector<1x32xf32> to vector<16x32xf32>
    %801 = arith.addf %800, %799 : vector<16x32xf32>
    %802 = vector.extract_strided_slice %782 {offsets = [0, 8], sizes = [16, 8], strides = [1, 1]} : vector<16x96xf32> to vector<16x8xf32>
    %803 = vector.extract_strided_slice %782 {offsets = [0, 40], sizes = [16, 8], strides = [1, 1]} : vector<16x96xf32> to vector<16x8xf32>
    %804 = vector.extract_strided_slice %782 {offsets = [0, 72], sizes = [16, 8], strides = [1, 1]} : vector<16x96xf32> to vector<16x8xf32>
    %cst_309 = arith.constant dense<0.000000e+00> : vector<16x16xf32>
    %805 = tpu.matmul %802, %803, %cst_309 {dimension_numbers = #tpu.dot_dimension_numbers<[1], [1], [0], [0], [0, 0, 1, 0], [], []>} : vector<16x8xf32>, vector<16x8xf32>, vector<16x16xf32> -> vector<16x16xf32>
    %cst_310 = arith.constant dense<0xFF800000> : vector<16xf32>
    %806 = vector.multi_reduction <maximumf>, %805, %cst_310 [1] : vector<16x16xf32> to vector<16xf32>
    %807 = vector.shape_cast %806 : vector<16xf32> to vector<16x1xf32>
    %808 = vector.broadcast %807 : vector<16x1xf32> to vector<16x16xf32>
    %809 = arith.subf %805, %808 : vector<16x16xf32>
    %810 = math.exp %809 : vector<16x16xf32>
    %cst_311 = arith.constant dense<0.000000e+00> : vector<16xf32>
    %811 = vector.multi_reduction <add>, %810, %cst_311 [1] : vector<16x16xf32> to vector<16xf32>
    %812 = vector.shape_cast %811 : vector<16xf32> to vector<16x1xf32>
    %813 = vector.broadcast %812 : vector<16x1xf32> to vector<16x16xf32>
    %814 = arith.divf %810, %813 : vector<16x16xf32>
    %cst_312 = arith.constant dense<0.000000e+00> : vector<16x8xf32>
    %815 = tpu.matmul %814, %804, %cst_312 {dimension_numbers = #tpu.dot_dimension_numbers<[1], [0], [0], [1], [0, 0, 1, 1], [], []>} : vector<16x16xf32>, vector<16x8xf32>, vector<16x8xf32> -> vector<16x8xf32>
    %816 = vector.extract_strided_slice %777 {offsets = [8, 0], sizes = [8, 32], strides = [1, 1]} : vector<32x32xbf16> to vector<8x32xbf16>
    %817 = arith.truncf %815 : vector<16x8xf32> to vector<16x8xbf16>
    %cst_313 = arith.constant dense<0.000000e+00> : vector<16x32xf32>
    %818 = tpu.matmul %817, %816, %cst_313 {dimension_numbers = #tpu.dot_dimension_numbers<[1], [0], [0], [1], [0, 0, 1, 1], [], []>} : vector<16x8xbf16>, vector<8x32xbf16>, vector<16x32xf32> -> vector<16x32xf32>
    %819 = arith.addf %801, %818 : vector<16x32xf32>
    %820 = vector.extract_strided_slice %782 {offsets = [0, 16], sizes = [16, 8], strides = [1, 1]} : vector<16x96xf32> to vector<16x8xf32>
    %821 = vector.extract_strided_slice %782 {offsets = [0, 48], sizes = [16, 8], strides = [1, 1]} : vector<16x96xf32> to vector<16x8xf32>
    %822 = vector.extract_strided_slice %782 {offsets = [0, 80], sizes = [16, 8], strides = [1, 1]} : vector<16x96xf32> to vector<16x8xf32>
    %cst_314 = arith.constant dense<0.000000e+00> : vector<16x16xf32>
    %823 = tpu.matmul %820, %821, %cst_314 {dimension_numbers = #tpu.dot_dimension_numbers<[1], [1], [0], [0], [0, 0, 1, 0], [], []>} : vector<16x8xf32>, vector<16x8xf32>, vector<16x16xf32> -> vector<16x16xf32>
    %cst_315 = arith.constant dense<0xFF800000> : vector<16xf32>
    %824 = vector.multi_reduction <maximumf>, %823, %cst_315 [1] : vector<16x16xf32> to vector<16xf32>
    %825 = vector.shape_cast %824 : vector<16xf32> to vector<16x1xf32>
    %826 = vector.broadcast %825 : vector<16x1xf32> to vector<16x16xf32>
    %827 = arith.subf %823, %826 : vector<16x16xf32>
    %828 = math.exp %827 : vector<16x16xf32>
    %cst_316 = arith.constant dense<0.000000e+00> : vector<16xf32>
    %829 = vector.multi_reduction <add>, %828, %cst_316 [1] : vector<16x16xf32> to vector<16xf32>
    %830 = vector.shape_cast %829 : vector<16xf32> to vector<16x1xf32>
    %831 = vector.broadcast %830 : vector<16x1xf32> to vector<16x16xf32>
    %832 = arith.divf %828, %831 : vector<16x16xf32>
    %cst_317 = arith.constant dense<0.000000e+00> : vector<16x8xf32>
    %833 = tpu.matmul %832, %822, %cst_317 {dimension_numbers = #tpu.dot_dimension_numbers<[1], [0], [0], [1], [0, 0, 1, 1], [], []>} : vector<16x16xf32>, vector<16x8xf32>, vector<16x8xf32> -> vector<16x8xf32>
    %834 = vector.extract_strided_slice %777 {offsets = [16, 0], sizes = [8, 32], strides = [1, 1]} : vector<32x32xbf16> to vector<8x32xbf16>
    %835 = arith.truncf %833 : vector<16x8xf32> to vector<16x8xbf16>
    %cst_318 = arith.constant dense<0.000000e+00> : vector<16x32xf32>
    %836 = tpu.matmul %835, %834, %cst_318 {dimension_numbers = #tpu.dot_dimension_numbers<[1], [0], [0], [1], [0, 0, 1, 1], [], []>} : vector<16x8xbf16>, vector<8x32xbf16>, vector<16x32xf32> -> vector<16x32xf32>
    %837 = arith.addf %819, %836 : vector<16x32xf32>
    %838 = vector.extract_strided_slice %782 {offsets = [0, 24], sizes = [16, 8], strides = [1, 1]} : vector<16x96xf32> to vector<16x8xf32>
    %839 = vector.extract_strided_slice %782 {offsets = [0, 56], sizes = [16, 8], strides = [1, 1]} : vector<16x96xf32> to vector<16x8xf32>
    %840 = vector.extract_strided_slice %782 {offsets = [0, 88], sizes = [16, 8], strides = [1, 1]} : vector<16x96xf32> to vector<16x8xf32>
    %cst_319 = arith.constant dense<0.000000e+00> : vector<16x16xf32>
    %841 = tpu.matmul %838, %839, %cst_319 {dimension_numbers = #tpu.dot_dimension_numbers<[1], [1], [0], [0], [0, 0, 1, 0], [], []>} : vector<16x8xf32>, vector<16x8xf32>, vector<16x16xf32> -> vector<16x16xf32>
    %cst_320 = arith.constant dense<0xFF800000> : vector<16xf32>
    %842 = vector.multi_reduction <maximumf>, %841, %cst_320 [1] : vector<16x16xf32> to vector<16xf32>
    %843 = vector.shape_cast %842 : vector<16xf32> to vector<16x1xf32>
    %844 = vector.broadcast %843 : vector<16x1xf32> to vector<16x16xf32>
    %845 = arith.subf %841, %844 : vector<16x16xf32>
    %846 = math.exp %845 : vector<16x16xf32>
    %cst_321 = arith.constant dense<0.000000e+00> : vector<16xf32>
    %847 = vector.multi_reduction <add>, %846, %cst_321 [1] : vector<16x16xf32> to vector<16xf32>
    %848 = vector.shape_cast %847 : vector<16xf32> to vector<16x1xf32>
    %849 = vector.broadcast %848 : vector<16x1xf32> to vector<16x16xf32>
    %850 = arith.divf %846, %849 : vector<16x16xf32>
    %cst_322 = arith.constant dense<0.000000e+00> : vector<16x8xf32>
    %851 = tpu.matmul %850, %840, %cst_322 {dimension_numbers = #tpu.dot_dimension_numbers<[1], [0], [0], [1], [0, 0, 1, 1], [], []>} : vector<16x16xf32>, vector<16x8xf32>, vector<16x8xf32> -> vector<16x8xf32>
    %852 = vector.extract_strided_slice %777 {offsets = [24, 0], sizes = [8, 32], strides = [1, 1]} : vector<32x32xbf16> to vector<8x32xbf16>
    %853 = arith.truncf %851 : vector<16x8xf32> to vector<16x8xbf16>
    %cst_323 = arith.constant dense<0.000000e+00> : vector<16x32xf32>
    %854 = tpu.matmul %853, %852, %cst_323 {dimension_numbers = #tpu.dot_dimension_numbers<[1], [0], [0], [1], [0, 0, 1, 1], [], []>} : vector<16x8xbf16>, vector<8x32xbf16>, vector<16x32xf32> -> vector<16x32xf32>
    %855 = arith.addf %837, %854 : vector<16x32xf32>
    %856 = arith.addf %750, %855 : vector<16x32xf32>
    %c4_324 = arith.constant 4 : index
    %c0_325 = arith.constant 0 : index
    %857 = vector.load %arg7[%c4_324, %c0_325] : memref<72x128xf32, #tpu.memory_space<vmem>>, vector<1x32xf32>
    %c5_326 = arith.constant 5 : index
    %c0_327 = arith.constant 0 : index
    %858 = vector.load %arg7[%c5_326, %c0_327] : memref<72x128xf32, #tpu.memory_space<vmem>>, vector<1x32xf32>
    %cst_328 = arith.constant dense<0.000000e+00> : vector<16xf32>
    %859 = vector.multi_reduction <add>, %856, %cst_328 [1] : vector<16x32xf32> to vector<16xf32>
    %860 = vector.shape_cast %859 : vector<16xf32> to vector<16x1xf32>
    %cst_329 = arith.constant 3.200000e+01 : f32
    %861 = vector.broadcast %cst_329 : f32 to vector<16x1xf32>
    %862 = arith.divf %860, %861 : vector<16x1xf32>
    %863 = vector.broadcast %862 : vector<16x1xf32> to vector<16x32xf32>
    %864 = arith.subf %856, %863 : vector<16x32xf32>
    %865 = arith.mulf %864, %864 : vector<16x32xf32>
    %cst_330 = arith.constant dense<0.000000e+00> : vector<16xf32>
    %866 = vector.multi_reduction <add>, %865, %cst_330 [1] : vector<16x32xf32> to vector<16xf32>
    %867 = vector.shape_cast %866 : vector<16xf32> to vector<16x1xf32>
    %cst_331 = arith.constant 3.200000e+01 : f32
    %868 = vector.broadcast %cst_331 : f32 to vector<16x1xf32>
    %869 = arith.divf %867, %868 : vector<16x1xf32>
    %cst_332 = arith.constant 9.99999997E-7 : f32
    %870 = vector.broadcast %cst_332 : f32 to vector<16x1xf32>
    %871 = arith.addf %869, %870 : vector<16x1xf32>
    %872 = math.rsqrt %871 : vector<16x1xf32>
    %873 = vector.broadcast %872 : vector<16x1xf32> to vector<16x32xf32>
    %874 = arith.mulf %864, %873 : vector<16x32xf32>
    %875 = vector.broadcast %857 : vector<1x32xf32> to vector<16x32xf32>
    %876 = arith.mulf %874, %875 : vector<16x32xf32>
    %877 = vector.broadcast %858 : vector<1x32xf32> to vector<16x32xf32>
    %878 = arith.addf %876, %877 : vector<16x32xf32>
    %c0_333 = arith.constant 0 : index
    %c0_334 = arith.constant 0 : index
    %c0_335 = arith.constant 0 : index
    %879 = vector.load %arg5[%c0_333, %c0_334, %c0_335] : memref<4x32x64xbf16, #tpu.memory_space<vmem>>, vector<1x32x64xbf16>
    %880 = vector.shape_cast %879 : vector<1x32x64xbf16> to vector<32x64xbf16>
    %c6_336 = arith.constant 6 : index
    %c0_337 = arith.constant 0 : index
    %881 = vector.load %arg7[%c6_336, %c0_337] : memref<72x128xf32, #tpu.memory_space<vmem>>, vector<1x64xf32>
    %882 = arith.truncf %878 : vector<16x32xf32> to vector<16x32xbf16>
    %cst_338 = arith.constant dense<0.000000e+00> : vector<16x64xf32>
    %883 = tpu.matmul %882, %880, %cst_338 {dimension_numbers = #tpu.dot_dimension_numbers<[1], [0], [0], [1], [0, 0, 1, 1], [], []>} : vector<16x32xbf16>, vector<32x64xbf16>, vector<16x64xf32> -> vector<16x64xf32>
    %884 = vector.broadcast %881 : vector<1x64xf32> to vector<16x64xf32>
    %885 = arith.addf %883, %884 : vector<16x64xf32>
    %886 = arith.mulf %885, %885 : vector<16x64xf32>
    %887 = arith.mulf %885, %886 : vector<16x64xf32>
    %cst_339 = arith.constant 4.471500e-02 : f32
    %888 = vector.broadcast %cst_339 : f32 to vector<16x64xf32>
    %889 = arith.mulf %888, %887 : vector<16x64xf32>
    %890 = arith.addf %885, %889 : vector<16x64xf32>
    %cst_340 = arith.constant 0.797884583 : f32
    %891 = vector.broadcast %cst_340 : f32 to vector<16x64xf32>
    %892 = arith.mulf %891, %890 : vector<16x64xf32>
    %893 = math.tanh %892 : vector<16x64xf32>
    %cst_341 = arith.constant 1.000000e+00 : f32
    %894 = vector.broadcast %cst_341 : f32 to vector<16x64xf32>
    %895 = arith.addf %894, %893 : vector<16x64xf32>
    %cst_342 = arith.constant 5.000000e-01 : f32
    %896 = vector.broadcast %cst_342 : f32 to vector<16x64xf32>
    %897 = arith.mulf %896, %895 : vector<16x64xf32>
    %898 = arith.mulf %885, %897 : vector<16x64xf32>
    %c0_343 = arith.constant 0 : index
    %c0_344 = arith.constant 0 : index
    %c0_345 = arith.constant 0 : index
    %899 = vector.load %arg6[%c0_343, %c0_344, %c0_345] : memref<5x64x32xbf16, #tpu.memory_space<vmem>>, vector<1x64x32xbf16>
    %900 = vector.shape_cast %899 : vector<1x64x32xbf16> to vector<64x32xbf16>
    %c7_346 = arith.constant 7 : index
    %c0_347 = arith.constant 0 : index
    %901 = vector.load %arg7[%c7_346, %c0_347] : memref<72x128xf32, #tpu.memory_space<vmem>>, vector<1x32xf32>
    %902 = arith.truncf %898 : vector<16x64xf32> to vector<16x64xbf16>
    %cst_348 = arith.constant dense<0.000000e+00> : vector<16x32xf32>
    %903 = tpu.matmul %902, %900, %cst_348 {dimension_numbers = #tpu.dot_dimension_numbers<[1], [0], [0], [1], [0, 0, 1, 1], [], []>} : vector<16x64xbf16>, vector<64x32xbf16>, vector<16x32xf32> -> vector<16x32xf32>
    %904 = vector.broadcast %901 : vector<1x32xf32> to vector<16x32xf32>
    %905 = arith.addf %903, %904 : vector<16x32xf32>
    %906 = arith.addf %856, %905 : vector<16x32xf32>
    %c8_349 = arith.constant 8 : index
    %c0_350 = arith.constant 0 : index
    %907 = vector.load %arg7[%c8_349, %c0_350] : memref<72x128xf32, #tpu.memory_space<vmem>>, vector<1x32xf32>
    %c9_351 = arith.constant 9 : index
    %c0_352 = arith.constant 0 : index
    %908 = vector.load %arg7[%c9_351, %c0_352] : memref<72x128xf32, #tpu.memory_space<vmem>>, vector<1x32xf32>
    %cst_353 = arith.constant dense<0.000000e+00> : vector<16xf32>
    %909 = vector.multi_reduction <add>, %906, %cst_353 [1] : vector<16x32xf32> to vector<16xf32>
    %910 = vector.shape_cast %909 : vector<16xf32> to vector<16x1xf32>
    %cst_354 = arith.constant 3.200000e+01 : f32
    %911 = vector.broadcast %cst_354 : f32 to vector<16x1xf32>
    %912 = arith.divf %910, %911 : vector<16x1xf32>
    %913 = vector.broadcast %912 : vector<16x1xf32> to vector<16x32xf32>
    %914 = arith.subf %906, %913 : vector<16x32xf32>
    %915 = arith.mulf %914, %914 : vector<16x32xf32>
    %cst_355 = arith.constant dense<0.000000e+00> : vector<16xf32>
    %916 = vector.multi_reduction <add>, %915, %cst_355 [1] : vector<16x32xf32> to vector<16xf32>
    %917 = vector.shape_cast %916 : vector<16xf32> to vector<16x1xf32>
    %cst_356 = arith.constant 3.200000e+01 : f32
    %918 = vector.broadcast %cst_356 : f32 to vector<16x1xf32>
    %919 = arith.divf %917, %918 : vector<16x1xf32>
    %cst_357 = arith.constant 9.99999997E-7 : f32
    %920 = vector.broadcast %cst_357 : f32 to vector<16x1xf32>
    %921 = arith.addf %919, %920 : vector<16x1xf32>
    %922 = math.rsqrt %921 : vector<16x1xf32>
    %923 = vector.broadcast %922 : vector<16x1xf32> to vector<16x32xf32>
    %924 = arith.mulf %914, %923 : vector<16x32xf32>
    %925 = vector.broadcast %907 : vector<1x32xf32> to vector<16x32xf32>
    %926 = arith.mulf %924, %925 : vector<16x32xf32>
    %927 = vector.broadcast %908 : vector<1x32xf32> to vector<16x32xf32>
    %928 = arith.addf %926, %927 : vector<16x32xf32>
    %c1_358 = arith.constant 1 : index
    %c0_359 = arith.constant 0 : index
    %c0_360 = arith.constant 0 : index
    %929 = vector.load %arg3[%c1_358, %c0_359, %c0_360] : memref<4x32x96xbf16, #tpu.memory_space<vmem>>, vector<1x32x96xbf16>
    %930 = vector.shape_cast %929 : vector<1x32x96xbf16> to vector<32x96xbf16>
    %c10_361 = arith.constant 10 : index
    %c0_362 = arith.constant 0 : index
    %931 = vector.load %arg7[%c10_361, %c0_362] : memref<72x128xf32, #tpu.memory_space<vmem>>, vector<1x96xf32>
    %c1_363 = arith.constant 1 : index
    %c0_364 = arith.constant 0 : index
    %c0_365 = arith.constant 0 : index
    %932 = vector.load %arg4[%c1_363, %c0_364, %c0_365] : memref<7x32x32xbf16, #tpu.memory_space<vmem>>, vector<1x32x32xbf16>
    %933 = vector.shape_cast %932 : vector<1x32x32xbf16> to vector<32x32xbf16>
    %c11_366 = arith.constant 11 : index
    %c0_367 = arith.constant 0 : index
    %934 = vector.load %arg7[%c11_366, %c0_367] : memref<72x128xf32, #tpu.memory_space<vmem>>, vector<1x32xf32>
    %935 = arith.truncf %928 : vector<16x32xf32> to vector<16x32xbf16>
    %cst_368 = arith.constant dense<0.000000e+00> : vector<16x96xf32>
    %936 = tpu.matmul %935, %930, %cst_368 {dimension_numbers = #tpu.dot_dimension_numbers<[1], [0], [0], [1], [0, 0, 1, 1], [], []>} : vector<16x32xbf16>, vector<32x96xbf16>, vector<16x96xf32> -> vector<16x96xf32>
    %937 = vector.broadcast %931 : vector<1x96xf32> to vector<16x96xf32>
    %938 = arith.addf %936, %937 : vector<16x96xf32>
    %939 = vector.extract_strided_slice %938 {offsets = [0, 0], sizes = [16, 8], strides = [1, 1]} : vector<16x96xf32> to vector<16x8xf32>
    %940 = vector.extract_strided_slice %938 {offsets = [0, 32], sizes = [16, 8], strides = [1, 1]} : vector<16x96xf32> to vector<16x8xf32>
    %941 = vector.extract_strided_slice %938 {offsets = [0, 64], sizes = [16, 8], strides = [1, 1]} : vector<16x96xf32> to vector<16x8xf32>
    %cst_369 = arith.constant dense<0.000000e+00> : vector<16x16xf32>
    %942 = tpu.matmul %939, %940, %cst_369 {dimension_numbers = #tpu.dot_dimension_numbers<[1], [1], [0], [0], [0, 0, 1, 0], [], []>} : vector<16x8xf32>, vector<16x8xf32>, vector<16x16xf32> -> vector<16x16xf32>
    %cst_370 = arith.constant dense<0xFF800000> : vector<16xf32>
    %943 = vector.multi_reduction <maximumf>, %942, %cst_370 [1] : vector<16x16xf32> to vector<16xf32>
    %944 = vector.shape_cast %943 : vector<16xf32> to vector<16x1xf32>
    %945 = vector.broadcast %944 : vector<16x1xf32> to vector<16x16xf32>
    %946 = arith.subf %942, %945 : vector<16x16xf32>
    %947 = math.exp %946 : vector<16x16xf32>
    %cst_371 = arith.constant dense<0.000000e+00> : vector<16xf32>
    %948 = vector.multi_reduction <add>, %947, %cst_371 [1] : vector<16x16xf32> to vector<16xf32>
    %949 = vector.shape_cast %948 : vector<16xf32> to vector<16x1xf32>
    %950 = vector.broadcast %949 : vector<16x1xf32> to vector<16x16xf32>
    %951 = arith.divf %947, %950 : vector<16x16xf32>
    %cst_372 = arith.constant dense<0.000000e+00> : vector<16x8xf32>
    %952 = tpu.matmul %951, %941, %cst_372 {dimension_numbers = #tpu.dot_dimension_numbers<[1], [0], [0], [1], [0, 0, 1, 1], [], []>} : vector<16x16xf32>, vector<16x8xf32>, vector<16x8xf32> -> vector<16x8xf32>
    %953 = vector.extract_strided_slice %933 {offsets = [0, 0], sizes = [8, 32], strides = [1, 1]} : vector<32x32xbf16> to vector<8x32xbf16>
    %954 = arith.truncf %952 : vector<16x8xf32> to vector<16x8xbf16>
    %cst_373 = arith.constant dense<0.000000e+00> : vector<16x32xf32>
    %955 = tpu.matmul %954, %953, %cst_373 {dimension_numbers = #tpu.dot_dimension_numbers<[1], [0], [0], [1], [0, 0, 1, 1], [], []>} : vector<16x8xbf16>, vector<8x32xbf16>, vector<16x32xf32> -> vector<16x32xf32>
    %956 = vector.broadcast %934 : vector<1x32xf32> to vector<16x32xf32>
    %957 = arith.addf %956, %955 : vector<16x32xf32>
    %958 = vector.extract_strided_slice %938 {offsets = [0, 8], sizes = [16, 8], strides = [1, 1]} : vector<16x96xf32> to vector<16x8xf32>
    %959 = vector.extract_strided_slice %938 {offsets = [0, 40], sizes = [16, 8], strides = [1, 1]} : vector<16x96xf32> to vector<16x8xf32>
    %960 = vector.extract_strided_slice %938 {offsets = [0, 72], sizes = [16, 8], strides = [1, 1]} : vector<16x96xf32> to vector<16x8xf32>
    %cst_374 = arith.constant dense<0.000000e+00> : vector<16x16xf32>
    %961 = tpu.matmul %958, %959, %cst_374 {dimension_numbers = #tpu.dot_dimension_numbers<[1], [1], [0], [0], [0, 0, 1, 0], [], []>} : vector<16x8xf32>, vector<16x8xf32>, vector<16x16xf32> -> vector<16x16xf32>
    %cst_375 = arith.constant dense<0xFF800000> : vector<16xf32>
    %962 = vector.multi_reduction <maximumf>, %961, %cst_375 [1] : vector<16x16xf32> to vector<16xf32>
    %963 = vector.shape_cast %962 : vector<16xf32> to vector<16x1xf32>
    %964 = vector.broadcast %963 : vector<16x1xf32> to vector<16x16xf32>
    %965 = arith.subf %961, %964 : vector<16x16xf32>
    %966 = math.exp %965 : vector<16x16xf32>
    %cst_376 = arith.constant dense<0.000000e+00> : vector<16xf32>
    %967 = vector.multi_reduction <add>, %966, %cst_376 [1] : vector<16x16xf32> to vector<16xf32>
    %968 = vector.shape_cast %967 : vector<16xf32> to vector<16x1xf32>
    %969 = vector.broadcast %968 : vector<16x1xf32> to vector<16x16xf32>
    %970 = arith.divf %966, %969 : vector<16x16xf32>
    %cst_377 = arith.constant dense<0.000000e+00> : vector<16x8xf32>
    %971 = tpu.matmul %970, %960, %cst_377 {dimension_numbers = #tpu.dot_dimension_numbers<[1], [0], [0], [1], [0, 0, 1, 1], [], []>} : vector<16x16xf32>, vector<16x8xf32>, vector<16x8xf32> -> vector<16x8xf32>
    %972 = vector.extract_strided_slice %933 {offsets = [8, 0], sizes = [8, 32], strides = [1, 1]} : vector<32x32xbf16> to vector<8x32xbf16>
    %973 = arith.truncf %971 : vector<16x8xf32> to vector<16x8xbf16>
    %cst_378 = arith.constant dense<0.000000e+00> : vector<16x32xf32>
    %974 = tpu.matmul %973, %972, %cst_378 {dimension_numbers = #tpu.dot_dimension_numbers<[1], [0], [0], [1], [0, 0, 1, 1], [], []>} : vector<16x8xbf16>, vector<8x32xbf16>, vector<16x32xf32> -> vector<16x32xf32>
    %975 = arith.addf %957, %974 : vector<16x32xf32>
    %976 = vector.extract_strided_slice %938 {offsets = [0, 16], sizes = [16, 8], strides = [1, 1]} : vector<16x96xf32> to vector<16x8xf32>
    %977 = vector.extract_strided_slice %938 {offsets = [0, 48], sizes = [16, 8], strides = [1, 1]} : vector<16x96xf32> to vector<16x8xf32>
    %978 = vector.extract_strided_slice %938 {offsets = [0, 80], sizes = [16, 8], strides = [1, 1]} : vector<16x96xf32> to vector<16x8xf32>
    %cst_379 = arith.constant dense<0.000000e+00> : vector<16x16xf32>
    %979 = tpu.matmul %976, %977, %cst_379 {dimension_numbers = #tpu.dot_dimension_numbers<[1], [1], [0], [0], [0, 0, 1, 0], [], []>} : vector<16x8xf32>, vector<16x8xf32>, vector<16x16xf32> -> vector<16x16xf32>
    %cst_380 = arith.constant dense<0xFF800000> : vector<16xf32>
    %980 = vector.multi_reduction <maximumf>, %979, %cst_380 [1] : vector<16x16xf32> to vector<16xf32>
    %981 = vector.shape_cast %980 : vector<16xf32> to vector<16x1xf32>
    %982 = vector.broadcast %981 : vector<16x1xf32> to vector<16x16xf32>
    %983 = arith.subf %979, %982 : vector<16x16xf32>
    %984 = math.exp %983 : vector<16x16xf32>
    %cst_381 = arith.constant dense<0.000000e+00> : vector<16xf32>
    %985 = vector.multi_reduction <add>, %984, %cst_381 [1] : vector<16x16xf32> to vector<16xf32>
    %986 = vector.shape_cast %985 : vector<16xf32> to vector<16x1xf32>
    %987 = vector.broadcast %986 : vector<16x1xf32> to vector<16x16xf32>
    %988 = arith.divf %984, %987 : vector<16x16xf32>
    %cst_382 = arith.constant dense<0.000000e+00> : vector<16x8xf32>
    %989 = tpu.matmul %988, %978, %cst_382 {dimension_numbers = #tpu.dot_dimension_numbers<[1], [0], [0], [1], [0, 0, 1, 1], [], []>} : vector<16x16xf32>, vector<16x8xf32>, vector<16x8xf32> -> vector<16x8xf32>
    %990 = vector.extract_strided_slice %933 {offsets = [16, 0], sizes = [8, 32], strides = [1, 1]} : vector<32x32xbf16> to vector<8x32xbf16>
    %991 = arith.truncf %989 : vector<16x8xf32> to vector<16x8xbf16>
    %cst_383 = arith.constant dense<0.000000e+00> : vector<16x32xf32>
    %992 = tpu.matmul %991, %990, %cst_383 {dimension_numbers = #tpu.dot_dimension_numbers<[1], [0], [0], [1], [0, 0, 1, 1], [], []>} : vector<16x8xbf16>, vector<8x32xbf16>, vector<16x32xf32> -> vector<16x32xf32>
    %993 = arith.addf %975, %992 : vector<16x32xf32>
    %994 = vector.extract_strided_slice %938 {offsets = [0, 24], sizes = [16, 8], strides = [1, 1]} : vector<16x96xf32> to vector<16x8xf32>
    %995 = vector.extract_strided_slice %938 {offsets = [0, 56], sizes = [16, 8], strides = [1, 1]} : vector<16x96xf32> to vector<16x8xf32>
    %996 = vector.extract_strided_slice %938 {offsets = [0, 88], sizes = [16, 8], strides = [1, 1]} : vector<16x96xf32> to vector<16x8xf32>
    %cst_384 = arith.constant dense<0.000000e+00> : vector<16x16xf32>
    %997 = tpu.matmul %994, %995, %cst_384 {dimension_numbers = #tpu.dot_dimension_numbers<[1], [1], [0], [0], [0, 0, 1, 0], [], []>} : vector<16x8xf32>, vector<16x8xf32>, vector<16x16xf32> -> vector<16x16xf32>
    %cst_385 = arith.constant dense<0xFF800000> : vector<16xf32>
    %998 = vector.multi_reduction <maximumf>, %997, %cst_385 [1] : vector<16x16xf32> to vector<16xf32>
    %999 = vector.shape_cast %998 : vector<16xf32> to vector<16x1xf32>
    %1000 = vector.broadcast %999 : vector<16x1xf32> to vector<16x16xf32>
    %1001 = arith.subf %997, %1000 : vector<16x16xf32>
    %1002 = math.exp %1001 : vector<16x16xf32>
    %cst_386 = arith.constant dense<0.000000e+00> : vector<16xf32>
    %1003 = vector.multi_reduction <add>, %1002, %cst_386 [1] : vector<16x16xf32> to vector<16xf32>
    %1004 = vector.shape_cast %1003 : vector<16xf32> to vector<16x1xf32>
    %1005 = vector.broadcast %1004 : vector<16x1xf32> to vector<16x16xf32>
    %1006 = arith.divf %1002, %1005 : vector<16x16xf32>
    %cst_387 = arith.constant dense<0.000000e+00> : vector<16x8xf32>
    %1007 = tpu.matmul %1006, %996, %cst_387 {dimension_numbers = #tpu.dot_dimension_numbers<[1], [0], [0], [1], [0, 0, 1, 1], [], []>} : vector<16x16xf32>, vector<16x8xf32>, vector<16x8xf32> -> vector<16x8xf32>
    %1008 = vector.extract_strided_slice %933 {offsets = [24, 0], sizes = [8, 32], strides = [1, 1]} : vector<32x32xbf16> to vector<8x32xbf16>
    %1009 = arith.truncf %1007 : vector<16x8xf32> to vector<16x8xbf16>
    %cst_388 = arith.constant dense<0.000000e+00> : vector<16x32xf32>
    %1010 = tpu.matmul %1009, %1008, %cst_388 {dimension_numbers = #tpu.dot_dimension_numbers<[1], [0], [0], [1], [0, 0, 1, 1], [], []>} : vector<16x8xbf16>, vector<8x32xbf16>, vector<16x32xf32> -> vector<16x32xf32>
    %1011 = arith.addf %993, %1010 : vector<16x32xf32>
    %1012 = arith.addf %906, %1011 : vector<16x32xf32>
    %c12_389 = arith.constant 12 : index
    %c0_390 = arith.constant 0 : index
    %1013 = vector.load %arg7[%c12_389, %c0_390] : memref<72x128xf32, #tpu.memory_space<vmem>>, vector<1x32xf32>
    %c13_391 = arith.constant 13 : index
    %c0_392 = arith.constant 0 : index
    %1014 = vector.load %arg7[%c13_391, %c0_392] : memref<72x128xf32, #tpu.memory_space<vmem>>, vector<1x32xf32>
    %cst_393 = arith.constant dense<0.000000e+00> : vector<16xf32>
    %1015 = vector.multi_reduction <add>, %1012, %cst_393 [1] : vector<16x32xf32> to vector<16xf32>
    %1016 = vector.shape_cast %1015 : vector<16xf32> to vector<16x1xf32>
    %cst_394 = arith.constant 3.200000e+01 : f32
    %1017 = vector.broadcast %cst_394 : f32 to vector<16x1xf32>
    %1018 = arith.divf %1016, %1017 : vector<16x1xf32>
    %1019 = vector.broadcast %1018 : vector<16x1xf32> to vector<16x32xf32>
    %1020 = arith.subf %1012, %1019 : vector<16x32xf32>
    %1021 = arith.mulf %1020, %1020 : vector<16x32xf32>
    %cst_395 = arith.constant dense<0.000000e+00> : vector<16xf32>
    %1022 = vector.multi_reduction <add>, %1021, %cst_395 [1] : vector<16x32xf32> to vector<16xf32>
    %1023 = vector.shape_cast %1022 : vector<16xf32> to vector<16x1xf32>
    %cst_396 = arith.constant 3.200000e+01 : f32
    %1024 = vector.broadcast %cst_396 : f32 to vector<16x1xf32>
    %1025 = arith.divf %1023, %1024 : vector<16x1xf32>
    %cst_397 = arith.constant 9.99999997E-7 : f32
    %1026 = vector.broadcast %cst_397 : f32 to vector<16x1xf32>
    %1027 = arith.addf %1025, %1026 : vector<16x1xf32>
    %1028 = math.rsqrt %1027 : vector<16x1xf32>
    %1029 = vector.broadcast %1028 : vector<16x1xf32> to vector<16x32xf32>
    %1030 = arith.mulf %1020, %1029 : vector<16x32xf32>
    %1031 = vector.broadcast %1013 : vector<1x32xf32> to vector<16x32xf32>
    %1032 = arith.mulf %1030, %1031 : vector<16x32xf32>
    %1033 = vector.broadcast %1014 : vector<1x32xf32> to vector<16x32xf32>
    %1034 = arith.addf %1032, %1033 : vector<16x32xf32>
    %c1_398 = arith.constant 1 : index
    %c0_399 = arith.constant 0 : index
    %c0_400 = arith.constant 0 : index
    %1035 = vector.load %arg5[%c1_398, %c0_399, %c0_400] : memref<4x32x64xbf16, #tpu.memory_space<vmem>>, vector<1x32x64xbf16>
    %1036 = vector.shape_cast %1035 : vector<1x32x64xbf16> to vector<32x64xbf16>
    %c14_401 = arith.constant 14 : index
    %c0_402 = arith.constant 0 : index
    %1037 = vector.load %arg7[%c14_401, %c0_402] : memref<72x128xf32, #tpu.memory_space<vmem>>, vector<1x64xf32>
    %1038 = arith.truncf %1034 : vector<16x32xf32> to vector<16x32xbf16>
    %cst_403 = arith.constant dense<0.000000e+00> : vector<16x64xf32>
    %1039 = tpu.matmul %1038, %1036, %cst_403 {dimension_numbers = #tpu.dot_dimension_numbers<[1], [0], [0], [1], [0, 0, 1, 1], [], []>} : vector<16x32xbf16>, vector<32x64xbf16>, vector<16x64xf32> -> vector<16x64xf32>
    %1040 = vector.broadcast %1037 : vector<1x64xf32> to vector<16x64xf32>
    %1041 = arith.addf %1039, %1040 : vector<16x64xf32>
    %1042 = arith.mulf %1041, %1041 : vector<16x64xf32>
    %1043 = arith.mulf %1041, %1042 : vector<16x64xf32>
    %cst_404 = arith.constant 4.471500e-02 : f32
    %1044 = vector.broadcast %cst_404 : f32 to vector<16x64xf32>
    %1045 = arith.mulf %1044, %1043 : vector<16x64xf32>
    %1046 = arith.addf %1041, %1045 : vector<16x64xf32>
    %cst_405 = arith.constant 0.797884583 : f32
    %1047 = vector.broadcast %cst_405 : f32 to vector<16x64xf32>
    %1048 = arith.mulf %1047, %1046 : vector<16x64xf32>
    %1049 = math.tanh %1048 : vector<16x64xf32>
    %cst_406 = arith.constant 1.000000e+00 : f32
    %1050 = vector.broadcast %cst_406 : f32 to vector<16x64xf32>
    %1051 = arith.addf %1050, %1049 : vector<16x64xf32>
    %cst_407 = arith.constant 5.000000e-01 : f32
    %1052 = vector.broadcast %cst_407 : f32 to vector<16x64xf32>
    %1053 = arith.mulf %1052, %1051 : vector<16x64xf32>
    %1054 = arith.mulf %1041, %1053 : vector<16x64xf32>
    %c1_408 = arith.constant 1 : index
    %c0_409 = arith.constant 0 : index
    %c0_410 = arith.constant 0 : index
    %1055 = vector.load %arg6[%c1_408, %c0_409, %c0_410] : memref<5x64x32xbf16, #tpu.memory_space<vmem>>, vector<1x64x32xbf16>
    %1056 = vector.shape_cast %1055 : vector<1x64x32xbf16> to vector<64x32xbf16>
    %c15_411 = arith.constant 15 : index
    %c0_412 = arith.constant 0 : index
    %1057 = vector.load %arg7[%c15_411, %c0_412] : memref<72x128xf32, #tpu.memory_space<vmem>>, vector<1x32xf32>
    %1058 = arith.truncf %1054 : vector<16x64xf32> to vector<16x64xbf16>
    %cst_413 = arith.constant dense<0.000000e+00> : vector<16x32xf32>
    %1059 = tpu.matmul %1058, %1056, %cst_413 {dimension_numbers = #tpu.dot_dimension_numbers<[1], [0], [0], [1], [0, 0, 1, 1], [], []>} : vector<16x64xbf16>, vector<64x32xbf16>, vector<16x32xf32> -> vector<16x32xf32>
    %1060 = vector.broadcast %1057 : vector<1x32xf32> to vector<16x32xf32>
    %1061 = arith.addf %1059, %1060 : vector<16x32xf32>
    %1062 = arith.addf %1012, %1061 : vector<16x32xf32>
    %c4_414 = arith.constant 4 : index
    %c0_415 = arith.constant 0 : index
    %c0_416 = arith.constant 0 : index
    %1063 = vector.load %arg4[%c4_414, %c0_415, %c0_416] : memref<7x32x32xbf16, #tpu.memory_space<vmem>>, vector<1x32x32xbf16>
    %1064 = vector.shape_cast %1063 : vector<1x32x32xbf16> to vector<32x32xbf16>
    %1065 = arith.truncf %1062 : vector<16x32xf32> to vector<16x32xbf16>
    %cst_417 = arith.constant dense<0.000000e+00> : vector<16x32xf32>
    %1066 = tpu.matmul %1065, %1064, %cst_417 {dimension_numbers = #tpu.dot_dimension_numbers<[1], [0], [0], [1], [0, 0, 1, 1], [], []>} : vector<16x32xbf16>, vector<32x32xbf16>, vector<16x32xf32> -> vector<16x32xf32>
    %1067 = vector.broadcast %3 : vector<1x32xf32> to vector<16x32xf32>
    %1068 = arith.addf %1066, %1067 : vector<16x32xf32>
    %1069 = tpu.concatenate %1068, %1 in 0 : vector<16x32xf32>, vector<8x32xf32> -> vector<24x32xf32>
    %c16_418 = arith.constant 16 : index
    %c0_419 = arith.constant 0 : index
    %1070 = vector.load %arg7[%c16_418, %c0_419] : memref<72x128xf32, #tpu.memory_space<vmem>>, vector<1x32xf32>
    %c17_420 = arith.constant 17 : index
    %c0_421 = arith.constant 0 : index
    %1071 = vector.load %arg7[%c17_420, %c0_421] : memref<72x128xf32, #tpu.memory_space<vmem>>, vector<1x32xf32>
    %cst_422 = arith.constant dense<0.000000e+00> : vector<24xf32>
    %1072 = vector.multi_reduction <add>, %1069, %cst_422 [1] : vector<24x32xf32> to vector<24xf32>
    %1073 = vector.shape_cast %1072 : vector<24xf32> to vector<24x1xf32>
    %cst_423 = arith.constant 3.200000e+01 : f32
    %1074 = vector.broadcast %cst_423 : f32 to vector<24x1xf32>
    %1075 = arith.divf %1073, %1074 : vector<24x1xf32>
    %1076 = vector.broadcast %1075 : vector<24x1xf32> to vector<24x32xf32>
    %1077 = arith.subf %1069, %1076 : vector<24x32xf32>
    %1078 = arith.mulf %1077, %1077 : vector<24x32xf32>
    %cst_424 = arith.constant dense<0.000000e+00> : vector<24xf32>
    %1079 = vector.multi_reduction <add>, %1078, %cst_424 [1] : vector<24x32xf32> to vector<24xf32>
    %1080 = vector.shape_cast %1079 : vector<24xf32> to vector<24x1xf32>
    %cst_425 = arith.constant 3.200000e+01 : f32
    %1081 = vector.broadcast %cst_425 : f32 to vector<24x1xf32>
    %1082 = arith.divf %1080, %1081 : vector<24x1xf32>
    %cst_426 = arith.constant 9.99999997E-7 : f32
    %1083 = vector.broadcast %cst_426 : f32 to vector<24x1xf32>
    %1084 = arith.addf %1082, %1083 : vector<24x1xf32>
    %1085 = math.rsqrt %1084 : vector<24x1xf32>
    %1086 = vector.broadcast %1085 : vector<24x1xf32> to vector<24x32xf32>
    %1087 = arith.mulf %1077, %1086 : vector<24x32xf32>
    %1088 = vector.broadcast %1070 : vector<1x32xf32> to vector<24x32xf32>
    %1089 = arith.mulf %1087, %1088 : vector<24x32xf32>
    %1090 = vector.broadcast %1071 : vector<1x32xf32> to vector<24x32xf32>
    %1091 = arith.addf %1089, %1090 : vector<24x32xf32>
    %c2_427 = arith.constant 2 : index
    %c0_428 = arith.constant 0 : index
    %c0_429 = arith.constant 0 : index
    %1092 = vector.load %arg3[%c2_427, %c0_428, %c0_429] : memref<4x32x96xbf16, #tpu.memory_space<vmem>>, vector<1x32x96xbf16>
    %1093 = vector.shape_cast %1092 : vector<1x32x96xbf16> to vector<32x96xbf16>
    %c18_430 = arith.constant 18 : index
    %c0_431 = arith.constant 0 : index
    %1094 = vector.load %arg7[%c18_430, %c0_431] : memref<72x128xf32, #tpu.memory_space<vmem>>, vector<1x96xf32>
    %c2_432 = arith.constant 2 : index
    %c0_433 = arith.constant 0 : index
    %c0_434 = arith.constant 0 : index
    %1095 = vector.load %arg4[%c2_432, %c0_433, %c0_434] : memref<7x32x32xbf16, #tpu.memory_space<vmem>>, vector<1x32x32xbf16>
    %1096 = vector.shape_cast %1095 : vector<1x32x32xbf16> to vector<32x32xbf16>
    %c19_435 = arith.constant 19 : index
    %c0_436 = arith.constant 0 : index
    %1097 = vector.load %arg7[%c19_435, %c0_436] : memref<72x128xf32, #tpu.memory_space<vmem>>, vector<1x32xf32>
    %1098 = arith.truncf %1091 : vector<24x32xf32> to vector<24x32xbf16>
    %cst_437 = arith.constant dense<0.000000e+00> : vector<24x96xf32>
    %1099 = tpu.matmul %1098, %1093, %cst_437 {dimension_numbers = #tpu.dot_dimension_numbers<[1], [0], [0], [1], [0, 0, 1, 1], [], []>} : vector<24x32xbf16>, vector<32x96xbf16>, vector<24x96xf32> -> vector<24x96xf32>
    %1100 = vector.broadcast %1094 : vector<1x96xf32> to vector<24x96xf32>
    %1101 = arith.addf %1099, %1100 : vector<24x96xf32>
    %1102 = vector.extract_strided_slice %1101 {offsets = [0, 0], sizes = [24, 8], strides = [1, 1]} : vector<24x96xf32> to vector<24x8xf32>
    %1103 = vector.extract_strided_slice %1101 {offsets = [0, 32], sizes = [24, 8], strides = [1, 1]} : vector<24x96xf32> to vector<24x8xf32>
    %1104 = vector.extract_strided_slice %1101 {offsets = [0, 64], sizes = [24, 8], strides = [1, 1]} : vector<24x96xf32> to vector<24x8xf32>
    %cst_438 = arith.constant dense<0.000000e+00> : vector<24x24xf32>
    %1105 = tpu.matmul %1102, %1103, %cst_438 {dimension_numbers = #tpu.dot_dimension_numbers<[1], [1], [0], [0], [0, 0, 1, 0], [], []>} : vector<24x8xf32>, vector<24x8xf32>, vector<24x24xf32> -> vector<24x24xf32>
    %1106 = vector.broadcast %8 : vector<1x24xf32> to vector<24x24xf32>
    %1107 = arith.addf %1105, %1106 : vector<24x24xf32>
    %cst_439 = arith.constant dense<0xFF800000> : vector<24xf32>
    %1108 = vector.multi_reduction <maximumf>, %1107, %cst_439 [1] : vector<24x24xf32> to vector<24xf32>
    %1109 = vector.shape_cast %1108 : vector<24xf32> to vector<24x1xf32>
    %1110 = vector.broadcast %1109 : vector<24x1xf32> to vector<24x24xf32>
    %1111 = arith.subf %1107, %1110 : vector<24x24xf32>
    %1112 = math.exp %1111 : vector<24x24xf32>
    %cst_440 = arith.constant dense<0.000000e+00> : vector<24xf32>
    %1113 = vector.multi_reduction <add>, %1112, %cst_440 [1] : vector<24x24xf32> to vector<24xf32>
    %1114 = vector.shape_cast %1113 : vector<24xf32> to vector<24x1xf32>
    %1115 = vector.broadcast %1114 : vector<24x1xf32> to vector<24x24xf32>
    %1116 = arith.divf %1112, %1115 : vector<24x24xf32>
    %cst_441 = arith.constant dense<0.000000e+00> : vector<24x8xf32>
    %1117 = tpu.matmul %1116, %1104, %cst_441 {dimension_numbers = #tpu.dot_dimension_numbers<[1], [0], [0], [1], [0, 0, 1, 1], [], []>} : vector<24x24xf32>, vector<24x8xf32>, vector<24x8xf32> -> vector<24x8xf32>
    %1118 = vector.extract_strided_slice %1096 {offsets = [0, 0], sizes = [8, 32], strides = [1, 1]} : vector<32x32xbf16> to vector<8x32xbf16>
    %1119 = arith.truncf %1117 : vector<24x8xf32> to vector<24x8xbf16>
    %cst_442 = arith.constant dense<0.000000e+00> : vector<24x32xf32>
    %1120 = tpu.matmul %1119, %1118, %cst_442 {dimension_numbers = #tpu.dot_dimension_numbers<[1], [0], [0], [1], [0, 0, 1, 1], [], []>} : vector<24x8xbf16>, vector<8x32xbf16>, vector<24x32xf32> -> vector<24x32xf32>
    %1121 = vector.broadcast %1097 : vector<1x32xf32> to vector<24x32xf32>
    %1122 = arith.addf %1121, %1120 : vector<24x32xf32>
    %1123 = vector.extract_strided_slice %1101 {offsets = [0, 8], sizes = [24, 8], strides = [1, 1]} : vector<24x96xf32> to vector<24x8xf32>
    %1124 = vector.extract_strided_slice %1101 {offsets = [0, 40], sizes = [24, 8], strides = [1, 1]} : vector<24x96xf32> to vector<24x8xf32>
    %1125 = vector.extract_strided_slice %1101 {offsets = [0, 72], sizes = [24, 8], strides = [1, 1]} : vector<24x96xf32> to vector<24x8xf32>
    %cst_443 = arith.constant dense<0.000000e+00> : vector<24x24xf32>
    %1126 = tpu.matmul %1123, %1124, %cst_443 {dimension_numbers = #tpu.dot_dimension_numbers<[1], [1], [0], [0], [0, 0, 1, 0], [], []>} : vector<24x8xf32>, vector<24x8xf32>, vector<24x24xf32> -> vector<24x24xf32>
    %1127 = vector.broadcast %8 : vector<1x24xf32> to vector<24x24xf32>
    %1128 = arith.addf %1126, %1127 : vector<24x24xf32>
    %cst_444 = arith.constant dense<0xFF800000> : vector<24xf32>
    %1129 = vector.multi_reduction <maximumf>, %1128, %cst_444 [1] : vector<24x24xf32> to vector<24xf32>
    %1130 = vector.shape_cast %1129 : vector<24xf32> to vector<24x1xf32>
    %1131 = vector.broadcast %1130 : vector<24x1xf32> to vector<24x24xf32>
    %1132 = arith.subf %1128, %1131 : vector<24x24xf32>
    %1133 = math.exp %1132 : vector<24x24xf32>
    %cst_445 = arith.constant dense<0.000000e+00> : vector<24xf32>
    %1134 = vector.multi_reduction <add>, %1133, %cst_445 [1] : vector<24x24xf32> to vector<24xf32>
    %1135 = vector.shape_cast %1134 : vector<24xf32> to vector<24x1xf32>
    %1136 = vector.broadcast %1135 : vector<24x1xf32> to vector<24x24xf32>
    %1137 = arith.divf %1133, %1136 : vector<24x24xf32>
    %cst_446 = arith.constant dense<0.000000e+00> : vector<24x8xf32>
    %1138 = tpu.matmul %1137, %1125, %cst_446 {dimension_numbers = #tpu.dot_dimension_numbers<[1], [0], [0], [1], [0, 0, 1, 1], [], []>} : vector<24x24xf32>, vector<24x8xf32>, vector<24x8xf32> -> vector<24x8xf32>
    %1139 = vector.extract_strided_slice %1096 {offsets = [8, 0], sizes = [8, 32], strides = [1, 1]} : vector<32x32xbf16> to vector<8x32xbf16>
    %1140 = arith.truncf %1138 : vector<24x8xf32> to vector<24x8xbf16>
    %cst_447 = arith.constant dense<0.000000e+00> : vector<24x32xf32>
    %1141 = tpu.matmul %1140, %1139, %cst_447 {dimension_numbers = #tpu.dot_dimension_numbers<[1], [0], [0], [1], [0, 0, 1, 1], [], []>} : vector<24x8xbf16>, vector<8x32xbf16>, vector<24x32xf32> -> vector<24x32xf32>
    %1142 = arith.addf %1122, %1141 : vector<24x32xf32>
    %1143 = vector.extract_strided_slice %1101 {offsets = [0, 16], sizes = [24, 8], strides = [1, 1]} : vector<24x96xf32> to vector<24x8xf32>
    %1144 = vector.extract_strided_slice %1101 {offsets = [0, 48], sizes = [24, 8], strides = [1, 1]} : vector<24x96xf32> to vector<24x8xf32>
    %1145 = vector.extract_strided_slice %1101 {offsets = [0, 80], sizes = [24, 8], strides = [1, 1]} : vector<24x96xf32> to vector<24x8xf32>
    %cst_448 = arith.constant dense<0.000000e+00> : vector<24x24xf32>
    %1146 = tpu.matmul %1143, %1144, %cst_448 {dimension_numbers = #tpu.dot_dimension_numbers<[1], [1], [0], [0], [0, 0, 1, 0], [], []>} : vector<24x8xf32>, vector<24x8xf32>, vector<24x24xf32> -> vector<24x24xf32>
    %1147 = vector.broadcast %8 : vector<1x24xf32> to vector<24x24xf32>
    %1148 = arith.addf %1146, %1147 : vector<24x24xf32>
    %cst_449 = arith.constant dense<0xFF800000> : vector<24xf32>
    %1149 = vector.multi_reduction <maximumf>, %1148, %cst_449 [1] : vector<24x24xf32> to vector<24xf32>
    %1150 = vector.shape_cast %1149 : vector<24xf32> to vector<24x1xf32>
    %1151 = vector.broadcast %1150 : vector<24x1xf32> to vector<24x24xf32>
    %1152 = arith.subf %1148, %1151 : vector<24x24xf32>
    %1153 = math.exp %1152 : vector<24x24xf32>
    %cst_450 = arith.constant dense<0.000000e+00> : vector<24xf32>
    %1154 = vector.multi_reduction <add>, %1153, %cst_450 [1] : vector<24x24xf32> to vector<24xf32>
    %1155 = vector.shape_cast %1154 : vector<24xf32> to vector<24x1xf32>
    %1156 = vector.broadcast %1155 : vector<24x1xf32> to vector<24x24xf32>
    %1157 = arith.divf %1153, %1156 : vector<24x24xf32>
    %cst_451 = arith.constant dense<0.000000e+00> : vector<24x8xf32>
    %1158 = tpu.matmul %1157, %1145, %cst_451 {dimension_numbers = #tpu.dot_dimension_numbers<[1], [0], [0], [1], [0, 0, 1, 1], [], []>} : vector<24x24xf32>, vector<24x8xf32>, vector<24x8xf32> -> vector<24x8xf32>
    %1159 = vector.extract_strided_slice %1096 {offsets = [16, 0], sizes = [8, 32], strides = [1, 1]} : vector<32x32xbf16> to vector<8x32xbf16>
    %1160 = arith.truncf %1158 : vector<24x8xf32> to vector<24x8xbf16>
    %cst_452 = arith.constant dense<0.000000e+00> : vector<24x32xf32>
    %1161 = tpu.matmul %1160, %1159, %cst_452 {dimension_numbers = #tpu.dot_dimension_numbers<[1], [0], [0], [1], [0, 0, 1, 1], [], []>} : vector<24x8xbf16>, vector<8x32xbf16>, vector<24x32xf32> -> vector<24x32xf32>
    %1162 = arith.addf %1142, %1161 : vector<24x32xf32>
    %1163 = vector.extract_strided_slice %1101 {offsets = [0, 24], sizes = [24, 8], strides = [1, 1]} : vector<24x96xf32> to vector<24x8xf32>
    %1164 = vector.extract_strided_slice %1101 {offsets = [0, 56], sizes = [24, 8], strides = [1, 1]} : vector<24x96xf32> to vector<24x8xf32>
    %1165 = vector.extract_strided_slice %1101 {offsets = [0, 88], sizes = [24, 8], strides = [1, 1]} : vector<24x96xf32> to vector<24x8xf32>
    %cst_453 = arith.constant dense<0.000000e+00> : vector<24x24xf32>
    %1166 = tpu.matmul %1163, %1164, %cst_453 {dimension_numbers = #tpu.dot_dimension_numbers<[1], [1], [0], [0], [0, 0, 1, 0], [], []>} : vector<24x8xf32>, vector<24x8xf32>, vector<24x24xf32> -> vector<24x24xf32>
    %1167 = vector.broadcast %8 : vector<1x24xf32> to vector<24x24xf32>
    %1168 = arith.addf %1166, %1167 : vector<24x24xf32>
    %cst_454 = arith.constant dense<0xFF800000> : vector<24xf32>
    %1169 = vector.multi_reduction <maximumf>, %1168, %cst_454 [1] : vector<24x24xf32> to vector<24xf32>
    %1170 = vector.shape_cast %1169 : vector<24xf32> to vector<24x1xf32>
    %1171 = vector.broadcast %1170 : vector<24x1xf32> to vector<24x24xf32>
    %1172 = arith.subf %1168, %1171 : vector<24x24xf32>
    %1173 = math.exp %1172 : vector<24x24xf32>
    %cst_455 = arith.constant dense<0.000000e+00> : vector<24xf32>
    %1174 = vector.multi_reduction <add>, %1173, %cst_455 [1] : vector<24x24xf32> to vector<24xf32>
    %1175 = vector.shape_cast %1174 : vector<24xf32> to vector<24x1xf32>
    %1176 = vector.broadcast %1175 : vector<24x1xf32> to vector<24x24xf32>
    %1177 = arith.divf %1173, %1176 : vector<24x24xf32>
    %cst_456 = arith.constant dense<0.000000e+00> : vector<24x8xf32>
    %1178 = tpu.matmul %1177, %1165, %cst_456 {dimension_numbers = #tpu.dot_dimension_numbers<[1], [0], [0], [1], [0, 0, 1, 1], [], []>} : vector<24x24xf32>, vector<24x8xf32>, vector<24x8xf32> -> vector<24x8xf32>
    %1179 = vector.extract_strided_slice %1096 {offsets = [24, 0], sizes = [8, 32], strides = [1, 1]} : vector<32x32xbf16> to vector<8x32xbf16>
    %1180 = arith.truncf %1178 : vector<24x8xf32> to vector<24x8xbf16>
    %cst_457 = arith.constant dense<0.000000e+00> : vector<24x32xf32>
    %1181 = tpu.matmul %1180, %1179, %cst_457 {dimension_numbers = #tpu.dot_dimension_numbers<[1], [0], [0], [1], [0, 0, 1, 1], [], []>} : vector<24x8xbf16>, vector<8x32xbf16>, vector<24x32xf32> -> vector<24x32xf32>
    %1182 = arith.addf %1162, %1181 : vector<24x32xf32>
    %1183 = arith.addf %1069, %1182 : vector<24x32xf32>
    %c20_458 = arith.constant 20 : index
    %c0_459 = arith.constant 0 : index
    %1184 = vector.load %arg7[%c20_458, %c0_459] : memref<72x128xf32, #tpu.memory_space<vmem>>, vector<1x32xf32>
    %c21_460 = arith.constant 21 : index
    %c0_461 = arith.constant 0 : index
    %1185 = vector.load %arg7[%c21_460, %c0_461] : memref<72x128xf32, #tpu.memory_space<vmem>>, vector<1x32xf32>
    %cst_462 = arith.constant dense<0.000000e+00> : vector<24xf32>
    %1186 = vector.multi_reduction <add>, %1183, %cst_462 [1] : vector<24x32xf32> to vector<24xf32>
    %1187 = vector.shape_cast %1186 : vector<24xf32> to vector<24x1xf32>
    %cst_463 = arith.constant 3.200000e+01 : f32
    %1188 = vector.broadcast %cst_463 : f32 to vector<24x1xf32>
    %1189 = arith.divf %1187, %1188 : vector<24x1xf32>
    %1190 = vector.broadcast %1189 : vector<24x1xf32> to vector<24x32xf32>
    %1191 = arith.subf %1183, %1190 : vector<24x32xf32>
    %1192 = arith.mulf %1191, %1191 : vector<24x32xf32>
    %cst_464 = arith.constant dense<0.000000e+00> : vector<24xf32>
    %1193 = vector.multi_reduction <add>, %1192, %cst_464 [1] : vector<24x32xf32> to vector<24xf32>
    %1194 = vector.shape_cast %1193 : vector<24xf32> to vector<24x1xf32>
    %cst_465 = arith.constant 3.200000e+01 : f32
    %1195 = vector.broadcast %cst_465 : f32 to vector<24x1xf32>
    %1196 = arith.divf %1194, %1195 : vector<24x1xf32>
    %cst_466 = arith.constant 9.99999997E-7 : f32
    %1197 = vector.broadcast %cst_466 : f32 to vector<24x1xf32>
    %1198 = arith.addf %1196, %1197 : vector<24x1xf32>
    %1199 = math.rsqrt %1198 : vector<24x1xf32>
    %1200 = vector.broadcast %1199 : vector<24x1xf32> to vector<24x32xf32>
    %1201 = arith.mulf %1191, %1200 : vector<24x32xf32>
    %1202 = vector.broadcast %1184 : vector<1x32xf32> to vector<24x32xf32>
    %1203 = arith.mulf %1201, %1202 : vector<24x32xf32>
    %1204 = vector.broadcast %1185 : vector<1x32xf32> to vector<24x32xf32>
    %1205 = arith.addf %1203, %1204 : vector<24x32xf32>
    %c2_467 = arith.constant 2 : index
    %c0_468 = arith.constant 0 : index
    %c0_469 = arith.constant 0 : index
    %1206 = vector.load %arg5[%c2_467, %c0_468, %c0_469] : memref<4x32x64xbf16, #tpu.memory_space<vmem>>, vector<1x32x64xbf16>
    %1207 = vector.shape_cast %1206 : vector<1x32x64xbf16> to vector<32x64xbf16>
    %c22_470 = arith.constant 22 : index
    %c0_471 = arith.constant 0 : index
    %1208 = vector.load %arg7[%c22_470, %c0_471] : memref<72x128xf32, #tpu.memory_space<vmem>>, vector<1x64xf32>
    %1209 = arith.truncf %1205 : vector<24x32xf32> to vector<24x32xbf16>
    %cst_472 = arith.constant dense<0.000000e+00> : vector<24x64xf32>
    %1210 = tpu.matmul %1209, %1207, %cst_472 {dimension_numbers = #tpu.dot_dimension_numbers<[1], [0], [0], [1], [0, 0, 1, 1], [], []>} : vector<24x32xbf16>, vector<32x64xbf16>, vector<24x64xf32> -> vector<24x64xf32>
    %1211 = vector.broadcast %1208 : vector<1x64xf32> to vector<24x64xf32>
    %1212 = arith.addf %1210, %1211 : vector<24x64xf32>
    %1213 = arith.mulf %1212, %1212 : vector<24x64xf32>
    %1214 = arith.mulf %1212, %1213 : vector<24x64xf32>
    %cst_473 = arith.constant 4.471500e-02 : f32
    %1215 = vector.broadcast %cst_473 : f32 to vector<24x64xf32>
    %1216 = arith.mulf %1215, %1214 : vector<24x64xf32>
    %1217 = arith.addf %1212, %1216 : vector<24x64xf32>
    %cst_474 = arith.constant 0.797884583 : f32
    %1218 = vector.broadcast %cst_474 : f32 to vector<24x64xf32>
    %1219 = arith.mulf %1218, %1217 : vector<24x64xf32>
    %1220 = math.tanh %1219 : vector<24x64xf32>
    %cst_475 = arith.constant 1.000000e+00 : f32
    %1221 = vector.broadcast %cst_475 : f32 to vector<24x64xf32>
    %1222 = arith.addf %1221, %1220 : vector<24x64xf32>
    %cst_476 = arith.constant 5.000000e-01 : f32
    %1223 = vector.broadcast %cst_476 : f32 to vector<24x64xf32>
    %1224 = arith.mulf %1223, %1222 : vector<24x64xf32>
    %1225 = arith.mulf %1212, %1224 : vector<24x64xf32>
    %c2_477 = arith.constant 2 : index
    %c0_478 = arith.constant 0 : index
    %c0_479 = arith.constant 0 : index
    %1226 = vector.load %arg6[%c2_477, %c0_478, %c0_479] : memref<5x64x32xbf16, #tpu.memory_space<vmem>>, vector<1x64x32xbf16>
    %1227 = vector.shape_cast %1226 : vector<1x64x32xbf16> to vector<64x32xbf16>
    %c23_480 = arith.constant 23 : index
    %c0_481 = arith.constant 0 : index
    %1228 = vector.load %arg7[%c23_480, %c0_481] : memref<72x128xf32, #tpu.memory_space<vmem>>, vector<1x32xf32>
    %1229 = arith.truncf %1225 : vector<24x64xf32> to vector<24x64xbf16>
    %cst_482 = arith.constant dense<0.000000e+00> : vector<24x32xf32>
    %1230 = tpu.matmul %1229, %1227, %cst_482 {dimension_numbers = #tpu.dot_dimension_numbers<[1], [0], [0], [1], [0, 0, 1, 1], [], []>} : vector<24x64xbf16>, vector<64x32xbf16>, vector<24x32xf32> -> vector<24x32xf32>
    %1231 = vector.broadcast %1228 : vector<1x32xf32> to vector<24x32xf32>
    %1232 = arith.addf %1230, %1231 : vector<24x32xf32>
    %1233 = arith.addf %1183, %1232 : vector<24x32xf32>
    %c24_483 = arith.constant 24 : index
    %c0_484 = arith.constant 0 : index
    %1234 = vector.load %arg7[%c24_483, %c0_484] : memref<72x128xf32, #tpu.memory_space<vmem>>, vector<1x32xf32>
    %c25_485 = arith.constant 25 : index
    %c0_486 = arith.constant 0 : index
    %1235 = vector.load %arg7[%c25_485, %c0_486] : memref<72x128xf32, #tpu.memory_space<vmem>>, vector<1x32xf32>
    %cst_487 = arith.constant dense<0.000000e+00> : vector<24xf32>
    %1236 = vector.multi_reduction <add>, %1233, %cst_487 [1] : vector<24x32xf32> to vector<24xf32>
    %1237 = vector.shape_cast %1236 : vector<24xf32> to vector<24x1xf32>
    %cst_488 = arith.constant 3.200000e+01 : f32
    %1238 = vector.broadcast %cst_488 : f32 to vector<24x1xf32>
    %1239 = arith.divf %1237, %1238 : vector<24x1xf32>
    %1240 = vector.broadcast %1239 : vector<24x1xf32> to vector<24x32xf32>
    %1241 = arith.subf %1233, %1240 : vector<24x32xf32>
    %1242 = arith.mulf %1241, %1241 : vector<24x32xf32>
    %cst_489 = arith.constant dense<0.000000e+00> : vector<24xf32>
    %1243 = vector.multi_reduction <add>, %1242, %cst_489 [1] : vector<24x32xf32> to vector<24xf32>
    %1244 = vector.shape_cast %1243 : vector<24xf32> to vector<24x1xf32>
    %cst_490 = arith.constant 3.200000e+01 : f32
    %1245 = vector.broadcast %cst_490 : f32 to vector<24x1xf32>
    %1246 = arith.divf %1244, %1245 : vector<24x1xf32>
    %cst_491 = arith.constant 9.99999997E-7 : f32
    %1247 = vector.broadcast %cst_491 : f32 to vector<24x1xf32>
    %1248 = arith.addf %1246, %1247 : vector<24x1xf32>
    %1249 = math.rsqrt %1248 : vector<24x1xf32>
    %1250 = vector.broadcast %1249 : vector<24x1xf32> to vector<24x32xf32>
    %1251 = arith.mulf %1241, %1250 : vector<24x32xf32>
    %1252 = vector.broadcast %1234 : vector<1x32xf32> to vector<24x32xf32>
    %1253 = arith.mulf %1251, %1252 : vector<24x32xf32>
    %1254 = vector.broadcast %1235 : vector<1x32xf32> to vector<24x32xf32>
    %1255 = arith.addf %1253, %1254 : vector<24x32xf32>
    %c3_492 = arith.constant 3 : index
    %c0_493 = arith.constant 0 : index
    %c0_494 = arith.constant 0 : index
    %1256 = vector.load %arg3[%c3_492, %c0_493, %c0_494] : memref<4x32x96xbf16, #tpu.memory_space<vmem>>, vector<1x32x96xbf16>
    %1257 = vector.shape_cast %1256 : vector<1x32x96xbf16> to vector<32x96xbf16>
    %c26_495 = arith.constant 26 : index
    %c0_496 = arith.constant 0 : index
    %1258 = vector.load %arg7[%c26_495, %c0_496] : memref<72x128xf32, #tpu.memory_space<vmem>>, vector<1x96xf32>
    %c3_497 = arith.constant 3 : index
    %c0_498 = arith.constant 0 : index
    %c0_499 = arith.constant 0 : index
    %1259 = vector.load %arg4[%c3_497, %c0_498, %c0_499] : memref<7x32x32xbf16, #tpu.memory_space<vmem>>, vector<1x32x32xbf16>
    %1260 = vector.shape_cast %1259 : vector<1x32x32xbf16> to vector<32x32xbf16>
    %c27_500 = arith.constant 27 : index
    %c0_501 = arith.constant 0 : index
    %1261 = vector.load %arg7[%c27_500, %c0_501] : memref<72x128xf32, #tpu.memory_space<vmem>>, vector<1x32xf32>
    %1262 = arith.truncf %1255 : vector<24x32xf32> to vector<24x32xbf16>
    %cst_502 = arith.constant dense<0.000000e+00> : vector<24x96xf32>
    %1263 = tpu.matmul %1262, %1257, %cst_502 {dimension_numbers = #tpu.dot_dimension_numbers<[1], [0], [0], [1], [0, 0, 1, 1], [], []>} : vector<24x32xbf16>, vector<32x96xbf16>, vector<24x96xf32> -> vector<24x96xf32>
    %1264 = vector.broadcast %1258 : vector<1x96xf32> to vector<24x96xf32>
    %1265 = arith.addf %1263, %1264 : vector<24x96xf32>
    %1266 = vector.extract_strided_slice %1265 {offsets = [0, 0], sizes = [24, 8], strides = [1, 1]} : vector<24x96xf32> to vector<24x8xf32>
    %1267 = vector.extract_strided_slice %1265 {offsets = [0, 32], sizes = [24, 8], strides = [1, 1]} : vector<24x96xf32> to vector<24x8xf32>
    %1268 = vector.extract_strided_slice %1265 {offsets = [0, 64], sizes = [24, 8], strides = [1, 1]} : vector<24x96xf32> to vector<24x8xf32>
    %cst_503 = arith.constant dense<0.000000e+00> : vector<24x24xf32>
    %1269 = tpu.matmul %1266, %1267, %cst_503 {dimension_numbers = #tpu.dot_dimension_numbers<[1], [1], [0], [0], [0, 0, 1, 0], [], []>} : vector<24x8xf32>, vector<24x8xf32>, vector<24x24xf32> -> vector<24x24xf32>
    %1270 = vector.broadcast %8 : vector<1x24xf32> to vector<24x24xf32>
    %1271 = arith.addf %1269, %1270 : vector<24x24xf32>
    %cst_504 = arith.constant dense<0xFF800000> : vector<24xf32>
    %1272 = vector.multi_reduction <maximumf>, %1271, %cst_504 [1] : vector<24x24xf32> to vector<24xf32>
    %1273 = vector.shape_cast %1272 : vector<24xf32> to vector<24x1xf32>
    %1274 = vector.broadcast %1273 : vector<24x1xf32> to vector<24x24xf32>
    %1275 = arith.subf %1271, %1274 : vector<24x24xf32>
    %1276 = math.exp %1275 : vector<24x24xf32>
    %cst_505 = arith.constant dense<0.000000e+00> : vector<24xf32>
    %1277 = vector.multi_reduction <add>, %1276, %cst_505 [1] : vector<24x24xf32> to vector<24xf32>
    %1278 = vector.shape_cast %1277 : vector<24xf32> to vector<24x1xf32>
    %1279 = vector.broadcast %1278 : vector<24x1xf32> to vector<24x24xf32>
    %1280 = arith.divf %1276, %1279 : vector<24x24xf32>
    %cst_506 = arith.constant dense<0.000000e+00> : vector<24x8xf32>
    %1281 = tpu.matmul %1280, %1268, %cst_506 {dimension_numbers = #tpu.dot_dimension_numbers<[1], [0], [0], [1], [0, 0, 1, 1], [], []>} : vector<24x24xf32>, vector<24x8xf32>, vector<24x8xf32> -> vector<24x8xf32>
    %1282 = vector.extract_strided_slice %1260 {offsets = [0, 0], sizes = [8, 32], strides = [1, 1]} : vector<32x32xbf16> to vector<8x32xbf16>
    %1283 = arith.truncf %1281 : vector<24x8xf32> to vector<24x8xbf16>
    %cst_507 = arith.constant dense<0.000000e+00> : vector<24x32xf32>
    %1284 = tpu.matmul %1283, %1282, %cst_507 {dimension_numbers = #tpu.dot_dimension_numbers<[1], [0], [0], [1], [0, 0, 1, 1], [], []>} : vector<24x8xbf16>, vector<8x32xbf16>, vector<24x32xf32> -> vector<24x32xf32>
    %1285 = vector.broadcast %1261 : vector<1x32xf32> to vector<24x32xf32>
    %1286 = arith.addf %1285, %1284 : vector<24x32xf32>
    %1287 = vector.extract_strided_slice %1265 {offsets = [0, 8], sizes = [24, 8], strides = [1, 1]} : vector<24x96xf32> to vector<24x8xf32>
    %1288 = vector.extract_strided_slice %1265 {offsets = [0, 40], sizes = [24, 8], strides = [1, 1]} : vector<24x96xf32> to vector<24x8xf32>
    %1289 = vector.extract_strided_slice %1265 {offsets = [0, 72], sizes = [24, 8], strides = [1, 1]} : vector<24x96xf32> to vector<24x8xf32>
    %cst_508 = arith.constant dense<0.000000e+00> : vector<24x24xf32>
    %1290 = tpu.matmul %1287, %1288, %cst_508 {dimension_numbers = #tpu.dot_dimension_numbers<[1], [1], [0], [0], [0, 0, 1, 0], [], []>} : vector<24x8xf32>, vector<24x8xf32>, vector<24x24xf32> -> vector<24x24xf32>
    %1291 = vector.broadcast %8 : vector<1x24xf32> to vector<24x24xf32>
    %1292 = arith.addf %1290, %1291 : vector<24x24xf32>
    %cst_509 = arith.constant dense<0xFF800000> : vector<24xf32>
    %1293 = vector.multi_reduction <maximumf>, %1292, %cst_509 [1] : vector<24x24xf32> to vector<24xf32>
    %1294 = vector.shape_cast %1293 : vector<24xf32> to vector<24x1xf32>
    %1295 = vector.broadcast %1294 : vector<24x1xf32> to vector<24x24xf32>
    %1296 = arith.subf %1292, %1295 : vector<24x24xf32>
    %1297 = math.exp %1296 : vector<24x24xf32>
    %cst_510 = arith.constant dense<0.000000e+00> : vector<24xf32>
    %1298 = vector.multi_reduction <add>, %1297, %cst_510 [1] : vector<24x24xf32> to vector<24xf32>
    %1299 = vector.shape_cast %1298 : vector<24xf32> to vector<24x1xf32>
    %1300 = vector.broadcast %1299 : vector<24x1xf32> to vector<24x24xf32>
    %1301 = arith.divf %1297, %1300 : vector<24x24xf32>
    %cst_511 = arith.constant dense<0.000000e+00> : vector<24x8xf32>
    %1302 = tpu.matmul %1301, %1289, %cst_511 {dimension_numbers = #tpu.dot_dimension_numbers<[1], [0], [0], [1], [0, 0, 1, 1], [], []>} : vector<24x24xf32>, vector<24x8xf32>, vector<24x8xf32> -> vector<24x8xf32>
    %1303 = vector.extract_strided_slice %1260 {offsets = [8, 0], sizes = [8, 32], strides = [1, 1]} : vector<32x32xbf16> to vector<8x32xbf16>
    %1304 = arith.truncf %1302 : vector<24x8xf32> to vector<24x8xbf16>
    %cst_512 = arith.constant dense<0.000000e+00> : vector<24x32xf32>
    %1305 = tpu.matmul %1304, %1303, %cst_512 {dimension_numbers = #tpu.dot_dimension_numbers<[1], [0], [0], [1], [0, 0, 1, 1], [], []>} : vector<24x8xbf16>, vector<8x32xbf16>, vector<24x32xf32> -> vector<24x32xf32>
    %1306 = arith.addf %1286, %1305 : vector<24x32xf32>
    %1307 = vector.extract_strided_slice %1265 {offsets = [0, 16], sizes = [24, 8], strides = [1, 1]} : vector<24x96xf32> to vector<24x8xf32>
    %1308 = vector.extract_strided_slice %1265 {offsets = [0, 48], sizes = [24, 8], strides = [1, 1]} : vector<24x96xf32> to vector<24x8xf32>
    %1309 = vector.extract_strided_slice %1265 {offsets = [0, 80], sizes = [24, 8], strides = [1, 1]} : vector<24x96xf32> to vector<24x8xf32>
    %cst_513 = arith.constant dense<0.000000e+00> : vector<24x24xf32>
    %1310 = tpu.matmul %1307, %1308, %cst_513 {dimension_numbers = #tpu.dot_dimension_numbers<[1], [1], [0], [0], [0, 0, 1, 0], [], []>} : vector<24x8xf32>, vector<24x8xf32>, vector<24x24xf32> -> vector<24x24xf32>
    %1311 = vector.broadcast %8 : vector<1x24xf32> to vector<24x24xf32>
    %1312 = arith.addf %1310, %1311 : vector<24x24xf32>
    %cst_514 = arith.constant dense<0xFF800000> : vector<24xf32>
    %1313 = vector.multi_reduction <maximumf>, %1312, %cst_514 [1] : vector<24x24xf32> to vector<24xf32>
    %1314 = vector.shape_cast %1313 : vector<24xf32> to vector<24x1xf32>
    %1315 = vector.broadcast %1314 : vector<24x1xf32> to vector<24x24xf32>
    %1316 = arith.subf %1312, %1315 : vector<24x24xf32>
    %1317 = math.exp %1316 : vector<24x24xf32>
    %cst_515 = arith.constant dense<0.000000e+00> : vector<24xf32>
    %1318 = vector.multi_reduction <add>, %1317, %cst_515 [1] : vector<24x24xf32> to vector<24xf32>
    %1319 = vector.shape_cast %1318 : vector<24xf32> to vector<24x1xf32>
    %1320 = vector.broadcast %1319 : vector<24x1xf32> to vector<24x24xf32>
    %1321 = arith.divf %1317, %1320 : vector<24x24xf32>
    %cst_516 = arith.constant dense<0.000000e+00> : vector<24x8xf32>
    %1322 = tpu.matmul %1321, %1309, %cst_516 {dimension_numbers = #tpu.dot_dimension_numbers<[1], [0], [0], [1], [0, 0, 1, 1], [], []>} : vector<24x24xf32>, vector<24x8xf32>, vector<24x8xf32> -> vector<24x8xf32>
    %1323 = vector.extract_strided_slice %1260 {offsets = [16, 0], sizes = [8, 32], strides = [1, 1]} : vector<32x32xbf16> to vector<8x32xbf16>
    %1324 = arith.truncf %1322 : vector<24x8xf32> to vector<24x8xbf16>
    %cst_517 = arith.constant dense<0.000000e+00> : vector<24x32xf32>
    %1325 = tpu.matmul %1324, %1323, %cst_517 {dimension_numbers = #tpu.dot_dimension_numbers<[1], [0], [0], [1], [0, 0, 1, 1], [], []>} : vector<24x8xbf16>, vector<8x32xbf16>, vector<24x32xf32> -> vector<24x32xf32>
    %1326 = arith.addf %1306, %1325 : vector<24x32xf32>
    %1327 = vector.extract_strided_slice %1265 {offsets = [0, 24], sizes = [24, 8], strides = [1, 1]} : vector<24x96xf32> to vector<24x8xf32>
    %1328 = vector.extract_strided_slice %1265 {offsets = [0, 56], sizes = [24, 8], strides = [1, 1]} : vector<24x96xf32> to vector<24x8xf32>
    %1329 = vector.extract_strided_slice %1265 {offsets = [0, 88], sizes = [24, 8], strides = [1, 1]} : vector<24x96xf32> to vector<24x8xf32>
    %cst_518 = arith.constant dense<0.000000e+00> : vector<24x24xf32>
    %1330 = tpu.matmul %1327, %1328, %cst_518 {dimension_numbers = #tpu.dot_dimension_numbers<[1], [1], [0], [0], [0, 0, 1, 0], [], []>} : vector<24x8xf32>, vector<24x8xf32>, vector<24x24xf32> -> vector<24x24xf32>
    %1331 = vector.broadcast %8 : vector<1x24xf32> to vector<24x24xf32>
    %1332 = arith.addf %1330, %1331 : vector<24x24xf32>
    %cst_519 = arith.constant dense<0xFF800000> : vector<24xf32>
    %1333 = vector.multi_reduction <maximumf>, %1332, %cst_519 [1] : vector<24x24xf32> to vector<24xf32>
    %1334 = vector.shape_cast %1333 : vector<24xf32> to vector<24x1xf32>
    %1335 = vector.broadcast %1334 : vector<24x1xf32> to vector<24x24xf32>
    %1336 = arith.subf %1332, %1335 : vector<24x24xf32>
    %1337 = math.exp %1336 : vector<24x24xf32>
    %cst_520 = arith.constant dense<0.000000e+00> : vector<24xf32>
    %1338 = vector.multi_reduction <add>, %1337, %cst_520 [1] : vector<24x24xf32> to vector<24xf32>
    %1339 = vector.shape_cast %1338 : vector<24xf32> to vector<24x1xf32>
    %1340 = vector.broadcast %1339 : vector<24x1xf32> to vector<24x24xf32>
    %1341 = arith.divf %1337, %1340 : vector<24x24xf32>
    %cst_521 = arith.constant dense<0.000000e+00> : vector<24x8xf32>
    %1342 = tpu.matmul %1341, %1329, %cst_521 {dimension_numbers = #tpu.dot_dimension_numbers<[1], [0], [0], [1], [0, 0, 1, 1], [], []>} : vector<24x24xf32>, vector<24x8xf32>, vector<24x8xf32> -> vector<24x8xf32>
    %1343 = vector.extract_strided_slice %1260 {offsets = [24, 0], sizes = [8, 32], strides = [1, 1]} : vector<32x32xbf16> to vector<8x32xbf16>
    %1344 = arith.truncf %1342 : vector<24x8xf32> to vector<24x8xbf16>
    %cst_522 = arith.constant dense<0.000000e+00> : vector<24x32xf32>
    %1345 = tpu.matmul %1344, %1343, %cst_522 {dimension_numbers = #tpu.dot_dimension_numbers<[1], [0], [0], [1], [0, 0, 1, 1], [], []>} : vector<24x8xbf16>, vector<8x32xbf16>, vector<24x32xf32> -> vector<24x32xf32>
    %1346 = arith.addf %1326, %1345 : vector<24x32xf32>
    %1347 = arith.addf %1233, %1346 : vector<24x32xf32>
    %c28_523 = arith.constant 28 : index
    %c0_524 = arith.constant 0 : index
    %1348 = vector.load %arg7[%c28_523, %c0_524] : memref<72x128xf32, #tpu.memory_space<vmem>>, vector<1x32xf32>
    %c29_525 = arith.constant 29 : index
    %c0_526 = arith.constant 0 : index
    %1349 = vector.load %arg7[%c29_525, %c0_526] : memref<72x128xf32, #tpu.memory_space<vmem>>, vector<1x32xf32>
    %cst_527 = arith.constant dense<0.000000e+00> : vector<24xf32>
    %1350 = vector.multi_reduction <add>, %1347, %cst_527 [1] : vector<24x32xf32> to vector<24xf32>
    %1351 = vector.shape_cast %1350 : vector<24xf32> to vector<24x1xf32>
    %cst_528 = arith.constant 3.200000e+01 : f32
    %1352 = vector.broadcast %cst_528 : f32 to vector<24x1xf32>
    %1353 = arith.divf %1351, %1352 : vector<24x1xf32>
    %1354 = vector.broadcast %1353 : vector<24x1xf32> to vector<24x32xf32>
    %1355 = arith.subf %1347, %1354 : vector<24x32xf32>
    %1356 = arith.mulf %1355, %1355 : vector<24x32xf32>
    %cst_529 = arith.constant dense<0.000000e+00> : vector<24xf32>
    %1357 = vector.multi_reduction <add>, %1356, %cst_529 [1] : vector<24x32xf32> to vector<24xf32>
    %1358 = vector.shape_cast %1357 : vector<24xf32> to vector<24x1xf32>
    %cst_530 = arith.constant 3.200000e+01 : f32
    %1359 = vector.broadcast %cst_530 : f32 to vector<24x1xf32>
    %1360 = arith.divf %1358, %1359 : vector<24x1xf32>
    %cst_531 = arith.constant 9.99999997E-7 : f32
    %1361 = vector.broadcast %cst_531 : f32 to vector<24x1xf32>
    %1362 = arith.addf %1360, %1361 : vector<24x1xf32>
    %1363 = math.rsqrt %1362 : vector<24x1xf32>
    %1364 = vector.broadcast %1363 : vector<24x1xf32> to vector<24x32xf32>
    %1365 = arith.mulf %1355, %1364 : vector<24x32xf32>
    %1366 = vector.broadcast %1348 : vector<1x32xf32> to vector<24x32xf32>
    %1367 = arith.mulf %1365, %1366 : vector<24x32xf32>
    %1368 = vector.broadcast %1349 : vector<1x32xf32> to vector<24x32xf32>
    %1369 = arith.addf %1367, %1368 : vector<24x32xf32>
    %c3_532 = arith.constant 3 : index
    %c0_533 = arith.constant 0 : index
    %c0_534 = arith.constant 0 : index
    %1370 = vector.load %arg5[%c3_532, %c0_533, %c0_534] : memref<4x32x64xbf16, #tpu.memory_space<vmem>>, vector<1x32x64xbf16>
    %1371 = vector.shape_cast %1370 : vector<1x32x64xbf16> to vector<32x64xbf16>
    %c30_535 = arith.constant 30 : index
    %c0_536 = arith.constant 0 : index
    %1372 = vector.load %arg7[%c30_535, %c0_536] : memref<72x128xf32, #tpu.memory_space<vmem>>, vector<1x64xf32>
    %1373 = arith.truncf %1369 : vector<24x32xf32> to vector<24x32xbf16>
    %cst_537 = arith.constant dense<0.000000e+00> : vector<24x64xf32>
    %1374 = tpu.matmul %1373, %1371, %cst_537 {dimension_numbers = #tpu.dot_dimension_numbers<[1], [0], [0], [1], [0, 0, 1, 1], [], []>} : vector<24x32xbf16>, vector<32x64xbf16>, vector<24x64xf32> -> vector<24x64xf32>
    %1375 = vector.broadcast %1372 : vector<1x64xf32> to vector<24x64xf32>
    %1376 = arith.addf %1374, %1375 : vector<24x64xf32>
    %1377 = arith.mulf %1376, %1376 : vector<24x64xf32>
    %1378 = arith.mulf %1376, %1377 : vector<24x64xf32>
    %cst_538 = arith.constant 4.471500e-02 : f32
    %1379 = vector.broadcast %cst_538 : f32 to vector<24x64xf32>
    %1380 = arith.mulf %1379, %1378 : vector<24x64xf32>
    %1381 = arith.addf %1376, %1380 : vector<24x64xf32>
    %cst_539 = arith.constant 0.797884583 : f32
    %1382 = vector.broadcast %cst_539 : f32 to vector<24x64xf32>
    %1383 = arith.mulf %1382, %1381 : vector<24x64xf32>
    %1384 = math.tanh %1383 : vector<24x64xf32>
    %cst_540 = arith.constant 1.000000e+00 : f32
    %1385 = vector.broadcast %cst_540 : f32 to vector<24x64xf32>
    %1386 = arith.addf %1385, %1384 : vector<24x64xf32>
    %cst_541 = arith.constant 5.000000e-01 : f32
    %1387 = vector.broadcast %cst_541 : f32 to vector<24x64xf32>
    %1388 = arith.mulf %1387, %1386 : vector<24x64xf32>
    %1389 = arith.mulf %1376, %1388 : vector<24x64xf32>
    %c3_542 = arith.constant 3 : index
    %c0_543 = arith.constant 0 : index
    %c0_544 = arith.constant 0 : index
    %1390 = vector.load %arg6[%c3_542, %c0_543, %c0_544] : memref<5x64x32xbf16, #tpu.memory_space<vmem>>, vector<1x64x32xbf16>
    %1391 = vector.shape_cast %1390 : vector<1x64x32xbf16> to vector<64x32xbf16>
    %c31_545 = arith.constant 31 : index
    %c0_546 = arith.constant 0 : index
    %1392 = vector.load %arg7[%c31_545, %c0_546] : memref<72x128xf32, #tpu.memory_space<vmem>>, vector<1x32xf32>
    %1393 = arith.truncf %1389 : vector<24x64xf32> to vector<24x64xbf16>
    %cst_547 = arith.constant dense<0.000000e+00> : vector<24x32xf32>
    %1394 = tpu.matmul %1393, %1391, %cst_547 {dimension_numbers = #tpu.dot_dimension_numbers<[1], [0], [0], [1], [0, 0, 1, 1], [], []>} : vector<24x64xbf16>, vector<64x32xbf16>, vector<24x32xf32> -> vector<24x32xf32>
    %1395 = vector.broadcast %1392 : vector<1x32xf32> to vector<24x32xf32>
    %1396 = arith.addf %1394, %1395 : vector<24x32xf32>
    %1397 = arith.addf %1347, %1396 : vector<24x32xf32>
    %cst_548 = arith.constant dense<0.000000e+00> : vector<24xf32>
    %1398 = vector.multi_reduction <add>, %1397, %cst_548 [1] : vector<24x32xf32> to vector<24xf32>
    %1399 = vector.shape_cast %1398 : vector<24xf32> to vector<24x1xf32>
    %cst_549 = arith.constant 3.200000e+01 : f32
    %1400 = vector.broadcast %cst_549 : f32 to vector<24x1xf32>
    %1401 = arith.divf %1399, %1400 : vector<24x1xf32>
    %1402 = vector.broadcast %1401 : vector<24x1xf32> to vector<24x32xf32>
    %1403 = arith.subf %1397, %1402 : vector<24x32xf32>
    %1404 = arith.mulf %1403, %1403 : vector<24x32xf32>
    %cst_550 = arith.constant dense<0.000000e+00> : vector<24xf32>
    %1405 = vector.multi_reduction <add>, %1404, %cst_550 [1] : vector<24x32xf32> to vector<24xf32>
    %1406 = vector.shape_cast %1405 : vector<24xf32> to vector<24x1xf32>
    %cst_551 = arith.constant 3.200000e+01 : f32
    %1407 = vector.broadcast %cst_551 : f32 to vector<24x1xf32>
    %1408 = arith.divf %1406, %1407 : vector<24x1xf32>
    %cst_552 = arith.constant 9.99999997E-7 : f32
    %1409 = vector.broadcast %cst_552 : f32 to vector<24x1xf32>
    %1410 = arith.addf %1408, %1409 : vector<24x1xf32>
    %1411 = math.rsqrt %1410 : vector<24x1xf32>
    %1412 = vector.broadcast %1411 : vector<24x1xf32> to vector<24x32xf32>
    %1413 = arith.mulf %1403, %1412 : vector<24x32xf32>
    %1414 = vector.broadcast %4 : vector<1x32xf32> to vector<24x32xf32>
    %1415 = arith.mulf %1413, %1414 : vector<24x32xf32>
    %1416 = vector.broadcast %5 : vector<1x32xf32> to vector<24x32xf32>
    %1417 = arith.addf %1415, %1416 : vector<24x32xf32>
    %1418 = vector.extract_strided_slice %1417 {offsets = [0, 0], sizes = [16, 32], strides = [1, 1]} : vector<24x32xf32> to vector<16x32xf32>
    %c5_553 = arith.constant 5 : index
    %c0_554 = arith.constant 0 : index
    %c0_555 = arith.constant 0 : index
    %1419 = vector.load %arg4[%c5_553, %c0_554, %c0_555] : memref<7x32x32xbf16, #tpu.memory_space<vmem>>, vector<1x32x32xbf16>
    %1420 = vector.shape_cast %1419 : vector<1x32x32xbf16> to vector<32x32xbf16>
    %1421 = arith.truncf %1418 : vector<16x32xf32> to vector<16x32xbf16>
    %cst_556 = arith.constant dense<0.000000e+00> : vector<16x32xf32>
    %1422 = tpu.matmul %1421, %1420, %cst_556 {dimension_numbers = #tpu.dot_dimension_numbers<[1], [0], [0], [1], [0, 0, 1, 1], [], []>} : vector<16x32xbf16>, vector<32x32xbf16>, vector<16x32xf32> -> vector<16x32xf32>
    %1423 = arith.mulf %1422, %1422 : vector<16x32xf32>
    %cst_557 = arith.constant dense<0.000000e+00> : vector<16xf32>
    %1424 = vector.multi_reduction <add>, %1423, %cst_557 [1] : vector<16x32xf32> to vector<16xf32>
    %1425 = vector.shape_cast %1424 : vector<16xf32> to vector<16x1xf32>
    %cst_558 = arith.constant 1.000000e-24 : f32
    %1426 = vector.broadcast %cst_558 : f32 to vector<16x1xf32>
    %1427 = arith.maximumf %1425, %1426 : vector<16x1xf32>
    %1428 = math.rsqrt %1427 : vector<16x1xf32>
    %1429 = vector.broadcast %1428 : vector<16x1xf32> to vector<16x32xf32>
    %1430 = arith.mulf %1422, %1429 : vector<16x32xf32>
    %1431 = vector.extract_strided_slice %1417 {offsets = [16, 0], sizes = [8, 32], strides = [1, 1]} : vector<24x32xf32> to vector<8x32xf32>
    %c6_559 = arith.constant 6 : index
    %c0_560 = arith.constant 0 : index
    %c0_561 = arith.constant 0 : index
    %1432 = vector.load %arg4[%c6_559, %c0_560, %c0_561] : memref<7x32x32xbf16, #tpu.memory_space<vmem>>, vector<1x32x32xbf16>
    %1433 = vector.shape_cast %1432 : vector<1x32x32xbf16> to vector<32x32xbf16>
    %1434 = arith.truncf %1431 : vector<8x32xf32> to vector<8x32xbf16>
    %cst_562 = arith.constant dense<0.000000e+00> : vector<8x32xf32>
    %1435 = tpu.matmul %1434, %1433, %cst_562 {dimension_numbers = #tpu.dot_dimension_numbers<[1], [0], [0], [1], [0, 0, 1, 1], [], []>} : vector<8x32xbf16>, vector<32x32xbf16>, vector<8x32xf32> -> vector<8x32xf32>
    %1436 = arith.mulf %1435, %1435 : vector<8x32xf32>
    %cst_563 = arith.constant dense<0.000000e+00> : vector<8xf32>
    %1437 = vector.multi_reduction <add>, %1436, %cst_563 [1] : vector<8x32xf32> to vector<8xf32>
    %1438 = vector.shape_cast %1437 : vector<8xf32> to vector<8x1xf32>
    %cst_564 = arith.constant 1.000000e-24 : f32
    %1439 = vector.broadcast %cst_564 : f32 to vector<8x1xf32>
    %1440 = arith.maximumf %1438, %1439 : vector<8x1xf32>
    %1441 = math.rsqrt %1440 : vector<8x1xf32>
    %1442 = vector.broadcast %1441 : vector<8x1xf32> to vector<8x32xf32>
    %1443 = arith.mulf %1435, %1442 : vector<8x32xf32>
    %cst_565 = arith.constant dense<0.000000e+00> : vector<8x16xf32>
    %1444 = tpu.matmul %1443, %1430, %cst_565 {dimension_numbers = #tpu.dot_dimension_numbers<[1], [1], [0], [0], [0, 0, 1, 0], [], []>} : vector<8x32xf32>, vector<16x32xf32>, vector<8x16xf32> -> vector<8x16xf32>
    %1445 = vector.extract_strided_slice %1444 {offsets = [0, 0], sizes = [5, 16], strides = [1, 1]} : vector<8x16xf32> to vector<5x16xf32>
    %cst_566 = arith.constant dense<0.000000e+00> : vector<16xf32>
    %1446 = vector.multi_reduction <add>, %1445, %cst_566 [0] : vector<5x16xf32> to vector<16xf32>
    %1447 = vector.shape_cast %1446 : vector<16xf32> to vector<1x16xf32>
    %cst_567 = arith.constant 5.000000e+00 : f32
    %1448 = vector.broadcast %cst_567 : f32 to vector<1x16xf32>
    %1449 = arith.divf %1447, %1448 : vector<1x16xf32>
    %1450 = vector.broadcast %1449 : vector<1x16xf32> to vector<5x16xf32>
    %1451 = arith.subf %1445, %1450 : vector<5x16xf32>
    %1452 = vector.broadcast %1449 : vector<1x16xf32> to vector<5x16xf32>
    %1453 = arith.subf %1445, %1452 : vector<5x16xf32>
    %1454 = arith.mulf %1451, %1453 : vector<5x16xf32>
    %cst_568 = arith.constant dense<0.000000e+00> : vector<16xf32>
    %1455 = vector.multi_reduction <add>, %1454, %cst_568 [0] : vector<5x16xf32> to vector<16xf32>
    %1456 = vector.shape_cast %1455 : vector<16xf32> to vector<1x16xf32>
    %cst_569 = arith.constant 5.000000e+00 : f32
    %1457 = vector.broadcast %cst_569 : f32 to vector<1x16xf32>
    %1458 = arith.divf %1456, %1457 : vector<1x16xf32>
    %1459 = vector.broadcast %1449 : vector<1x16xf32> to vector<8x16xf32>
    %1460 = arith.subf %1444, %1459 : vector<8x16xf32>
    %cst_570 = arith.constant 9.99999997E-7 : f32
    %1461 = vector.broadcast %cst_570 : f32 to vector<1x16xf32>
    %1462 = arith.addf %1458, %1461 : vector<1x16xf32>
    %1463 = math.rsqrt %1462 : vector<1x16xf32>
    %1464 = vector.broadcast %1463 : vector<1x16xf32> to vector<8x16xf32>
    %1465 = arith.mulf %1460, %1464 : vector<8x16xf32>
    %1466 = vector.broadcast %6 : vector<8x1xf32> to vector<8x16xf32>
    %1467 = arith.mulf %1465, %1466 : vector<8x16xf32>
    %1468 = vector.broadcast %7 : vector<8x1xf32> to vector<8x16xf32>
    %1469 = arith.addf %1467, %1468 : vector<8x16xf32>
    %cst_571 = arith.constant dense<0.000000e+00> : vector<8x256xf32>
    %1470 = tpu.matmul %1469, %9, %cst_571 {dimension_numbers = #tpu.dot_dimension_numbers<[1], [0], [0], [1], [0, 0, 1, 1], [], []>} : vector<8x16xf32>, vector<16x256xf32>, vector<8x256xf32> -> vector<8x256xf32>
    %c1_572 = arith.constant 1 : index
    %c0_573 = arith.constant 0 : index
    %c0_574 = arith.constant 0 : index
    %1471 = vector.load %arg8[%c1_572, %c0_573, %c0_574] : memref<2x8x256xf32, #tpu.memory_space<vmem>>, vector<1x8x256xf32>
    %1472 = vector.shape_cast %1471 : vector<1x8x256xf32> to vector<8x256xf32>
    %1473 = vector.shape_cast %1470 : vector<8x256xf32> to vector<1x8x256xf32>
    tpu.vector_store %arg8[%c1_572, %c0_573, %c0_574], %1473 {strides = array<i32>} : memref<2x8x256xf32, #tpu.memory_space<vmem>>, vector<1x8x256xf32>,
    return
  }
  func.func @transform_0(%arg0: i32) -> (i32, i32, i32) {
    %c0_i32 = arith.constant 0 : i32
    %c0_i32_0 = arith.constant 0 : i32
    %c0_i32_1 = arith.constant 0 : i32
    %c0_i32_2 = arith.constant 0 : i32
    return %c0_i32, %c0_i32_0, %c0_i32_1 : i32, i32, i32
  }
  func.func @transform_1(%arg0: i32) -> (i32, i32) {
    %c0_i32 = arith.constant 0 : i32
    %c0_i32_0 = arith.constant 0 : i32
    %c0_i32_1 = arith.constant 0 : i32
    return %c0_i32, %c0_i32_0 : i32, i32
  }
  func.func @transform_2(%arg0: i32) -> (i32, i32, i32) {
    %c0_i32 = arith.constant 0 : i32
    %c0_i32_0 = arith.constant 0 : i32
    %c0_i32_1 = arith.constant 0 : i32
    %c0_i32_2 = arith.constant 0 : i32
    return %c0_i32, %c0_i32_0, %c0_i32_1 : i32, i32, i32
  }
  func.func @transform_3(%arg0: i32) -> (i32, i32, i32) {
    %c0_i32 = arith.constant 0 : i32
    %c0_i32_0 = arith.constant 0 : i32
    %c0_i32_1 = arith.constant 0 : i32
    %c0_i32_2 = arith.constant 0 : i32
    return %c0_i32, %c0_i32_0, %c0_i32_1 : i32, i32, i32
  }
  func.func @transform_4(%arg0: i32) -> (i32, i32, i32) {
    %c0_i32 = arith.constant 0 : i32
    %c0_i32_0 = arith.constant 0 : i32
    %c0_i32_1 = arith.constant 0 : i32
    %c0_i32_2 = arith.constant 0 : i32
    return %c0_i32, %c0_i32_0, %c0_i32_1 : i32, i32, i32
  }
  func.func @transform_5(%arg0: i32) -> (i32, i32, i32) {
    %c0_i32 = arith.constant 0 : i32
    %c0_i32_0 = arith.constant 0 : i32
    %c0_i32_1 = arith.constant 0 : i32
    %c0_i32_2 = arith.constant 0 : i32
    return %c0_i32, %c0_i32_0, %c0_i32_1 : i32, i32, i32
  }
  func.func @transform_6(%arg0: i32) -> (i32, i32) {
    %c0_i32 = arith.constant 0 : i32
    %c0_i32_0 = arith.constant 0 : i32
    %c0_i32_1 = arith.constant 0 : i32
    return %c0_i32, %c0_i32_0 : i32, i32
  }
  func.func @transform_7(%arg0: i32) -> (i32, i32, i32) {
    %c0_i32 = arith.constant 0 : i32
    %c0_i32_0 = arith.constant 0 : i32
    %c0_i32_1 = arith.constant 0 : i32
    %c0_i32_2 = arith.constant 0 : i32
    return %c0_i32, %c0_i32_0, %c0_i32_1 : i32, i32, i32
  }
}

</mosaic_0001>

<bundles_post_ra>
// kernel: pre_segmenter_forward.1
= control target key start
LH: loop header
LB: loop body
LE: loop exit
PB: predicated region body
PF: predicated region fallthrough
CT: control target
= control target key end

     0   :  { %v15724_v0 = vmov 0.0   ;;  %vm15725_vm0 = vmmov 0   ;;  %vm80_vm1 = vcmask 523264   ;;  %vm129_vm2 = vcmask 261120   ;;  %s15726_s29 = smov 96   ;;  %s15727_s30 = smov 64   ;;  %s18448_s5 = inlined_call_operand.vmem [shape: bf16[5,64,32], index: 5, kind: input, shape index: {}]   ;;  %s18449_s0 = inlined_call_operand.vmem [shape: f32[2,16,64], index: 0, kind: input, shape index: {}]   ;;  %s18450_s6 = inlined_call_operand.vmem [shape: f32[72,128], index: 6, kind: input, shape index: {}]   ;;  %s18451_s2 = inlined_call_operand.vmem [shape: bf16[4,32,96], index: 2, kind: input, shape index: {}]   ;;  %s18452_s3 = inlined_call_operand.vmem [shape: bf16[7,32,32], index: 3, kind: input, shape index: {}]   ;;  %s18453_s4 = inlined_call_operand.vmem [shape: bf16[4,32,64], index: 4, kind: input, shape index: {}]   ;;  %s18454_s1 = inlined_call_operand.vmem [shape: f32[16,256], index: 1, kind: input, shape index: {}]   ;;  %s18455_s7 = inlined_call_operand.vmem [shape: f32[2,8,256], index: 7, kind: output, shape index: {}]  }
   0x1   :  { %13920 = vmatprep.subr.bf16.mxu0 %v15724_v0  ;;  %v15159_v1 = vld [vmem:[%s18448_s5 + $0x98] sm:$0xff]   ;;  %13928 = vmatprep.mubr.msk.bf16.mxu0 %vm15725_vm0, %v15724_v0  ;;  %v15160_v2 = vld [vmem:[%s18448_s5 + $0x90] sm:$0xff]   ;;  %v15161_v3 = vld [vmem:[%s18448_s5 + $0x88] sm:$0xff]   ;;  %vm246_vm3 = vcmask 64512   ;;  %vm330_vm4 = vcmask 130048   ;;  %s15728_s8 = smov 88  }
   0x2   :  { %13932 = vmatprep.subr.bf16.mxu1 %v15724_v0  ;;  %13936 = vmatprep.mubr.msk.bf16.mxu1 %vm15725_vm0, %v15724_v0  ;;  %v15162_v4 = vld [vmem:[%s18448_s5 + $0x80] sm:$0xff]   ;;  %v41_v6 = vld [vmem:[%s18449_s0 + $0x8] sm:$0xff]  ;;  %v27_v9 = vld [vmem:[%s18450_s6 + $0x30] sm:$0xff]  ;;  %s15729_s9 = smov 120   ;;  %vm444_vm5 = vcmask 1043456   ;;  %s15730_s12 = smov 56  }
   0x3   :  { %13921 = vmatpush3.bf16.msra.mxu0 %v15159_v1  ;;  %v40_v5 = vld [vmem:[%s18449_s0] sm:$0xff]  ;;  %v28_v14 = vld [vmem:[%s18450_s6 + $0x38] sm:$0xff]  ;;  %v15163_v31 = vld [vmem:[%s18451_s2 + $0x8] sm:$0xff]   ;;  %s15731_s13 = smov 80   ;;  %s15732_s14 = smov 112   ;;  %vm3092_vm6 = vcmask 195584  }
   0x4   :  { %13922 = vmatprep.subr.bf16.mxu0 %v15724_v0  ;;  %v51_v7 = vpack.c.bf16 %v41_v6, %v40_v5  ;;  %v12737_v8 = vld [vmem:[%s18450_s6 + $0x20] ss:$0 sm:$0xff]  ;;  %13933 = vmatpush3.bf16.msra.mxu1 %v15163_v31  ;;  %v12744_v45 = vld [vmem:[%s18450_s6 + $0x1] ss:$0 sm:$0xff]  ;;  %v12745_v50 = vld [vmem:[%s18450_s6 + $0x2] ss:$0 sm:$0xff] }
   0x5   :  { %v15164_v32 = vld [vmem:[%s18451_s2] sm:$0xff]   ;;  %13934 = vmatprep.subr.bf16.mxu1 %v15724_v0  ;;  %s15733_s17 = smov 48   ;;  %s15734_s18 = smov 72   ;;  %vm6305_vm7 = vcmask 126976  }
   0x6   :  { %v12743_v41 = vld [vmem:[%s18450_s6] ss:$0 sm:$0xff]  ;;  %s15735_s19 = smov 104   ;;  %s15736_s24 = smov 40  }
   0x7   :  { %13923 = vmatpush3.bf16.msra.mxu0 %v15160_v2 }
   0x8   :  { %13924 = vmatprep.subr.bf16.mxu0 %v15724_v0  ;;  %13935 = vmatpush3.bf16.msra.mxu1 %v15164_v32 }
   0xb   :  { %13925 = vmatpush3.bf16.msra.mxu0 %v15161_v3 }
   0xc   :  { %13926 = vmatprep.subr.bf16.mxu0 %v15724_v0 }
   0xf   :  { %13927 = vmatpush3.bf16.msra.mxu0 %v15162_v4 }
  0x10   :  { %13954 = vmatprep.subr.bf16.mxu0 %v15724_v0 }
  0x12   :  { %13929 = vmatmul.mubr.msk.bf16.vlgmr.msra.gmra.mxu0 %vm80_vm1, %v51_v7 }
  0x13   :  { %13956 = vmatprep.mubr.msk.bf16.mxu0 %vm15725_vm0, %v15724_v0 }
  0xd2   :  { %v118_v10 = vpop.f32.mrf.mxu0 }
  0xd3   :  { %v119_v11 = vadd.f32 %v12737_v8, %v118_v10 }
  0xd4   :  { %v13930_v12 = vpop.f32.mrf.mxu0 }
  0xd5   :  { %v15816_v13 = vadd.f32 %v119_v11, %v27_v9 }
  0xd6   :  { %v121_v15 = vpop.f32.mrf.mxu0 }
  0xd7   :  { %v122_v16 = vadd.f32 %v12737_v8, %v121_v15  ;;  %v130_v17 = vsel %vm129_vm2, %v15816_v13, 0.0 }
  0xd8   :  { %131 = vadd.xlane.f32.xlu0 %v130_v17  ;;  %v13931_v18 = vpop.f32.mrf.mxu0 }
  0xd9   :  { %v15823_v19 = vadd.f32 %v122_v16, %v28_v14 }
  0xdb   :  { %v133_v20 = vsel %vm129_vm2, %v15823_v19, 0.0 }
  0xdc   :  { %134 = vadd.xlane.f32.xlu0 %v133_v20 }
 0x161   :  { %v132_v21 = vpop.xlane.xlu0 %131 }
 0x162   :  { %v137_v22 = vmul.f32 0.03125, %v132_v21 }
 0x164   :  { %v139_v23 = vsub.f32 %v15816_v13, %v137_v22 }
 0x165   :  { %v135_v24 = vpop.xlane.xlu0 %134 }
 0x166   :  { %v138_v25 = vmul.f32 0.03125, %v135_v24  ;;  %v141_v26 = vmul.f32 %v139_v23, %v139_v23  ;;  %v174_v24 = vld [vmem:[%s18452_s3] sm:$0xf] }
 0x168   :  { %v140_v27 = vsub.f32 %v15823_v19, %v138_v25  ;;  %v143_v28 = vsel %vm129_vm2, %v141_v26, 0.0  ;;  %v446_v25 = vsel %vm444_vm5, %v174_v24, 0 }
 0x169   :  { %144 = vadd.xlane.f32.xlu1 %v143_v28  ;;  %13955 = vmatpush3.bf16.msra.mxu0 %v446_v25 }
 0x16a   :  { %v142_v29 = vmul.f32 %v140_v27, %v140_v27 }
 0x16c   :  { %v146_v30 = vsel %vm129_vm2, %v142_v29, 0.0 }
 0x16d   :  { %147 = vadd.xlane.f32.xlu1 %v146_v30 }
 0x1f2   :  { %v145_v33 = vpop.xlane.xlu1 %144 }
 0x1f3   :  { %v149_v34 = vmul.f32 0.03125, %v145_v33 }
 0x1f5   :  { %v151_v35 = vadd.f32 1e-06, %v149_v34 }
 0x1f6   :  { %v148_v36 = vpop.xlane.xlu1 %147 }
 0x1f7   :  { %15243 = vrsqrt.f32 %v151_v35  ;;  %v150_v37 = vmul.f32 0.03125, %v148_v36 }
 0x1f9   :  { %v152_v38 = vadd.f32 1e-06, %v150_v37 }
 0x1fb   :  { %15245 = vrsqrt.f32 %v152_v38 }
 0x204   :  { %v15244_v39 = vpop.eup %15243 }
 0x205   :  { %v155_v40 = vmul.f32 %v15244_v39, %v139_v23 }
 0x207   :  { %v161_v44 = vmul.f32 %v12743_v41, %v155_v40 }
 0x208   :  { %v15246_v42 = vpop.eup %15245 }
 0x209   :  { %v156_v43 = vmul.f32 %v15246_v42, %v140_v27  ;;  %v167_v47 = vadd.f32 %v12744_v45, %v161_v44 }
 0x20b   :  { %v162_v46 = vmul.f32 %v12743_v41, %v156_v43 }
 0x20d   :  { %v168_v48 = vadd.f32 %v12744_v45, %v162_v46 }
 0x20f   :  { %v179_v49 = vpack.c.bf16 %v168_v48, %v167_v47 }
 0x211   :  { %13937 = vmatmul.mubr.msk.bf16.vlgmr.msra.gmra.mxu1 %vm129_vm2, %v179_v49 }
 0x2d1   :  { %v233_v51 = vpop.f32.mrf.mxu1 }
 0x2d2   :  { %v15848_v52 = vadd.f32 %v12745_v50, %v233_v51 }
 0x2d3   :  { %v13938_v53 = vpop.f32.mrf.mxu1 }
 0x2d4   :  { %242 = vrot.lane.b32.xlu1 %v15848_v52, %s15726_s29  ;;  %13944 = vmatprep.mubr.msk.f32.mxu1 %vm246_vm3, %v15848_v52 }
 0x2d5   :  { %v236_v54 = vpop.f32.mrf.mxu1 }
 0x2d6   :  { %v15854_v55 = vadd.f32 %v12745_v50, %v236_v54 }
 0x2d7   :  { %v13939_v56 = vpop.f32.mrf.mxu1 }
 0x2d8   :  { %244 = vrot.lane.b32.xlu0 %v15854_v55, %s15726_s29 }
 0x346   :  { %v243_v58 = vpop.permute.xlu1 %242 }
 0x34a   :  { %v245_v57 = vpop.permute.xlu0 %244 }
 0x34b   :  { %13940 = vmatprep.subr.msk.mxu1 %vm246_vm3, %v245_v57 }
 0x34c   :  { %13941 = vmatpush3.xpose.msk.msra.mxu1 %vm246_vm3, %v245_v57 }
 0x34d   :  { %13942 = vmatprep.subr.msk.mxu1 %vm246_vm3, %v243_v58 }
 0x350   :  { %13943 = vmatpush3.xpose.msk.msra.mxu1 %vm246_vm3, %v243_v58 }
 0x353   :  { %13945 = vmatmul.mubr.msk.f32.vlgmr.msra.gmra.mxu1 %vm246_vm3, %v15854_v55 }
 0x413   :  { %v13946_v59 = vpop.f32.mrf.mxu1 }
 0x414   :  { %v334_v60 = vsel %vm330_vm4, %v13946_v59, -inf }
 0x415   :  { %335 = vmax.xlane.f32.xlu0 %v334_v60  ;;  %v321_v61 = vpop.f32.mrf.mxu1 }
 0x416   :  { %v331_v62 = vsel %vm330_vm4, %v321_v61, -inf }
 0x417   :  { %332 = vmax.xlane.f32.xlu1 %v331_v62 }
 0x49e   :  { %v336_v63 = vpop.xlane.xlu0 %335 }
 0x49f   :  { %v338_v1 = vsub.f32 %v13946_v59, %v336_v63 }
 0x4a0   :  { %v333_v2 = vpop.xlane.xlu1 %332 }
 0x4a1   :  { %v341_v3 = vmul.f32 1.442695, %v338_v1  ;;  %v337_v4 = vsub.f32 %v321_v61, %v333_v2  ;;  %v175_v61 = vld [vmem:[%s18452_s3 + $0x4] sm:$0xf] }
 0x4a2   :  { %v700_v62 = vsel %vm444_vm5, %v175_v61, 0 }
 0x4a3   :  { %15247 = vpow2.f32 %v341_v3  ;;  %v339_v5 = vmul.f32 1.442695, %v337_v4 }
 0x4a5   :  { %15249 = vpow2.f32 %v339_v5 }
 0x4b0   :  { %v15248_v6 = vpop.eup %15247 }
 0x4b1   :  { %v346_v7 = vsel %vm330_vm4, %v15248_v6, 0.0 }
 0x4b2   :  { %v15250_v8 = vpop.eup %15249  ;;  %347 = vadd.xlane.f32.xlu1 %v346_v7 }
 0x4b3   :  { %v343_v9 = vsel %vm330_vm4, %v15250_v8, 0.0 }
 0x4b4   :  { %344 = vadd.xlane.f32.xlu0 %v343_v9 }
 0x4c3   :  { %353 = vrot.lane.b32.xlu1 %v15848_v52, %s15727_s30 }
 0x4c7   :  { %501 = vrot.lane.b32.xlu1 %v15854_v55, %s15728_s8 }
 0x4ca   :  { %355 = vrot.lane.b32.xlu0 %v15854_v55, %s15727_s30 }
 0x4cb   :  { %499 = vrot.lane.b32.xlu1 %v15848_v52, %s15728_s8 }
 0x4ce   :  { %495 = vrot.lane.b32.xlu0 %v15848_v52, %s15729_s9 }
 0x4cf   :  { %497 = vrot.lane.b32.xlu1 %v15854_v55, %s15729_s9 }
 0x53b   :  { %v348_v10 = vpop.xlane.xlu1 %347 }
 0x53c   :  { %15251 = vrcp.f32 %v348_v10 }
 0x53d   :  { %v345_v11 = vpop.xlane.xlu0 %344 }
 0x53e   :  { %15253 = vrcp.f32 %v345_v11 }
 0x53f   :  { %v354_v12 = vpop.permute.xlu1 %353 }
 0x541   :  { %v356_v14 = vpop.permute.xlu0 %355 }
 0x542   :  { %13947 = vmatprep.subr.mxu1 %v356_v14 }
 0x543   :  { %13948 = vmatpush3.msra.mxu1 %v356_v14  ;;  %v502_v15 = vpop.permute.xlu1 %501 }
 0x544   :  { %13949 = vmatprep.subr.mxu1 %v354_v12 }
 0x545   :  { %13950 = vmatpush3.msra.mxu1 %v354_v12  ;;  %v496_v21 = vpop.permute.xlu0 %495 }
 0x546   :  { %13960 = vmatprep.subr.msk.mxu1 %vm246_vm3, %v502_v15 }
 0x547   :  { %v500_v22 = vpop.permute.xlu1 %499 }
 0x549   :  { %v15252_v16 = vpop.eup %15251 }
 0x54a   :  { %v352_v20 = vmul.f32 %v15252_v16, %v15248_v6 }
 0x54b   :  { %v15254_v17 = vpop.eup %15253  ;;  %v498_v23 = vpop.permute.xlu1 %497 }
 0x54c   :  { %v350_v18 = vmul.f32 %v15254_v17, %v15250_v8 }
 0x54e   :  { %13951 = vmatprep.mubr.msk.f32.mxu1 %vm330_vm4, %v350_v18  ;;  %v12756_v18 = vld [vmem:[%s18450_s6 + $0x3] ss:$0 sm:$0xff] }
 0x54f   :  { %13952 = vmatmul.mubr.msk.f32.vlgmr.msra.gmra.mxu1 %vm330_vm4, %v352_v20 }
 0x550   :  { %13961 = vmatpush3.xpose.msk.msra.mxu1 %vm246_vm3, %v502_v15  ;;  %13964 = vmatprep.mubr.msk.f32.mxu1 %vm246_vm3, %v496_v21 }
 0x551   :  { %13962 = vmatprep.subr.msk.mxu1 %vm246_vm3, %v500_v22 }
 0x554   :  { %13963 = vmatpush3.xpose.msk.msra.mxu1 %vm246_vm3, %v500_v22 }
 0x555   :  { %13974 = vmatprep.subr.bf16.mxu1 %v15724_v0 }
 0x557   :  { %13965 = vmatmul.mubr.msk.f32.vlgmr.msra.gmra.mxu1 %vm246_vm3, %v498_v23 }
 0x558   :  { %13976 = vmatprep.mubr.msk.bf16.mxu1 %vm15725_vm0, %v15724_v0  ;;  %13975 = vmatpush3.bf16.msra.mxu1 %v700_v62 }
 0x60f   :  { %v13953_v26 = vpop.f32.mrf.mxu1 }
 0x611   :  { %v431_v27 = vpop.f32.mrf.mxu1 }
 0x612   :  { %v440_v28 = vpack.c.bf16 %v13953_v26, %v431_v27 }
 0x614   :  { %13957 = vmatmul.mubr.msk.bf16.vlgmr.msra.gmra.mxu0 %vm246_vm3, %v440_v28 }
 0x617   :  { %v13966_v29 = vpop.f32.mrf.mxu1 }
 0x618   :  { %v589_v30 = vsel %vm330_vm4, %v13966_v29, -inf }
 0x619   :  { %590 = vmax.xlane.f32.xlu1 %v589_v30  ;;  %v577_v31 = vpop.f32.mrf.mxu1 }
 0x61a   :  { %v586_v32 = vsel %vm330_vm4, %v577_v31, -inf }
 0x61b   :  { %587 = vmax.xlane.f32.xlu0 %v586_v32 }
 0x62a   :  { %608 = vrot.lane.b32.xlu1 %v15848_v52, %s15730_s12 }
 0x62e   :  { %751 = vrot.lane.b32.xlu1 %v15854_v55, %s15731_s13 }
 0x632   :  { %749 = vrot.lane.b32.xlu1 %v15848_v52, %s15731_s13 }
 0x636   :  { %747 = vrot.lane.b32.xlu1 %v15854_v55, %s15732_s14 }
 0x6a2   :  { %v591_v33 = vpop.xlane.xlu1 %590 }
 0x6a3   :  { %v593_v34 = vsub.f32 %v13966_v29, %v591_v33 }
 0x6a4   :  { %v588_v35 = vpop.xlane.xlu0 %587 }
 0x6a5   :  { %v596_v36 = vmul.f32 1.442695, %v593_v34  ;;  %v592_v37 = vsub.f32 %v577_v31, %v588_v35 }
 0x6a6   :  { %v609_v49 = vpop.permute.xlu1 %608 }
 0x6a7   :  { %15255 = vpow2.f32 %v596_v36  ;;  %v594_v38 = vmul.f32 1.442695, %v592_v37 }
 0x6a9   :  { %15257 = vpow2.f32 %v594_v38 }
 0x6aa   :  { %v752_v51 = vpop.permute.xlu1 %751 }
 0x6ae   :  { %v750_v59 = vpop.permute.xlu1 %749 }
 0x6b2   :  { %v748_v60 = vpop.permute.xlu1 %747 }
 0x6b4   :  { %v15256_v39 = vpop.eup %15255 }
 0x6b5   :  { %v601_v40 = vsel %vm330_vm4, %v15256_v39, 0.0 }
 0x6b6   :  { %v15258_v41 = vpop.eup %15257  ;;  %602 = vadd.xlane.f32.xlu0 %v601_v40  ;;  %v176_v40 = vld [vmem:[%s18452_s3 + $0x8] sm:$0xf] }
 0x6b7   :  { %v598_v42 = vsel %vm330_vm4, %v15258_v41, 0.0 }
 0x6ba   :  { %599 = vadd.xlane.f32.xlu0 %v598_v42 }
 0x6d0   :  { %610 = vrot.lane.b32.xlu0 %v15854_v55, %s15730_s12 }
 0x6d4   :  { %745 = vrot.lane.b32.xlu0 %v15848_v52, %s15732_s14  ;;  %v15912_v43 = vpop.f32.mrf.mxu0 }
 0x6d5   :  { %v493_v20 = vadd.f32 %v12756_v18, %v15912_v43 }
 0x6d6   :  { %v13958_v44 = vpop.f32.mrf.mxu0 }
 0x6d8   :  { %v15914_v45 = vpop.f32.mrf.mxu0 }
 0x6d9   :  { %v494_v24 = vadd.f32 %v12756_v18, %v15914_v45 }
 0x6da   :  { %v13959_v46 = vpop.f32.mrf.mxu0 }
 0x73f   :  { %v603_v47 = vpop.xlane.xlu0 %602 }
 0x740   :  { %15259 = vrcp.f32 %v603_v47 }
 0x743   :  { %v600_v48 = vpop.xlane.xlu0 %599 }
 0x744   :  { %15261 = vrcp.f32 %v600_v48 }
 0x747   :  { %v611_v50 = vpop.permute.xlu0 %610 }
 0x748   :  { %13967 = vmatprep.subr.mxu0 %v611_v50 }
 0x749   :  { %13968 = vmatpush3.msra.mxu0 %v611_v50 }
 0x74a   :  { %13969 = vmatprep.subr.mxu0 %v609_v49 }
 0x74b   :  { %13970 = vmatpush3.msra.mxu0 %v609_v49  ;;  %v746_v58 = vpop.permute.xlu0 %745 }
 0x74c   :  { %13980 = vmatprep.subr.msk.mxu0 %vm246_vm3, %v752_v51 }
 0x74d   :  { %v15260_v53 = vpop.eup %15259 }
 0x74e   :  { %v607_v57 = vmul.f32 %v15260_v53, %v15256_v39 }
 0x751   :  { %v15262_v54 = vpop.eup %15261 }
 0x752   :  { %v605_v56 = vmul.f32 %v15262_v54, %v15258_v41  ;;  %v950_v41 = vsel %vm444_vm5, %v176_v40, 0 }
 0x754   :  { %13971 = vmatprep.mubr.msk.f32.mxu0 %vm330_vm4, %v605_v56 }
 0x755   :  { %13972 = vmatmul.mubr.msk.f32.vlgmr.msra.gmra.mxu0 %vm330_vm4, %v607_v57 }
 0x756   :  { %13981 = vmatpush3.xpose.msk.msra.mxu0 %vm246_vm3, %v752_v51  ;;  %13984 = vmatprep.mubr.msk.f32.mxu0 %vm246_vm3, %v746_v58 }
 0x757   :  { %13982 = vmatprep.subr.msk.mxu0 %vm246_vm3, %v750_v59 }
 0x75a   :  { %13983 = vmatpush3.xpose.msk.msra.mxu0 %vm246_vm3, %v750_v59 }
 0x75b   :  { %13994 = vmatprep.subr.bf16.mxu0 %v15724_v0 }
 0x75d   :  { %13985 = vmatmul.mubr.msk.f32.vlgmr.msra.gmra.mxu0 %vm246_vm3, %v748_v60 }
 0x75e   :  { %13996 = vmatprep.mubr.msk.bf16.mxu0 %vm15725_vm0, %v15724_v0  ;;  %13995 = vmatpush3.bf16.msra.mxu0 %v950_v41 }
 0x815   :  { %v13973_v63 = vpop.f32.mrf.mxu0 }
 0x817   :  { %v686_v1 = vpop.f32.mrf.mxu0 }
 0x818   :  { %v695_v2 = vpack.c.bf16 %v13973_v63, %v686_v1 }
 0x81a   :  { %13977 = vmatmul.mubr.msk.bf16.vlgmr.msra.gmra.mxu1 %vm246_vm3, %v695_v2 }
 0x81d   :  { %v13986_v3 = vpop.f32.mrf.mxu0 }
 0x81e   :  { %v839_v4 = vsel %vm330_vm4, %v13986_v3, -inf }
 0x81f   :  { %840 = vmax.xlane.f32.xlu1 %v839_v4  ;;  %v827_v5 = vpop.f32.mrf.mxu0 }
 0x820   :  { %v836_v6 = vsel %vm330_vm4, %v827_v5, -inf }
 0x821   :  { %837 = vmax.xlane.f32.xlu0 %v836_v6 }
 0x830   :  { %858 = vrot.lane.b32.xlu1 %v15848_v52, %s15733_s17 }
 0x834   :  { %1001 = vrot.lane.b32.xlu1 %v15854_v55, %s15734_s18 }
 0x838   :  { %999 = vrot.lane.b32.xlu1 %v15848_v52, %s15734_s18 }
 0x83c   :  { %997 = vrot.lane.b32.xlu1 %v15854_v55, %s15735_s19 }
 0x8a8   :  { %v841_v7 = vpop.xlane.xlu1 %840 }
 0x8a9   :  { %v843_v8 = vsub.f32 %v13986_v3, %v841_v7 }
 0x8aa   :  { %v838_v9 = vpop.xlane.xlu0 %837 }
 0x8ab   :  { %v846_v10 = vmul.f32 1.442695, %v843_v8  ;;  %v842_v11 = vsub.f32 %v827_v5, %v838_v9 }
 0x8ac   :  { %v859_v30 = vpop.permute.xlu1 %858 }
 0x8ad   :  { %15263 = vpow2.f32 %v846_v10  ;;  %v844_v12 = vmul.f32 1.442695, %v842_v11  ;;  %v177_v10 = vld [vmem:[%s18452_s3 + $0xc] sm:$0xf] }
 0x8ae   :  { %v1200_v11 = vsel %vm444_vm5, %v177_v10, 0 }
 0x8af   :  { %15265 = vpow2.f32 %v844_v12 }
 0x8b0   :  { %v1002_v32 = vpop.permute.xlu1 %1001 }
 0x8b4   :  { %v1000_v38 = vpop.permute.xlu1 %999 }
 0x8b8   :  { %v998_v39 = vpop.permute.xlu1 %997 }
 0x8ba   :  { %v15264_v14 = vpop.eup %15263 }
 0x8bb   :  { %v851_v15 = vsel %vm330_vm4, %v15264_v14, 0.0 }
 0x8bc   :  { %v15266_v16 = vpop.eup %15265  ;;  %852 = vadd.xlane.f32.xlu0 %v851_v15 }
 0x8bd   :  { %v848_v17 = vsel %vm330_vm4, %v15266_v16, 0.0 }
 0x8c0   :  { %849 = vadd.xlane.f32.xlu0 %v848_v17 }
 0x8d6   :  { %860 = vrot.lane.b32.xlu0 %v15854_v55, %s15733_s17 }
 0x8da   :  { %995 = vrot.lane.b32.xlu0 %v15848_v52, %s15735_s19  ;;  %v736_v21 = vpop.f32.mrf.mxu1 }
 0x8db   :  { %v15952_v22 = vadd.f32 %v736_v21, %v493_v20 }
 0x8dc   :  { %v13978_v23 = vpop.f32.mrf.mxu1 }
 0x8de   :  { %v739_v25 = vpop.f32.mrf.mxu1 }
 0x8df   :  { %v15955_v26 = vadd.f32 %v739_v25, %v494_v24 }
 0x8e0   :  { %v13979_v27 = vpop.f32.mrf.mxu1 }
 0x945   :  { %v853_v28 = vpop.xlane.xlu0 %852 }
 0x946   :  { %15267 = vrcp.f32 %v853_v28 }
 0x949   :  { %v850_v29 = vpop.xlane.xlu0 %849 }
 0x94a   :  { %15269 = vrcp.f32 %v850_v29 }
 0x94d   :  { %v861_v31 = vpop.permute.xlu0 %860 }
 0x94e   :  { %13987 = vmatprep.subr.mxu1 %v861_v31 }
 0x94f   :  { %13988 = vmatpush3.msra.mxu1 %v861_v31 }
 0x950   :  { %13989 = vmatprep.subr.mxu1 %v859_v30 }
 0x951   :  { %13990 = vmatpush3.msra.mxu1 %v859_v30  ;;  %v996_v37 = vpop.permute.xlu0 %995 }
 0x952   :  { %14000 = vmatprep.subr.msk.mxu1 %vm246_vm3, %v1002_v32 }
 0x953   :  { %v15268_v33 = vpop.eup %15267 }
 0x954   :  { %v857_v36 = vmul.f32 %v15268_v33, %v15264_v14 }
 0x957   :  { %v15270_v34 = vpop.eup %15269 }
 0x958   :  { %v855_v35 = vmul.f32 %v15270_v34, %v15266_v16 }
 0x95a   :  { %13991 = vmatprep.mubr.msk.f32.mxu1 %vm330_vm4, %v855_v35  ;;  %v15165_v35 = vld [vmem:[%s18453_s4 + $0x8] sm:$0xff]  }
 0x95b   :  { %13992 = vmatmul.mubr.msk.f32.vlgmr.msra.gmra.mxu1 %vm330_vm4, %v857_v36  ;;  %v15166_v36 = vld [vmem:[%s18453_s4] sm:$0xff]  }
 0x95c   :  { %14001 = vmatpush3.xpose.msk.msra.mxu1 %vm246_vm3, %v1002_v32  ;;  %14004 = vmatprep.mubr.msk.f32.mxu1 %vm246_vm3, %v996_v37 }
 0x95d   :  { %14002 = vmatprep.subr.msk.mxu1 %vm246_vm3, %v1000_v38 }
 0x960   :  { %14003 = vmatpush3.xpose.msk.msra.mxu1 %vm246_vm3, %v1000_v38 }
 0x961   :  { %14014 = vmatprep.subr.bf16.mxu1 %v15724_v0 }
 0x963   :  { %14005 = vmatmul.mubr.msk.f32.vlgmr.msra.gmra.mxu1 %vm246_vm3, %v998_v39 }
 0x964   :  { %14016 = vmatprep.mubr.msk.bf16.mxu1 %vm15725_vm0, %v15724_v0  ;;  %14015 = vmatpush3.bf16.msra.mxu1 %v1200_v11 }
 0x965   :  { %14028 = vmatprep.subr.bf16.mxu1 %v15724_v0 }
 0xa1b   :  { %v13993_v42 = vpop.f32.mrf.mxu1 }
 0xa1d   :  { %v936_v43 = vpop.f32.mrf.mxu1 }
 0xa1e   :  { %v945_v44 = vpack.c.bf16 %v13993_v42, %v936_v43 }
 0xa20   :  { %13997 = vmatmul.mubr.msk.bf16.vlgmr.msra.gmra.mxu0 %vm246_vm3, %v945_v44 }
 0xa23   :  { %v14006_v45 = vpop.f32.mrf.mxu1 }
 0xa24   :  { %v1089_v46 = vsel %vm330_vm4, %v14006_v45, -inf }
 0xa25   :  { %1090 = vmax.xlane.f32.xlu1 %v1089_v46  ;;  %v1077_v47 = vpop.f32.mrf.mxu1 }
 0xa26   :  { %v1086_v48 = vsel %vm330_vm4, %v1077_v47, -inf }
 0xa27   :  { %1087 = vmax.xlane.f32.xlu0 %v1086_v48 }
 0xa36   :  { %1108 = vrot.lane.b32.xlu1 %v15848_v52, %s15736_s24 }
 0xaae   :  { %v1091_v49 = vpop.xlane.xlu1 %1090 }
 0xaaf   :  { %v1093_v50 = vsub.f32 %v14006_v45, %v1091_v49  ;;  %v12778_v45 = vld [vmem:[%s18450_s6 + $0x4] ss:$0 sm:$0xff]  ;;  %v12779_v49 = vld [vmem:[%s18450_s6 + $0x5] ss:$0 sm:$0xff] }
 0xab0   :  { %v1088_v51 = vpop.xlane.xlu0 %1087 }
 0xab1   :  { %v1096_v53 = vmul.f32 1.442695, %v1093_v50  ;;  %v1092_v54 = vsub.f32 %v1077_v47, %v1088_v51 }
 0xab2   :  { %v1109_v6 = vpop.permute.xlu1 %1108 }
 0xab3   :  { %15271 = vpow2.f32 %v1096_v53  ;;  %v1094_v56 = vmul.f32 1.442695, %v1092_v54 }
 0xab5   :  { %15273 = vpow2.f32 %v1094_v56  ;;  %v15167_v56 = vld [vmem:[%s18448_s5 + $0x18] sm:$0xff]  }
 0xac0   :  { %v15272_v57 = vpop.eup %15271 }
 0xac1   :  { %v1101_v58 = vsel %vm330_vm4, %v15272_v57, 0.0 }
 0xac2   :  { %v15274_v59 = vpop.eup %15273  ;;  %1102 = vadd.xlane.f32.xlu0 %v1101_v58  ;;  %v15169_v58 = vld [vmem:[%s18448_s5 + $0x8] sm:$0xff]  }
 0xac3   :  { %v1098_v60 = vsel %vm330_vm4, %v15274_v59, 0.0 }
 0xac6   :  { %1099 = vadd.xlane.f32.xlu0 %v1098_v60  ;;  %v12780_v60 = vld [vmem:[%s18450_s6 + $0x6] ss:$0 sm:$0xff] }
 0xadc   :  { %1110 = vrot.lane.b32.xlu0 %v15854_v55, %s15736_s24 }
 0xae0   :  { %v986_v52 = vpop.f32.mrf.mxu0 }
 0xae1   :  { %v993_v61 = vadd.f32 %v986_v52, %v15952_v22 }
 0xae2   :  { %v13998_v62 = vpop.f32.mrf.mxu0 }
 0xae4   :  { %v989_v63 = vpop.f32.mrf.mxu0 }
 0xae5   :  { %v994_v1 = vadd.f32 %v989_v63, %v15955_v26 }
 0xae6   :  { %v13999_v2 = vpop.f32.mrf.mxu0 }
 0xb4b   :  { %v1103_v3 = vpop.xlane.xlu0 %1102 }
 0xb4c   :  { %15275 = vrcp.f32 %v1103_v3 }
 0xb4f   :  { %v1100_v4 = vpop.xlane.xlu0 %1099 }
 0xb50   :  { %15277 = vrcp.f32 %v1100_v4 }
 0xb53   :  { %v1111_v5 = vpop.permute.xlu0 %1110 }
 0xb54   :  { %14007 = vmatprep.subr.mxu0 %v1111_v5 }
 0xb55   :  { %14008 = vmatpush3.msra.mxu0 %v1111_v5 }
 0xb56   :  { %14009 = vmatprep.subr.mxu0 %v1109_v6 }
 0xb57   :  { %14010 = vmatpush3.msra.mxu0 %v1109_v6 }
 0xb58   :  { %14020 = vmatprep.subr.bf16.mxu0 %v15724_v0 }
 0xb59   :  { %v15276_v55 = vpop.eup %15275 }
 0xb5a   :  { %v1107_v9 = vmul.f32 %v15276_v55, %v15272_v57  ;;  %v15168_v57 = vld [vmem:[%s18448_s5 + $0x10] sm:$0xff]  }
 0xb5d   :  { %v15278_v7 = vpop.eup %15277 }
 0xb5e   :  { %v1105_v8 = vmul.f32 %v15278_v7, %v15274_v59  ;;  %v15170_v59 = vld [vmem:[%s18448_s5] sm:$0xff]  }
 0xb60   :  { %14011 = vmatprep.mubr.msk.f32.mxu0 %vm330_vm4, %v1105_v8 }
 0xb61   :  { %14012 = vmatmul.mubr.msk.f32.vlgmr.msra.gmra.mxu0 %vm330_vm4, %v1107_v9 }
 0xb62   :  { %14024 = vmatprep.mubr.msk.bf16.mxu0 %vm15725_vm0, %v15724_v0  ;;  %14021 = vmatpush3.bf16.msra.mxu0 %v15165_v35 }
 0xb63   :  { %14022 = vmatprep.subr.bf16.mxu0 %v15724_v0 }
 0xb66   :  { %14023 = vmatpush3.bf16.msra.mxu0 %v15166_v36 }
 0xb67   :  { %14040 = vmatprep.subr.bf16.mxu0 %v15724_v0 }
 0xc21   :  { %v14013_v12 = vpop.f32.mrf.mxu0 }
 0xc23   :  { %v1186_v14 = vpop.f32.mrf.mxu0 }
 0xc24   :  { %v1195_v15 = vpack.c.bf16 %v14013_v12, %v1186_v14 }
 0xc26   :  { %14017 = vmatmul.mubr.msk.bf16.vlgmr.msra.gmra.mxu1 %vm246_vm3, %v1195_v15 }
 0xc27   :  { %14036 = vmatprep.mubr.msk.bf16.mxu1 %vm15725_vm0, %v15724_v0  ;;  %14029 = vmatpush3.bf16.msra.mxu1 %v15167_v56 }
 0xc28   :  { %14030 = vmatprep.subr.bf16.mxu1 %v15724_v0 }
 0xc2b   :  { %14031 = vmatpush3.bf16.msra.mxu1 %v15168_v57 }
 0xc2c   :  { %14032 = vmatprep.subr.bf16.mxu1 %v15724_v0 }
 0xc2f   :  { %14033 = vmatpush3.bf16.msra.mxu1 %v15169_v58  ;;  %v12791_v58 = vld [vmem:[%s18450_s6 + $0x9] ss:$0 sm:$0xff] }
 0xc30   :  { %14034 = vmatprep.subr.bf16.mxu1 %v15724_v0 }
 0xc33   :  { %14035 = vmatpush3.bf16.msra.mxu1 %v15170_v59 }
 0xce6   :  { %v1236_v16 = vpop.f32.mrf.mxu1 }
 0xce7   :  { %v1243_v17 = vadd.f32 %v1236_v16, %v993_v61 }
 0xce8   :  { %v14018_v18 = vpop.f32.mrf.mxu1 }
 0xce9   :  { %v15997_v20 = vadd.f32 %v1243_v17, %v15816_v13 }
 0xcea   :  { %v1239_v21 = vpop.f32.mrf.mxu1 }
 0xceb   :  { %v1244_v22 = vadd.f32 %v1239_v21, %v994_v1  ;;  %v1249_v23 = vsel %vm129_vm2, %v15997_v20, 0.0 }
 0xcec   :  { %1250 = vadd.xlane.f32.xlu1 %v1249_v23  ;;  %v14019_v24 = vpop.f32.mrf.mxu1 }
 0xced   :  { %v16002_v25 = vadd.f32 %v1244_v22, %v15823_v19  ;;  %v12784_v24 = vld [vmem:[%s18450_s6 + $0x7] ss:$0 sm:$0xff] }
 0xcef   :  { %v1252_v26 = vsel %vm129_vm2, %v16002_v25, 0.0 }
 0xcf0   :  { %1253 = vadd.xlane.f32.xlu0 %v1252_v26 }
 0xd75   :  { %v1251_v27 = vpop.xlane.xlu1 %1250 }
 0xd76   :  { %v1255_v28 = vmul.f32 0.03125, %v1251_v27 }
 0xd78   :  { %v1257_v29 = vsub.f32 %v15997_v20, %v1255_v28 }
 0xd79   :  { %v1254_v13 = vpop.xlane.xlu0 %1253 }
 0xd7a   :  { %v1256_v30 = vmul.f32 0.03125, %v1254_v13  ;;  %v1259_v31 = vmul.f32 %v1257_v29, %v1257_v29 }
 0xd7c   :  { %v1258_v32 = vsub.f32 %v16002_v25, %v1256_v30  ;;  %v1261_v33 = vsel %vm129_vm2, %v1259_v31, 0.0 }
 0xd7d   :  { %1262 = vadd.xlane.f32.xlu0 %v1261_v33 }
 0xd7e   :  { %v1260_v34 = vmul.f32 %v1258_v32, %v1258_v32 }
 0xd80   :  { %v1264_v19 = vsel %vm129_vm2, %v1260_v34, 0.0 }
 0xd81   :  { %1265 = vadd.xlane.f32.xlu1 %v1264_v19 }
 0xe06   :  { %v1263_v37 = vpop.xlane.xlu0 %1262 }
 0xe07   :  { %v1267_v38 = vmul.f32 0.03125, %v1263_v37 }
 0xe09   :  { %v1269_v39 = vadd.f32 1e-06, %v1267_v38 }
 0xe0a   :  { %v1266_v40 = vpop.xlane.xlu1 %1265 }
 0xe0b   :  { %15279 = vrsqrt.f32 %v1269_v39  ;;  %v1268_v41 = vmul.f32 0.03125, %v1266_v40 }
 0xe0d   :  { %v1270_v42 = vadd.f32 1e-06, %v1268_v41 }
 0xe0f   :  { %15281 = vrsqrt.f32 %v1270_v42  ;;  %v15171_v42 = vld [vmem:[%s18451_s2 + $0x18] sm:$0xff]  }
 0xe18   :  { %v15280_v43 = vpop.eup %15279 }
 0xe19   :  { %v1273_v44 = vmul.f32 %v15280_v43, %v1257_v29  ;;  %v15172_v43 = vld [vmem:[%s18451_s2 + $0x10] sm:$0xff]  }
 0xe1b   :  { %v1279_v48 = vmul.f32 %v12778_v45, %v1273_v44 }
 0xe1c   :  { %v15282_v46 = vpop.eup %15281 }
 0xe1d   :  { %v1274_v47 = vmul.f32 %v15282_v46, %v1258_v32  ;;  %v1285_v51 = vadd.f32 %v12779_v49, %v1279_v48 }
 0xe1f   :  { %v1280_v50 = vmul.f32 %v12778_v45, %v1274_v47 }
 0xe21   :  { %v1286_v53 = vadd.f32 %v12779_v49, %v1280_v50 }
 0xe23   :  { %v1292_v54 = vpack.c.bf16 %v1286_v53, %v1285_v51  ;;  %v12790_v53 = vld [vmem:[%s18450_s6 + $0x8] ss:$0 sm:$0xff] }
 0xe25   :  { %14025 = vmatmul.mubr.msk.bf16.vlgmr.msra.gmra.mxu0 %vm129_vm2, %v1292_v54 }
 0xe26   :  { %14044 = vmatprep.mubr.msk.bf16.mxu0 %vm15725_vm0, %v15724_v0  ;;  %14041 = vmatpush3.bf16.msra.mxu0 %v15171_v42 }
 0xe27   :  { %14042 = vmatprep.subr.bf16.mxu0 %v15724_v0 }
 0xe2a   :  { %14043 = vmatpush3.bf16.msra.mxu0 %v15172_v43 }
 0xee5   :  { %v1346_v52 = vpop.f32.mrf.mxu0 }
 0xee6   :  { %v1347_v61 = vadd.f32 %v12780_v60, %v1346_v52 }
 0xee7   :  { %v14026_v62 = vpop.f32.mrf.mxu0 }
 0xee8   :  { %v1353_v63 = vmul.f32 %v1347_v61, %v1347_v61  ;;  %v12800_v62 = vld [vmem:[%s18450_s6 + $0xa] ss:$0 sm:$0xff] }
 0xee9   :  { %v1349_v1 = vpop.f32.mrf.mxu0 }
 0xeea   :  { %v1355_v2 = vmul.f32 %v1353_v63, %v1347_v61  ;;  %v1350_v3 = vadd.f32 %v12780_v60, %v1349_v1 }
 0xeeb   :  { %v14027_v4 = vpop.f32.mrf.mxu0 }
 0xeec   :  { %v1357_v5 = vmul.f32 0.044715, %v1355_v2  ;;  %v1354_v6 = vmul.f32 %v1350_v3, %v1350_v3 }
 0xeee   :  { %v1359_v55 = vadd.f32 %v1357_v5, %v1347_v61  ;;  %v1356_v7 = vmul.f32 %v1354_v6, %v1350_v3 }
 0xef0   :  { %v1361_v8 = vmul.f32 0.7978846, %v1359_v55  ;;  %v1358_v9 = vmul.f32 0.044715, %v1356_v7 }
 0xef2   :  { %15283 = vtanh.f32 %v1361_v8  ;;  %v1360_v10 = vadd.f32 %v1358_v9, %v1350_v3 }
 0xef4   :  { %v1362_v11 = vmul.f32 0.7978846, %v1360_v10 }
 0xef6   :  { %15285 = vtanh.f32 %v1362_v11 }
 0xeff   :  { %v15284_v12 = vpop.eup %15283 }
 0xf00   :  { %v1365_v14 = vadd.f32 1.0, %v15284_v12 }
 0xf02   :  { %v1367_v16 = vmul.f32 0.5, %v1365_v14 }
 0xf03   :  { %v15286_v15 = vpop.eup %15285 }
 0xf04   :  { %v1366_v17 = vadd.f32 1.0, %v15286_v15  ;;  %v1369_v21 = vmul.f32 %v1367_v16, %v1347_v61 }
 0xf06   :  { %v1368_v18 = vmul.f32 0.5, %v1366_v17 }
 0xf08   :  { %v1370_v22 = vmul.f32 %v1368_v18, %v1350_v3 }
 0xf0a   :  { %v1380_v23 = vpack.c.bf16 %v1370_v22, %v1369_v21 }
 0xf0c   :  { %14037 = vmatmul.mubr.msk.bf16.vlgmr.msra.gmra.mxu1 %vm80_vm1, %v1380_v23 }
 0xfcc   :  { %v1446_v26 = vpop.f32.mrf.mxu1 }
 0xfcd   :  { %v1447_v27 = vadd.f32 %v12784_v24, %v1446_v26 }
 0xfce   :  { %v14038_v28 = vpop.f32.mrf.mxu1 }
 0xfcf   :  { %v16050_v29 = vadd.f32 %v1447_v27, %v15997_v20 }
 0xfd0   :  { %v1449_v13 = vpop.f32.mrf.mxu1 }
 0xfd1   :  { %v1450_v30 = vadd.f32 %v12784_v24, %v1449_v13  ;;  %v1457_v31 = vsel %vm129_vm2, %v16050_v29, 0.0 }
 0xfd2   :  { %1458 = vadd.xlane.f32.xlu0 %v1457_v31  ;;  %v14039_v32 = vpop.f32.mrf.mxu1 }
 0xfd3   :  { %v16055_v33 = vadd.f32 %v1450_v30, %v16002_v25 }
 0xfd5   :  { %v1460_v34 = vsel %vm129_vm2, %v16055_v33, 0.0 }
 0xfd6   :  { %1461 = vadd.xlane.f32.xlu1 %v1460_v34 }
0x105b   :  { %v1459_v19 = vpop.xlane.xlu0 %1458 }
0x105c   :  { %v1463_v35 = vmul.f32 0.03125, %v1459_v19 }
0x105e   :  { %v1465_v36 = vsub.f32 %v16050_v29, %v1463_v35 }
0x105f   :  { %v1462_v20 = vpop.xlane.xlu1 %1461 }
0x1060   :  { %v1464_v37 = vmul.f32 0.03125, %v1462_v20  ;;  %v1467_v38 = vmul.f32 %v1465_v36, %v1465_v36  ;;  %v12796_v20 = vld [vmem:[%s18452_s3 + $0x10] sm:$0xf] }
0x1062   :  { %v1466_v39 = vsub.f32 %v16055_v33, %v1464_v37  ;;  %v1469_v40 = vsel %vm129_vm2, %v1467_v38, 0.0  ;;  %v1771_v37 = vsel %vm444_vm5, %v12796_v20, 0 }
0x1063   :  { %1470 = vadd.xlane.f32.xlu0 %v1469_v40 }
0x1064   :  { %v1468_v41 = vmul.f32 %v1466_v39, %v1466_v39 }
0x1066   :  { %v1472_v25 = vsel %vm129_vm2, %v1468_v41, 0.0 }
0x1067   :  { %1473 = vadd.xlane.f32.xlu1 %v1472_v25 }
0x10ec   :  { %v1471_v44 = vpop.xlane.xlu0 %1470 }
0x10ed   :  { %v1475_v45 = vmul.f32 0.03125, %v1471_v44 }
0x10ef   :  { %v1477_v46 = vadd.f32 1e-06, %v1475_v45 }
0x10f0   :  { %v1474_v47 = vpop.xlane.xlu1 %1473 }
0x10f1   :  { %15287 = vrsqrt.f32 %v1477_v46  ;;  %v1476_v48 = vmul.f32 0.03125, %v1474_v47 }
0x10f3   :  { %v1478_v49 = vadd.f32 1e-06, %v1476_v48 }
0x10f5   :  { %15289 = vrsqrt.f32 %v1478_v49 }
0x10fe   :  { %v15288_v50 = vpop.eup %15287 }
0x10ff   :  { %v1481_v51 = vmul.f32 %v15288_v50, %v1465_v36 }
0x1101   :  { %v1487_v57 = vmul.f32 %v12790_v53, %v1481_v51 }
0x1102   :  { %v15290_v54 = vpop.eup %15289 }
0x1103   :  { %v1482_v56 = vmul.f32 %v15290_v54, %v1466_v39  ;;  %v1493_v60 = vadd.f32 %v12791_v58, %v1487_v57 }
0x1105   :  { %v1488_v59 = vmul.f32 %v12790_v53, %v1482_v56 }
0x1107   :  { %v1494_v52 = vadd.f32 %v12791_v58, %v1488_v59 }
0x1109   :  { %v1507_v61 = vpack.c.bf16 %v1494_v52, %v1493_v60 }
0x110b   :  { %14045 = vmatmul.mubr.msk.bf16.vlgmr.msra.gmra.mxu0 %vm129_vm2, %v1507_v61 }
0x11cb   :  { %v1561_v63 = vpop.f32.mrf.mxu0 }
0x11cc   :  { %v16080_v1 = vadd.f32 %v12800_v62, %v1561_v63 }
0x11cd   :  { %v14046_v2 = vpop.f32.mrf.mxu0 }
0x11ce   :  { %1570 = vrot.lane.b32.xlu1 %v16080_v1, %s15726_s29  ;;  %14052 = vmatprep.mubr.msk.f32.mxu0 %vm246_vm3, %v16080_v1 }
0x11cf   :  { %v1564_v3 = vpop.f32.mrf.mxu0 }
0x11d0   :  { %v16086_v4 = vadd.f32 %v12800_v62, %v1564_v3 }
0x11d1   :  { %v14047_v5 = vpop.f32.mrf.mxu0 }
0x11d2   :  { %1572 = vrot.lane.b32.xlu0 %v16086_v4, %s15726_s29 }
0x1240   :  { %v1571_v55 = vpop.permute.xlu1 %1570 }
0x1244   :  { %v1573_v6 = vpop.permute.xlu0 %1572 }
0x1245   :  { %14048 = vmatprep.subr.msk.mxu0 %vm246_vm3, %v1573_v6 }
0x1246   :  { %14049 = vmatpush3.xpose.msk.msra.mxu0 %vm246_vm3, %v1573_v6 }
0x1247   :  { %14050 = vmatprep.subr.msk.mxu0 %vm246_vm3, %v1571_v55 }
0x124a   :  { %14051 = vmatpush3.xpose.msk.msra.mxu0 %vm246_vm3, %v1571_v55 }
0x124b   :  { %14062 = vmatprep.subr.bf16.mxu0 %v15724_v0 }
0x124d   :  { %14053 = vmatmul.mubr.msk.f32.vlgmr.msra.gmra.mxu0 %vm246_vm3, %v16086_v4 }
0x124e   :  { %14064 = vmatprep.mubr.msk.bf16.mxu0 %vm15725_vm0, %v15724_v0  ;;  %14063 = vmatpush3.bf16.msra.mxu0 %v1771_v37 }
0x130d   :  { %v14054_v7 = vpop.f32.mrf.mxu0 }
0x130e   :  { %v1660_v8 = vsel %vm330_vm4, %v14054_v7, -inf }
0x130f   :  { %1661 = vmax.xlane.f32.xlu0 %v1660_v8  ;;  %v1648_v9 = vpop.f32.mrf.mxu0 }
0x1310   :  { %v1657_v10 = vsel %vm330_vm4, %v1648_v9, -inf }
0x1311   :  { %1658 = vmax.xlane.f32.xlu1 %v1657_v10 }
0x1398   :  { %v1662_v11 = vpop.xlane.xlu0 %1661 }
0x1399   :  { %v1664_v12 = vsub.f32 %v14054_v7, %v1662_v11 }
0x139a   :  { %v1659_v14 = vpop.xlane.xlu1 %1658 }
0x139b   :  { %v1667_v15 = vmul.f32 1.442695, %v1664_v12  ;;  %v1663_v16 = vsub.f32 %v1648_v9, %v1659_v14  ;;  %v12797_v9 = vld [vmem:[%s18452_s3 + $0x14] sm:$0xf] }
0x139c   :  { %v2025_v10 = vsel %vm444_vm5, %v12797_v9, 0 }
0x139d   :  { %15291 = vpow2.f32 %v1667_v15  ;;  %v1665_v17 = vmul.f32 1.442695, %v1663_v16 }
0x139f   :  { %15293 = vpow2.f32 %v1665_v17 }
0x13aa   :  { %v15292_v18 = vpop.eup %15291 }
0x13ab   :  { %v1672_v21 = vsel %vm330_vm4, %v15292_v18, 0.0 }
0x13ac   :  { %v15294_v22 = vpop.eup %15293  ;;  %1673 = vadd.xlane.f32.xlu1 %v1672_v21 }
0x13ad   :  { %v1669_v23 = vsel %vm330_vm4, %v15294_v22, 0.0 }
0x13ae   :  { %1670 = vadd.xlane.f32.xlu0 %v1669_v23 }
0x13bd   :  { %1679 = vrot.lane.b32.xlu1 %v16080_v1, %s15727_s30 }
0x13c1   :  { %1826 = vrot.lane.b32.xlu1 %v16086_v4, %s15728_s8 }
0x13c4   :  { %1681 = vrot.lane.b32.xlu0 %v16086_v4, %s15727_s30 }
0x13c5   :  { %1824 = vrot.lane.b32.xlu1 %v16080_v1, %s15728_s8 }
0x13c8   :  { %1820 = vrot.lane.b32.xlu0 %v16080_v1, %s15729_s9 }
0x13c9   :  { %1822 = vrot.lane.b32.xlu1 %v16086_v4, %s15729_s9 }
0x1435   :  { %v1674_v24 = vpop.xlane.xlu1 %1673 }
0x1436   :  { %15295 = vrcp.f32 %v1674_v24 }
0x1437   :  { %v1671_v26 = vpop.xlane.xlu0 %1670 }
0x1438   :  { %15297 = vrcp.f32 %v1671_v26 }
0x1439   :  { %v1680_v27 = vpop.permute.xlu1 %1679 }
0x143b   :  { %v1682_v28 = vpop.permute.xlu0 %1681 }
0x143c   :  { %14055 = vmatprep.subr.mxu1 %v1682_v28 }
0x143d   :  { %14056 = vmatpush3.msra.mxu1 %v1682_v28  ;;  %v1827_v13 = vpop.permute.xlu1 %1826 }
0x143e   :  { %14057 = vmatprep.subr.mxu1 %v1680_v27 }
0x143f   :  { %14058 = vmatpush3.msra.mxu1 %v1680_v27  ;;  %v1821_v19 = vpop.permute.xlu0 %1820 }
0x1440   :  { %14068 = vmatprep.subr.msk.mxu1 %vm246_vm3, %v1827_v13 }
0x1441   :  { %v1825_v35 = vpop.permute.xlu1 %1824 }
0x1443   :  { %v15296_v30 = vpop.eup %15295 }
0x1444   :  { %v1678_v34 = vmul.f32 %v15296_v30, %v15292_v18 }
0x1445   :  { %v15298_v31 = vpop.eup %15297  ;;  %v1823_v36 = vpop.permute.xlu1 %1822 }
0x1446   :  { %v1676_v32 = vmul.f32 %v15298_v31, %v15294_v22 }
0x1448   :  { %14059 = vmatprep.mubr.msk.f32.mxu1 %vm330_vm4, %v1676_v32  ;;  %v12811_v32 = vld [vmem:[%s18450_s6 + $0xb] ss:$0 sm:$0xff] }
0x1449   :  { %14060 = vmatmul.mubr.msk.f32.vlgmr.msra.gmra.mxu1 %vm330_vm4, %v1678_v34 }
0x144a   :  { %14069 = vmatpush3.xpose.msk.msra.mxu1 %vm246_vm3, %v1827_v13  ;;  %14072 = vmatprep.mubr.msk.f32.mxu1 %vm246_vm3, %v1821_v19 }
0x144b   :  { %14070 = vmatprep.subr.msk.mxu1 %vm246_vm3, %v1825_v35 }
0x144e   :  { %14071 = vmatpush3.xpose.msk.msra.mxu1 %vm246_vm3, %v1825_v35 }
0x144f   :  { %14082 = vmatprep.subr.bf16.mxu1 %v15724_v0 }
0x1451   :  { %14073 = vmatmul.mubr.msk.f32.vlgmr.msra.gmra.mxu1 %vm246_vm3, %v1823_v36 }
0x1452   :  { %14084 = vmatprep.mubr.msk.bf16.mxu1 %vm15725_vm0, %v15724_v0  ;;  %14083 = vmatpush3.bf16.msra.mxu1 %v2025_v10 }
0x1509   :  { %v14061_v38 = vpop.f32.mrf.mxu1 }
0x150b   :  { %v1757_v39 = vpop.f32.mrf.mxu1 }
0x150c   :  { %v1766_v40 = vpack.c.bf16 %v14061_v38, %v1757_v39 }
0x150e   :  { %14065 = vmatmul.mubr.msk.bf16.vlgmr.msra.gmra.mxu0 %vm246_vm3, %v1766_v40 }
0x1511   :  { %v14074_v41 = vpop.f32.mrf.mxu1 }
0x1512   :  { %v1914_v25 = vsel %vm330_vm4, %v14074_v41, -inf }
0x1513   :  { %1915 = vmax.xlane.f32.xlu1 %v1914_v25  ;;  %v1902_v42 = vpop.f32.mrf.mxu1 }
0x1514   :  { %v1911_v43 = vsel %vm330_vm4, %v1902_v42, -inf }
0x1515   :  { %1912 = vmax.xlane.f32.xlu0 %v1911_v43 }
0x1524   :  { %1933 = vrot.lane.b32.xlu1 %v16080_v1, %s15730_s12 }
0x1528   :  { %2076 = vrot.lane.b32.xlu1 %v16086_v4, %s15731_s13 }
0x152c   :  { %2074 = vrot.lane.b32.xlu1 %v16080_v1, %s15731_s13 }
0x1530   :  { %2072 = vrot.lane.b32.xlu1 %v16086_v4, %s15732_s14 }
0x159c   :  { %v1916_v44 = vpop.xlane.xlu1 %1915 }
0x159d   :  { %v1918_v45 = vsub.f32 %v14074_v41, %v1916_v44 }
0x159e   :  { %v1913_v46 = vpop.xlane.xlu0 %1912 }
0x159f   :  { %v1921_v47 = vmul.f32 1.442695, %v1918_v45  ;;  %v1917_v48 = vsub.f32 %v1902_v42, %v1913_v46 }
0x15a0   :  { %v1934_v61 = vpop.permute.xlu1 %1933 }
0x15a1   :  { %15299 = vpow2.f32 %v1921_v47  ;;  %v1919_v49 = vmul.f32 1.442695, %v1917_v48 }
0x15a3   :  { %15301 = vpow2.f32 %v1919_v49 }
0x15a4   :  { %v2077_v63 = vpop.permute.xlu1 %2076 }
0x15a8   :  { %v2075_v7 = vpop.permute.xlu1 %2074 }
0x15ac   :  { %v2073_v8 = vpop.permute.xlu1 %2072 }
0x15ae   :  { %v15300_v50 = vpop.eup %15299 }
0x15af   :  { %v1926_v51 = vsel %vm330_vm4, %v15300_v50, 0.0 }
0x15b0   :  { %v15302_v53 = vpop.eup %15301  ;;  %1927 = vadd.xlane.f32.xlu0 %v1926_v51  ;;  %v12798_v51 = vld [vmem:[%s18452_s3 + $0x18] sm:$0xf] }
0x15b1   :  { %v1923_v54 = vsel %vm330_vm4, %v15302_v53, 0.0 }
0x15b4   :  { %1924 = vadd.xlane.f32.xlu0 %v1923_v54 }
0x15ca   :  { %1935 = vrot.lane.b32.xlu0 %v16086_v4, %s15730_s12 }
0x15ce   :  { %2070 = vrot.lane.b32.xlu0 %v16080_v1, %s15732_s14  ;;  %v16147_v56 = vpop.f32.mrf.mxu0 }
0x15cf   :  { %v1818_v34 = vadd.f32 %v12811_v32, %v16147_v56 }
0x15d0   :  { %v14066_v57 = vpop.f32.mrf.mxu0 }
0x15d2   :  { %v16149_v58 = vpop.f32.mrf.mxu0 }
0x15d3   :  { %v1819_v20 = vadd.f32 %v12811_v32, %v16149_v58 }
0x15d4   :  { %v14067_v59 = vpop.f32.mrf.mxu0 }
0x1639   :  { %v1928_v60 = vpop.xlane.xlu0 %1927 }
0x163a   :  { %15303 = vrcp.f32 %v1928_v60 }
0x163d   :  { %v1925_v52 = vpop.xlane.xlu0 %1924 }
0x163e   :  { %15305 = vrcp.f32 %v1925_v52 }
0x1641   :  { %v1936_v62 = vpop.permute.xlu0 %1935 }
0x1642   :  { %14075 = vmatprep.subr.mxu0 %v1936_v62 }
0x1643   :  { %14076 = vmatpush3.msra.mxu0 %v1936_v62 }
0x1644   :  { %14077 = vmatprep.subr.mxu0 %v1934_v61 }
0x1645   :  { %14078 = vmatpush3.msra.mxu0 %v1934_v61  ;;  %v2071_v55 = vpop.permute.xlu0 %2070 }
0x1646   :  { %14088 = vmatprep.subr.msk.mxu0 %vm246_vm3, %v2077_v63 }
0x1647   :  { %v15304_v2 = vpop.eup %15303 }
0x1648   :  { %v1932_v6 = vmul.f32 %v15304_v2, %v15300_v50 }
0x164b   :  { %v15306_v3 = vpop.eup %15305 }
0x164c   :  { %v1930_v5 = vmul.f32 %v15306_v3, %v15302_v53  ;;  %v2275_v53 = vsel %vm444_vm5, %v12798_v51, 0 }
0x164e   :  { %14079 = vmatprep.mubr.msk.f32.mxu0 %vm330_vm4, %v1930_v5 }
0x164f   :  { %14080 = vmatmul.mubr.msk.f32.vlgmr.msra.gmra.mxu0 %vm330_vm4, %v1932_v6 }
0x1650   :  { %14089 = vmatpush3.xpose.msk.msra.mxu0 %vm246_vm3, %v2077_v63  ;;  %14092 = vmatprep.mubr.msk.f32.mxu0 %vm246_vm3, %v2071_v55 }
0x1651   :  { %14090 = vmatprep.subr.msk.mxu0 %vm246_vm3, %v2075_v7 }
0x1654   :  { %14091 = vmatpush3.xpose.msk.msra.mxu0 %vm246_vm3, %v2075_v7 }
0x1655   :  { %14102 = vmatprep.subr.bf16.mxu0 %v15724_v0 }
0x1657   :  { %14093 = vmatmul.mubr.msk.f32.vlgmr.msra.gmra.mxu0 %vm246_vm3, %v2073_v8 }
0x1658   :  { %14104 = vmatprep.mubr.msk.bf16.mxu0 %vm15725_vm0, %v15724_v0  ;;  %14103 = vmatpush3.bf16.msra.mxu0 %v2275_v53 }
0x170f   :  { %v14081_v11 = vpop.f32.mrf.mxu0 }
0x1711   :  { %v2011_v12 = vpop.f32.mrf.mxu0 }
0x1712   :  { %v2020_v14 = vpack.c.bf16 %v14081_v11, %v2011_v12 }
0x1714   :  { %14085 = vmatmul.mubr.msk.bf16.vlgmr.msra.gmra.mxu1 %vm246_vm3, %v2020_v14 }
0x1717   :  { %v14094_v15 = vpop.f32.mrf.mxu0 }
0x1718   :  { %v2164_v16 = vsel %vm330_vm4, %v14094_v15, -inf }
0x1719   :  { %2165 = vmax.xlane.f32.xlu1 %v2164_v16  ;;  %v2152_v17 = vpop.f32.mrf.mxu0 }
0x171a   :  { %v2161_v18 = vsel %vm330_vm4, %v2152_v17, -inf }
0x171b   :  { %2162 = vmax.xlane.f32.xlu0 %v2161_v18 }
0x172a   :  { %2183 = vrot.lane.b32.xlu1 %v16080_v1, %s15733_s17 }
0x172e   :  { %2326 = vrot.lane.b32.xlu1 %v16086_v4, %s15734_s18 }
0x1732   :  { %2324 = vrot.lane.b32.xlu1 %v16080_v1, %s15734_s18 }
0x1736   :  { %2322 = vrot.lane.b32.xlu1 %v16086_v4, %s15735_s19 }
0x17a2   :  { %v2166_v21 = vpop.xlane.xlu1 %2165 }
0x17a3   :  { %v2168_v22 = vsub.f32 %v14094_v15, %v2166_v21 }
0x17a4   :  { %v2163_v23 = vpop.xlane.xlu0 %2162 }
0x17a5   :  { %v2171_v24 = vmul.f32 1.442695, %v2168_v22  ;;  %v2167_v26 = vsub.f32 %v2152_v17, %v2163_v23 }
0x17a6   :  { %v2184_v25 = vpop.permute.xlu1 %2183 }
0x17a7   :  { %15307 = vpow2.f32 %v2171_v24  ;;  %v2169_v27 = vmul.f32 1.442695, %v2167_v26  ;;  %v12799_v24 = vld [vmem:[%s18452_s3 + $0x1c] sm:$0xf] }
0x17a8   :  { %v2525_v26 = vsel %vm444_vm5, %v12799_v24, 0 }
0x17a9   :  { %15309 = vpow2.f32 %v2169_v27 }
0x17aa   :  { %v2327_v43 = vpop.permute.xlu1 %2326 }
0x17ae   :  { %v2325_v49 = vpop.permute.xlu1 %2324 }
0x17b2   :  { %v2323_v50 = vpop.permute.xlu1 %2322 }
0x17b4   :  { %v15308_v28 = vpop.eup %15307 }
0x17b5   :  { %v2176_v13 = vsel %vm330_vm4, %v15308_v28, 0.0 }
0x17b6   :  { %v15310_v30 = vpop.eup %15309  ;;  %2177 = vadd.xlane.f32.xlu0 %v2176_v13 }
0x17b7   :  { %v2173_v31 = vsel %vm330_vm4, %v15310_v30, 0.0 }
0x17ba   :  { %2174 = vadd.xlane.f32.xlu0 %v2173_v31 }
0x17d0   :  { %2185 = vrot.lane.b32.xlu0 %v16086_v4, %s15733_s17 }
0x17d4   :  { %2320 = vrot.lane.b32.xlu0 %v16080_v1, %s15735_s19  ;;  %v2061_v19 = vpop.f32.mrf.mxu1 }
0x17d5   :  { %v16187_v35 = vadd.f32 %v2061_v19, %v1818_v34 }
0x17d6   :  { %v14086_v36 = vpop.f32.mrf.mxu1 }
0x17d8   :  { %v2064_v37 = vpop.f32.mrf.mxu1 }
0x17d9   :  { %v16190_v38 = vadd.f32 %v2064_v37, %v1819_v20 }
0x17da   :  { %v14087_v39 = vpop.f32.mrf.mxu1 }
0x183f   :  { %v2178_v40 = vpop.xlane.xlu0 %2177 }
0x1840   :  { %15311 = vrcp.f32 %v2178_v40 }
0x1843   :  { %v2175_v41 = vpop.xlane.xlu0 %2174 }
0x1844   :  { %15313 = vrcp.f32 %v2175_v41 }
0x1847   :  { %v2186_v42 = vpop.permute.xlu0 %2185 }
0x1848   :  { %14095 = vmatprep.subr.mxu1 %v2186_v42 }
0x1849   :  { %14096 = vmatpush3.msra.mxu1 %v2186_v42 }
0x184a   :  { %14097 = vmatprep.subr.mxu1 %v2184_v25 }
0x184b   :  { %14098 = vmatpush3.msra.mxu1 %v2184_v25  ;;  %v2321_v48 = vpop.permute.xlu0 %2320 }
0x184c   :  { %14108 = vmatprep.subr.msk.mxu1 %vm246_vm3, %v2327_v43 }
0x184d   :  { %v15312_v44 = vpop.eup %15311 }
0x184e   :  { %v2182_v47 = vmul.f32 %v15312_v44, %v15308_v28 }
0x1851   :  { %v15314_v45 = vpop.eup %15313 }
0x1852   :  { %v2180_v46 = vmul.f32 %v15314_v45, %v15310_v30 }
0x1854   :  { %14099 = vmatprep.mubr.msk.f32.mxu1 %vm330_vm4, %v2180_v46  ;;  %v15173_v46 = vld [vmem:[%s18453_s4 + $0x18] sm:$0xff]  }
0x1855   :  { %14100 = vmatmul.mubr.msk.f32.vlgmr.msra.gmra.mxu1 %vm330_vm4, %v2182_v47  ;;  %v15174_v47 = vld [vmem:[%s18453_s4 + $0x10] sm:$0xff]  }
0x1856   :  { %14109 = vmatpush3.xpose.msk.msra.mxu1 %vm246_vm3, %v2327_v43  ;;  %14112 = vmatprep.mubr.msk.f32.mxu1 %vm246_vm3, %v2321_v48 }
0x1857   :  { %14110 = vmatprep.subr.msk.mxu1 %vm246_vm3, %v2325_v49 }
0x185a   :  { %14111 = vmatpush3.xpose.msk.msra.mxu1 %vm246_vm3, %v2325_v49 }
0x185b   :  { %14122 = vmatprep.subr.bf16.mxu1 %v15724_v0 }
0x185d   :  { %14113 = vmatmul.mubr.msk.f32.vlgmr.msra.gmra.mxu1 %vm246_vm3, %v2323_v50 }
0x185e   :  { %14124 = vmatprep.mubr.msk.bf16.mxu1 %vm15725_vm0, %v15724_v0  ;;  %14123 = vmatpush3.bf16.msra.mxu1 %v2525_v26 }
0x185f   :  { %14136 = vmatprep.subr.bf16.mxu1 %v15724_v0 }
0x1915   :  { %v14101_v54 = vpop.f32.mrf.mxu1 }
0x1917   :  { %v2261_v56 = vpop.f32.mrf.mxu1 }
0x1918   :  { %v2270_v57 = vpack.c.bf16 %v14101_v54, %v2261_v56 }
0x191a   :  { %14105 = vmatmul.mubr.msk.bf16.vlgmr.msra.gmra.mxu0 %vm246_vm3, %v2270_v57 }
0x191d   :  { %v14114_v58 = vpop.f32.mrf.mxu1 }
0x191e   :  { %v2414_v59 = vsel %vm330_vm4, %v14114_v58, -inf }
0x191f   :  { %2415 = vmax.xlane.f32.xlu1 %v2414_v59  ;;  %v2402_v60 = vpop.f32.mrf.mxu1 }
0x1920   :  { %v2411_v52 = vsel %vm330_vm4, %v2402_v60, -inf }
0x1921   :  { %2412 = vmax.xlane.f32.xlu0 %v2411_v52 }
0x1930   :  { %2433 = vrot.lane.b32.xlu1 %v16080_v1, %s15736_s24 }
0x19a8   :  { %v2416_v61 = vpop.xlane.xlu1 %2415 }
0x19a9   :  { %v2418_v62 = vsub.f32 %v14114_v58, %v2416_v61  ;;  %v12833_v58 = vld [vmem:[%s18450_s6 + $0xc] ss:$0 sm:$0xff]  ;;  %v12834_v61 = vld [vmem:[%s18450_s6 + $0xd] ss:$0 sm:$0xff] }
0x19aa   :  { %v2413_v63 = vpop.xlane.xlu0 %2412 }
0x19ab   :  { %v2421_v2 = vmul.f32 1.442695, %v2418_v62  ;;  %v2417_v3 = vsub.f32 %v2402_v60, %v2413_v63 }
0x19ac   :  { %v2434_v18 = vpop.permute.xlu1 %2433 }
0x19ad   :  { %15315 = vpow2.f32 %v2421_v2  ;;  %v2419_v5 = vmul.f32 1.442695, %v2417_v3 }
0x19af   :  { %15317 = vpow2.f32 %v2419_v5  ;;  %v15175_v5 = vld [vmem:[%s18448_s5 + $0x38] sm:$0xff]  }
0x19ba   :  { %v15316_v6 = vpop.eup %15315 }
0x19bb   :  { %v2426_v55 = vsel %vm330_vm4, %v15316_v6, 0.0 }
0x19bc   :  { %v15318_v7 = vpop.eup %15317  ;;  %2427 = vadd.xlane.f32.xlu0 %v2426_v55  ;;  %v15177_v55 = vld [vmem:[%s18448_s5 + $0x28] sm:$0xff]  }
0x19bd   :  { %v2423_v8 = vsel %vm330_vm4, %v15318_v7, 0.0 }
0x19c0   :  { %2424 = vadd.xlane.f32.xlu0 %v2423_v8  ;;  %v12839_v8 = vld [vmem:[%s18450_s6 + $0xe] ss:$0 sm:$0xff] }
0x19d6   :  { %2435 = vrot.lane.b32.xlu0 %v16086_v4, %s15736_s24 }
0x19da   :  { %v2311_v1 = vpop.f32.mrf.mxu0 }
0x19db   :  { %v2318_v9 = vadd.f32 %v2311_v1, %v16187_v35 }
0x19dc   :  { %v14106_v10 = vpop.f32.mrf.mxu0 }
0x19de   :  { %v2314_v11 = vpop.f32.mrf.mxu0 }
0x19df   :  { %v2319_v12 = vadd.f32 %v2314_v11, %v16190_v38 }
0x19e0   :  { %v14107_v14 = vpop.f32.mrf.mxu0 }
0x1a45   :  { %v2428_v15 = vpop.xlane.xlu0 %2427 }
0x1a46   :  { %15319 = vrcp.f32 %v2428_v15 }
0x1a49   :  { %v2425_v16 = vpop.xlane.xlu0 %2424 }
0x1a4a   :  { %15321 = vrcp.f32 %v2425_v16 }
0x1a4d   :  { %v2436_v17 = vpop.permute.xlu0 %2435 }
0x1a4e   :  { %14115 = vmatprep.subr.mxu0 %v2436_v17 }
0x1a4f   :  { %14116 = vmatpush3.msra.mxu0 %v2436_v17 }
0x1a50   :  { %14117 = vmatprep.subr.mxu0 %v2434_v18 }
0x1a51   :  { %14118 = vmatpush3.msra.mxu0 %v2434_v18 }
0x1a52   :  { %14128 = vmatprep.subr.bf16.mxu0 %v15724_v0 }
0x1a53   :  { %v15320_v4 = vpop.eup %15319 }
0x1a54   :  { %v2432_v23 = vmul.f32 %v15320_v4, %v15316_v6  ;;  %v15176_v6 = vld [vmem:[%s18448_s5 + $0x30] sm:$0xff]  }
0x1a57   :  { %v15322_v21 = vpop.eup %15321 }
0x1a58   :  { %v2430_v22 = vmul.f32 %v15322_v21, %v15318_v7  ;;  %v15178_v7 = vld [vmem:[%s18448_s5 + $0x20] sm:$0xff]  }
0x1a5a   :  { %14119 = vmatprep.mubr.msk.f32.mxu0 %vm330_vm4, %v2430_v22 }
0x1a5b   :  { %14120 = vmatmul.mubr.msk.f32.vlgmr.msra.gmra.mxu0 %vm330_vm4, %v2432_v23 }
0x1a5c   :  { %14132 = vmatprep.mubr.msk.bf16.mxu0 %vm15725_vm0, %v15724_v0  ;;  %14129 = vmatpush3.bf16.msra.mxu0 %v15173_v46  ;;  %v12861_v46 = vld [vmem:[%s18450_s6 + $0x21] ss:$0 sm:$0xff] }
0x1a5d   :  { %14130 = vmatprep.subr.bf16.mxu0 %v15724_v0 }
0x1a60   :  { %14131 = vmatpush3.bf16.msra.mxu0 %v15174_v47 }
0x1a61   :  { %14148 = vmatprep.subr.bf16.mxu0 %v15724_v0 }
0x1b1b   :  { %v14121_v27 = vpop.f32.mrf.mxu0 }
0x1b1d   :  { %v2511_v28 = vpop.f32.mrf.mxu0 }
0x1b1e   :  { %v2520_v13 = vpack.c.bf16 %v14121_v27, %v2511_v28 }
0x1b20   :  { %14125 = vmatmul.mubr.msk.bf16.vlgmr.msra.gmra.mxu1 %vm246_vm3, %v2520_v13 }
0x1b21   :  { %14144 = vmatprep.mubr.msk.bf16.mxu1 %vm15725_vm0, %v15724_v0  ;;  %14137 = vmatpush3.bf16.msra.mxu1 %v15175_v5 }
0x1b22   :  { %14138 = vmatprep.subr.bf16.mxu1 %v15724_v0 }
0x1b25   :  { %14139 = vmatpush3.bf16.msra.mxu1 %v15176_v6 }
0x1b26   :  { %14140 = vmatprep.subr.bf16.mxu1 %v15724_v0 }
0x1b29   :  { %14141 = vmatpush3.bf16.msra.mxu1 %v15177_v55 }
0x1b2a   :  { %14142 = vmatprep.subr.bf16.mxu1 %v15724_v0 }
0x1b2d   :  { %14143 = vmatpush3.bf16.msra.mxu1 %v15178_v7 }
0x1b2e   :  { %14164 = vmatprep.subr.mxu1 %v15724_v0 }
0x1be0   :  { %v2561_v30 = vpop.f32.mrf.mxu1 }
0x1be1   :  { %v2568_v31 = vadd.f32 %v2561_v30, %v2318_v9 }
0x1be2   :  { %v14126_v32 = vpop.f32.mrf.mxu1 }
0x1be3   :  { %v16232_v34 = vadd.f32 %v2568_v31, %v16050_v29 }
0x1be4   :  { %v2564_v19 = vpop.f32.mrf.mxu1 }
0x1be5   :  { %v2569_v35 = vadd.f32 %v2564_v19, %v2319_v12  ;;  %v2574_v36 = vsel %vm129_vm2, %v16232_v34, 0.0 }
0x1be6   :  { %2575 = vadd.xlane.f32.xlu1 %v2574_v36  ;;  %v14127_v20 = vpop.f32.mrf.mxu1 }
0x1be7   :  { %v16237_v37 = vadd.f32 %v2569_v35, %v16055_v33  ;;  %v15179_v20 = vld [vmem:[%s18452_s3 + $0x48] sm:$0xff]  }
0x1be9   :  { %v2577_v38 = vsel %vm129_vm2, %v16237_v37, 0.0 }
0x1bea   :  { %2578 = vadd.xlane.f32.xlu0 %v2577_v38  ;;  %v15180_v38 = vld [vmem:[%s18452_s3 + $0x40] sm:$0xff]  }
0x1c6f   :  { %v2576_v39 = vpop.xlane.xlu1 %2575 }
0x1c70   :  { %v2580_v40 = vmul.f32 0.03125, %v2576_v39  ;;  %v12851_v39 = vld [vmem:[%s18450_s6 + $0xf] ss:$0 sm:$0xff] }
0x1c72   :  { %v2582_v41 = vsub.f32 %v16232_v34, %v2580_v40 }
0x1c73   :  { %v2579_v29 = vpop.xlane.xlu0 %2578 }
0x1c74   :  { %v2581_v25 = vmul.f32 0.03125, %v2579_v29  ;;  %v2584_v42 = vmul.f32 %v2582_v41, %v2582_v41 }
0x1c76   :  { %v2583_v43 = vsub.f32 %v16237_v37, %v2581_v25  ;;  %v2586_v44 = vsel %vm129_vm2, %v2584_v42, 0.0 }
0x1c77   :  { %2587 = vadd.xlane.f32.xlu0 %v2586_v44 }
0x1c78   :  { %v2585_v45 = vmul.f32 %v2583_v43, %v2583_v43 }
0x1c7a   :  { %v2589_v33 = vsel %vm129_vm2, %v2585_v45, 0.0 }
0x1c7b   :  { %2590 = vadd.xlane.f32.xlu1 %v2589_v33 }
0x1d00   :  { %v2588_v48 = vpop.xlane.xlu0 %2587 }
0x1d01   :  { %v2592_v49 = vmul.f32 0.03125, %v2588_v48 }
0x1d03   :  { %v2594_v50 = vadd.f32 1e-06, %v2592_v49 }
0x1d04   :  { %v2591_v51 = vpop.xlane.xlu1 %2590 }
0x1d05   :  { %15323 = vrsqrt.f32 %v2594_v50  ;;  %v2593_v53 = vmul.f32 0.03125, %v2591_v51  ;;  %v29_v50 = vld [vmem:[%s18450_s6 + $0x40] sm:$0xff] }
0x1d07   :  { %v2595_v54 = vadd.f32 1e-06, %v2593_v53  ;;  %v2856_v53 = vsel %vm129_vm2, %v29_v50, 0.0 }
0x1d09   :  { %15325 = vrsqrt.f32 %v2595_v54 }
0x1d12   :  { %v15324_v56 = vpop.eup %15323 }
0x1d13   :  { %v2598_v57 = vmul.f32 %v15324_v56, %v2582_v41 }
0x1d15   :  { %v2604_v52 = vmul.f32 %v12833_v58, %v2598_v57 }
0x1d16   :  { %v15326_v59 = vpop.eup %15325 }
0x1d17   :  { %v2599_v60 = vmul.f32 %v15326_v59, %v2583_v43  ;;  %v2610_v63 = vadd.f32 %v12834_v61, %v2604_v52 }
0x1d19   :  { %v2605_v62 = vmul.f32 %v12833_v58, %v2599_v60 }
0x1d1b   :  { %v2611_v2 = vadd.f32 %v12834_v61, %v2605_v62 }
0x1d1d   :  { %v2618_v3 = vpack.c.bf16 %v2611_v2, %v2610_v63 }
0x1d1f   :  { %14133 = vmatmul.mubr.msk.bf16.vlgmr.msra.gmra.mxu0 %vm129_vm2, %v2618_v3 }
0x1d20   :  { %14152 = vmatprep.mubr.msk.bf16.mxu0 %vm15725_vm0, %v15724_v0  ;;  %14149 = vmatpush3.bf16.msra.mxu0 %v15179_v20 }
0x1d21   :  { %14150 = vmatprep.subr.bf16.mxu0 %v15724_v0 }
0x1d24   :  { %14151 = vmatpush3.bf16.msra.mxu0 %v15180_v38 }
0x1ddf   :  { %v2672_v1 = vpop.f32.mrf.mxu0 }
0x1de0   :  { %v2673_v9 = vadd.f32 %v12839_v8, %v2672_v1  ;;  %v15181_v1 = vld [vmem:[%s18451_s2 + $0x28] sm:$0xff]  }
0x1de1   :  { %v14134_v10 = vpop.f32.mrf.mxu0  ;;  %14156 = vmatprep.subr.bf16.mxu0 %v15181_v1 }
0x1de2   :  { %v2679_v11 = vmul.f32 %v2673_v9, %v2673_v9 }
0x1de3   :  { %v2675_v12 = vpop.f32.mrf.mxu0 }
0x1de4   :  { %v2681_v14 = vmul.f32 %v2679_v11, %v2673_v9  ;;  %v2676_v15 = vadd.f32 %v12839_v8, %v2675_v12 }
0x1de5   :  { %v14135_v16 = vpop.f32.mrf.mxu0 }
0x1de6   :  { %v2683_v17 = vmul.f32 0.044715, %v2681_v14  ;;  %v2680_v18 = vmul.f32 %v2676_v15, %v2676_v15 }
0x1de8   :  { %v2685_v4 = vadd.f32 %v2683_v17, %v2673_v9  ;;  %v2682_v21 = vmul.f32 %v2680_v18, %v2676_v15 }
0x1dea   :  { %v2687_v22 = vmul.f32 0.7978846, %v2685_v4  ;;  %v2684_v23 = vmul.f32 0.044715, %v2682_v21 }
0x1dec   :  { %15327 = vtanh.f32 %v2687_v22  ;;  %v2686_v24 = vadd.f32 %v2684_v23, %v2676_v15  ;;  %v12865_v23 = vld [vmem:[%s18450_s6 + $0x10] ss:$0 sm:$0xff] }
0x1dee   :  { %v2688_v26 = vmul.f32 0.7978846, %v2686_v24 }
0x1df0   :  { %15329 = vtanh.f32 %v2688_v26 }
0x1df9   :  { %v15328_v27 = vpop.eup %15327 }
0x1dfa   :  { %v2691_v28 = vadd.f32 1.0, %v15328_v27 }
0x1dfc   :  { %v2693_v30 = vmul.f32 0.5, %v2691_v28 }
0x1dfd   :  { %v15330_v13 = vpop.eup %15329 }
0x1dfe   :  { %v2692_v31 = vadd.f32 1.0, %v15330_v13  ;;  %v2695_v19 = vmul.f32 %v2693_v30, %v2673_v9  ;;  %v15182_v9 = vld [vmem:[%s18451_s2 + $0x20] sm:$0xff]   ;;  %v12866_v13 = vld [vmem:[%s18450_s6 + $0x11] ss:$0 sm:$0xff] }
0x1e00   :  { %v2694_v32 = vmul.f32 0.5, %v2692_v31 }
0x1e02   :  { %v2696_v35 = vmul.f32 %v2694_v32, %v2676_v15 }
0x1e04   :  { %v2707_v36 = vpack.c.bf16 %v2696_v35, %v2695_v19 }
0x1e06   :  { %14145 = vmatmul.mubr.msk.bf16.vlgmr.msra.gmra.mxu1 %vm80_vm1, %v2707_v36 }
0x1e07   :  { %14170 = vmatprep.mubr.msk.f32.mxu1 %vm15725_vm0, %v15724_v0 }
0x1ec6   :  { %v2773_v40 = vpop.f32.mrf.mxu1 }
0x1ec7   :  { %v2774_v29 = vadd.f32 %v12851_v39, %v2773_v40 }
0x1ec8   :  { %v14146_v41 = vpop.f32.mrf.mxu1 }
0x1ec9   :  { %v2780_v44 = vadd.f32 %v2774_v29, %v16232_v34 }
0x1eca   :  { %v2776_v25 = vpop.f32.mrf.mxu1 }
0x1ecb   :  { %v2777_v42 = vadd.f32 %v12851_v39, %v2776_v25  ;;  %v12875_v39 = vld [vmem:[%s18450_s6 + $0x12] ss:$0 sm:$0xff] }
0x1ecc   :  { %v14147_v43 = vpop.f32.mrf.mxu1 }
0x1ecd   :  { %v2781_v45 = vadd.f32 %v2777_v42, %v16237_v37 }
0x1ecf   :  { %v2787_v33 = vpack.c.bf16 %v2781_v45, %v2780_v44 }
0x1ed1   :  { %14153 = vmatmul.mubr.msk.bf16.vlgmr.msra.gmra.mxu0 %vm129_vm2, %v2787_v33 }
0x1ed2   :  { %14157 = vmatpush3.bf16.msra.mxu0 %v15181_v1 }
0x1ed3   :  { %14158 = vmatprep.subr.bf16.mxu0 %v15182_v9 }
0x1ed6   :  { %14159 = vmatpush3.bf16.msra.mxu0 %v15182_v9 }
0x1ed7   :  { %14179 = vmatprep.subr.mxu0 %v15724_v0 }
0x1f91   :  { %v2841_v47 = vpop.f32.mrf.mxu0 }
0x1f92   :  { %v16300_v48 = vadd.f32 %v12861_v46, %v2841_v47  ;;  %v16370_v47 = vld [vmem:[%s18450_s6 + $0x2c] ss:$0 sm:$0xff] }
0x1f93   :  { %v14154_v49 = vpop.f32.mrf.mxu0 }
0x1f94   :  { %v2850_v34 = vsel %vm129_vm2, %v16300_v48, 0.0 }
0x1f95   :  { %2851 = vadd.xlane.f32.xlu0 %v2850_v34  ;;  %v2844_v37 = vpop.f32.mrf.mxu0 }
0x1f96   :  { %v16307_v51 = vadd.f32 %v12861_v46, %v2844_v37 }
0x1f97   :  { %v14155_v54 = vpop.f32.mrf.mxu0 }
0x1f98   :  { %v2853_v56 = vsel %vm129_vm2, %v16307_v51, 0.0 }
0x1f99   :  { %2857 = vadd.xlane.f32.xlu0 %v2856_v53  ;;  %2854 = vadd.xlane.f32.xlu1 %v2853_v56 }
0x201e   :  { %v2852_v57 = vpop.xlane.xlu0 %2851 }
0x201f   :  { %v2859_v58 = vmul.f32 0.03125, %v2852_v57 }
0x2021   :  { %v2862_v59 = vsub.f32 %v16300_v48, %v2859_v58 }
0x2022   :  { %v2858_v60 = vpop.xlane.xlu0 %2857  ;;  %v2855_v52 = vpop.xlane.xlu1 %2854 }
0x2023   :  { %v2861_v61 = vmul.f32 0.03125, %v2858_v60  ;;  %v2860_v62 = vmul.f32 0.03125, %v2855_v52  ;;  %v2865_v63 = vmul.f32 %v2862_v59, %v2862_v59 }
0x2025   :  { %v2864_v2 = vsub.f32 %v29_v50, %v2861_v61  ;;  %v2863_v3 = vsub.f32 %v16307_v51, %v2860_v62  ;;  %v2868_v5 = vsel %vm129_vm2, %v2865_v63, 0.0 }
0x2026   :  { %2869 = vadd.xlane.f32.xlu1 %v2868_v5 }
0x2027   :  { %v2867_v6 = vmul.f32 %v2864_v2, %v2864_v2  ;;  %v2866_v55 = vmul.f32 %v2863_v3, %v2863_v3 }
0x2029   :  { %v2874_v7 = vsel %vm129_vm2, %v2867_v6, 0.0  ;;  %v2871_v8 = vsel %vm129_vm2, %v2866_v55, 0.0 }
0x202a   :  { %2875 = vadd.xlane.f32.xlu1 %v2874_v7  ;;  %2872 = vadd.xlane.f32.xlu0 %v2871_v8 }
0x20af   :  { %v2870_v10 = vpop.xlane.xlu1 %2869 }
0x20b0   :  { %v2877_v11 = vmul.f32 0.03125, %v2870_v10 }
0x20b2   :  { %v2880_v12 = vadd.f32 1e-06, %v2877_v11 }
0x20b3   :  { %v2873_v14 = vpop.xlane.xlu0 %2872  ;;  %v2876_v15 = vpop.xlane.xlu1 %2875 }
0x20b4   :  { %15331 = vrsqrt.f32 %v2880_v12  ;;  %v2878_v16 = vmul.f32 0.03125, %v2873_v14  ;;  %v2879_v17 = vmul.f32 0.03125, %v2876_v15 }
0x20b6   :  { %v2881_v18 = vadd.f32 1e-06, %v2878_v16  ;;  %v2882_v4 = vadd.f32 1e-06, %v2879_v17 }
0x20b8   :  { %15333 = vrsqrt.f32 %v2881_v18 }
0x20b9   :  { %15335 = vrsqrt.f32 %v2882_v4 }
0x20c1   :  { %v15332_v21 = vpop.eup %15331 }
0x20c2   :  { %v2886_v22 = vmul.f32 %v15332_v21, %v2862_v59 }
0x20c4   :  { %v2893_v28 = vmul.f32 %v12865_v23, %v2886_v22 }
0x20c5   :  { %v15334_v24 = vpop.eup %15333 }
0x20c6   :  { %v15336_v26 = vpop.eup %15335  ;;  %v2887_v27 = vmul.f32 %v15334_v24, %v2863_v3  ;;  %v2900_v19 = vadd.f32 %v12866_v13, %v2893_v28 }
0x20c7   :  { %v16330_v30 = vmul.f32 %v15336_v26, %v2864_v2 }
0x20c8   :  { %v2894_v31 = vmul.f32 %v12865_v23, %v2887_v27 }
0x20c9   :  { %v2895_v32 = vmul.f32 %v12865_v23, %v16330_v30 }
0x20ca   :  { %v2901_v35 = vadd.f32 %v12866_v13, %v2894_v31 }
0x20cb   :  { %v2902_v36 = vadd.f32 %v12866_v13, %v2895_v32 }
0x20cc   :  { %v2915_v20 = vpack.c.bf16 %v2901_v35, %v2900_v19 }
0x20cd   :  { %v2916_v38 = vpack.c.bf16 %v2902_v36, %v2902_v36  ;;  %v12871_v36 = vld [vmem:[%s18452_s3 + $0x20] sm:$0xf] }
0x20ce   :  { %14160 = vmatprep.mubr.msk.bf16.mxu0 %vm129_vm2, %v2915_v20  ;;  %v3233_v20 = vsel %vm444_vm5, %v12871_v36, 0 }
0x20cf   :  { %14161 = vmatmul.mubr.msk.bf16.vlgmr.msra.gmra.mxu0 %vm129_vm2, %v2916_v38 }
0x20d0   :  { %14185 = vmatprep.mubr.msk.f32.mxu0 %vm15725_vm0, %v15724_v0 }
0x218f   :  { %v14162_v40 = vpop.f32.mrf.mxu0 }
0x2190   :  { %v16340_v41 = vadd.f32 %v14162_v40, %v12875_v39 }
0x2191   :  { %v2973_v29 = vpop.f32.mrf.mxu0 }
0x2192   :  { %2998 = vrot.lane.b32.xlu0 %v16340_v41, %s15726_s29  ;;  %v16348_v44 = vadd.f32 %v12875_v39, %v2973_v29 }
0x2193   :  { %v14163_v25 = vpop.f32.mrf.mxu0 }
0x2195   :  { %v2976_v42 = vpop.f32.mrf.mxu0 }
0x2196   :  { %v16344_v43 = vadd.f32 %v12875_v39, %v2976_v42 }
0x2198   :  { %2996 = vrot.lane.b32.xlu1 %v16344_v43, %s15726_s29 }
0x219c   :  { %2994 = vrot.lane.b32.xlu1 %v16348_v44, %s15726_s29 }
0x2204   :  { %v2999_v45 = vpop.permute.xlu0 %2998 }
0x2205   :  { %14165 = vmatpush3.xpose.msk.msra.mxu1 %vm246_vm3, %v2999_v45 }
0x2206   :  { %14166 = vmatprep.subr.mxu1 %v15724_v0 }
0x220a   :  { %v2997_v33 = vpop.permute.xlu1 %2996 }
0x220b   :  { %14167 = vmatpush3.xpose.msk.msra.mxu1 %vm246_vm3, %v2997_v33 }
0x220c   :  { %14168 = vmatprep.subr.mxu1 %v15724_v0 }
0x220e   :  { %v2995_v46 = vpop.permute.xlu1 %2994 }
0x220f   :  { %14169 = vmatpush3.xpose.msk.msra.mxu1 %vm246_vm3, %v2995_v46 }
0x2210   :  { %15126 = vmatprep.subr.msk.bf16.mxu1 %vm444_vm5, %v12871_v36 }
0x2212   :  { %14171 = vmatmul.mubr.msk.f32.vlgmr.msra.gmra.mxu1 %vm246_vm3, %v16348_v44 }
0x2213   :  { %14173 = vmatprep.mubr.msk.f32.mxu1 %vm15725_vm0, %v15724_v0  ;;  %14195 = vmatpush3.bf16.msra.mxu1 %v3233_v20 }
0x2214   :  { %14215 = vmatprep.subr.mxu1 %v15724_v0 }
0x2216   :  { %14174 = vmatmul.mubr.msk.f32.gmra.mxu1 %vm246_vm3, %v16344_v43 }
0x2217   :  { %14176 = vmatprep.mubr.msk.f32.mxu1 %vm15725_vm0, %v15724_v0 }
0x221a   :  { %14177 = vmatmul.mubr.msk.f32.gmra.mxu1 %vm246_vm3, %v16340_v41 }
0x22d2   :  { %v3078_v49 = vpop.f32.mrf.mxu1 }
0x22d3   :  { %v3079_v50 = vadd.f32 %v16370_v47, %v3078_v49 }
0x22d4   :  { %v14172_v34 = vpop.f32.mrf.mxu1 }
0x22d5   :  { %v3093_v37 = vsel %vm3092_vm6, %v3079_v50, -inf }
0x22d6   :  { %3094 = vmax.xlane.f32.xlu1 %v3093_v37  ;;  %v3083_v53 = vpop.f32.mrf.mxu1 }
0x22d7   :  { %v3084_v54 = vadd.f32 %v16370_v47, %v3083_v53 }
0x22d8   :  { %v14175_v56 = vpop.f32.mrf.mxu1 }
0x22d9   :  { %v3096_v57 = vsel %vm3092_vm6, %v3084_v54, -inf }
0x22da   :  { %3097 = vmax.xlane.f32.xlu0 %v3096_v57  ;;  %v3088_v58 = vpop.f32.mrf.mxu1 }
0x22db   :  { %v3089_v59 = vadd.f32 %v16370_v47, %v3088_v58 }
0x22dc   :  { %v14178_v60 = vpop.f32.mrf.mxu1 }
0x22dd   :  { %v3099_v52 = vsel %vm3092_vm6, %v3089_v59, -inf }
0x22de   :  { %3100 = vmax.xlane.f32.xlu0 %v3099_v52 }
0x22e7   :  { %3130 = vrot.lane.b32.xlu1 %v16340_v41, %s15727_s30 }
0x22eb   :  { %3126 = vrot.lane.b32.xlu1 %v16348_v44, %s15727_s30 }
0x22ef   :  { %3300 = vrot.lane.b32.xlu1 %v16340_v41, %s15728_s8 }
0x22f3   :  { %3298 = vrot.lane.b32.xlu1 %v16344_v43, %s15728_s8 }
0x235f   :  { %v3095_v61 = vpop.xlane.xlu1 %3094 }
0x2360   :  { %v3102_v62 = vsub.f32 %v3079_v50, %v3095_v61 }
0x2362   :  { %v3105_v63 = vmul.f32 1.442695, %v3102_v62 }
0x2363   :  { %v3131_v2 = vpop.permute.xlu1 %3130  ;;  %v3098_v3 = vpop.xlane.xlu0 %3097 }
0x2364   :  { %15337 = vpow2.f32 %v3105_v63  ;;  %v3103_v5 = vsub.f32 %v3084_v54, %v3098_v3  ;;  %14180 = vmatpush3.msra.mxu0 %v3131_v2 }
0x2365   :  { %14181 = vmatprep.subr.mxu0 %v15724_v0 }
0x2366   :  { %v3107_v6 = vmul.f32 1.442695, %v3103_v5 }
0x2367   :  { %v3101_v9 = vpop.xlane.xlu0 %3100  ;;  %v3127_v15 = vpop.permute.xlu1 %3126 }
0x2368   :  { %15339 = vpow2.f32 %v3107_v6  ;;  %v3104_v10 = vsub.f32 %v3089_v59, %v3101_v9 }
0x236a   :  { %v3109_v11 = vmul.f32 1.442695, %v3104_v10 }
0x236b   :  { %v3301_v16 = vpop.permute.xlu1 %3300 }
0x236c   :  { %15341 = vpow2.f32 %v3109_v11 }
0x236f   :  { %v3299_v17 = vpop.permute.xlu1 %3298 }
0x2371   :  { %v15338_v55 = vpop.eup %15337 }
0x2372   :  { %v3111_v7 = vsel %vm3092_vm6, %v15338_v55, 0.0 }
0x2373   :  { %3112 = vadd.xlane.f32.xlu0 %v3111_v7 }
0x2375   :  { %v15340_v8 = vpop.eup %15339 }
0x2376   :  { %v3114_v1 = vsel %vm3092_vm6, %v15340_v8, 0.0 }
0x2377   :  { %3115 = vadd.xlane.f32.xlu1 %v3114_v1 }
0x2379   :  { %v15342_v12 = vpop.eup %15341 }
0x237a   :  { %v3117_v14 = vsel %vm3092_vm6, %v15342_v12, 0.0 }
0x2388   :  { %3290 = vrot.lane.b32.xlu1 %v16348_v44, %s15729_s9 }
0x2389   :  { %3128 = vrot.lane.b32.xlu0 %v16344_v43, %s15727_s30 }
0x238c   :  { %3294 = vrot.lane.b32.xlu1 %v16340_v41, %s15729_s9 }
0x23a8   :  { %3118 = vadd.xlane.f32.xlu0 %v3117_v14 }
0x23be   :  { %3296 = vrot.lane.b32.xlu0 %v16348_v44, %s15728_s8 }
0x23c2   :  { %3292 = vrot.lane.b32.xlu0 %v16344_v43, %s15729_s9 }
0x23fc   :  { %v3113_v18 = vpop.xlane.xlu0 %3112 }
0x23fd   :  { %15343 = vrcp.f32 %v3113_v18 }
0x2400   :  { %v3116_v4 = vpop.xlane.xlu1 %3115  ;;  %v3129_v21 = vpop.permute.xlu0 %3128 }
0x2401   :  { %15345 = vrcp.f32 %v3116_v4  ;;  %14182 = vmatpush3.msra.mxu0 %v3129_v21 }
0x2402   :  { %14183 = vmatprep.subr.mxu0 %v15724_v0 }
0x2403   :  { %14184 = vmatpush3.msra.mxu0 %v3127_v15 }
0x2404   :  { %14200 = vmatprep.subr.mxu0 %v15724_v0  ;;  %v3291_v32 = vpop.permute.xlu1 %3290 }
0x2408   :  { %v3295_v35 = vpop.permute.xlu1 %3294 }
0x240a   :  { %v15344_v22 = vpop.eup %15343 }
0x240b   :  { %v3121_v23 = vmul.f32 %v15344_v22, %v15338_v55 }
0x240d   :  { %14186 = vmatmul.mubr.msk.f32.vlgmr.msra.gmra.mxu0 %vm3092_vm6, %v3121_v23 }
0x240e   :  { %v15346_v24 = vpop.eup %15345  ;;  %14201 = vmatpush3.xpose.msk.msra.mxu0 %vm246_vm3, %v3301_v16  ;;  %14188 = vmatprep.mubr.msk.f32.mxu0 %vm15725_vm0, %v15724_v0 }
0x240f   :  { %14202 = vmatprep.subr.mxu0 %v15724_v0  ;;  %v3123_v26 = vmul.f32 %v15346_v24, %v15340_v8 }
0x2411   :  { %14189 = vmatmul.mubr.msk.f32.gmra.mxu0 %vm3092_vm6, %v3123_v26 }
0x2412   :  { %14203 = vmatpush3.xpose.msk.msra.mxu0 %vm246_vm3, %v3299_v17  ;;  %14191 = vmatprep.mubr.msk.f32.mxu0 %vm15725_vm0, %v15724_v0 }
0x2413   :  { %14204 = vmatprep.subr.mxu0 %v15724_v0 }
0x2431   :  { %v3119_v27 = vpop.xlane.xlu0 %3118 }
0x2432   :  { %15347 = vrcp.f32 %v3119_v27 }
0x2435   :  { %v3297_v28 = vpop.permute.xlu0 %3296 }
0x2436   :  { %14205 = vmatpush3.xpose.msk.msra.mxu0 %vm246_vm3, %v3297_v28 }
0x2439   :  { %v3293_v19 = vpop.permute.xlu0 %3292 }
0x243f   :  { %v15348_v13 = vpop.eup %15347 }
0x2440   :  { %v3125_v31 = vmul.f32 %v15348_v13, %v15342_v12 }
0x2442   :  { %14192 = vmatmul.mubr.msk.f32.gmra.mxu0 %vm3092_vm6, %v3125_v31 }
0x2443   :  { %14206 = vmatprep.mubr.msk.f32.mxu0 %vm15725_vm0, %v15724_v0 }
0x2446   :  { %14207 = vmatmul.mubr.msk.f32.vlgmr.msra.gmra.mxu0 %vm246_vm3, %v3291_v32 }
0x2447   :  { %14209 = vmatprep.mubr.msk.f32.mxu0 %vm15725_vm0, %v15724_v0 }
0x244a   :  { %14210 = vmatmul.mubr.msk.f32.gmra.mxu0 %vm246_vm3, %v3293_v19 }
0x244b   :  { %14212 = vmatprep.mubr.msk.f32.mxu0 %vm15725_vm0, %v15724_v0 }
0x244e   :  { %14213 = vmatmul.mubr.msk.f32.gmra.mxu0 %vm246_vm3, %v3295_v35 }
0x24cd   :  { %v3210_v38 = vpop.f32.mrf.mxu0 }
0x24cf   :  { %v14187_v39 = vpop.f32.mrf.mxu0 }
0x24d1   :  { %v3215_v40 = vpop.f32.mrf.mxu0 }
0x24d2   :  { %v3224_v29 = vpack.c.bf16 %v3215_v40, %v3210_v38  ;;  %v12872_v38 = vld [vmem:[%s18452_s3 + $0x24] sm:$0xf] }
0x24d3   :  { %v14190_v25 = vpop.f32.mrf.mxu0  ;;  %15127 = vmatprep.subr.msk.bf16.mxu0 %vm444_vm5, %v12872_v38  ;;  %v3534_v39 = vsel %vm444_vm5, %v12872_v38, 0 }
0x24d4   :  { %14196 = vmatprep.mubr.msk.bf16.mxu1 %vm246_vm3, %v3224_v29  ;;  %14231 = vmatpush3.bf16.msra.mxu0 %v3534_v39 }
0x24d5   :  { %14251 = vmatprep.subr.mxu0 %v15724_v0 }
0x2502   :  { %v3220_v42 = vpop.f32.mrf.mxu0 }
0x2503   :  { %v3225_v45 = vpack.c.bf16 %v3220_v42, %v3220_v42 }
0x2504   :  { %v14193_v33 = vpop.f32.mrf.mxu0 }
0x2505   :  { %14197 = vmatmul.mubr.msk.bf16.vlgmr.msra.gmra.mxu1 %vm246_vm3, %v3225_v45 }
0x2506   :  { %v3380_v46 = vpop.f32.mrf.mxu0  ;;  %14221 = vmatprep.mubr.msk.f32.mxu1 %vm15725_vm0, %v15724_v0 }
0x2507   :  { %v3381_v49 = vadd.f32 %v16370_v47, %v3380_v46 }
0x2508   :  { %v14208_v50 = vpop.f32.mrf.mxu0 }
0x2509   :  { %v3394_v34 = vsel %vm3092_vm6, %v3381_v49, -inf }
0x250a   :  { %3395 = vmax.xlane.f32.xlu0 %v3394_v34  ;;  %v3385_v37 = vpop.f32.mrf.mxu0 }
0x250b   :  { %v3386_v53 = vadd.f32 %v16370_v47, %v3385_v37 }
0x250c   :  { %v14211_v54 = vpop.f32.mrf.mxu0 }
0x250d   :  { %v3397_v56 = vsel %vm3092_vm6, %v3386_v53, -inf }
0x250e   :  { %3398 = vmax.xlane.f32.xlu1 %v3397_v56  ;;  %v3390_v57 = vpop.f32.mrf.mxu0 }
0x250f   :  { %v3391_v58 = vadd.f32 %v16370_v47, %v3390_v57 }
0x2510   :  { %v14214_v59 = vpop.f32.mrf.mxu0 }
0x2511   :  { %v3400_v60 = vsel %vm3092_vm6, %v3391_v58, -inf }
0x2512   :  { %3401 = vmax.xlane.f32.xlu0 %v3400_v60 }
0x251f   :  { %3429 = vrot.lane.b32.xlu1 %v16344_v43, %s15730_s12 }
0x2523   :  { %3427 = vrot.lane.b32.xlu1 %v16348_v44, %s15730_s12 }
0x2527   :  { %3597 = vrot.lane.b32.xlu1 %v16340_v41, %s15731_s13 }
0x2528   :  { %3431 = vrot.lane.b32.xlu0 %v16340_v41, %s15730_s12 }
0x252b   :  { %3593 = vrot.lane.b32.xlu1 %v16348_v44, %s15731_s13 }
0x2593   :  { %v3396_v52 = vpop.xlane.xlu0 %3395 }
0x2594   :  { %v3403_v61 = vsub.f32 %v3381_v49, %v3396_v52 }
0x2596   :  { %v3406_v62 = vmul.f32 1.442695, %v3403_v61 }
0x2597   :  { %v3399_v63 = vpop.xlane.xlu1 %3398 }
0x2598   :  { %15349 = vpow2.f32 %v3406_v62  ;;  %v3404_v2 = vsub.f32 %v3386_v53, %v3399_v63 }
0x259a   :  { %v3408_v3 = vmul.f32 1.442695, %v3404_v2 }
0x259b   :  { %v3402_v5 = vpop.xlane.xlu0 %3401  ;;  %v3430_v55 = vpop.permute.xlu1 %3429 }
0x259c   :  { %15351 = vpow2.f32 %v3408_v3  ;;  %v3405_v6 = vsub.f32 %v3391_v58, %v3402_v5 }
0x259e   :  { %v3410_v7 = vmul.f32 1.442695, %v3405_v6 }
0x259f   :  { %v3432_v8 = vpop.permute.xlu0 %3431  ;;  %v3428_v1 = vpop.permute.xlu1 %3427 }
0x25a0   :  { %15353 = vpow2.f32 %v3410_v7  ;;  %14216 = vmatpush3.msra.mxu1 %v3432_v8 }
0x25a1   :  { %14217 = vmatprep.subr.mxu1 %v15724_v0 }
0x25a2   :  { %14218 = vmatpush3.msra.mxu1 %v3430_v55 }
0x25a3   :  { %14219 = vmatprep.subr.mxu1 %v15724_v0  ;;  %v3598_v4 = vpop.permute.xlu1 %3597 }
0x25a4   :  { %14220 = vmatpush3.msra.mxu1 %v3428_v1 }
0x25a5   :  { %v15350_v9 = vpop.eup %15349  ;;  %14236 = vmatprep.subr.mxu1 %v15724_v0 }
0x25a6   :  { %v3412_v10 = vsel %vm3092_vm6, %v15350_v9, 0.0 }
0x25a7   :  { %3413 = vadd.xlane.f32.xlu0 %v3412_v10  ;;  %v3594_v22 = vpop.permute.xlu1 %3593 }
0x25a9   :  { %v15352_v11 = vpop.eup %15351 }
0x25aa   :  { %v3415_v12 = vsel %vm3092_vm6, %v15352_v11, 0.0 }
0x25ab   :  { %3416 = vadd.xlane.f32.xlu0 %v3415_v12  ;;  %v16526_v12 = vld [vmem:[%s18450_s6 + $0x13] ss:$0 sm:$0xff] }
0x25ad   :  { %v15354_v14 = vpop.eup %15353 }
0x25ae   :  { %v3418_v15 = vsel %vm3092_vm6, %v15354_v14, 0.0 }
0x25af   :  { %3419 = vadd.xlane.f32.xlu1 %v3418_v15 }
0x25c0   :  { %3589 = vrot.lane.b32.xlu1 %v16344_v43, %s15732_s14 }
0x25c1   :  { %3595 = vrot.lane.b32.xlu0 %v16344_v43, %s15731_s13 }
0x25c5   :  { %3587 = vrot.lane.b32.xlu0 %v16348_v44, %s15732_s14  ;;  %v16461_v16 = vpop.f32.mrf.mxu1 }
0x25c6   :  { %v3289_v15 = vadd.f32 %v16461_v16, %v16526_v12 }
0x25c7   :  { %v16463_v17 = vpop.f32.mrf.mxu1 }
0x25c9   :  { %3591 = vrot.lane.b32.xlu0 %v16340_v41, %s15732_s14  ;;  %v14199_v18 = vpop.f32.mrf.mxu1 }
0x25cb   :  { %v16494_v40 = vpop.f32.mrf.mxu1 }
0x2630   :  { %v3414_v21 = vpop.xlane.xlu0 %3413 }
0x2631   :  { %15355 = vrcp.f32 %v3414_v21 }
0x2634   :  { %v3417_v23 = vpop.xlane.xlu0 %3416 }
0x2635   :  { %15357 = vrcp.f32 %v3417_v23 }
0x2638   :  { %v3420_v24 = vpop.xlane.xlu1 %3419  ;;  %v3596_v31 = vpop.permute.xlu0 %3595 }
0x2639   :  { %15359 = vrcp.f32 %v3420_v24 }
0x263c   :  { %v3588_v35 = vpop.permute.xlu0 %3587  ;;  %v3590_v36 = vpop.permute.xlu1 %3589 }
0x263e   :  { %v15356_v26 = vpop.eup %15355 }
0x263f   :  { %v3422_v27 = vmul.f32 %v15356_v26, %v15350_v9 }
0x2640   :  { %v3592_v20 = vpop.permute.xlu0 %3591 }
0x2641   :  { %14222 = vmatmul.mubr.msk.f32.vlgmr.msra.gmra.mxu1 %vm3092_vm6, %v3422_v27 }
0x2642   :  { %v15358_v28 = vpop.eup %15357  ;;  %14237 = vmatpush3.xpose.msk.msra.mxu1 %vm246_vm3, %v3598_v4  ;;  %14224 = vmatprep.mubr.msk.f32.mxu1 %vm15725_vm0, %v15724_v0 }
0x2643   :  { %14238 = vmatprep.subr.mxu1 %v15724_v0  ;;  %v3424_v13 = vmul.f32 %v15358_v28, %v15352_v11 }
0x2645   :  { %14225 = vmatmul.mubr.msk.f32.gmra.mxu1 %vm3092_vm6, %v3424_v13 }
0x2646   :  { %v15360_v32 = vpop.eup %15359  ;;  %14239 = vmatpush3.xpose.msk.msra.mxu1 %vm246_vm3, %v3596_v31  ;;  %14227 = vmatprep.mubr.msk.f32.mxu1 %vm15725_vm0, %v15724_v0 }
0x2647   :  { %14240 = vmatprep.subr.mxu1 %v15724_v0  ;;  %v3426_v19 = vmul.f32 %v15360_v32, %v15354_v14 }
0x2649   :  { %14228 = vmatmul.mubr.msk.f32.gmra.mxu1 %vm3092_vm6, %v3426_v19 }
0x264a   :  { %14241 = vmatpush3.xpose.msk.msra.mxu1 %vm246_vm3, %v3594_v22  ;;  %14242 = vmatprep.mubr.msk.f32.mxu1 %vm15725_vm0, %v15724_v0 }
0x264d   :  { %14243 = vmatmul.mubr.msk.f32.vlgmr.msra.gmra.mxu1 %vm246_vm3, %v3588_v35 }
0x264e   :  { %14245 = vmatprep.mubr.msk.f32.mxu1 %vm15725_vm0, %v15724_v0 }
0x2651   :  { %14246 = vmatmul.mubr.msk.f32.gmra.mxu1 %vm246_vm3, %v3590_v36 }
0x2652   :  { %14248 = vmatprep.mubr.msk.f32.mxu1 %vm15725_vm0, %v15724_v0 }
0x2655   :  { %14249 = vmatmul.mubr.msk.f32.gmra.mxu1 %vm246_vm3, %v3592_v20 }
0x2701   :  { %v3511_v29 = vpop.f32.mrf.mxu1 }
0x2703   :  { %v14223_v25 = vpop.f32.mrf.mxu1 }
0x2705   :  { %v3516_v42 = vpop.f32.mrf.mxu1 }
0x2706   :  { %v3525_v45 = vpack.c.bf16 %v3516_v42, %v3511_v29 }
0x2707   :  { %v14226_v33 = vpop.f32.mrf.mxu1 }
0x2708   :  { %14232 = vmatprep.mubr.msk.bf16.mxu0 %vm246_vm3, %v3525_v45 }
0x2709   :  { %v3521_v46 = vpop.f32.mrf.mxu1 }
0x270a   :  { %v3526_v49 = vpack.c.bf16 %v3521_v46, %v3521_v46  ;;  %v12873_v46 = vld [vmem:[%s18452_s3 + $0x28] sm:$0xf] }
0x270b   :  { %v14229_v50 = vpop.f32.mrf.mxu1  ;;  %15128 = vmatprep.subr.msk.bf16.mxu1 %vm444_vm5, %v12873_v46 }
0x270c   :  { %14233 = vmatmul.mubr.msk.bf16.vlgmr.msra.gmra.mxu0 %vm246_vm3, %v3526_v49  ;;  %v3831_v49 = vsel %vm444_vm5, %v12873_v46, 0 }
0x270d   :  { %v3677_v34 = vpop.f32.mrf.mxu1  ;;  %14257 = vmatprep.mubr.msk.f32.mxu0 %vm15725_vm0, %v15724_v0  ;;  %14267 = vmatpush3.bf16.msra.mxu1 %v3831_v49 }
0x270e   :  { %v3678_v37 = vadd.f32 %v16370_v47, %v3677_v34  ;;  %14287 = vmatprep.subr.mxu1 %v15724_v0 }
0x270f   :  { %v14244_v53 = vpop.f32.mrf.mxu1 }
0x2710   :  { %v3691_v54 = vsel %vm3092_vm6, %v3678_v37, -inf }
0x2711   :  { %3692 = vmax.xlane.f32.xlu1 %v3691_v54  ;;  %v3682_v56 = vpop.f32.mrf.mxu1 }
0x2712   :  { %v3683_v57 = vadd.f32 %v16370_v47, %v3682_v56 }
0x2713   :  { %v14247_v58 = vpop.f32.mrf.mxu1 }
0x2714   :  { %v3694_v59 = vsel %vm3092_vm6, %v3683_v57, -inf }
0x2715   :  { %3695 = vmax.xlane.f32.xlu0 %v3694_v59  ;;  %v3687_v60 = vpop.f32.mrf.mxu1 }
0x2716   :  { %v3688_v52 = vadd.f32 %v16370_v47, %v3687_v60 }
0x2717   :  { %v14250_v61 = vpop.f32.mrf.mxu1 }
0x2718   :  { %v3697_v62 = vsel %vm3092_vm6, %v3688_v52, -inf }
0x2719   :  { %3698 = vmax.xlane.f32.xlu0 %v3697_v62 }
0x2722   :  { %3728 = vrot.lane.b32.xlu1 %v16340_v41, %s15733_s17 }
0x2726   :  { %3724 = vrot.lane.b32.xlu1 %v16348_v44, %s15733_s17 }
0x272a   :  { %3894 = vrot.lane.b32.xlu1 %v16340_v41, %s15734_s18 }
0x272e   :  { %3892 = vrot.lane.b32.xlu1 %v16344_v43, %s15734_s18 }
0x279a   :  { %v3693_v63 = vpop.xlane.xlu1 %3692 }
0x279b   :  { %v3700_v2 = vsub.f32 %v3678_v37, %v3693_v63 }
0x279d   :  { %v3703_v3 = vmul.f32 1.442695, %v3700_v2 }
0x279e   :  { %v3729_v5 = vpop.permute.xlu1 %3728  ;;  %v3696_v6 = vpop.xlane.xlu0 %3695 }
0x279f   :  { %15361 = vpow2.f32 %v3703_v3  ;;  %v3701_v55 = vsub.f32 %v3683_v57, %v3696_v6  ;;  %14252 = vmatpush3.msra.mxu0 %v3729_v5 }
0x27a0   :  { %14253 = vmatprep.subr.mxu0 %v15724_v0 }
0x27a1   :  { %v3705_v7 = vmul.f32 1.442695, %v3701_v55 }
0x27a2   :  { %v3699_v11 = vpop.xlane.xlu0 %3698  ;;  %v3725_v27 = vpop.permute.xlu1 %3724 }
0x27a3   :  { %15363 = vpow2.f32 %v3705_v7  ;;  %v3702_v14 = vsub.f32 %v3688_v52, %v3699_v11 }
0x27a5   :  { %v3707_v21 = vmul.f32 1.442695, %v3702_v14 }
0x27a6   :  { %v3895_v16 = vpop.permute.xlu1 %3894 }
0x27a7   :  { %15365 = vpow2.f32 %v3707_v21 }
0x27aa   :  { %v3893_v28 = vpop.permute.xlu1 %3892 }
0x27ac   :  { %v15362_v8 = vpop.eup %15361 }
0x27ad   :  { %v3709_v1 = vsel %vm3092_vm6, %v15362_v8, 0.0 }
0x27ae   :  { %3710 = vadd.xlane.f32.xlu0 %v3709_v1 }
0x27b0   :  { %v15364_v9 = vpop.eup %15363 }
0x27b1   :  { %v3712_v10 = vsel %vm3092_vm6, %v15364_v9, 0.0 }
0x27b2   :  { %3713 = vadd.xlane.f32.xlu1 %v3712_v10 }
0x27b4   :  { %v15366_v24 = vpop.eup %15365 }
0x27b5   :  { %v3715_v26 = vsel %vm3092_vm6, %v15366_v24, 0.0 }
0x27c3   :  { %3884 = vrot.lane.b32.xlu1 %v16348_v44, %s15735_s19 }
0x27c4   :  { %3726 = vrot.lane.b32.xlu0 %v16344_v43, %s15733_s17 }
0x27c7   :  { %3888 = vrot.lane.b32.xlu1 %v16340_v41, %s15735_s19 }
0x27cc   :  { %v14234_v18 = vpop.f32.mrf.mxu0 }
0x27cd   :  { %v16530_v4 = vadd.f32 %v14234_v18, %v3289_v15 }
0x27ce   :  { %v16532_v22 = vpop.f32.mrf.mxu0 }
0x27d0   :  { %v14235_v23 = vpop.f32.mrf.mxu0 }
0x27d2   :  { %v16568_v50 = vpop.f32.mrf.mxu0 }
0x27e3   :  { %3716 = vadd.xlane.f32.xlu0 %v3715_v26 }
0x27f9   :  { %3890 = vrot.lane.b32.xlu0 %v16348_v44, %s15734_s18 }
0x27fd   :  { %3886 = vrot.lane.b32.xlu0 %v16344_v43, %s15735_s19 }
0x2837   :  { %v3711_v13 = vpop.xlane.xlu0 %3710 }
0x2838   :  { %15367 = vrcp.f32 %v3711_v13 }
0x283b   :  { %v3714_v31 = vpop.xlane.xlu1 %3713  ;;  %v3727_v32 = vpop.permute.xlu0 %3726 }
0x283c   :  { %15369 = vrcp.f32 %v3714_v31  ;;  %14254 = vmatpush3.msra.mxu0 %v3727_v32 }
0x283d   :  { %14255 = vmatprep.subr.mxu0 %v15724_v0 }
0x283e   :  { %14256 = vmatpush3.msra.mxu0 %v3725_v27 }
0x283f   :  { %14272 = vmatprep.subr.mxu0 %v15724_v0  ;;  %v3885_v42 = vpop.permute.xlu1 %3884 }
0x2843   :  { %v3889_v33 = vpop.permute.xlu1 %3888 }
0x2845   :  { %v15368_v19 = vpop.eup %15367 }
0x2846   :  { %v3719_v35 = vmul.f32 %v15368_v19, %v15362_v8  ;;  %v12874_v19 = vld [vmem:[%s18452_s3 + $0x2c] sm:$0xf] }
0x2848   :  { %14258 = vmatmul.mubr.msk.f32.vlgmr.msra.gmra.mxu0 %vm3092_vm6, %v3719_v35 }
0x2849   :  { %v15370_v36 = vpop.eup %15369  ;;  %14273 = vmatpush3.xpose.msk.msra.mxu0 %vm246_vm3, %v3895_v16  ;;  %14260 = vmatprep.mubr.msk.f32.mxu0 %vm15725_vm0, %v15724_v0 }
0x284a   :  { %14274 = vmatprep.subr.mxu0 %v15724_v0  ;;  %v3721_v20 = vmul.f32 %v15370_v36, %v15364_v9 }
0x284c   :  { %14261 = vmatmul.mubr.msk.f32.gmra.mxu0 %vm3092_vm6, %v3721_v20 }
0x284d   :  { %14275 = vmatpush3.xpose.msk.msra.mxu0 %vm246_vm3, %v3893_v28  ;;  %14263 = vmatprep.mubr.msk.f32.mxu0 %vm15725_vm0, %v15724_v0 }
0x284e   :  { %14276 = vmatprep.subr.mxu0 %v15724_v0 }
0x286c   :  { %v3717_v38 = vpop.xlane.xlu0 %3716 }
0x286d   :  { %15371 = vrcp.f32 %v3717_v38 }
0x2870   :  { %v3891_v39 = vpop.permute.xlu0 %3890 }
0x2871   :  { %14277 = vmatpush3.xpose.msk.msra.mxu0 %vm246_vm3, %v3891_v39 }
0x2872   :  { %15129 = vmatprep.subr.msk.bf16.mxu0 %vm444_vm5, %v12874_v19 }
0x2874   :  { %v3887_v45 = vpop.permute.xlu0 %3886 }
0x287a   :  { %v15372_v29 = vpop.eup %15371 }
0x287b   :  { %v3723_v25 = vmul.f32 %v15372_v29, %v15366_v24 }
0x287d   :  { %14264 = vmatmul.mubr.msk.f32.gmra.mxu0 %vm3092_vm6, %v3723_v25 }
0x287e   :  { %14278 = vmatprep.mubr.msk.f32.mxu0 %vm15725_vm0, %v15724_v0 }
0x2881   :  { %14279 = vmatmul.mubr.msk.f32.vlgmr.msra.gmra.mxu0 %vm246_vm3, %v3885_v42 }
0x2882   :  { %14281 = vmatprep.mubr.msk.f32.mxu0 %vm15725_vm0, %v15724_v0 }
0x2885   :  { %14282 = vmatmul.mubr.msk.f32.gmra.mxu0 %vm246_vm3, %v3887_v45 }
0x2886   :  { %14284 = vmatprep.mubr.msk.f32.mxu0 %vm15725_vm0, %v15724_v0 }
0x2889   :  { %14285 = vmatmul.mubr.msk.f32.gmra.mxu0 %vm246_vm3, %v3889_v33  ;;  %v4128_v33 = vsel %vm444_vm5, %v12874_v19, 0 }
0x288a   :  { %14303 = vmatpush3.bf16.msra.mxu0 %v4128_v33  ;;  %v12927_v33 = vld [vmem:[%s18450_s6 + $0x15] ss:$0 sm:$0xff] }
0x2908   :  { %v3808_v34 = vpop.f32.mrf.mxu0 }
0x290a   :  { %v14259_v37 = vpop.f32.mrf.mxu0 }
0x290c   :  { %v3813_v53 = vpop.f32.mrf.mxu0 }
0x290d   :  { %v3822_v54 = vpack.c.bf16 %v3813_v53, %v3808_v34 }
0x290e   :  { %v14262_v56 = vpop.f32.mrf.mxu0 }
0x290f   :  { %14268 = vmatprep.mubr.msk.bf16.mxu1 %vm246_vm3, %v3822_v54 }
0x293d   :  { %v3818_v57 = vpop.f32.mrf.mxu0 }
0x293e   :  { %v3823_v58 = vpack.c.bf16 %v3818_v57, %v3818_v57 }
0x293f   :  { %v14265_v59 = vpop.f32.mrf.mxu0 }
0x2940   :  { %14269 = vmatmul.mubr.msk.bf16.vlgmr.msra.gmra.mxu1 %vm246_vm3, %v3823_v58  ;;  %v3287_v59 = vadd.f32 %v16526_v12, %v16463_v17 }
0x2941   :  { %v3974_v60 = vpop.f32.mrf.mxu0  ;;  %14293 = vmatprep.mubr.msk.f32.mxu1 %vm15725_vm0, %v15724_v0 }
0x2942   :  { %v3975_v52 = vadd.f32 %v16370_v47, %v3974_v60  ;;  %v3584_v60 = vadd.f32 %v16532_v22, %v3287_v59  ;;  %v15185_v59 = vld [vmem:[%s18448_s5 + $0x58] sm:$0xff]  }
0x2943   :  { %v14280_v61 = vpop.f32.mrf.mxu0  ;;  %14316 = vmatprep.subr.bf16.mxu0 %v15185_v59 }
0x2944   :  { %v3988_v62 = vsel %vm3092_vm6, %v3975_v52, -inf  ;;  %v3288_v61 = vadd.f32 %v16526_v12, %v16494_v40  ;;  %v15709_v40 = vld [vmem:[%s18450_s6 + $0x40] sm:$0xff] }
0x2945   :  { %3989 = vmax.xlane.f32.xlu0 %v3988_v62  ;;  %v3979_v63 = vpop.f32.mrf.mxu0 }
0x2946   :  { %v3980_v2 = vadd.f32 %v16370_v47, %v3979_v63 }
0x2947   :  { %v14283_v3 = vpop.f32.mrf.mxu0 }
0x2948   :  { %v3991_v5 = vsel %vm3092_vm6, %v3980_v2, -inf }
0x2949   :  { %3992 = vmax.xlane.f32.xlu1 %v3991_v5  ;;  %v3984_v6 = vpop.f32.mrf.mxu0 }
0x294a   :  { %v3985_v55 = vadd.f32 %v16370_v47, %v3984_v6 }
0x294b   :  { %v14286_v7 = vpop.f32.mrf.mxu0 }
0x294c   :  { %v3994_v8 = vsel %vm3092_vm6, %v3985_v55, -inf }
0x294d   :  { %3995 = vmax.xlane.f32.xlu0 %v3994_v8 }
0x295a   :  { %4023 = vrot.lane.b32.xlu1 %v16344_v43, %s15736_s24 }
0x29ce   :  { %v3990_v1 = vpop.xlane.xlu0 %3989 }
0x29cf   :  { %v3997_v9 = vsub.f32 %v3975_v52, %v3990_v1 }
0x29d1   :  { %v4000_v10 = vmul.f32 1.442695, %v3997_v9 }
0x29d2   :  { %v3993_v11 = vpop.xlane.xlu1 %3992 }
0x29d3   :  { %15373 = vpow2.f32 %v4000_v10  ;;  %v3998_v14 = vsub.f32 %v3980_v2, %v3993_v11  ;;  %v3585_v2 = vadd.f32 %v16568_v50, %v3288_v61  ;;  %v15188_v61 = vld [vmem:[%s18448_s5 + $0x40] sm:$0xff]  }
0x29d5   :  { %v4002_v15 = vmul.f32 1.442695, %v3998_v14 }
0x29d6   :  { %v3996_v18 = vpop.xlane.xlu0 %3995  ;;  %v4024_v36 = vpop.permute.xlu1 %4023 }
0x29d7   :  { %15375 = vpow2.f32 %v4002_v15  ;;  %v3999_v21 = vsub.f32 %v3985_v55, %v3996_v18 }
0x29d9   :  { %v4004_v23 = vmul.f32 1.442695, %v3999_v21 }
0x29db   :  { %15377 = vpow2.f32 %v4004_v23 }
0x29e0   :  { %v15374_v47 = vpop.eup %15373 }
0x29e1   :  { %v4006_v24 = vsel %vm3092_vm6, %v15374_v47, 0.0 }
0x29e2   :  { %4007 = vadd.xlane.f32.xlu0 %v4006_v24 }
0x29e4   :  { %v15376_v26 = vpop.eup %15375 }
0x29e5   :  { %v4009_v27 = vsel %vm3092_vm6, %v15376_v26, 0.0 }
0x29e6   :  { %4010 = vadd.xlane.f32.xlu0 %v4009_v27 }
0x29e8   :  { %v15378_v43 = vpop.eup %15377 }
0x29e9   :  { %v4012_v16 = vsel %vm3092_vm6, %v15378_v43, 0.0 }
0x29ea   :  { %4013 = vadd.xlane.f32.xlu1 %v4012_v16 }
0x29fb   :  { %4021 = vrot.lane.b32.xlu1 %v16348_v44, %s15736_s24 }
0x29fc   :  { %4025 = vrot.lane.b32.xlu0 %v16340_v41, %s15736_s24 }
0x2a00   :  { %v14270_v28 = vpop.f32.mrf.mxu1 }
0x2a01   :  { %v3883_v13 = vadd.f32 %v14270_v28, %v16530_v4  ;;  %v15183_v28 = vld [vmem:[%s18453_s4 + $0x28] sm:$0xff]  }
0x2a02   :  { %v3867_v31 = vpop.f32.mrf.mxu1 }
0x2a03   :  { %v3881_v62 = vadd.f32 %v3867_v31, %v3584_v60  ;;  %v15186_v60 = vld [vmem:[%s18448_s5 + $0x50] sm:$0xff]  }
0x2a04   :  { %v14271_v32 = vpop.f32.mrf.mxu1 }
0x2a06   :  { %v3870_v46 = vpop.f32.mrf.mxu1 }
0x2a07   :  { %v3882_v6 = vadd.f32 %v3870_v46, %v3585_v2 }
0x2a6b   :  { %v4008_v35 = vpop.xlane.xlu0 %4007 }
0x2a6c   :  { %15379 = vrcp.f32 %v4008_v35 }
0x2a6f   :  { %v4011_v20 = vpop.xlane.xlu0 %4010 }
0x2a70   :  { %15381 = vrcp.f32 %v4011_v20 }
0x2a73   :  { %v4014_v44 = vpop.xlane.xlu1 %4013  ;;  %v4026_v38 = vpop.permute.xlu0 %4025 }
0x2a74   :  { %15383 = vrcp.f32 %v4014_v44  ;;  %14288 = vmatpush3.msra.mxu1 %v4026_v38 }
0x2a75   :  { %14289 = vmatprep.subr.mxu1 %v15724_v0 }
0x2a76   :  { %14290 = vmatpush3.msra.mxu1 %v4024_v36 }
0x2a77   :  { %v4022_v41 = vpop.permute.xlu1 %4021  ;;  %14291 = vmatprep.subr.mxu1 %v15724_v0 }
0x2a78   :  { %14292 = vmatpush3.msra.mxu1 %v4022_v41 }
0x2a79   :  { %v15380_v4 = vpop.eup %15379  ;;  %14308 = vmatprep.subr.bf16.mxu1 %v15183_v28 }
0x2a7a   :  { %v4016_v39 = vmul.f32 %v15380_v4, %v15374_v47 }
0x2a7c   :  { %14294 = vmatmul.mubr.msk.f32.vlgmr.msra.gmra.mxu1 %vm3092_vm6, %v4016_v39 }
0x2a7d   :  { %v15382_v29 = vpop.eup %15381  ;;  %14296 = vmatprep.mubr.msk.f32.mxu1 %vm15725_vm0, %v15724_v0  ;;  %14309 = vmatpush3.bf16.msra.mxu1 %v15183_v28 }
0x2a7e   :  { %v4018_v25 = vmul.f32 %v15382_v29, %v15376_v26  ;;  %v12926_v29 = vld [vmem:[%s18450_s6 + $0x14] ss:$0 sm:$0xff] }
0x2a80   :  { %14297 = vmatmul.mubr.msk.f32.gmra.mxu1 %vm3092_vm6, %v4018_v25 }
0x2a81   :  { %v15384_v42 = vpop.eup %15383  ;;  %14299 = vmatprep.mubr.msk.f32.mxu1 %vm15725_vm0, %v15724_v0 }
0x2a82   :  { %v4020_v45 = vmul.f32 %v15384_v42, %v15378_v43 }
0x2a84   :  { %14300 = vmatmul.mubr.msk.f32.gmra.mxu1 %vm3092_vm6, %v4020_v45 }
0x2b3c   :  { %v4105_v49 = vpop.f32.mrf.mxu1 }
0x2b3e   :  { %v14295_v34 = vpop.f32.mrf.mxu1 }
0x2b40   :  { %v4110_v37 = vpop.f32.mrf.mxu1 }
0x2b41   :  { %v4119_v53 = vpack.c.bf16 %v4110_v37, %v4105_v49 }
0x2b42   :  { %v14298_v54 = vpop.f32.mrf.mxu1 }
0x2b43   :  { %14304 = vmatprep.mubr.msk.bf16.mxu0 %vm246_vm3, %v4119_v53 }
0x2b44   :  { %v4115_v56 = vpop.f32.mrf.mxu1 }
0x2b45   :  { %v4120_v57 = vpack.c.bf16 %v4115_v56, %v4115_v56 }
0x2b46   :  { %v14301_v58 = vpop.f32.mrf.mxu1 }
0x2b47   :  { %14305 = vmatmul.mubr.msk.bf16.vlgmr.msra.gmra.mxu0 %vm246_vm3, %v4120_v57 }
0x2b48   :  { %14317 = vmatpush3.bf16.msra.mxu0 %v15185_v59 }
0x2b49   :  { %14318 = vmatprep.subr.bf16.mxu0 %v15186_v60 }
0x2b4c   :  { %14319 = vmatpush3.bf16.msra.mxu0 %v15186_v60 }
0x2c07   :  { %v14306_v52 = vpop.f32.mrf.mxu0 }
0x2c08   :  { %v4180_v8 = vadd.f32 %v14306_v52, %v3883_v13  ;;  %v15184_v13 = vld [vmem:[%s18453_s4 + $0x20] sm:$0xff]   ;;  %v15187_v52 = vld [vmem:[%s18448_s5 + $0x48] sm:$0xff]  }
0x2c09   :  { %v4164_v63 = vpop.f32.mrf.mxu0  ;;  %14310 = vmatprep.subr.bf16.mxu1 %v15184_v13  ;;  %14320 = vmatprep.subr.bf16.mxu0 %v15187_v52 }
0x2c0a   :  { %v4178_v3 = vadd.f32 %v4164_v63, %v3881_v62  ;;  %v16623_v12 = vadd.f32 %v15709_v40, %v4180_v8  ;;  %14311 = vmatpush3.bf16.msra.mxu1 %v15184_v13  ;;  %14321 = vmatpush3.bf16.msra.mxu0 %v15187_v52  ;;  %v12932_v62 = vld [vmem:[%s18450_s6 + $0x16] ss:$0 sm:$0xff] }
0x2c0b   :  { %v14307_v5 = vpop.f32.mrf.mxu0  ;;  %14322 = vmatprep.subr.bf16.mxu0 %v15188_v61 }
0x2c0c   :  { %v16613_v55 = vadd.f32 %v4178_v3, %v16300_v48  ;;  %v4192_v50 = vsel %vm129_vm2, %v16623_v12, 0.0 }
0x2c0d   :  { %v4167_v7 = vpop.f32.mrf.mxu0 }
0x2c0e   :  { %v4179_v1 = vadd.f32 %v4167_v7, %v3882_v6  ;;  %v4186_v17 = vsel %vm129_vm2, %v16613_v55, 0.0  ;;  %14323 = vmatpush3.bf16.msra.mxu0 %v15188_v61 }
0x2c0f   :  { %4187 = vadd.xlane.f32.xlu1 %v4186_v17  ;;  %14351 = vmatprep.subr.mxu0 %v15724_v0 }
0x2c10   :  { %v16618_v22 = vadd.f32 %v4179_v1, %v16307_v51 }
0x2c12   :  { %v4189_v48 = vsel %vm129_vm2, %v16618_v22, 0.0 }
0x2c13   :  { %4190 = vadd.xlane.f32.xlu0 %v4189_v48 }
0x2c17   :  { %4193 = vadd.xlane.f32.xlu0 %v4192_v50 }
0x2c98   :  { %v4188_v9 = vpop.xlane.xlu1 %4187 }
0x2c99   :  { %v4195_v10 = vmul.f32 0.03125, %v4188_v9 }
0x2c9b   :  { %v4198_v11 = vsub.f32 %v16613_v55, %v4195_v10 }
0x2c9c   :  { %v4191_v51 = vpop.xlane.xlu0 %4190 }
0x2c9d   :  { %v4196_v14 = vmul.f32 0.03125, %v4191_v51  ;;  %v4201_v15 = vmul.f32 %v4198_v11, %v4198_v11 }
0x2c9f   :  { %v4199_v18 = vsub.f32 %v16618_v22, %v4196_v14  ;;  %v4204_v21 = vsel %vm129_vm2, %v4201_v15, 0.0 }
0x2ca0   :  { %4205 = vadd.xlane.f32.xlu0 %v4204_v21  ;;  %v4194_v23 = vpop.xlane.xlu0 %4193 }
0x2ca1   :  { %v4197_v47 = vmul.f32 0.03125, %v4194_v23  ;;  %v4202_v24 = vmul.f32 %v4199_v18, %v4199_v18 }
0x2ca3   :  { %v4200_v26 = vsub.f32 %v16623_v12, %v4197_v47  ;;  %v4207_v27 = vsel %vm129_vm2, %v4202_v24, 0.0 }
0x2ca4   :  { %4208 = vadd.xlane.f32.xlu1 %v4207_v27 }
0x2ca5   :  { %v4203_v43 = vmul.f32 %v4200_v26, %v4200_v26 }
0x2ca7   :  { %v4210_v16 = vsel %vm129_vm2, %v4203_v43, 0.0 }
0x2ca8   :  { %4211 = vadd.xlane.f32.xlu0 %v4210_v16 }
0x2d29   :  { %v4206_v31 = vpop.xlane.xlu0 %4205 }
0x2d2a   :  { %v4213_v32 = vmul.f32 0.03125, %v4206_v31 }
0x2d2c   :  { %v4216_v19 = vadd.f32 1e-06, %v4213_v32 }
0x2d2d   :  { %v4209_v35 = vpop.xlane.xlu1 %4208 }
0x2d2e   :  { %15385 = vrsqrt.f32 %v4216_v19  ;;  %v4214_v36 = vmul.f32 0.03125, %v4209_v35 }
0x2d30   :  { %v4217_v20 = vadd.f32 1e-06, %v4214_v36 }
0x2d31   :  { %v4212_v44 = vpop.xlane.xlu0 %4211 }
0x2d32   :  { %15387 = vrsqrt.f32 %v4217_v20  ;;  %v4215_v38 = vmul.f32 0.03125, %v4212_v44 }
0x2d34   :  { %v4218_v41 = vadd.f32 1e-06, %v4215_v38 }
0x2d36   :  { %15389 = vrsqrt.f32 %v4218_v41  ;;  %v12945_v41 = vld [vmem:[%s18450_s6 + $0x17] ss:$0 sm:$0xff] }
0x2d3b   :  { %v15386_v4 = vpop.eup %15385 }
0x2d3c   :  { %v4222_v39 = vmul.f32 %v15386_v4, %v4198_v11 }
0x2d3e   :  { %v4229_v45 = vmul.f32 %v12926_v29, %v4222_v39 }
0x2d3f   :  { %v15388_v25 = vpop.eup %15387 }
0x2d40   :  { %v4223_v42 = vmul.f32 %v15388_v25, %v4199_v18  ;;  %v4236_v37 = vadd.f32 %v12927_v33, %v4229_v45 }
0x2d42   :  { %v4230_v46 = vmul.f32 %v12926_v29, %v4223_v42 }
0x2d43   :  { %v15390_v49 = vpop.eup %15389 }
0x2d44   :  { %v4224_v34 = vmul.f32 %v15390_v49, %v4200_v26  ;;  %v4237_v53 = vadd.f32 %v12927_v33, %v4230_v46 }
0x2d46   :  { %v4231_v54 = vmul.f32 %v12926_v29, %v4224_v34  ;;  %v4245_v56 = vpack.c.bf16 %v4237_v53, %v4236_v37 }
0x2d48   :  { %v4238_v57 = vadd.f32 %v12927_v33, %v4231_v54  ;;  %14312 = vmatprep.mubr.msk.bf16.mxu1 %vm129_vm2, %v4245_v56 }
0x2d4a   :  { %v4246_v58 = vpack.c.bf16 %v4238_v57, %v4238_v57 }
0x2d4c   :  { %14313 = vmatmul.mubr.msk.bf16.vlgmr.msra.gmra.mxu1 %vm129_vm2, %v4246_v58 }
0x2e0c   :  { %v14314_v63 = vpop.f32.mrf.mxu1 }
0x2e0d   :  { %v4312_v2 = vadd.f32 %v14314_v63, %v12932_v62 }
0x2e0e   :  { %v4303_v3 = vpop.f32.mrf.mxu1 }
0x2e0f   :  { %v4319_v5 = vmul.f32 %v4312_v2, %v4312_v2  ;;  %v4304_v6 = vadd.f32 %v12932_v62, %v4303_v3 }
0x2e10   :  { %v14315_v7 = vpop.f32.mrf.mxu1 }
0x2e11   :  { %v4322_v8 = vmul.f32 %v4319_v5, %v4312_v2  ;;  %v4317_v1 = vmul.f32 %v4304_v6, %v4304_v6  ;;  %v15189_v5 = vld [vmem:[%s18451_s2 + $0x38] sm:$0xff]  }
0x2e12   :  { %v4306_v17 = vpop.f32.mrf.mxu1  ;;  %14328 = vmatprep.subr.bf16.mxu1 %v15189_v5 }
0x2e13   :  { %v4325_v40 = vmul.f32 0.044715, %v4322_v8  ;;  %v4320_v48 = vmul.f32 %v4317_v1, %v4304_v6  ;;  %v4307_v50 = vadd.f32 %v12932_v62, %v4306_v17  ;;  %14329 = vmatpush3.bf16.msra.mxu1 %v15189_v5 }
0x2e15   :  { %v4328_v9 = vadd.f32 %v4325_v40, %v4312_v2  ;;  %v4323_v10 = vmul.f32 0.044715, %v4320_v48  ;;  %v4318_v11 = vmul.f32 %v4307_v50, %v4307_v50 }
0x2e17   :  { %v4331_v51 = vmul.f32 0.7978846, %v4328_v9  ;;  %v4326_v14 = vadd.f32 %v4323_v10, %v4304_v6  ;;  %v4321_v15 = vmul.f32 %v4318_v11, %v4307_v50 }
0x2e19   :  { %15391 = vtanh.f32 %v4331_v51  ;;  %v4329_v18 = vmul.f32 0.7978846, %v4326_v14  ;;  %v4324_v21 = vmul.f32 0.044715, %v4321_v15  ;;  %v12952_v14 = vld [vmem:[%s18450_s6 + $0x18] ss:$0 sm:$0xff] }
0x2e1b   :  { %15393 = vtanh.f32 %v4329_v18  ;;  %v4327_v23 = vadd.f32 %v4324_v21, %v4307_v50 }
0x2e1d   :  { %v4330_v47 = vmul.f32 0.7978846, %v4327_v23 }
0x2e1f   :  { %15395 = vtanh.f32 %v4330_v47 }
0x2e26   :  { %v15392_v24 = vpop.eup %15391 }
0x2e27   :  { %v4337_v27 = vadd.f32 1.0, %v15392_v24  ;;  %v12953_v24 = vld [vmem:[%s18450_s6 + $0x19] ss:$0 sm:$0xff] }
0x2e28   :  { %v15394_v26 = vpop.eup %15393 }
0x2e29   :  { %v4335_v43 = vadd.f32 1.0, %v15394_v26  ;;  %v4340_v28 = vmul.f32 0.5, %v4337_v27 }
0x2e2b   :  { %v4338_v31 = vmul.f32 0.5, %v4335_v43  ;;  %v4343_v19 = vmul.f32 %v4340_v28, %v4312_v2 }
0x2e2c   :  { %v15396_v16 = vpop.eup %15395 }
0x2e2d   :  { %v4336_v13 = vadd.f32 1.0, %v15396_v16  ;;  %v4341_v35 = vmul.f32 %v4338_v31, %v4304_v6  ;;  %v4355_v44 = vpack.c.bf16 %v4343_v19, %v4343_v19  ;;  %v15190_v6 = vld [vmem:[%s18451_s2 + $0x30] sm:$0xff]  }
0x2e2e   :  { %14330 = vmatprep.subr.bf16.mxu1 %v15190_v6 }
0x2e2f   :  { %v4339_v32 = vmul.f32 0.5, %v4336_v13  ;;  %14331 = vmatpush3.bf16.msra.mxu1 %v15190_v6 }
0x2e30   :  { %14336 = vmatprep.subr.mxu1 %v15724_v0 }
0x2e31   :  { %v4342_v36 = vmul.f32 %v4339_v32, %v4307_v50  ;;  %v12962_v32 = vld [vmem:[%s18450_s6 + $0x1a] ss:$0 sm:$0xff] }
0x2e33   :  { %v4354_v20 = vpack.c.bf16 %v4342_v36, %v4341_v35 }
0x2e35   :  { %14324 = vmatprep.mubr.msk.bf16.mxu0 %vm80_vm1, %v4354_v20 }
0x2e36   :  { %14325 = vmatmul.mubr.msk.bf16.vlgmr.msra.gmra.mxu0 %vm80_vm1, %v4355_v44 }
0x2e37   :  { %14357 = vmatprep.mubr.msk.f32.mxu0 %vm15725_vm0, %v15724_v0 }
0x2ef6   :  { %v14326_v38 = vpop.f32.mrf.mxu0 }
0x2ef7   :  { %v4433_v39 = vadd.f32 %v14326_v38, %v12945_v41 }
0x2ef8   :  { %v4424_v4 = vpop.f32.mrf.mxu0 }
0x2ef9   :  { %v4425_v29 = vadd.f32 %v12945_v41, %v4424_v4  ;;  %v16676_v33 = vadd.f32 %v4433_v39, %v16623_v12 }
0x2efa   :  { %v14327_v25 = vpop.f32.mrf.mxu0 }
0x2efb   :  { %v16673_v42 = vadd.f32 %v4425_v29, %v16613_v55  ;;  %v4449_v53 = vsel %vm129_vm2, %v16676_v33, 0.0 }
0x2efc   :  { %v4427_v45 = vpop.f32.mrf.mxu0 }
0x2efd   :  { %v4428_v46 = vadd.f32 %v12945_v41, %v4427_v45  ;;  %v4443_v49 = vsel %vm129_vm2, %v16673_v42, 0.0 }
0x2efe   :  { %4444 = vadd.xlane.f32.xlu1 %v4443_v49 }
0x2eff   :  { %v16681_v34 = vadd.f32 %v4428_v46, %v16618_v22 }
0x2f01   :  { %v4446_v37 = vsel %vm129_vm2, %v16681_v34, 0.0 }
0x2f02   :  { %4447 = vadd.xlane.f32.xlu0 %v4446_v37  ;;  %4450 = vadd.xlane.f32.xlu1 %v4449_v53 }
0x2f87   :  { %v4445_v55 = vpop.xlane.xlu1 %4444 }
0x2f88   :  { %v4452_v54 = vmul.f32 0.03125, %v4445_v55 }
0x2f8a   :  { %v4455_v12 = vsub.f32 %v16673_v42, %v4452_v54  ;;  %v16770_v54 = vld [vmem:[%s18450_s6 + $0x2c] ss:$0 sm:$0xff] }
0x2f8b   :  { %v4448_v56 = vpop.xlane.xlu0 %4447  ;;  %v4451_v57 = vpop.xlane.xlu1 %4450 }
0x2f8c   :  { %v4453_v58 = vmul.f32 0.03125, %v4448_v56  ;;  %v4454_v59 = vmul.f32 0.03125, %v4451_v57  ;;  %v4458_v60 = vmul.f32 %v4455_v12, %v4455_v12 }
0x2f8e   :  { %v4456_v22 = vsub.f32 %v16681_v34, %v4453_v58  ;;  %v4457_v52 = vsub.f32 %v16676_v33, %v4454_v59  ;;  %v4461_v61 = vsel %vm129_vm2, %v4458_v60, 0.0 }
0x2f8f   :  { %4462 = vadd.xlane.f32.xlu0 %v4461_v61 }
0x2f90   :  { %v4459_v62 = vmul.f32 %v4456_v22, %v4456_v22  ;;  %v4460_v63 = vmul.f32 %v4457_v52, %v4457_v52 }
0x2f92   :  { %v4464_v2 = vsel %vm129_vm2, %v4459_v62, 0.0  ;;  %v4467_v3 = vsel %vm129_vm2, %v4460_v63, 0.0 }
0x2f93   :  { %4465 = vadd.xlane.f32.xlu1 %v4464_v2  ;;  %4468 = vadd.xlane.f32.xlu0 %v4467_v3 }
0x3018   :  { %v4463_v7 = vpop.xlane.xlu0 %4462 }
0x3019   :  { %v4470_v8 = vmul.f32 0.03125, %v4463_v7 }
0x301b   :  { %v4473_v1 = vadd.f32 1e-06, %v4470_v8 }
0x301c   :  { %v4469_v17 = vpop.xlane.xlu0 %4468  ;;  %v4466_v40 = vpop.xlane.xlu1 %4465 }
0x301d   :  { %15397 = vrsqrt.f32 %v4473_v1  ;;  %v4472_v48 = vmul.f32 0.03125, %v4469_v17  ;;  %v4471_v50 = vmul.f32 0.03125, %v4466_v40 }
0x301f   :  { %v4475_v9 = vadd.f32 1e-06, %v4472_v48  ;;  %v4474_v10 = vadd.f32 1e-06, %v4471_v50 }
0x3021   :  { %15399 = vrsqrt.f32 %v4475_v9 }
0x3022   :  { %15401 = vrsqrt.f32 %v4474_v10 }
0x302a   :  { %v15398_v11 = vpop.eup %15397 }
0x302b   :  { %v4479_v51 = vmul.f32 %v15398_v11, %v4455_v12 }
0x302d   :  { %v4486_v47 = vmul.f32 %v12952_v14, %v4479_v51 }
0x302e   :  { %v15400_v15 = vpop.eup %15399 }
0x302f   :  { %v15402_v18 = vpop.eup %15401  ;;  %v4481_v21 = vmul.f32 %v15400_v15, %v4457_v52  ;;  %v4493_v16 = vadd.f32 %v12953_v24, %v4486_v47 }
0x3030   :  { %v4480_v23 = vmul.f32 %v15402_v18, %v4456_v22 }
0x3031   :  { %v4488_v26 = vmul.f32 %v12952_v14, %v4481_v21 }
0x3032   :  { %v4487_v27 = vmul.f32 %v12952_v14, %v4480_v23 }
0x3033   :  { %v4495_v43 = vadd.f32 %v12953_v24, %v4488_v26 }
0x3034   :  { %v4494_v28 = vadd.f32 %v12953_v24, %v4487_v27 }
0x3035   :  { %v4509_v13 = vpack.c.bf16 %v4495_v43, %v4495_v43 }
0x3036   :  { %v4508_v31 = vpack.c.bf16 %v4494_v28, %v4493_v16 }
0x3038   :  { %14332 = vmatprep.mubr.msk.bf16.mxu1 %vm129_vm2, %v4508_v31 }
0x3039   :  { %14333 = vmatmul.mubr.msk.bf16.vlgmr.msra.gmra.mxu1 %vm129_vm2, %v4509_v13 }
0x303a   :  { %14342 = vmatprep.mubr.msk.f32.mxu1 %vm15725_vm0, %v15724_v0 }
0x30f9   :  { %v14334_v19 = vpop.f32.mrf.mxu1 }
0x30fa   :  { %v16713_v35 = vadd.f32 %v14334_v19, %v12962_v32 }
0x30fb   :  { %v4566_v36 = vpop.f32.mrf.mxu1 }
0x30fc   :  { %4587 = vrot.lane.b32.xlu1 %v16713_v35, %s15726_s29  ;;  %v16717_v44 = vadd.f32 %v12962_v32, %v4566_v36 }
0x30fd   :  { %v14335_v20 = vpop.f32.mrf.mxu1 }
0x30ff   :  { %v4569_v38 = vpop.f32.mrf.mxu1 }
0x3100   :  { %v16719_v41 = vadd.f32 %v12962_v32, %v4569_v38  ;;  %4583 = vrot.lane.b32.xlu1 %v16717_v44, %s15726_s29 }
0x3102   :  { %4585 = vrot.lane.b32.xlu0 %v16719_v41, %s15726_s29 }
0x3104   :  { %4888 = vrot.lane.b32.xlu1 %v16713_v35, %s15728_s8 }
0x3106   :  { %4884 = vrot.lane.b32.xlu0 %v16717_v44, %s15728_s8 }
0x3108   :  { %4886 = vrot.lane.b32.xlu1 %v16719_v41, %s15728_s8 }
0x310a   :  { %4880 = vrot.lane.b32.xlu0 %v16719_v41, %s15729_s9 }
0x310c   :  { %4878 = vrot.lane.b32.xlu1 %v16717_v44, %s15729_s9 }
0x3110   :  { %4882 = vrot.lane.b32.xlu1 %v16713_v35, %s15729_s9 }
0x316e   :  { %v4588_v4 = vpop.permute.xlu1 %4587 }
0x316f   :  { %14337 = vmatpush3.xpose.msk.msra.mxu1 %vm246_vm3, %v4588_v4 }
0x3170   :  { %14338 = vmatprep.subr.mxu1 %v15724_v0 }
0x3172   :  { %v4584_v39 = vpop.permute.xlu1 %4583 }
0x3174   :  { %v4586_v29 = vpop.permute.xlu0 %4585 }
0x3175   :  { %14339 = vmatpush3.xpose.msk.msra.mxu1 %vm246_vm3, %v4586_v29 }
0x3176   :  { %14340 = vmatprep.subr.mxu1 %v15724_v0  ;;  %v4889_v25 = vpop.permute.xlu1 %4888 }
0x3178   :  { %v4885_v46 = vpop.permute.xlu0 %4884 }
0x3179   :  { %14341 = vmatpush3.xpose.msk.msra.mxu1 %vm246_vm3, %v4584_v39 }
0x317a   :  { %14372 = vmatprep.subr.mxu1 %v15724_v0  ;;  %v4887_v45 = vpop.permute.xlu1 %4886 }
0x317c   :  { %14343 = vmatmul.mubr.msk.f32.vlgmr.msra.gmra.mxu1 %vm246_vm3, %v16717_v44  ;;  %v4881_v37 = vpop.permute.xlu0 %4880 }
0x317d   :  { %14373 = vmatpush3.xpose.msk.msra.mxu1 %vm246_vm3, %v4889_v25  ;;  %14345 = vmatprep.mubr.msk.f32.mxu1 %vm15725_vm0, %v15724_v0 }
0x317e   :  { %14374 = vmatprep.subr.mxu1 %v15724_v0  ;;  %v4879_v49 = vpop.permute.xlu1 %4878 }
0x3180   :  { %14346 = vmatmul.mubr.msk.f32.gmra.mxu1 %vm246_vm3, %v16719_v41 }
0x3181   :  { %14375 = vmatpush3.xpose.msk.msra.mxu1 %vm246_vm3, %v4887_v45  ;;  %14348 = vmatprep.mubr.msk.f32.mxu1 %vm15725_vm0, %v15724_v0 }
0x3182   :  { %14376 = vmatprep.subr.mxu1 %v15724_v0  ;;  %v4883_v53 = vpop.permute.xlu1 %4882 }
0x3184   :  { %14349 = vmatmul.mubr.msk.f32.gmra.mxu1 %vm246_vm3, %v16713_v35 }
0x3185   :  { %14377 = vmatpush3.xpose.msk.msra.mxu1 %vm246_vm3, %v4885_v46  ;;  %14378 = vmatprep.mubr.msk.f32.mxu1 %vm15725_vm0, %v15724_v0 }
0x3188   :  { %14379 = vmatmul.mubr.msk.f32.vlgmr.msra.gmra.mxu1 %vm246_vm3, %v4879_v49 }
0x3189   :  { %14381 = vmatprep.mubr.msk.f32.mxu1 %vm15725_vm0, %v15724_v0 }
0x318c   :  { %14382 = vmatmul.mubr.msk.f32.gmra.mxu1 %vm246_vm3, %v4881_v37 }
0x318d   :  { %14384 = vmatprep.mubr.msk.f32.mxu1 %vm15725_vm0, %v15724_v0 }
0x3190   :  { %14385 = vmatmul.mubr.msk.f32.gmra.mxu1 %vm246_vm3, %v4883_v53 }
0x323c   :  { %v4667_v55 = vpop.f32.mrf.mxu1 }
0x323d   :  { %v4668_v12 = vadd.f32 %v16770_v54, %v4667_v55 }
0x323e   :  { %v14344_v56 = vpop.f32.mrf.mxu1 }
0x323f   :  { %v4681_v57 = vsel %vm3092_vm6, %v4668_v12, -inf }
0x3240   :  { %4682 = vmax.xlane.f32.xlu0 %v4681_v57  ;;  %v4672_v58 = vpop.f32.mrf.mxu1 }
0x3241   :  { %v4673_v59 = vadd.f32 %v16770_v54, %v4672_v58 }
0x3242   :  { %v14347_v60 = vpop.f32.mrf.mxu1 }
0x3243   :  { %v4684_v22 = vsel %vm3092_vm6, %v4673_v59, -inf  ;;  %v12958_v60 = vld [vmem:[%s18452_s3 + $0x30] sm:$0xf] }
0x3244   :  { %4685 = vmax.xlane.f32.xlu1 %v4684_v22  ;;  %v4677_v52 = vpop.f32.mrf.mxu1  ;;  %v4821_v22 = vsel %vm444_vm5, %v12958_v60, 0 }
0x3245   :  { %v4678_v61 = vadd.f32 %v16770_v54, %v4677_v52 }
0x3246   :  { %v14350_v62 = vpop.f32.mrf.mxu1 }
0x3247   :  { %v4687_v63 = vsel %vm3092_vm6, %v4678_v61, -inf }
0x3248   :  { %4688 = vmax.xlane.f32.xlu0 %v4687_v63  ;;  %v4968_v2 = vpop.f32.mrf.mxu1 }
0x3249   :  { %v4969_v26 = vadd.f32 %v16770_v54, %v4968_v2 }
0x324a   :  { %v14380_v3 = vpop.f32.mrf.mxu1 }
0x324b   :  { %v4982_v16 = vsel %vm3092_vm6, %v4969_v26, -inf }
0x324c   :  { %v4973_v5 = vpop.f32.mrf.mxu1 }
0x324d   :  { %v4974_v24 = vadd.f32 %v16770_v54, %v4973_v5 }
0x324e   :  { %v14383_v6 = vpop.f32.mrf.mxu1 }
0x324f   :  { %v4985_v43 = vsel %vm3092_vm6, %v4974_v24, -inf }
0x3250   :  { %v4978_v7 = vpop.f32.mrf.mxu1 }
0x3251   :  { %v4979_v27 = vadd.f32 %v16770_v54, %v4978_v7 }
0x3252   :  { %v14386_v8 = vpop.f32.mrf.mxu1 }
0x3253   :  { %v4988_v28 = vsel %vm3092_vm6, %v4979_v27, -inf }
0x3255   :  { %4716 = vrot.lane.b32.xlu1 %v16719_v41, %s15727_s30 }
0x32c9   :  { %v4683_v1 = vpop.xlane.xlu0 %4682 }
0x32ca   :  { %v4690_v17 = vsub.f32 %v4668_v12, %v4683_v1 }
0x32cc   :  { %v4693_v40 = vmul.f32 1.442695, %v4690_v17 }
0x32cd   :  { %v4686_v48 = vpop.xlane.xlu1 %4685 }
0x32ce   :  { %15403 = vpow2.f32 %v4693_v40  ;;  %v4691_v50 = vsub.f32 %v4673_v59, %v4686_v48 }
0x32d0   :  { %v4695_v9 = vmul.f32 1.442695, %v4691_v50 }
0x32d1   :  { %v4689_v10 = vpop.xlane.xlu0 %4688  ;;  %v4717_v31 = vpop.permute.xlu1 %4716 }
0x32d2   :  { %15405 = vpow2.f32 %v4695_v9  ;;  %v4692_v11 = vsub.f32 %v4678_v61, %v4689_v10 }
0x32d4   :  { %v4697_v51 = vmul.f32 1.442695, %v4692_v11 }
0x32d6   :  { %15407 = vpow2.f32 %v4697_v51 }
0x32db   :  { %v15404_v14 = vpop.eup %15403 }
0x32dc   :  { %v4699_v15 = vsel %vm3092_vm6, %v15404_v14, 0.0 }
0x32dd   :  { %4700 = vadd.xlane.f32.xlu0 %v4699_v15 }
0x32df   :  { %v15406_v18 = vpop.eup %15405 }
0x32e0   :  { %v4702_v21 = vsel %vm3092_vm6, %v15406_v18, 0.0 }
0x32e1   :  { %4703 = vadd.xlane.f32.xlu0 %v4702_v21 }
0x32e3   :  { %v15408_v23 = vpop.eup %15407 }
0x32e4   :  { %v4705_v47 = vsel %vm3092_vm6, %v15408_v23, 0.0 }
0x32e5   :  { %4706 = vadd.xlane.f32.xlu1 %v4705_v47 }
0x32f6   :  { %4714 = vrot.lane.b32.xlu1 %v16717_v44, %s15727_s30 }
0x32f7   :  { %4718 = vrot.lane.b32.xlu0 %v16713_v35, %s15727_s30 }
0x3316   :  { %4986 = vmax.xlane.f32.xlu0 %v4985_v43 }
0x331a   :  { %4983 = vmax.xlane.f32.xlu1 %v4982_v16  ;;  %4989 = vmax.xlane.f32.xlu0 %v4988_v28 }
0x332b   :  { %5019 = vrot.lane.b32.xlu1 %v16713_v35, %s15730_s12 }
0x332f   :  { %5015 = vrot.lane.b32.xlu1 %v16717_v44, %s15730_s12 }
0x3333   :  { %5185 = vrot.lane.b32.xlu1 %v16713_v35, %s15731_s13 }
0x3337   :  { %5183 = vrot.lane.b32.xlu1 %v16719_v41, %s15731_s13 }
0x3366   :  { %v4701_v13 = vpop.xlane.xlu0 %4700 }
0x3367   :  { %15409 = vrcp.f32 %v4701_v13  ;;  %v12959_v13 = vld [vmem:[%s18452_s3 + $0x34] sm:$0xf] }
0x3368   :  { %15131 = vmatprep.subr.msk.bf16.mxu1 %vm444_vm5, %v12959_v13 }
0x336a   :  { %v4704_v32 = vpop.xlane.xlu0 %4703 }
0x336b   :  { %15411 = vrcp.f32 %v4704_v32 }
0x336e   :  { %v4719_v19 = vpop.permute.xlu0 %4718  ;;  %v4707_v36 = vpop.xlane.xlu1 %4706 }
0x336f   :  { %15413 = vrcp.f32 %v4707_v36  ;;  %14352 = vmatpush3.msra.mxu0 %v4719_v19 }
0x3370   :  { %14353 = vmatprep.subr.mxu0 %v15724_v0 }
0x3371   :  { %14354 = vmatpush3.msra.mxu0 %v4717_v31  ;;  %v5122_v31 = vsel %vm444_vm5, %v12959_v13, 0 }
0x3372   :  { %14355 = vmatprep.subr.mxu0 %v15724_v0  ;;  %v4715_v20 = vpop.permute.xlu1 %4714  ;;  %14403 = vmatpush3.bf16.msra.mxu1 %v5122_v31 }
0x3373   :  { %14356 = vmatpush3.msra.mxu0 %v4715_v20  ;;  %14423 = vmatprep.subr.mxu1 %v15724_v0 }
0x3374   :  { %v15410_v38 = vpop.eup %15409  ;;  %15130 = vmatprep.subr.msk.bf16.mxu0 %vm444_vm5, %v12958_v60 }
0x3375   :  { %v4709_v4 = vmul.f32 %v15410_v38, %v15404_v14 }
0x3377   :  { %14358 = vmatmul.mubr.msk.f32.vlgmr.msra.gmra.mxu0 %vm3092_vm6, %v4709_v4 }
0x3378   :  { %v15412_v39 = vpop.eup %15411  ;;  %14360 = vmatprep.mubr.msk.f32.mxu0 %vm15725_vm0, %v15724_v0  ;;  %14367 = vmatpush3.bf16.msra.mxu0 %v4821_v22 }
0x3379   :  { %v4711_v29 = vmul.f32 %v15412_v39, %v15406_v18  ;;  %14387 = vmatprep.subr.mxu0 %v15724_v0 }
0x337b   :  { %14361 = vmatmul.mubr.msk.f32.gmra.mxu0 %vm3092_vm6, %v4711_v29 }
0x337c   :  { %v15414_v25 = vpop.eup %15413  ;;  %14363 = vmatprep.mubr.msk.f32.mxu0 %vm15725_vm0, %v15724_v0 }
0x337d   :  { %v4713_v45 = vmul.f32 %v15414_v25, %v15408_v23 }
0x337f   :  { %14364 = vmatmul.mubr.msk.f32.gmra.mxu0 %vm3092_vm6, %v4713_v45 }
0x339f   :  { %v4987_v46 = vpop.xlane.xlu0 %4986 }
0x33a0   :  { %v4992_v49 = vsub.f32 %v4974_v24, %v4987_v46 }
0x33a2   :  { %v4996_v37 = vmul.f32 1.442695, %v4992_v49 }
0x33a3   :  { %v4984_v53 = vpop.xlane.xlu1 %4983  ;;  %v4990_v52 = vpop.xlane.xlu0 %4989 }
0x33a4   :  { %15415 = vpow2.f32 %v4996_v37  ;;  %v4991_v55 = vsub.f32 %v4969_v26, %v4984_v53  ;;  %v4993_v61 = vsub.f32 %v4979_v27, %v4990_v52 }
0x33a6   :  { %v4994_v12 = vmul.f32 1.442695, %v4991_v55  ;;  %v4998_v62 = vmul.f32 1.442695, %v4993_v61 }
0x33a7   :  { %v5020_v3 = vpop.permute.xlu1 %5019 }
0x33a8   :  { %15417 = vpow2.f32 %v4994_v12 }
0x33a9   :  { %15419 = vpow2.f32 %v4998_v62 }
0x33ab   :  { %v5016_v5 = vpop.permute.xlu1 %5015 }
0x33af   :  { %v5186_v6 = vpop.permute.xlu1 %5185 }
0x33b1   :  { %v15416_v56 = vpop.eup %15415 }
0x33b2   :  { %v5003_v57 = vsel %vm3092_vm6, %v15416_v56, 0.0 }
0x33b3   :  { %5004 = vadd.xlane.f32.xlu1 %v5003_v57  ;;  %v5184_v17 = vpop.permute.xlu1 %5183 }
0x33b5   :  { %v15418_v58 = vpop.eup %15417 }
0x33b6   :  { %v5000_v59 = vsel %vm3092_vm6, %v15418_v58, 0.0  ;;  %v15420_v63 = vpop.eup %15419 }
0x33b7   :  { %5001 = vadd.xlane.f32.xlu0 %v5000_v59  ;;  %v5006_v2 = vsel %vm3092_vm6, %v15420_v63, 0.0 }
0x33c4   :  { %5175 = vrot.lane.b32.xlu1 %v16717_v44, %s15732_s14 }
0x33c8   :  { %5179 = vrot.lane.b32.xlu1 %v16713_v35, %s15732_s14 }
0x33cd   :  { %5017 = vrot.lane.b32.xlu0 %v16719_v41, %s15730_s12 }
0x33ec   :  { %5007 = vadd.xlane.f32.xlu0 %v5006_v2 }
0x3402   :  { %5181 = vrot.lane.b32.xlu0 %v16717_v44, %s15731_s13 }
0x3406   :  { %5177 = vrot.lane.b32.xlu0 %v16719_v41, %s15732_s14 }
0x3437   :  { %v4798_v7 = vpop.f32.mrf.mxu0 }
0x3439   :  { %v14359_v8 = vpop.f32.mrf.mxu0 }
0x343b   :  { %v4803_v1 = vpop.f32.mrf.mxu0 }
0x343c   :  { %v4812_v40 = vpack.c.bf16 %v4803_v1, %v4798_v7  ;;  %v5005_v9 = vpop.xlane.xlu1 %5004 }
0x343d   :  { %v14362_v48 = vpop.f32.mrf.mxu0 }
0x343e   :  { %14368 = vmatprep.mubr.msk.bf16.mxu0 %vm246_vm3, %v4812_v40 }
0x343f   :  { %v4808_v50 = vpop.f32.mrf.mxu0 }
0x3440   :  { %v4813_v10 = vpack.c.bf16 %v4808_v50, %v4808_v50  ;;  %v5002_v11 = vpop.xlane.xlu0 %5001  ;;  %v5176_v43 = vpop.permute.xlu1 %5175 }
0x3441   :  { %v14365_v51 = vpop.f32.mrf.mxu0  ;;  %15421 = vrcp.f32 %v5002_v11 }
0x3442   :  { %14369 = vmatmul.mubr.msk.bf16.vlgmr.msra.gmra.mxu0 %vm246_vm3, %v4813_v10  ;;  %15423 = vrcp.f32 %v5005_v9 }
0x3443   :  { %14388 = vmatpush3.msra.mxu0 %v5020_v3  ;;  %14393 = vmatprep.mubr.msk.f32.mxu0 %vm15725_vm0, %v15724_v0 }
0x3444   :  { %14389 = vmatprep.subr.mxu0 %v15724_v0  ;;  %v5018_v14 = vpop.permute.xlu0 %5017  ;;  %v5180_v28 = vpop.permute.xlu1 %5179 }
0x3445   :  { %14390 = vmatpush3.msra.mxu0 %v5018_v14 }
0x3446   :  { %14391 = vmatprep.subr.mxu0 %v15724_v0 }
0x3447   :  { %14392 = vmatpush3.msra.mxu0 %v5016_v5 }
0x3448   :  { %14408 = vmatprep.subr.mxu0 %v15724_v0 }
0x344e   :  { %v15422_v15 = vpop.eup %15421 }
0x344f   :  { %v5010_v18 = vmul.f32 %v15422_v15, %v15418_v58  ;;  %v15424_v21 = vpop.eup %15423  ;;  %v16900_v15 = vld [vmem:[%s18450_s6 + $0x1b] ss:$0 sm:$0xff] }
0x3450   :  { %v5012_v23 = vmul.f32 %v15424_v21, %v15416_v56 }
0x3451   :  { %14394 = vmatmul.mubr.msk.f32.vlgmr.msra.gmra.mxu0 %vm3092_vm6, %v5010_v18 }
0x3452   :  { %14409 = vmatpush3.xpose.msk.msra.mxu0 %vm246_vm3, %v5186_v6  ;;  %14396 = vmatprep.mubr.msk.f32.mxu0 %vm15725_vm0, %v15724_v0 }
0x3453   :  { %14410 = vmatprep.subr.mxu0 %v15724_v0 }
0x3455   :  { %14397 = vmatmul.mubr.msk.f32.gmra.mxu0 %vm3092_vm6, %v5012_v23 }
0x3456   :  { %14411 = vmatpush3.xpose.msk.msra.mxu0 %vm246_vm3, %v5184_v17  ;;  %14399 = vmatprep.mubr.msk.f32.mxu0 %vm15725_vm0, %v15724_v0 }
0x3457   :  { %14412 = vmatprep.subr.mxu0 %v15724_v0 }
0x3475   :  { %v5008_v47 = vpop.xlane.xlu0 %5007 }
0x3476   :  { %15425 = vrcp.f32 %v5008_v47 }
0x3479   :  { %v5182_v24 = vpop.permute.xlu0 %5181 }
0x347a   :  { %14413 = vmatpush3.xpose.msk.msra.mxu0 %vm246_vm3, %v5182_v24 }
0x347d   :  { %v5178_v16 = vpop.permute.xlu0 %5177 }
0x3483   :  { %v15426_v26 = vpop.eup %15425 }
0x3484   :  { %v5014_v27 = vmul.f32 %v15426_v26, %v15420_v63 }
0x3486   :  { %14400 = vmatmul.mubr.msk.f32.gmra.mxu0 %vm3092_vm6, %v5014_v27 }
0x3487   :  { %14414 = vmatprep.mubr.msk.f32.mxu0 %vm15725_vm0, %v15724_v0 }
0x348a   :  { %14415 = vmatmul.mubr.msk.f32.vlgmr.msra.gmra.mxu0 %vm246_vm3, %v5176_v43 }
0x348b   :  { %14417 = vmatprep.mubr.msk.f32.mxu0 %vm15725_vm0, %v15724_v0 }
0x348e   :  { %14418 = vmatmul.mubr.msk.f32.gmra.mxu0 %vm246_vm3, %v5178_v16 }
0x348f   :  { %14420 = vmatprep.mubr.msk.f32.mxu0 %vm15725_vm0, %v15724_v0 }
0x3492   :  { %14421 = vmatmul.mubr.msk.f32.gmra.mxu0 %vm246_vm3, %v5180_v28 }
0x3502   :  { %v16863_v32 = vpop.f32.mrf.mxu0 }
0x3503   :  { %v4877_v18 = vadd.f32 %v16863_v32, %v16900_v15 }
0x3504   :  { %v16865_v19 = vpop.f32.mrf.mxu0 }
0x3506   :  { %v14371_v36 = vpop.f32.mrf.mxu0 }
0x3508   :  { %v16867_v20 = vpop.f32.mrf.mxu0 }
0x3511   :  { %v5099_v38 = vpop.f32.mrf.mxu0 }
0x3513   :  { %v14395_v4 = vpop.f32.mrf.mxu0 }
0x3515   :  { %v5104_v39 = vpop.f32.mrf.mxu0 }
0x3516   :  { %v5113_v29 = vpack.c.bf16 %v5104_v39, %v5099_v38 }
0x3517   :  { %v14398_v25 = vpop.f32.mrf.mxu0 }
0x3518   :  { %14404 = vmatprep.mubr.msk.bf16.mxu1 %vm246_vm3, %v5113_v29 }
0x3546   :  { %v5109_v45 = vpop.f32.mrf.mxu0 }
0x3547   :  { %v5114_v46 = vpack.c.bf16 %v5109_v45, %v5109_v45 }
0x3548   :  { %v14401_v49 = vpop.f32.mrf.mxu0 }
0x3549   :  { %14405 = vmatmul.mubr.msk.bf16.vlgmr.msra.gmra.mxu1 %vm246_vm3, %v5114_v46  ;;  %v12960_v46 = vld [vmem:[%s18452_s3 + $0x38] sm:$0xf] }
0x354a   :  { %v5265_v37 = vpop.f32.mrf.mxu0  ;;  %14429 = vmatprep.mubr.msk.f32.mxu1 %vm15725_vm0, %v15724_v0  ;;  %15132 = vmatprep.subr.msk.bf16.mxu0 %vm444_vm5, %v12960_v46  ;;  %v5419_v49 = vsel %vm444_vm5, %v12960_v46, 0 }
0x354b   :  { %v5266_v53 = vadd.f32 %v16770_v54, %v5265_v37  ;;  %14439 = vmatpush3.bf16.msra.mxu0 %v5419_v49 }
0x354c   :  { %v14416_v55 = vpop.f32.mrf.mxu0  ;;  %14459 = vmatprep.subr.mxu0 %v15724_v0 }
0x354d   :  { %v5279_v12 = vsel %vm3092_vm6, %v5266_v53, -inf }
0x354e   :  { %5280 = vmax.xlane.f32.xlu0 %v5279_v12  ;;  %v5270_v56 = vpop.f32.mrf.mxu0 }
0x354f   :  { %v5271_v57 = vadd.f32 %v16770_v54, %v5270_v56 }
0x3550   :  { %v14419_v58 = vpop.f32.mrf.mxu0 }
0x3551   :  { %v5282_v59 = vsel %vm3092_vm6, %v5271_v57, -inf }
0x3552   :  { %5283 = vmax.xlane.f32.xlu1 %v5282_v59  ;;  %v5275_v60 = vpop.f32.mrf.mxu0 }
0x3553   :  { %v5276_v22 = vadd.f32 %v16770_v54, %v5275_v60 }
0x3554   :  { %v14422_v52 = vpop.f32.mrf.mxu0 }
0x3555   :  { %v5285_v61 = vsel %vm3092_vm6, %v5276_v22, -inf }
0x3556   :  { %5286 = vmax.xlane.f32.xlu0 %v5285_v61 }
0x3563   :  { %5314 = vrot.lane.b32.xlu1 %v16719_v41, %s15733_s17 }
0x3567   :  { %5312 = vrot.lane.b32.xlu1 %v16717_v44, %s15733_s17 }
0x356b   :  { %5482 = vrot.lane.b32.xlu1 %v16713_v35, %s15734_s18 }
0x356c   :  { %5316 = vrot.lane.b32.xlu0 %v16713_v35, %s15733_s17 }
0x356f   :  { %5478 = vrot.lane.b32.xlu1 %v16717_v44, %s15734_s18 }
0x35d7   :  { %v5281_v62 = vpop.xlane.xlu0 %5280 }
0x35d8   :  { %v5288_v63 = vsub.f32 %v5266_v53, %v5281_v62 }
0x35da   :  { %v5291_v2 = vmul.f32 1.442695, %v5288_v63 }
0x35db   :  { %v5284_v3 = vpop.xlane.xlu1 %5283 }
0x35dc   :  { %15427 = vpow2.f32 %v5291_v2  ;;  %v5289_v5 = vsub.f32 %v5271_v57, %v5284_v3 }
0x35de   :  { %v5293_v6 = vmul.f32 1.442695, %v5289_v5 }
0x35df   :  { %v5287_v7 = vpop.xlane.xlu0 %5286  ;;  %v5315_v1 = vpop.permute.xlu1 %5314 }
0x35e0   :  { %15429 = vpow2.f32 %v5293_v6  ;;  %v5290_v8 = vsub.f32 %v5276_v22, %v5287_v7 }
0x35e2   :  { %v5295_v17 = vmul.f32 1.442695, %v5290_v8 }
0x35e3   :  { %v5317_v40 = vpop.permute.xlu0 %5316  ;;  %v5313_v48 = vpop.permute.xlu1 %5312 }
0x35e4   :  { %15431 = vpow2.f32 %v5295_v17  ;;  %14424 = vmatpush3.msra.mxu1 %v5317_v40 }
0x35e5   :  { %14425 = vmatprep.subr.mxu1 %v15724_v0 }
0x35e6   :  { %14426 = vmatpush3.msra.mxu1 %v5315_v1 }
0x35e7   :  { %14427 = vmatprep.subr.mxu1 %v15724_v0  ;;  %v5483_v26 = vpop.permute.xlu1 %5482 }
0x35e8   :  { %14428 = vmatpush3.msra.mxu1 %v5313_v48 }
0x35e9   :  { %v15428_v50 = vpop.eup %15427  ;;  %14444 = vmatprep.subr.mxu1 %v15724_v0 }
0x35ea   :  { %v5297_v9 = vsel %vm3092_vm6, %v15428_v50, 0.0 }
0x35eb   :  { %5298 = vadd.xlane.f32.xlu0 %v5297_v9  ;;  %v5479_v43 = vpop.permute.xlu1 %5478 }
0x35ed   :  { %v15430_v10 = vpop.eup %15429 }
0x35ee   :  { %v5300_v11 = vsel %vm3092_vm6, %v15430_v10, 0.0 }
0x35ef   :  { %5301 = vadd.xlane.f32.xlu0 %v5300_v11 }
0x35f1   :  { %v15432_v51 = vpop.eup %15431 }
0x35f2   :  { %v5303_v14 = vsel %vm3092_vm6, %v15432_v51, 0.0 }
0x35f3   :  { %5304 = vadd.xlane.f32.xlu1 %v5303_v14 }
0x3604   :  { %5474 = vrot.lane.b32.xlu1 %v16719_v41, %s15735_s19 }
0x3605   :  { %5480 = vrot.lane.b32.xlu0 %v16719_v41, %s15734_s18 }
0x3609   :  { %v14406_v21 = vpop.f32.mrf.mxu1  ;;  %5472 = vrot.lane.b32.xlu0 %v16717_v44, %s15735_s19 }
0x360a   :  { %v16908_v23 = vadd.f32 %v14406_v21, %v4877_v18 }
0x360b   :  { %v16910_v47 = vpop.f32.mrf.mxu1 }
0x360d   :  { %v14407_v24 = vpop.f32.mrf.mxu1  ;;  %5476 = vrot.lane.b32.xlu0 %v16713_v35, %s15735_s19 }
0x360f   :  { %v16941_v37 = vpop.f32.mrf.mxu1 }
0x3674   :  { %v5299_v27 = vpop.xlane.xlu0 %5298 }
0x3675   :  { %15433 = vrcp.f32 %v5299_v27 }
0x3678   :  { %v5302_v16 = vpop.xlane.xlu0 %5301 }
0x3679   :  { %15435 = vrcp.f32 %v5302_v16 }
0x367c   :  { %v5305_v28 = vpop.xlane.xlu1 %5304  ;;  %v5481_v38 = vpop.permute.xlu0 %5480 }
0x367d   :  { %15437 = vrcp.f32 %v5305_v28 }
0x3680   :  { %v5473_v29 = vpop.permute.xlu0 %5472  ;;  %v5475_v25 = vpop.permute.xlu1 %5474 }
0x3682   :  { %v15434_v13 = vpop.eup %15433 }
0x3683   :  { %v5307_v31 = vmul.f32 %v15434_v13, %v15428_v50 }
0x3684   :  { %v5477_v45 = vpop.permute.xlu0 %5476 }
0x3685   :  { %14430 = vmatmul.mubr.msk.f32.vlgmr.msra.gmra.mxu1 %vm3092_vm6, %v5307_v31  ;;  %v12961_v31 = vld [vmem:[%s18452_s3 + $0x3c] sm:$0xf] }
0x3686   :  { %v15436_v32 = vpop.eup %15435  ;;  %14445 = vmatpush3.xpose.msk.msra.mxu1 %vm246_vm3, %v5483_v26  ;;  %14432 = vmatprep.mubr.msk.f32.mxu1 %vm15725_vm0, %v15724_v0  ;;  %v5716_v46 = vsel %vm444_vm5, %v12961_v31, 0 }
0x3687   :  { %14446 = vmatprep.subr.mxu1 %v15724_v0  ;;  %v5309_v36 = vmul.f32 %v15436_v32, %v15430_v10 }
0x3689   :  { %14433 = vmatmul.mubr.msk.f32.gmra.mxu1 %vm3092_vm6, %v5309_v36 }
0x368a   :  { %v15438_v4 = vpop.eup %15437  ;;  %14447 = vmatpush3.xpose.msk.msra.mxu1 %vm246_vm3, %v5481_v38  ;;  %14435 = vmatprep.mubr.msk.f32.mxu1 %vm15725_vm0, %v15724_v0 }
0x368b   :  { %14448 = vmatprep.subr.mxu1 %v15724_v0  ;;  %v5311_v39 = vmul.f32 %v15438_v4, %v15432_v51 }
0x368d   :  { %14436 = vmatmul.mubr.msk.f32.gmra.mxu1 %vm3092_vm6, %v5311_v39 }
0x368e   :  { %14449 = vmatpush3.xpose.msk.msra.mxu1 %vm246_vm3, %v5479_v43  ;;  %14450 = vmatprep.mubr.msk.f32.mxu1 %vm15725_vm0, %v15724_v0 }
0x368f   :  { %15133 = vmatprep.subr.msk.bf16.mxu1 %vm444_vm5, %v12961_v31 }
0x3691   :  { %14451 = vmatmul.mubr.msk.f32.vlgmr.msra.gmra.mxu1 %vm246_vm3, %v5473_v29 }
0x3692   :  { %14453 = vmatprep.mubr.msk.f32.mxu1 %vm15725_vm0, %v15724_v0  ;;  %14475 = vmatpush3.bf16.msra.mxu1 %v5716_v46 }
0x3695   :  { %14454 = vmatmul.mubr.msk.f32.gmra.mxu1 %vm246_vm3, %v5475_v25 }
0x3696   :  { %14456 = vmatprep.mubr.msk.f32.mxu1 %vm15725_vm0, %v15724_v0 }
0x3699   :  { %14457 = vmatmul.mubr.msk.f32.gmra.mxu1 %vm246_vm3, %v5477_v45 }
0x3745   :  { %v5396_v53 = vpop.f32.mrf.mxu1 }
0x3747   :  { %v14431_v55 = vpop.f32.mrf.mxu1 }
0x3749   :  { %v5401_v12 = vpop.f32.mrf.mxu1 }
0x374a   :  { %v5410_v56 = vpack.c.bf16 %v5401_v12, %v5396_v53 }
0x374b   :  { %v14434_v57 = vpop.f32.mrf.mxu1 }
0x374c   :  { %14440 = vmatprep.mubr.msk.bf16.mxu0 %vm246_vm3, %v5410_v56 }
0x374d   :  { %v5406_v58 = vpop.f32.mrf.mxu1 }
0x374e   :  { %v5411_v59 = vpack.c.bf16 %v5406_v58, %v5406_v58 }
0x374f   :  { %v14437_v60 = vpop.f32.mrf.mxu1 }
0x3750   :  { %14441 = vmatmul.mubr.msk.bf16.vlgmr.msra.gmra.mxu0 %vm246_vm3, %v5411_v59 }
0x3751   :  { %v5562_v22 = vpop.f32.mrf.mxu1  ;;  %14465 = vmatprep.mubr.msk.f32.mxu0 %vm15725_vm0, %v15724_v0 }
0x3752   :  { %v5563_v52 = vadd.f32 %v16770_v54, %v5562_v22  ;;  %v4875_v22 = vadd.f32 %v16900_v15, %v16865_v19 }
0x3753   :  { %v14452_v61 = vpop.f32.mrf.mxu1 }
0x3754   :  { %v5576_v62 = vsel %vm3092_vm6, %v5563_v52, -inf }
0x3755   :  { %5577 = vmax.xlane.f32.xlu1 %v5576_v62  ;;  %v5567_v63 = vpop.f32.mrf.mxu1  ;;  %v4876_v62 = vadd.f32 %v16900_v15, %v16867_v20 }
0x3756   :  { %v5568_v2 = vadd.f32 %v16770_v54, %v5567_v63 }
0x3757   :  { %v14455_v3 = vpop.f32.mrf.mxu1 }
0x3758   :  { %v5579_v5 = vsel %vm3092_vm6, %v5568_v2, -inf  ;;  %v5173_v3 = vadd.f32 %v16941_v37, %v4876_v62  ;;  %v13018_v62 = vld [vmem:[%s18450_s6 + $0x1e] ss:$0 sm:$0xff] }
0x3759   :  { %5580 = vmax.xlane.f32.xlu0 %v5579_v5  ;;  %v5572_v6 = vpop.f32.mrf.mxu1 }
0x375a   :  { %v5573_v7 = vadd.f32 %v16770_v54, %v5572_v6 }
0x375b   :  { %v14458_v8 = vpop.f32.mrf.mxu1 }
0x375c   :  { %v5582_v1 = vsel %vm3092_vm6, %v5573_v7, -inf }
0x375d   :  { %5583 = vmax.xlane.f32.xlu0 %v5582_v1 }
0x3766   :  { %5613 = vrot.lane.b32.xlu1 %v16713_v35, %s15736_s24 }
0x37de   :  { %v5578_v17 = vpop.xlane.xlu1 %5577 }
0x37df   :  { %v5585_v40 = vsub.f32 %v5563_v52, %v5578_v17  ;;  %v5172_v52 = vadd.f32 %v16910_v47, %v4875_v22  ;;  %v15194_v22 = vld [vmem:[%s18448_s5 + $0x70] sm:$0xff]  }
0x37e1   :  { %v5588_v48 = vmul.f32 1.442695, %v5585_v40 }
0x37e2   :  { %v5581_v50 = vpop.xlane.xlu0 %5580  ;;  %v5614_v9 = vpop.permute.xlu1 %5613 }
0x37e3   :  { %15439 = vpow2.f32 %v5588_v48  ;;  %v5586_v10 = vsub.f32 %v5568_v2, %v5581_v50  ;;  %14460 = vmatpush3.msra.mxu0 %v5614_v9 }
0x37e4   :  { %14461 = vmatprep.subr.mxu0 %v15724_v0 }
0x37e5   :  { %v5590_v11 = vmul.f32 1.442695, %v5586_v10 }
0x37e6   :  { %v5584_v51 = vpop.xlane.xlu0 %5583 }
0x37e7   :  { %15441 = vpow2.f32 %v5590_v11  ;;  %v5587_v54 = vsub.f32 %v5573_v7, %v5584_v51 }
0x37e9   :  { %v5592_v14 = vmul.f32 1.442695, %v5587_v54 }
0x37eb   :  { %15443 = vpow2.f32 %v5592_v14 }
0x37f0   :  { %v15440_v18 = vpop.eup %15439 }
0x37f1   :  { %v5594_v21 = vsel %vm3092_vm6, %v15440_v18, 0.0 }
0x37f2   :  { %5595 = vadd.xlane.f32.xlu0 %v5594_v21 }
0x37f4   :  { %v15442_v35 = vpop.eup %15441 }
0x37f5   :  { %v5597_v24 = vsel %vm3092_vm6, %v15442_v35, 0.0 }
0x37f6   :  { %5598 = vadd.xlane.f32.xlu1 %v5597_v24 }
0x37f8   :  { %v15444_v26 = vpop.eup %15443 }
0x37f9   :  { %v5600_v27 = vsel %vm3092_vm6, %v15444_v26, 0.0 }
0x37fa   :  { %5601 = vadd.xlane.f32.xlu0 %v5600_v27  ;;  %v15192_v27 = vld [vmem:[%s18453_s4 + $0x30] sm:$0xff]  }
0x3807   :  { %5609 = vrot.lane.b32.xlu1 %v16717_v44, %s15736_s24 }
0x3810   :  { %v14442_v43 = vpop.f32.mrf.mxu0  ;;  %5611 = vrot.lane.b32.xlu0 %v16719_v41, %s15736_s24 }
0x3811   :  { %v5471_v16 = vadd.f32 %v14442_v43, %v16908_v23 }
0x3812   :  { %v5455_v28 = vpop.f32.mrf.mxu0 }
0x3813   :  { %v5469_v63 = vadd.f32 %v5455_v28, %v5172_v52  ;;  %v15195_v52 = vld [vmem:[%s18448_s5 + $0x68] sm:$0xff]  }
0x3814   :  { %v14443_v13 = vpop.f32.mrf.mxu0 }
0x3816   :  { %v5458_v49 = vpop.f32.mrf.mxu0 }
0x3817   :  { %v5470_v7 = vadd.f32 %v5458_v49, %v5173_v3 }
0x387b   :  { %v5596_v32 = vpop.xlane.xlu0 %5595 }
0x387c   :  { %15445 = vrcp.f32 %v5596_v32 }
0x387f   :  { %v5599_v36 = vpop.xlane.xlu1 %5598 }
0x3880   :  { %15447 = vrcp.f32 %v5599_v36 }
0x3883   :  { %v5602_v38 = vpop.xlane.xlu0 %5601  ;;  %v5610_v41 = vpop.permute.xlu1 %5609 }
0x3884   :  { %15449 = vrcp.f32 %v5602_v38 }
0x3887   :  { %v5612_v44 = vpop.permute.xlu0 %5611 }
0x3888   :  { %14462 = vmatpush3.msra.mxu0 %v5612_v44 }
0x3889   :  { %v15446_v4 = vpop.eup %15445  ;;  %14463 = vmatprep.subr.mxu0 %v15724_v0 }
0x388a   :  { %v5604_v23 = vmul.f32 %v15446_v4, %v15440_v18  ;;  %14464 = vmatpush3.msra.mxu0 %v5610_v41 }
0x388c   :  { %14466 = vmatmul.mubr.msk.f32.vlgmr.msra.gmra.mxu0 %vm3092_vm6, %v5604_v23  ;;  %v13012_v23 = vld [vmem:[%s18450_s6 + $0x1c] ss:$0 sm:$0xff] }
0x388d   :  { %v15448_v39 = vpop.eup %15447  ;;  %14468 = vmatprep.mubr.msk.f32.mxu0 %vm15725_vm0, %v15724_v0 }
0x388e   :  { %v5606_v29 = vmul.f32 %v15448_v39, %v15442_v35 }
0x3890   :  { %14469 = vmatmul.mubr.msk.f32.gmra.mxu0 %vm3092_vm6, %v5606_v29 }
0x3891   :  { %v15450_v25 = vpop.eup %15449  ;;  %14471 = vmatprep.mubr.msk.f32.mxu0 %vm15725_vm0, %v15724_v0 }
0x3892   :  { %v5608_v45 = vmul.f32 %v15450_v25, %v15444_v26  ;;  %v15191_v26 = vld [vmem:[%s18453_s4 + $0x38] sm:$0xff]  }
0x3893   :  { %14480 = vmatprep.subr.bf16.mxu0 %v15191_v26 }
0x3894   :  { %14472 = vmatmul.mubr.msk.f32.gmra.mxu0 %vm3092_vm6, %v5608_v45  ;;  %v13013_v45 = vld [vmem:[%s18450_s6 + $0x1d] ss:$0 sm:$0xff] }
0x3895   :  { %14481 = vmatpush3.bf16.msra.mxu0 %v15191_v26 }
0x3896   :  { %14482 = vmatprep.subr.bf16.mxu0 %v15192_v27 }
0x3899   :  { %14483 = vmatpush3.bf16.msra.mxu0 %v15192_v27 }
0x389a   :  { %14500 = vmatprep.subr.bf16.mxu0 %v15724_v0 }
0x394c   :  { %v5693_v53 = vpop.f32.mrf.mxu0 }
0x394e   :  { %v14467_v55 = vpop.f32.mrf.mxu0 }
0x3950   :  { %v5698_v12 = vpop.f32.mrf.mxu0 }
0x3951   :  { %v5707_v56 = vpack.c.bf16 %v5698_v12, %v5693_v53 }
0x3952   :  { %v14470_v57 = vpop.f32.mrf.mxu0 }
0x3953   :  { %14476 = vmatprep.mubr.msk.bf16.mxu1 %vm246_vm3, %v5707_v56 }
0x3954   :  { %v5703_v58 = vpop.f32.mrf.mxu0 }
0x3955   :  { %v5708_v59 = vpack.c.bf16 %v5703_v58, %v5703_v58 }
0x3956   :  { %v14473_v60 = vpop.f32.mrf.mxu0 }
0x3957   :  { %14477 = vmatmul.mubr.msk.bf16.vlgmr.msra.gmra.mxu1 %vm246_vm3, %v5708_v59  ;;  %v15193_v60 = vld [vmem:[%s18448_s5 + $0x78] sm:$0xff]  }
0x3958   :  { %14488 = vmatprep.subr.bf16.mxu1 %v15193_v60 }
0x3959   :  { %14489 = vmatpush3.bf16.msra.mxu1 %v15193_v60 }
0x395a   :  { %14490 = vmatprep.subr.bf16.mxu1 %v15194_v22 }
0x395d   :  { %14491 = vmatpush3.bf16.msra.mxu1 %v15194_v22 }
0x395e   :  { %14492 = vmatprep.subr.bf16.mxu1 %v15195_v52 }
0x3961   :  { %14493 = vmatpush3.bf16.msra.mxu1 %v15195_v52 }
0x3a17   :  { %v14478_v61 = vpop.f32.mrf.mxu1 }
0x3a18   :  { %v5768_v17 = vadd.f32 %v14478_v61, %v5471_v16  ;;  %v15196_v61 = vld [vmem:[%s18448_s5 + $0x60] sm:$0xff]  }
0x3a19   :  { %v5752_v2 = vpop.f32.mrf.mxu1  ;;  %14494 = vmatprep.subr.bf16.mxu1 %v15196_v61 }
0x3a1a   :  { %v5766_v5 = vadd.f32 %v5752_v2, %v5469_v63  ;;  %v16994_v20 = vadd.f32 %v5768_v17, %v16676_v33  ;;  %14495 = vmatpush3.bf16.msra.mxu1 %v15196_v61 }
0x3a1b   :  { %v14479_v6 = vpop.f32.mrf.mxu1  ;;  %14516 = vmatprep.subr.mxu1 %v15724_v0 }
0x3a1c   :  { %v16986_v8 = vadd.f32 %v5766_v5, %v16673_v42  ;;  %v5780_v42 = vsel %vm129_vm2, %v16994_v20, 0.0 }
0x3a1d   :  { %v5755_v1 = vpop.f32.mrf.mxu1 }
0x3a1e   :  { %v5767_v40 = vadd.f32 %v5755_v1, %v5470_v7  ;;  %v5774_v19 = vsel %vm129_vm2, %v16986_v8, 0.0 }
0x3a1f   :  { %5775 = vadd.xlane.f32.xlu1 %v5774_v19 }
0x3a20   :  { %v16991_v47 = vadd.f32 %v5767_v40, %v16681_v34 }
0x3a22   :  { %v5777_v15 = vsel %vm129_vm2, %v16991_v47, 0.0 }
0x3a23   :  { %5778 = vadd.xlane.f32.xlu0 %v5777_v15 }
0x3a27   :  { %5781 = vadd.xlane.f32.xlu0 %v5780_v42 }
0x3aa8   :  { %v5776_v37 = vpop.xlane.xlu1 %5775 }
0x3aa9   :  { %v5783_v48 = vmul.f32 0.03125, %v5776_v37 }
0x3aab   :  { %v5786_v50 = vsub.f32 %v16986_v8, %v5783_v48 }
0x3aac   :  { %v5779_v9 = vpop.xlane.xlu0 %5778 }
0x3aad   :  { %v5784_v10 = vmul.f32 0.03125, %v5779_v9  ;;  %v5789_v11 = vmul.f32 %v5786_v50, %v5786_v50 }
0x3aaf   :  { %v5787_v34 = vsub.f32 %v16991_v47, %v5784_v10  ;;  %v5792_v33 = vsel %vm129_vm2, %v5789_v11, 0.0 }
0x3ab0   :  { %5793 = vadd.xlane.f32.xlu1 %v5792_v33  ;;  %v5782_v51 = vpop.xlane.xlu0 %5781 }
0x3ab1   :  { %v5785_v54 = vmul.f32 0.03125, %v5782_v51  ;;  %v5790_v14 = vmul.f32 %v5787_v34, %v5787_v34 }
0x3ab3   :  { %v5788_v18 = vsub.f32 %v16994_v20, %v5785_v54  ;;  %v5795_v21 = vsel %vm129_vm2, %v5790_v14, 0.0 }
0x3ab4   :  { %5796 = vadd.xlane.f32.xlu0 %v5795_v21 }
0x3ab5   :  { %v5791_v35 = vmul.f32 %v5788_v18, %v5788_v18 }
0x3ab7   :  { %v5798_v24 = vsel %vm129_vm2, %v5791_v35, 0.0 }
0x3ab8   :  { %5799 = vadd.xlane.f32.xlu1 %v5798_v24 }
0x3b39   :  { %v5794_v43 = vpop.xlane.xlu1 %5793 }
0x3b3a   :  { %v5801_v16 = vmul.f32 0.03125, %v5794_v43 }
0x3b3c   :  { %v5804_v28 = vadd.f32 1e-06, %v5801_v16 }
0x3b3d   :  { %v5797_v13 = vpop.xlane.xlu0 %5796 }
0x3b3e   :  { %15451 = vrsqrt.f32 %v5804_v28  ;;  %v5802_v31 = vmul.f32 0.03125, %v5797_v13 }
0x3b40   :  { %v5805_v32 = vadd.f32 1e-06, %v5802_v31 }
0x3b41   :  { %v5800_v36 = vpop.xlane.xlu1 %5799 }
0x3b42   :  { %15453 = vrsqrt.f32 %v5805_v32  ;;  %v5803_v38 = vmul.f32 0.03125, %v5800_v36 }
0x3b44   :  { %v5806_v44 = vadd.f32 1e-06, %v5803_v38 }
0x3b46   :  { %15455 = vrsqrt.f32 %v5806_v44  ;;  %v13031_v44 = vld [vmem:[%s18450_s6 + $0x1f] ss:$0 sm:$0xff] }
0x3b4b   :  { %v15452_v4 = vpop.eup %15451 }
0x3b4c   :  { %v5810_v41 = vmul.f32 %v15452_v4, %v5786_v50 }
0x3b4e   :  { %v5817_v25 = vmul.f32 %v13012_v23, %v5810_v41 }
0x3b4f   :  { %v15454_v39 = vpop.eup %15453 }
0x3b50   :  { %v5811_v29 = vmul.f32 %v15454_v39, %v5787_v34  ;;  %v5824_v55 = vadd.f32 %v13013_v45, %v5817_v25 }
0x3b52   :  { %v5818_v46 = vmul.f32 %v13012_v23, %v5811_v29 }
0x3b53   :  { %v15456_v49 = vpop.eup %15455 }
0x3b54   :  { %v5812_v53 = vmul.f32 %v15456_v49, %v5788_v18  ;;  %v5825_v12 = vadd.f32 %v13013_v45, %v5818_v46 }
0x3b56   :  { %v5819_v56 = vmul.f32 %v13012_v23, %v5812_v53  ;;  %v5833_v57 = vpack.c.bf16 %v5825_v12, %v5824_v55 }
0x3b58   :  { %v5826_v58 = vadd.f32 %v13013_v45, %v5819_v56  ;;  %14484 = vmatprep.mubr.msk.bf16.mxu0 %vm129_vm2, %v5833_v57 }
0x3b5a   :  { %v5834_v59 = vpack.c.bf16 %v5826_v58, %v5826_v58 }
0x3b5c   :  { %14485 = vmatmul.mubr.msk.bf16.vlgmr.msra.gmra.mxu0 %vm129_vm2, %v5834_v59 }
0x3b5d   :  { %14504 = vmatprep.mubr.msk.bf16.mxu0 %vm15725_vm0, %v15724_v0 }
0x3c1c   :  { %v14486_v63 = vpop.f32.mrf.mxu0 }
0x3c1d   :  { %v5900_v2 = vadd.f32 %v14486_v63, %v13018_v62 }
0x3c1e   :  { %v5891_v3 = vpop.f32.mrf.mxu0 }
0x3c1f   :  { %v5907_v5 = vmul.f32 %v5900_v2, %v5900_v2  ;;  %v5892_v6 = vadd.f32 %v13018_v62, %v5891_v3 }
0x3c20   :  { %v14487_v7 = vpop.f32.mrf.mxu0 }
0x3c21   :  { %v5910_v1 = vmul.f32 %v5907_v5, %v5900_v2  ;;  %v5905_v17 = vmul.f32 %v5892_v6, %v5892_v6  ;;  %v15197_v5 = vld [vmem:[%s18452_s3 + $0x58] sm:$0xff]  }
0x3c22   :  { %v5894_v40 = vpop.f32.mrf.mxu0  ;;  %14501 = vmatpush3.bf16.msra.mxu0 %v15197_v5 }
0x3c23   :  { %v5913_v19 = vmul.f32 0.044715, %v5910_v1  ;;  %v5908_v15 = vmul.f32 %v5905_v17, %v5892_v6  ;;  %v5895_v42 = vadd.f32 %v13018_v62, %v5894_v40  ;;  %14502 = vmatprep.subr.bf16.mxu0 %v15724_v0 }
0x3c25   :  { %v5916_v37 = vadd.f32 %v5913_v19, %v5900_v2  ;;  %v5911_v48 = vmul.f32 0.044715, %v5908_v15  ;;  %v5906_v50 = vmul.f32 %v5895_v42, %v5895_v42 }
0x3c27   :  { %v5919_v9 = vmul.f32 0.7978846, %v5916_v37  ;;  %v5914_v10 = vadd.f32 %v5911_v48, %v5892_v6  ;;  %v5909_v11 = vmul.f32 %v5906_v50, %v5895_v42 }
0x3c29   :  { %15457 = vtanh.f32 %v5919_v9  ;;  %v5917_v34 = vmul.f32 0.7978846, %v5914_v10  ;;  %v5912_v33 = vmul.f32 0.044715, %v5909_v11  ;;  %v13038_v10 = vld [vmem:[%s18450_s6 + $0x22] ss:$0 sm:$0xff] }
0x3c2b   :  { %15459 = vtanh.f32 %v5917_v34  ;;  %v5915_v51 = vadd.f32 %v5912_v33, %v5895_v42 }
0x3c2d   :  { %v5918_v54 = vmul.f32 0.7978846, %v5915_v51 }
0x3c2f   :  { %15461 = vtanh.f32 %v5918_v54  ;;  %v13039_v54 = vld [vmem:[%s18450_s6 + $0x23] ss:$0 sm:$0xff] }
0x3c36   :  { %v15458_v14 = vpop.eup %15457 }
0x3c37   :  { %v5925_v21 = vadd.f32 1.0, %v15458_v14 }
0x3c38   :  { %v15460_v18 = vpop.eup %15459 }
0x3c39   :  { %v5923_v35 = vadd.f32 1.0, %v15460_v18  ;;  %v5928_v26 = vmul.f32 0.5, %v5925_v21 }
0x3c3b   :  { %v5926_v43 = vmul.f32 0.5, %v5923_v35  ;;  %v5931_v28 = vmul.f32 %v5928_v26, %v5900_v2 }
0x3c3c   :  { %v15462_v24 = vpop.eup %15461 }
0x3c3d   :  { %v5924_v27 = vadd.f32 1.0, %v15462_v24  ;;  %v5929_v13 = vmul.f32 %v5926_v43, %v5892_v6  ;;  %v5943_v36 = vpack.c.bf16 %v5931_v28, %v5931_v28  ;;  %v15198_v6 = vld [vmem:[%s18452_s3 + $0x50] sm:$0xff]   ;;  %v15199_v24 = vld [vmem:[%s18452_s3 + $0x68] sm:$0xff]   ;;  %v15200_v43 = vld [vmem:[%s18452_s3 + $0x60] sm:$0xff]  }
0x3c3e   :  { %14503 = vmatpush3.bf16.msra.mxu0 %v15198_v6  ;;  %v15201_v28 = vld [vmem:[%s18448_s5 + $0x98] sm:$0xff]   ;;  %v15737_v6 = vmov 0  }
0x3c3f   :  { %v5927_v16 = vmul.f32 0.5, %v5924_v27  ;;  %14508 = vmatprep.subr.bf16.mxu0 %v15724_v0  ;;  %15157 = vset.pattern.permute.xlu1 %v15737_v6 }
0x3c41   :  { %v5930_v31 = vmul.f32 %v5927_v16, %v5895_v42 }
0x3c43   :  { %v5942_v32 = vpack.c.bf16 %v5930_v31, %v5929_v13  ;;  %v15202_v31 = vld [vmem:[%s18448_s5 + $0x90] sm:$0xff]  }
0x3c45   :  { %14496 = vmatprep.mubr.msk.bf16.mxu1 %vm80_vm1, %v5942_v32  ;;  %v15203_v32 = vld [vmem:[%s18448_s5 + $0x88] sm:$0xff]  }
0x3c46   :  { %14497 = vmatmul.mubr.msk.bf16.vlgmr.msra.gmra.mxu1 %vm80_vm1, %v5943_v36  ;;  %v13058_v36 = vld [vmem:[%s18449_s0 + $0x10] sm:$0xff] }
0x3c47   :  { %14520 = vmatprep.mubr.msk.f32.mxu1 %vm15725_vm0, %v15724_v0 }
0x3d06   :  { %v14498_v38 = vpop.f32.mrf.mxu1 }
0x3d07   :  { %v6021_v41 = vadd.f32 %v14498_v38, %v13031_v44  ;;  %v13059_v38 = vld [vmem:[%s18449_s0 + $0x18] sm:$0xff] }
0x3d08   :  { %v6012_v4 = vpop.f32.mrf.mxu1 }
0x3d09   :  { %v6013_v23 = vadd.f32 %v13031_v44, %v6012_v4  ;;  %v6028_v45 = vadd.f32 %v6021_v41, %v16994_v20  ;;  %v6426_v4 = vpack.c.bf16 %v13059_v38, %v13058_v36 }
0x3d0a   :  { %v14499_v39 = vpop.f32.mrf.mxu1 }
0x3d0b   :  { %v6026_v29 = vadd.f32 %v6013_v23, %v16986_v8  ;;  %v6035_v12 = vsel %vm129_vm2, %v6028_v45, 0.0 }
0x3d0c   :  { %v6015_v25 = vpop.f32.mrf.mxu1 }
0x3d0d   :  { %v6016_v46 = vadd.f32 %v13031_v44, %v6015_v25  ;;  %v6029_v49 = vsel %vm129_vm2, %v6026_v29, 0.0  ;;  %v15204_v44 = vld [vmem:[%s18448_s5 + $0x80] sm:$0xff]  }
0x3d0e   :  { %6030 = vadd.xlane.f32.xlu0 %v6029_v49 }
0x3d0f   :  { %v6027_v53 = vadd.f32 %v6016_v46, %v16991_v47 }
0x3d11   :  { %v6032_v55 = vsel %vm129_vm2, %v6027_v53, 0.0 }
0x3d12   :  { %6033 = vadd.xlane.f32.xlu1 %v6032_v55  ;;  %6036 = vadd.xlane.f32.xlu0 %v6035_v12 }
0x3d97   :  { %v6031_v56 = vpop.xlane.xlu0 %6030 }
0x3d98   :  { %v6038_v57 = vmul.f32 0.03125, %v6031_v56 }
0x3d9a   :  { %v6041_v58 = vsub.f32 %v6026_v29, %v6038_v57 }
0x3d9b   :  { %v6034_v59 = vpop.xlane.xlu1 %6033  ;;  %v6037_v8 = vpop.xlane.xlu0 %6036 }
0x3d9c   :  { %v6039_v60 = vmul.f32 0.03125, %v6034_v59  ;;  %v6040_v22 = vmul.f32 0.03125, %v6037_v8  ;;  %v6044_v20 = vmul.f32 %v6041_v58, %v6041_v58  ;;  %v15711_v8 = vld [vmem:[%s18450_s6 + $0x20] ss:$0 sm:$0xff] }
0x3d9e   :  { %v6042_v52 = vsub.f32 %v6027_v53, %v6039_v60  ;;  %v6043_v61 = vsub.f32 %v6028_v45, %v6040_v22  ;;  %v6047_v62 = vsel %vm129_vm2, %v6044_v20, 0.0  ;;  %v15712_v20 = vld [vmem:[%s18450_s6 + $0x30] sm:$0xff] }
0x3d9f   :  { %6048 = vadd.xlane.f32.xlu1 %v6047_v62 }
0x3da0   :  { %v6045_v47 = vmul.f32 %v6042_v52, %v6042_v52  ;;  %v6046_v63 = vmul.f32 %v6043_v61, %v6043_v61 }
0x3da2   :  { %v6050_v2 = vsel %vm129_vm2, %v6045_v47, 0.0  ;;  %v6053_v3 = vsel %vm129_vm2, %v6046_v63, 0.0 }
0x3da3   :  { %6051 = vadd.xlane.f32.xlu0 %v6050_v2  ;;  %6054 = vadd.xlane.f32.xlu1 %v6053_v3  ;;  %v15713_v2 = vld [vmem:[%s18450_s6 + $0x38] sm:$0xff] }
0x3e28   :  { %v6049_v7 = vpop.xlane.xlu1 %6048 }
0x3e29   :  { %v6056_v1 = vmul.f32 0.03125, %v6049_v7  ;;  %v15738_v7 = vmov 1  }
0x3e2a   :  { %15158 = vset.pattern.permute.xlu0 %v15738_v7 }
0x3e2b   :  { %v6059_v17 = vadd.f32 1e-06, %v6056_v1 }
0x3e2c   :  { %v6055_v40 = vpop.xlane.xlu1 %6054  ;;  %v6052_v19 = vpop.xlane.xlu0 %6051 }
0x3e2d   :  { %15463 = vrsqrt.f32 %v6059_v17  ;;  %v6058_v15 = vmul.f32 0.03125, %v6055_v40  ;;  %v6057_v42 = vmul.f32 0.03125, %v6052_v19 }
0x3e2f   :  { %v6061_v37 = vadd.f32 1e-06, %v6058_v15  ;;  %v6060_v48 = vadd.f32 1e-06, %v6057_v42 }
0x3e31   :  { %15465 = vrsqrt.f32 %v6061_v37 }
0x3e32   :  { %15467 = vrsqrt.f32 %v6060_v48 }
0x3e3a   :  { %v15464_v50 = vpop.eup %15463 }
0x3e3b   :  { %v6065_v9 = vmul.f32 %v15464_v50, %v6041_v58 }
0x3e3d   :  { %v6072_v33 = vmul.f32 %v13038_v10, %v6065_v9 }
0x3e3e   :  { %v15466_v11 = vpop.eup %15465 }
0x3e3f   :  { %v15468_v34 = vpop.eup %15467  ;;  %v6067_v14 = vmul.f32 %v15466_v11, %v6043_v61  ;;  %v6079_v21 = vadd.f32 %v13039_v54, %v6072_v33 }
0x3e40   :  { %v6066_v51 = vmul.f32 %v15468_v34, %v6042_v52 }
0x3e41   :  { %v6074_v26 = vmul.f32 %v13038_v10, %v6067_v14 }
0x3e42   :  { %v6073_v18 = vmul.f32 %v13038_v10, %v6066_v51 }
0x3e43   :  { %v6081_v16 = vadd.f32 %v13039_v54, %v6074_v26 }
0x3e44   :  { %v6080_v35 = vadd.f32 %v13039_v54, %v6073_v18 }
0x3e45   :  { %v6163_v13 = vpack.c.bf16 %v6081_v16, %v6081_v16  ;;  %v38_v16 = vld [vmem:[%s18454_s1 + $0x10] sm:$0xff] }
0x3e46   :  { %v6087_v27 = vpack.c.bf16 %v6080_v35, %v6079_v21 }
0x3e48   :  { %14505 = vmatmul.mubr.msk.bf16.vlgmr.msra.gmra.mxu0 %vm129_vm2, %v6087_v27  ;;  %v34_v27 = vld [vmem:[%s18450_s6 + $0x24] sm:$0xff] }
0x3e49   :  { %14509 = vmatpush3.bf16.msra.mxu0 %v15199_v24  ;;  %14512 = vmatprep.mubr.msk.bf16.mxu0 %vm15725_vm0, %v15724_v0 }
0x3e4a   :  { %14510 = vmatprep.subr.bf16.mxu0 %v15724_v0 }
0x3e4d   :  { %14511 = vmatpush3.bf16.msra.mxu0 %v15200_v43  ;;  %v39_v43 = vld [vmem:[%s18454_s1 + $0x18] sm:$0xff] }
0x3e4e   :  { %14523 = vmatprep.subr.bf16.mxu0 %v15724_v0 }
0x3e50   :  { %14513 = vmatmul.mubr.msk.bf16.vlgmr.msra.gmra.mxu0 %vm129_vm2, %v6163_v13  ;;  %v36_v13 = vld [vmem:[%s18454_s1] sm:$0xff] }
0x3e51   :  { %14524 = vmatpush3.bf16.msra.mxu0 %v15201_v28  ;;  %14531 = vmatprep.mubr.msk.bf16.mxu0 %vm15725_vm0, %v15724_v0  ;;  %v37_v28 = vld [vmem:[%s18454_s1 + $0x8] sm:$0xff] }
0x3e52   :  { %14525 = vmatprep.subr.bf16.mxu0 %v15724_v0 }
0x3e55   :  { %14526 = vmatpush3.bf16.msra.mxu0 %v15202_v31 }
0x3e56   :  { %14527 = vmatprep.subr.bf16.mxu0 %v15724_v0 }
0x3e59   :  { %14528 = vmatpush3.bf16.msra.mxu0 %v15203_v32 }
0x3e5a   :  { %14529 = vmatprep.subr.bf16.mxu0 %v15724_v0 }
0x3e5d   :  { %14530 = vmatpush3.bf16.msra.mxu0 %v15204_v44 }
0x3e60   :  { %14532 = vmatmul.mubr.msk.bf16.vlgmr.msra.gmra.mxu0 %vm80_vm1, %v6426_v4 }
0x3f08   :  { %v6137_v41 = vpop.f32.mrf.mxu0 }
0x3f09   :  { %v6144_v23 = vmul.f32 %v6137_v41, %v6137_v41 }
0x3f0a   :  { %v14506_v39 = vpop.f32.mrf.mxu0 }
0x3f0b   :  { %v6146_v29 = vsel %vm129_vm2, %v6144_v23, 0.0 }
0x3f0c   :  { %6147 = vadd.xlane.f32.xlu1 %v6146_v29  ;;  %v6140_v25 = vpop.f32.mrf.mxu0 }
0x3f0d   :  { %v6145_v45 = vmul.f32 %v6140_v25, %v6140_v25 }
0x3f0e   :  { %v14507_v46 = vpop.f32.mrf.mxu0 }
0x3f0f   :  { %v6149_v49 = vsel %vm129_vm2, %v6145_v45, 0.0 }
0x3f10   :  { %6150 = vadd.xlane.f32.xlu0 %v6149_v49  ;;  %v6213_v53 = vpop.f32.mrf.mxu0 }
0x3f11   :  { %v6219_v55 = vmul.f32 %v6213_v53, %v6213_v53 }
0x3f12   :  { %v14514_v12 = vpop.f32.mrf.mxu0 }
0x3f13   :  { %v6220_v56 = vsel %vm129_vm2, %v6219_v55, 0.0 }
0x3f14   :  { %6221 = vadd.xlane.f32.xlu0 %v6220_v56  ;;  %v6216_v57 = vpop.f32.mrf.mxu0 }
0x3f16   :  { %v14515_v58 = vpop.f32.mrf.mxu0 }
0x3f20   :  { %v6488_v59 = vpop.f32.mrf.mxu0 }
0x3f21   :  { %v6489_v60 = vadd.f32 %v15711_v8, %v6488_v59 }
0x3f22   :  { %v14533_v22 = vpop.f32.mrf.mxu0 }
0x3f23   :  { %v17114_v52 = vadd.f32 %v15712_v20, %v6489_v60 }
0x3f24   :  { %v6491_v61 = vpop.f32.mrf.mxu0 }
0x3f25   :  { %v6492_v62 = vadd.f32 %v15711_v8, %v6491_v61  ;;  %v6499_v47 = vsel %vm129_vm2, %v17114_v52, 0.0 }
0x3f26   :  { %6500 = vadd.xlane.f32.xlu1 %v6499_v47  ;;  %v14534_v63 = vpop.f32.mrf.mxu0 }
0x3f27   :  { %v17121_v3 = vadd.f32 %v15713_v2, %v6492_v62 }
0x3f29   :  { %v6502_v5 = vsel %vm129_vm2, %v17121_v3, 0.0 }
0x3f2a   :  { %6503 = vadd.xlane.f32.xlu0 %v6502_v5 }
0x3f95   :  { %v6148_v1 = vpop.xlane.xlu1 %6147 }
0x3f96   :  { %v6152_v40 = vmax.f32 %v6148_v1, 1e-24 }
0x3f99   :  { %v6151_v17 = vpop.xlane.xlu0 %6150 }
0x3f9a   :  { %v6153_v19 = vmax.f32 %v6151_v17, 1e-24 }
0x3f9c   :  { %15469 = vrsqrt.f32 %v6153_v19  ;;  %v13073_v19 = vld [vmem:[%s18450_s6] ss:$0 sm:$0xff] }
0x3f9d   :  { %v6222_v15 = vpop.xlane.xlu0 %6221  ;;  %15471 = vrsqrt.f32 %v6152_v40 }
0x3f9e   :  { %v6223_v42 = vmax.f32 %v6222_v15, 1e-24  ;;  %v15205_v15 = vld [vmem:[%s18451_s2 + $0x8] sm:$0xff]  }
0x3fa0   :  { %15473 = vrsqrt.f32 %v6223_v42 }
0x3fa9   :  { %v15470_v37 = vpop.eup %15469 }
0x3faa   :  { %v6157_v48 = vmul.f32 %v15470_v37, %v6140_v25  ;;  %v15472_v50 = vpop.eup %15471 }
0x3fab   :  { %v6156_v10 = vmul.f32 %v15472_v50, %v6137_v41  ;;  %v15206_v50 = vld [vmem:[%s18451_s2] sm:$0xff]  }
0x3fac   :  { %14517 = vmatpush3.xpose.msk.msra.mxu1 %vm129_vm2, %v6157_v48 }
0x3fad   :  { %14518 = vmatprep.subr.mxu1 %v15724_v0  ;;  %v15474_v9 = vpop.eup %15473 }
0x3fae   :  { %v6225_v33 = vmul.f32 %v15474_v9, %v6213_v53  ;;  %v13074_v9 = vld [vmem:[%s18450_s6 + $0x1] ss:$0 sm:$0xff] }
0x3faf   :  { %v6501_v11 = vpop.xlane.xlu1 %6500 }
0x3fb0   :  { %v6505_v34 = vmul.f32 0.03125, %v6501_v11  ;;  %14519 = vmatpush3.xpose.msk.msra.mxu1 %vm129_vm2, %v6156_v10 }
0x3fb1   :  { %6370 = vmatprep.subr.mxu1 %v39_v43 }
0x3fb2   :  { %v17129_v51 = vsub.f32 %v17114_v52, %v6505_v34 }
0x3fb3   :  { %v6504_v54 = vpop.xlane.xlu0 %6503  ;;  %14521 = vmatmul.mubr.msk.f32.vlgmr.msra.gmra.mxu1 %vm129_vm2, %v6225_v33 }
0x3fb4   :  { %v6506_v14 = vmul.f32 0.03125, %v6504_v54  ;;  %v6509_v18 = vmul.f32 %v17129_v51, %v17129_v51  ;;  %6406 = vmatprep.mubr.f32.mxu1 %v15724_v0  ;;  %6371 = vmatpush1.msra.mxu1 %v38_v16  ;;  %v13075_v54 = vld [vmem:[%s18450_s6 + $0x2] ss:$0 sm:$0xff] }
0x3fb5   :  { %6372 = vmatprep.subr.mxu1 %v37_v28 }
0x3fb6   :  { %v6508_v21 = vsub.f32 %v17121_v3, %v6506_v14  ;;  %v6511_v35 = vsel %vm129_vm2, %v6509_v18, 0.0  ;;  %6373 = vmatpush1.msra.mxu1 %v36_v13 }
0x3fb7   :  { %6512 = vadd.xlane.f32.xlu1 %v6511_v35  ;;  %14535 = vmatprep.subr.bf16.mxu1 %v15724_v0 }
0x3fb8   :  { %v6510_v24 = vmul.f32 %v6508_v21, %v6508_v21 }
0x3fba   :  { %v6514_v26 = vsel %vm129_vm2, %v6510_v24, 0.0 }
0x3fbb   :  { %6515 = vadd.xlane.f32.xlu0 %v6514_v26 }
0x3fc8   :  { %6330 = vperm.xlu1 %15157, %v34_v27  }
0x3fd1   :  { %6335 = vperm.xlu0 %15158, %v34_v27  }
0x4040   :  { %v6513_v12 = vpop.xlane.xlu1 %6512 }
0x4041   :  { %v6517_v59 = vmul.f32 0.03125, %v6513_v12 }
0x4043   :  { %v6519_v20 = vadd.f32 1e-06, %v6517_v59 }
0x4044   :  { %v6516_v55 = vpop.xlane.xlu0 %6515  ;;  %v17156_v5 = vpop.permute.xlu1 %6330 }
0x4045   :  { %v6518_v57 = vmul.f32 0.03125, %v6516_v55 }
0x4047   :  { %v6520_v60 = vadd.f32 1e-06, %v6518_v57 }
0x4049   :  { %15475 = vrsqrt.f32 %v6520_v60 }
0x404a   :  { %15477 = vrsqrt.f32 %v6519_v20 }
0x404c   :  { %v17158_v1 = vpop.permute.xlu0 %6335 }
0x4056   :  { %v15476_v47 = vpop.eup %15475 }
0x4057   :  { %v15478_v63 = vpop.eup %15477  ;;  %v6524_v6 = vmul.f32 %v15476_v47, %v6508_v21 }
0x4058   :  { %v6523_v17 = vmul.f32 %v15478_v63, %v17129_v51 }
0x4059   :  { %v6530_v42 = vmul.f32 %v13073_v19, %v6524_v6 }
0x405a   :  { %v6529_v48 = vmul.f32 %v13073_v19, %v6523_v17 }
0x405b   :  { %v6536_v10 = vadd.f32 %v13074_v9, %v6530_v42 }
0x405c   :  { %v6535_v11 = vadd.f32 %v13074_v9, %v6529_v48 }
0x405e   :  { %v6547_v34 = vpack.c.bf16 %v6536_v10, %v6535_v11 }
0x4073   :  { %v6301_v31 = vpop.f32.mrf.mxu1 }
0x4074   :  { %v6306_v32 = vsel %vm6305_vm7, %v6301_v31, 0.0 }
0x4075   :  { %v6307_v36 = vrot.slane %v6306_v32, 4  ;;  %v14522_v38 = vpop.f32.mrf.mxu1 }
0x4077   :  { %v6308_v44 = vadd.f32 %v6307_v36, %v6306_v32 }
0x4079   :  { %v6309_v4 = vrot.slane %v6308_v44, 2 }
0x407b   :  { %v6310_v41 = vadd.f32 %v6309_v4, %v6308_v44 }
0x407d   :  { %v6311_v23 = vrot.slane %v6310_v41, 1 }
0x407f   :  { %v6312_v39 = vadd.f32 %v6311_v23, %v6310_v41 }
0x4081   :  { %v6314_v29 = vmul.f32 0.2, %v6312_v39 }
0x4083   :  { %v6315_v25 = vsub.f32 %v6301_v31, %v6314_v29 }
0x4085   :  { %v6316_v45 = vmul.f32 %v6315_v25, %v6315_v25 }
0x4087   :  { %v6317_v46 = vsel %vm6305_vm7, %v6316_v45, 0.0 }
0x4088   :  { %v6318_v49 = vrot.slane %v6317_v46, 4 }
0x408a   :  { %v6319_v53 = vadd.f32 %v6318_v49, %v6317_v46 }
0x408c   :  { %v6320_v56 = vrot.slane %v6319_v53, 2 }
0x408e   :  { %v6321_v58 = vadd.f32 %v6320_v56, %v6319_v53 }
0x4090   :  { %v6322_v8 = vrot.slane %v6321_v58, 1 }
0x4092   :  { %v6323_v22 = vadd.f32 %v6322_v8, %v6321_v58 }
0x4094   :  { %v6324_v61 = vmul.f32 0.2, %v6323_v22  ;;  %v6542_v22 = vld [vmem:[%s18452_s3] sm:$0xf] }
0x4095   :  { %v6811_v20 = vsel %vm444_vm5, %v6542_v22, 0 }
0x4096   :  { %v6325_v62 = vadd.f32 1e-06, %v6324_v61 }
0x4098   :  { %15479 = vrsqrt.f32 %v6325_v62 }
0x40a5   :  { %v15480_v2 = vpop.eup %15479 }
0x40a6   :  { %v6327_v7 = vmul.f32 %v15480_v2, %v6315_v25 }
0x40a8   :  { %v6333_v40 = vmul.f32 %v17156_v5, %v6327_v7 }
0x40aa   :  { %v6338_v37 = vadd.f32 %v17158_v1, %v6333_v40 }
0x40ac   :  { %13057 = vmatmul.mubr.msk.f32.vlgmr.msra.gmra.mxu1 %vm330_vm4, %v6338_v37 }
0x40ad   :  { %14536 = vmatpush3.bf16.msra.mxu1 %v15205_v15  ;;  %14539 = vmatprep.mubr.msk.bf16.mxu1 %vm15725_vm0, %v15724_v0 }
0x40ae   :  { %14537 = vmatprep.subr.bf16.mxu1 %v15724_v0 }
0x40b1   :  { %14538 = vmatpush3.bf16.msra.mxu1 %v15206_v50 }
0x40b4   :  { %14540 = vmatmul.mubr.msk.bf16.vlgmr.msra.gmra.mxu1 %vm129_vm2, %v6547_v34 }
0x416c   :  { %v6408_v33 = vpop.f32.mrf.mxu1 }
0x416d   :  { %6413 = vst [vmem:[%s18455_s7] sm:$0xff] %v6408_v33 }
0x416e   :  { %v6410_v51 = vpop.f32.mrf.mxu1 }
0x416f   :  { %6414 = vst [vmem:[%s18455_s7 + $0x8] sm:$0xff] %v6410_v51 }
0x4174   :  { %v6601_v14 = vpop.f32.mrf.mxu1 }
0x4175   :  { %v17189_v18 = vadd.f32 %v13075_v54, %v6601_v14 }
0x4176   :  { %v14541_v21 = vpop.f32.mrf.mxu1 }
0x4177   :  { %14547 = vmatprep.mubr.msk.f32.mxu1 %vm246_vm3, %v17189_v18 }
0x4178   :  { %v6604_v35 = vpop.f32.mrf.mxu1 }
0x4179   :  { %v17193_v24 = vadd.f32 %v13075_v54, %v6604_v35 }
0x417a   :  { %v14542_v26 = vpop.f32.mrf.mxu1 }
0x417b   :  { %6612 = vrot.lane.b32.xlu1 %v17193_v24, %s15726_s29 }
0x417f   :  { %6610 = vrot.lane.b32.xlu1 %v17189_v18, %s15726_s29 }
0x41ed   :  { %v6613_v27 = vpop.permute.xlu1 %6612 }
0x41ee   :  { %14543 = vmatprep.subr.msk.mxu1 %vm246_vm3, %v6613_v27 }
0x41ef   :  { %14544 = vmatpush3.xpose.msk.msra.mxu1 %vm246_vm3, %v6613_v27 }
0x41f1   :  { %v6611_v43 = vpop.permute.xlu1 %6610 }
0x41f2   :  { %14545 = vmatprep.subr.msk.mxu1 %vm246_vm3, %v6611_v43 }
0x41f3   :  { %14546 = vmatpush3.xpose.msk.msra.mxu1 %vm246_vm3, %v6611_v43 }
0x41f4   :  { %14557 = vmatprep.subr.bf16.mxu1 %v15724_v0 }
0x41f6   :  { %14548 = vmatmul.mubr.msk.f32.vlgmr.msra.gmra.mxu1 %vm246_vm3, %v17193_v24 }
0x41f7   :  { %14559 = vmatprep.mubr.msk.bf16.mxu1 %vm15725_vm0, %v15724_v0  ;;  %14558 = vmatpush3.bf16.msra.mxu1 %v6811_v20 }
0x42b6   :  { %v14549_v16 = vpop.f32.mrf.mxu1 }
0x42b7   :  { %v6700_v28 = vsel %vm330_vm4, %v14549_v16, -inf }
0x42b8   :  { %6701 = vmax.xlane.f32.xlu0 %v6700_v28  ;;  %v6688_v13 = vpop.f32.mrf.mxu1 }
0x42b9   :  { %v6697_v31 = vsel %vm330_vm4, %v6688_v13, -inf }
0x42ba   :  { %6698 = vmax.xlane.f32.xlu1 %v6697_v31 }
0x42cb   :  { %6721 = vrot.lane.b32.xlu1 %v17193_v24, %s15727_s30 }
0x42ce   :  { %6719 = vrot.lane.b32.xlu0 %v17189_v18, %s15727_s30 }
0x42cf   :  { %6866 = vrot.lane.b32.xlu1 %v17193_v24, %s15728_s8 }
0x42d3   :  { %6864 = vrot.lane.b32.xlu1 %v17189_v18, %s15728_s8 }
0x42d7   :  { %6860 = vrot.lane.b32.xlu1 %v17189_v18, %s15729_s9 }
0x4341   :  { %v6702_v32 = vpop.xlane.xlu0 %6701 }
0x4342   :  { %v6704_v36 = vsub.f32 %v14549_v16, %v6702_v32 }
0x4343   :  { %v6699_v38 = vpop.xlane.xlu1 %6698 }
0x4344   :  { %v6707_v44 = vmul.f32 1.442695, %v6704_v36  ;;  %v6703_v4 = vsub.f32 %v6688_v13, %v6699_v38  ;;  %v6543_v36 = vld [vmem:[%s18452_s3 + $0x4] sm:$0xf] }
0x4345   :  { %v6720_v39 = vpop.permute.xlu0 %6719  ;;  %v7065_v38 = vsel %vm444_vm5, %v6543_v36, 0 }
0x4346   :  { %15481 = vpow2.f32 %v6707_v44  ;;  %v6705_v41 = vmul.f32 1.442695, %v6703_v4 }
0x4347   :  { %v6722_v23 = vpop.permute.xlu1 %6721 }
0x4348   :  { %15483 = vpow2.f32 %v6705_v41  ;;  %14550 = vmatprep.subr.mxu0 %v6722_v23 }
0x4349   :  { %14551 = vmatpush3.msra.mxu0 %v6722_v23 }
0x434a   :  { %14552 = vmatprep.subr.mxu0 %v6720_v39 }
0x434b   :  { %14553 = vmatpush3.msra.mxu0 %v6720_v39  ;;  %v6867_v29 = vpop.permute.xlu1 %6866 }
0x434c   :  { %14563 = vmatprep.subr.msk.mxu0 %vm246_vm3, %v6867_v29 }
0x434f   :  { %v6865_v53 = vpop.permute.xlu1 %6864 }
0x4353   :  { %v15482_v25 = vpop.eup %15481  ;;  %v6861_v55 = vpop.permute.xlu1 %6860 }
0x4354   :  { %v6712_v45 = vsel %vm330_vm4, %v15482_v25, 0.0 }
0x4355   :  { %v15484_v46 = vpop.eup %15483  ;;  %6713 = vadd.xlane.f32.xlu1 %v6712_v45 }
0x4356   :  { %v6709_v49 = vsel %vm330_vm4, %v15484_v46, 0.0 }
0x4359   :  { %6710 = vadd.xlane.f32.xlu1 %v6709_v49 }
0x436a   :  { %6862 = vrot.lane.b32.xlu1 %v17193_v24, %s15729_s9 }
0x43de   :  { %v6714_v12 = vpop.xlane.xlu1 %6713 }
0x43df   :  { %15485 = vrcp.f32 %v6714_v12 }
0x43e2   :  { %v6711_v56 = vpop.xlane.xlu1 %6710 }
0x43e3   :  { %15487 = vrcp.f32 %v6711_v56 }
0x43e6   :  { %v6863_v60 = vpop.permute.xlu1 %6862 }
0x43ec   :  { %v15486_v57 = vpop.eup %15485 }
0x43ed   :  { %v6718_v8 = vmul.f32 %v15486_v57, %v15482_v25 }
0x43f0   :  { %v15488_v58 = vpop.eup %15487 }
0x43f1   :  { %v6716_v59 = vmul.f32 %v15488_v58, %v15484_v46 }
0x43f3   :  { %14554 = vmatprep.mubr.msk.f32.mxu0 %vm330_vm4, %v6716_v59 }
0x43f4   :  { %14555 = vmatmul.mubr.msk.f32.vlgmr.msra.gmra.mxu0 %vm330_vm4, %v6718_v8 }
0x43f5   :  { %14564 = vmatpush3.xpose.msk.msra.mxu0 %vm246_vm3, %v6867_v29  ;;  %14567 = vmatprep.mubr.msk.f32.mxu0 %vm246_vm3, %v6861_v55 }
0x43f6   :  { %14565 = vmatprep.subr.msk.mxu0 %vm246_vm3, %v6865_v53 }
0x43f9   :  { %14566 = vmatpush3.xpose.msk.msra.mxu0 %vm246_vm3, %v6865_v53 }
0x43fa   :  { %14577 = vmatprep.subr.bf16.mxu0 %v15724_v0 }
0x43fc   :  { %14568 = vmatmul.mubr.msk.f32.vlgmr.msra.gmra.mxu0 %vm246_vm3, %v6863_v60  ;;  %v13086_v60 = vld [vmem:[%s18450_s6 + $0x3] ss:$0 sm:$0xff] }
0x43fd   :  { %14579 = vmatprep.mubr.msk.bf16.mxu0 %vm15725_vm0, %v15724_v0  ;;  %14578 = vmatpush3.bf16.msra.mxu0 %v7065_v38 }
0x44b4   :  { %v14556_v61 = vpop.f32.mrf.mxu0 }
0x44b6   :  { %v6797_v62 = vpop.f32.mrf.mxu0 }
0x44b7   :  { %v6806_v47 = vpack.c.bf16 %v14556_v61, %v6797_v62 }
0x44b9   :  { %14560 = vmatmul.mubr.msk.bf16.vlgmr.msra.gmra.mxu1 %vm246_vm3, %v6806_v47 }
0x44bc   :  { %v14569_v63 = vpop.f32.mrf.mxu0 }
0x44bd   :  { %v6954_v2 = vsel %vm330_vm4, %v14569_v63, -inf }
0x44be   :  { %6955 = vmax.xlane.f32.xlu1 %v6954_v2  ;;  %v6942_v6 = vpop.f32.mrf.mxu0 }
0x44bf   :  { %v6951_v7 = vsel %vm330_vm4, %v6942_v6, -inf }
0x44c0   :  { %6952 = vmax.xlane.f32.xlu0 %v6951_v7 }
0x44cf   :  { %6975 = vrot.lane.b32.xlu1 %v17193_v24, %s15730_s12 }
0x44d3   :  { %7116 = vrot.lane.b32.xlu1 %v17193_v24, %s15731_s13 }
0x44d7   :  { %7114 = vrot.lane.b32.xlu1 %v17189_v18, %s15731_s13 }
0x44db   :  { %7112 = vrot.lane.b32.xlu1 %v17193_v24, %s15732_s14 }
0x4547   :  { %v6956_v17 = vpop.xlane.xlu1 %6955 }
0x4548   :  { %v6958_v40 = vsub.f32 %v14569_v63, %v6956_v17 }
0x4549   :  { %v6953_v19 = vpop.xlane.xlu0 %6952 }
0x454a   :  { %v6961_v15 = vmul.f32 1.442695, %v6958_v40  ;;  %v6957_v42 = vsub.f32 %v6942_v6, %v6953_v19 }
0x454b   :  { %v6976_v37 = vpop.permute.xlu1 %6975 }
0x454c   :  { %15489 = vpow2.f32 %v6961_v15  ;;  %v6959_v48 = vmul.f32 1.442695, %v6957_v42  ;;  %14570 = vmatprep.subr.mxu1 %v6976_v37 }
0x454d   :  { %14571 = vmatpush3.msra.mxu1 %v6976_v37 }
0x454e   :  { %15491 = vpow2.f32 %v6959_v48 }
0x454f   :  { %v7117_v26 = vpop.permute.xlu1 %7116 }
0x4553   :  { %v7115_v31 = vpop.permute.xlu1 %7114 }
0x4557   :  { %v7113_v32 = vpop.permute.xlu1 %7112 }
0x4559   :  { %v15490_v50 = vpop.eup %15489 }
0x455a   :  { %v6966_v9 = vsel %vm330_vm4, %v15490_v50, 0.0 }
0x455b   :  { %v15492_v10 = vpop.eup %15491  ;;  %6967 = vadd.xlane.f32.xlu0 %v6966_v9 }
0x455c   :  { %v6963_v11 = vsel %vm330_vm4, %v15492_v10, 0.0 }
0x455f   :  { %6964 = vadd.xlane.f32.xlu0 %v6963_v11  ;;  %v6544_v11 = vld [vmem:[%s18452_s3 + $0x8] sm:$0xf] }
0x4575   :  { %6973 = vrot.lane.b32.xlu0 %v17189_v18, %s15730_s12 }
0x4579   :  { %7110 = vrot.lane.b32.xlu0 %v17189_v18, %s15732_s14  ;;  %v17256_v34 = vpop.f32.mrf.mxu1 }
0x457a   :  { %v6858_v22 = vadd.f32 %v13086_v60, %v17256_v34  ;;  %v7315_v34 = vsel %vm444_vm5, %v6544_v11, 0 }
0x457b   :  { %v14561_v33 = vpop.f32.mrf.mxu1 }
0x457d   :  { %v17258_v51 = vpop.f32.mrf.mxu1 }
0x457e   :  { %v6859_v47 = vadd.f32 %v13086_v60, %v17258_v51 }
0x457f   :  { %v14562_v54 = vpop.f32.mrf.mxu1 }
0x45e4   :  { %v6968_v14 = vpop.xlane.xlu0 %6967 }
0x45e5   :  { %15493 = vrcp.f32 %v6968_v14 }
0x45e8   :  { %v6965_v21 = vpop.xlane.xlu0 %6964 }
0x45e9   :  { %15495 = vrcp.f32 %v6965_v21 }
0x45ec   :  { %v6974_v35 = vpop.permute.xlu0 %6973 }
0x45ed   :  { %14572 = vmatprep.subr.mxu1 %v6974_v35 }
0x45ee   :  { %14573 = vmatpush3.msra.mxu1 %v6974_v35 }
0x45ef   :  { %14583 = vmatprep.subr.msk.mxu1 %vm246_vm3, %v7117_v26 }
0x45f0   :  { %v7111_v13 = vpop.permute.xlu0 %7110 }
0x45f2   :  { %v15494_v27 = vpop.eup %15493 }
0x45f3   :  { %v6972_v28 = vmul.f32 %v15494_v27, %v15490_v50 }
0x45f6   :  { %v15496_v43 = vpop.eup %15495 }
0x45f7   :  { %v6970_v16 = vmul.f32 %v15496_v43, %v15492_v10 }
0x45f9   :  { %14574 = vmatprep.mubr.msk.f32.mxu1 %vm330_vm4, %v6970_v16 }
0x45fa   :  { %14575 = vmatmul.mubr.msk.f32.vlgmr.msra.gmra.mxu1 %vm330_vm4, %v6972_v28 }
0x45fb   :  { %14584 = vmatpush3.xpose.msk.msra.mxu1 %vm246_vm3, %v7117_v26  ;;  %14587 = vmatprep.mubr.msk.f32.mxu1 %vm246_vm3, %v7111_v13 }
0x45fc   :  { %14585 = vmatprep.subr.msk.mxu1 %vm246_vm3, %v7115_v31 }
0x45ff   :  { %14586 = vmatpush3.xpose.msk.msra.mxu1 %vm246_vm3, %v7115_v31 }
0x4600   :  { %14597 = vmatprep.subr.bf16.mxu1 %v15724_v0 }
0x4602   :  { %14588 = vmatmul.mubr.msk.f32.vlgmr.msra.gmra.mxu1 %vm246_vm3, %v7113_v32 }
0x4603   :  { %14599 = vmatprep.mubr.msk.bf16.mxu1 %vm15725_vm0, %v15724_v0  ;;  %14598 = vmatpush3.bf16.msra.mxu1 %v7315_v34 }
0x46ba   :  { %v14576_v44 = vpop.f32.mrf.mxu1 }
0x46bc   :  { %v7051_v4 = vpop.f32.mrf.mxu1 }
0x46bd   :  { %v7060_v41 = vpack.c.bf16 %v14576_v44, %v7051_v4 }
0x46bf   :  { %14580 = vmatmul.mubr.msk.bf16.vlgmr.msra.gmra.mxu0 %vm246_vm3, %v7060_v41 }
0x46c2   :  { %v14589_v23 = vpop.f32.mrf.mxu1 }
0x46c3   :  { %v7204_v39 = vsel %vm330_vm4, %v14589_v23, -inf }
0x46c4   :  { %7205 = vmax.xlane.f32.xlu1 %v7204_v39  ;;  %v7192_v29 = vpop.f32.mrf.mxu1 }
0x46c5   :  { %v7201_v25 = vsel %vm330_vm4, %v7192_v29, -inf }
0x46c6   :  { %7202 = vmax.xlane.f32.xlu0 %v7201_v25 }
0x46d5   :  { %7225 = vrot.lane.b32.xlu1 %v17193_v24, %s15733_s17 }
0x46d9   :  { %7366 = vrot.lane.b32.xlu1 %v17193_v24, %s15734_s18 }
0x46dd   :  { %7364 = vrot.lane.b32.xlu1 %v17189_v18, %s15734_s18 }
0x46e1   :  { %7362 = vrot.lane.b32.xlu1 %v17193_v24, %s15735_s19 }
0x474d   :  { %v7206_v45 = vpop.xlane.xlu1 %7205 }
0x474e   :  { %v7208_v46 = vsub.f32 %v14589_v23, %v7206_v45 }
0x474f   :  { %v7203_v49 = vpop.xlane.xlu0 %7202 }
0x4750   :  { %v7211_v53 = vmul.f32 1.442695, %v7208_v46  ;;  %v7207_v55 = vsub.f32 %v7192_v29, %v7203_v49 }
0x4751   :  { %v7226_v12 = vpop.permute.xlu1 %7225 }
0x4752   :  { %15497 = vpow2.f32 %v7211_v53  ;;  %v7209_v56 = vmul.f32 1.442695, %v7207_v55  ;;  %14590 = vmatprep.subr.mxu0 %v7226_v12 }
0x4753   :  { %14591 = vmatpush3.msra.mxu0 %v7226_v12 }
0x4754   :  { %15499 = vpow2.f32 %v7209_v56  ;;  %v6545_v56 = vld [vmem:[%s18452_s3 + $0xc] sm:$0xf] }
0x4755   :  { %v7367_v19 = vpop.permute.xlu1 %7366 }
0x4759   :  { %v7365_v9 = vpop.permute.xlu1 %7364 }
0x475d   :  { %v7363_v10 = vpop.permute.xlu1 %7362 }
0x475f   :  { %v15498_v57 = vpop.eup %15497 }
0x4760   :  { %v7216_v58 = vsel %vm330_vm4, %v15498_v57, 0.0 }
0x4761   :  { %v15500_v59 = vpop.eup %15499  ;;  %7217 = vadd.xlane.f32.xlu0 %v7216_v58 }
0x4762   :  { %v7213_v8 = vsel %vm330_vm4, %v15500_v59, 0.0 }
0x4765   :  { %7214 = vadd.xlane.f32.xlu0 %v7213_v8 }
0x477b   :  { %7223 = vrot.lane.b32.xlu0 %v17189_v18, %s15733_s17 }
0x477f   :  { %7360 = vrot.lane.b32.xlu0 %v17189_v18, %s15735_s19  ;;  %v7101_v20 = vpop.f32.mrf.mxu0 }
0x4780   :  { %v17296_v61 = vadd.f32 %v7101_v20, %v6858_v22 }
0x4781   :  { %v14581_v62 = vpop.f32.mrf.mxu0 }
0x4783   :  { %v7104_v63 = vpop.f32.mrf.mxu0 }
0x4784   :  { %v17299_v2 = vadd.f32 %v7104_v63, %v6859_v47 }
0x4785   :  { %v14582_v6 = vpop.f32.mrf.mxu0 }
0x47ea   :  { %v7218_v7 = vpop.xlane.xlu0 %7217 }
0x47eb   :  { %15501 = vrcp.f32 %v7218_v7 }
0x47ee   :  { %v7215_v17 = vpop.xlane.xlu0 %7214 }
0x47ef   :  { %15503 = vrcp.f32 %v7215_v17 }
0x47f2   :  { %v7224_v40 = vpop.permute.xlu0 %7223 }
0x47f3   :  { %14592 = vmatprep.subr.mxu0 %v7224_v40 }
0x47f4   :  { %14593 = vmatpush3.msra.mxu0 %v7224_v40 }
0x47f5   :  { %14603 = vmatprep.subr.msk.mxu0 %vm246_vm3, %v7367_v19 }
0x47f6   :  { %v7361_v50 = vpop.permute.xlu0 %7360 }
0x47f8   :  { %v15502_v15 = vpop.eup %15501 }
0x47f9   :  { %v7222_v48 = vmul.f32 %v15502_v15, %v15498_v57  ;;  %v7565_v57 = vsel %vm444_vm5, %v6545_v56, 0 }
0x47fc   :  { %v15504_v42 = vpop.eup %15503 }
0x47fd   :  { %v7220_v37 = vmul.f32 %v15504_v42, %v15500_v59 }
0x47ff   :  { %14594 = vmatprep.mubr.msk.f32.mxu0 %vm330_vm4, %v7220_v37 }
0x4800   :  { %14595 = vmatmul.mubr.msk.f32.vlgmr.msra.gmra.mxu0 %vm330_vm4, %v7222_v48 }
0x4801   :  { %14604 = vmatpush3.xpose.msk.msra.mxu0 %vm246_vm3, %v7367_v19  ;;  %14607 = vmatprep.mubr.msk.f32.mxu0 %vm246_vm3, %v7361_v50 }
0x4802   :  { %14605 = vmatprep.subr.msk.mxu0 %vm246_vm3, %v7365_v9 }
0x4805   :  { %14606 = vmatpush3.xpose.msk.msra.mxu0 %vm246_vm3, %v7365_v9  ;;  %v15207_v9 = vld [vmem:[%s18453_s4 + $0x8] sm:$0xff]  }
0x4806   :  { %14617 = vmatprep.subr.bf16.mxu0 %v15724_v0 }
0x4808   :  { %14608 = vmatmul.mubr.msk.f32.vlgmr.msra.gmra.mxu0 %vm246_vm3, %v7363_v10  ;;  %v15208_v10 = vld [vmem:[%s18453_s4] sm:$0xff]  }
0x4809   :  { %14619 = vmatprep.mubr.msk.bf16.mxu0 %vm15725_vm0, %v15724_v0  ;;  %14618 = vmatpush3.bf16.msra.mxu0 %v7565_v57 }
0x480a   :  { %14631 = vmatprep.subr.bf16.mxu0 %v15724_v0 }
0x48c0   :  { %v14596_v33 = vpop.f32.mrf.mxu0 }
0x48c2   :  { %v7301_v51 = vpop.f32.mrf.mxu0 }
0x48c3   :  { %v7310_v54 = vpack.c.bf16 %v14596_v33, %v7301_v51 }
0x48c5   :  { %14600 = vmatmul.mubr.msk.bf16.vlgmr.msra.gmra.mxu1 %vm246_vm3, %v7310_v54 }
0x48c8   :  { %v14609_v14 = vpop.f32.mrf.mxu0 }
0x48c9   :  { %v7454_v21 = vsel %vm330_vm4, %v14609_v14, -inf }
0x48ca   :  { %7455 = vmax.xlane.f32.xlu1 %v7454_v21  ;;  %v7442_v35 = vpop.f32.mrf.mxu0 }
0x48cb   :  { %v7451_v26 = vsel %vm330_vm4, %v7442_v35, -inf }
0x48cc   :  { %7452 = vmax.xlane.f32.xlu0 %v7451_v26  ;;  %v13108_v26 = vld [vmem:[%s18450_s6 + $0x4] ss:$0 sm:$0xff] }
0x48db   :  { %7475 = vrot.lane.b32.xlu1 %v17193_v24, %s15736_s24 }
0x4953   :  { %v7456_v27 = vpop.xlane.xlu1 %7455 }
0x4954   :  { %v7458_v43 = vsub.f32 %v14609_v14, %v7456_v27 }
0x4955   :  { %v7453_v16 = vpop.xlane.xlu0 %7452 }
0x4956   :  { %v7461_v28 = vmul.f32 1.442695, %v7458_v43  ;;  %v7457_v13 = vsub.f32 %v7442_v35, %v7453_v16 }
0x4957   :  { %v7476_v31 = vpop.permute.xlu1 %7475 }
0x4958   :  { %15505 = vpow2.f32 %v7461_v28  ;;  %v7459_v32 = vmul.f32 1.442695, %v7457_v13  ;;  %14610 = vmatprep.subr.mxu1 %v7476_v31  ;;  %v13109_v28 = vld [vmem:[%s18450_s6 + $0x5] ss:$0 sm:$0xff] }
0x4959   :  { %14611 = vmatpush3.msra.mxu1 %v7476_v31 }
0x495a   :  { %15507 = vpow2.f32 %v7459_v32 }
0x4965   :  { %v15506_v36 = vpop.eup %15505 }
0x4966   :  { %v7466_v38 = vsel %vm330_vm4, %v15506_v36, 0.0 }
0x4967   :  { %v15508_v44 = vpop.eup %15507  ;;  %7467 = vadd.xlane.f32.xlu0 %v7466_v38  ;;  %v15209_v38 = vld [vmem:[%s18448_s5 + $0x18] sm:$0xff]  }
0x4968   :  { %v7463_v4 = vsel %vm330_vm4, %v15508_v44, 0.0 }
0x496b   :  { %7464 = vadd.xlane.f32.xlu0 %v7463_v4  ;;  %v15211_v4 = vld [vmem:[%s18448_s5 + $0x8] sm:$0xff]  }
0x4981   :  { %7473 = vrot.lane.b32.xlu0 %v17189_v18, %s15736_s24 }
0x4985   :  { %v7351_v24 = vpop.f32.mrf.mxu1 }
0x4986   :  { %v7358_v41 = vadd.f32 %v7351_v24, %v17296_v61  ;;  %v15212_v24 = vld [vmem:[%s18448_s5] sm:$0xff]  }
0x4987   :  { %v14601_v23 = vpop.f32.mrf.mxu1 }
0x4989   :  { %v7354_v39 = vpop.f32.mrf.mxu1 }
0x498a   :  { %v7359_v29 = vadd.f32 %v7354_v39, %v17299_v2 }
0x498b   :  { %v14602_v25 = vpop.f32.mrf.mxu1 }
0x49f0   :  { %v7468_v45 = vpop.xlane.xlu0 %7467 }
0x49f1   :  { %15509 = vrcp.f32 %v7468_v45 }
0x49f4   :  { %v7465_v46 = vpop.xlane.xlu0 %7464 }
0x49f5   :  { %15511 = vrcp.f32 %v7465_v46 }
0x49f8   :  { %v7474_v49 = vpop.permute.xlu0 %7473 }
0x49f9   :  { %14612 = vmatprep.subr.mxu1 %v7474_v49 }
0x49fa   :  { %14613 = vmatpush3.msra.mxu1 %v7474_v49 }
0x49fb   :  { %14623 = vmatprep.subr.bf16.mxu1 %v15724_v0 }
0x49fe   :  { %v15510_v53 = vpop.eup %15509 }
0x49ff   :  { %v7472_v12 = vmul.f32 %v15510_v53, %v15506_v36 }
0x4a02   :  { %v15512_v55 = vpop.eup %15511 }
0x4a03   :  { %v7470_v18 = vmul.f32 %v15512_v55, %v15508_v44  ;;  %v15210_v44 = vld [vmem:[%s18448_s5 + $0x10] sm:$0xff]  }
0x4a05   :  { %14614 = vmatprep.mubr.msk.f32.mxu1 %vm330_vm4, %v7470_v18 }
0x4a06   :  { %14615 = vmatmul.mubr.msk.f32.vlgmr.msra.gmra.mxu1 %vm330_vm4, %v7472_v12 }
0x4a07   :  { %14627 = vmatprep.mubr.msk.bf16.mxu1 %vm15725_vm0, %v15724_v0  ;;  %14624 = vmatpush3.bf16.msra.mxu1 %v15207_v9 }
0x4a08   :  { %14625 = vmatprep.subr.bf16.mxu1 %v15724_v0 }
0x4a0b   :  { %14626 = vmatpush3.bf16.msra.mxu1 %v15208_v10 }
0x4a0c   :  { %14643 = vmatprep.subr.bf16.mxu1 %v15724_v0 }
0x4ac6   :  { %v14616_v58 = vpop.f32.mrf.mxu1 }
0x4ac8   :  { %v7551_v59 = vpop.f32.mrf.mxu1 }
0x4ac9   :  { %v7560_v8 = vpack.c.bf16 %v14616_v58, %v7551_v59 }
0x4acb   :  { %14620 = vmatmul.mubr.msk.bf16.vlgmr.msra.gmra.mxu0 %vm246_vm3, %v7560_v8 }
0x4acc   :  { %14639 = vmatprep.mubr.msk.bf16.mxu0 %vm15725_vm0, %v15724_v0  ;;  %14632 = vmatpush3.bf16.msra.mxu0 %v15209_v38 }
0x4acd   :  { %14633 = vmatprep.subr.bf16.mxu0 %v15724_v0 }
0x4ad0   :  { %14634 = vmatpush3.bf16.msra.mxu0 %v15210_v44  ;;  %v13120_v44 = vld [vmem:[%s18450_s6 + $0x8] ss:$0 sm:$0xff] }
0x4ad1   :  { %14635 = vmatprep.subr.bf16.mxu0 %v15724_v0 }
0x4ad4   :  { %14636 = vmatpush3.bf16.msra.mxu0 %v15211_v4 }
0x4ad5   :  { %14637 = vmatprep.subr.bf16.mxu0 %v15724_v0 }
0x4ad8   :  { %14638 = vmatpush3.bf16.msra.mxu0 %v15212_v24 }
0x4b8b   :  { %v7601_v60 = vpop.f32.mrf.mxu0 }
0x4b8c   :  { %v7608_v22 = vadd.f32 %v7601_v60, %v7358_v41  ;;  %v13110_v41 = vld [vmem:[%s18450_s6 + $0x6] ss:$0 sm:$0xff] }
0x4b8d   :  { %v14621_v20 = vpop.f32.mrf.mxu0 }
0x4b8e   :  { %v17341_v61 = vadd.f32 %v7608_v22, %v17114_v52 }
0x4b8f   :  { %v7604_v62 = vpop.f32.mrf.mxu0 }
0x4b90   :  { %v7609_v47 = vadd.f32 %v7604_v62, %v7359_v29  ;;  %v7614_v63 = vsel %vm129_vm2, %v17341_v61, 0.0 }
0x4b91   :  { %7615 = vadd.xlane.f32.xlu1 %v7614_v63  ;;  %v14622_v2 = vpop.f32.mrf.mxu0 }
0x4b92   :  { %v17346_v6 = vadd.f32 %v7609_v47, %v17121_v3 }
0x4b94   :  { %v7617_v7 = vsel %vm129_vm2, %v17346_v6, 0.0 }
0x4b95   :  { %7618 = vadd.xlane.f32.xlu0 %v7617_v7 }
0x4c1a   :  { %v7616_v17 = vpop.xlane.xlu1 %7615 }
0x4c1b   :  { %v7620_v40 = vmul.f32 0.03125, %v7616_v17 }
0x4c1d   :  { %v7622_v19 = vsub.f32 %v17341_v61, %v7620_v40  ;;  %v13114_v40 = vld [vmem:[%s18450_s6 + $0x7] ss:$0 sm:$0xff] }
0x4c1e   :  { %v7619_v52 = vpop.xlane.xlu0 %7618 }
0x4c1f   :  { %v7621_v15 = vmul.f32 0.03125, %v7619_v52  ;;  %v7624_v42 = vmul.f32 %v7622_v19, %v7622_v19 }
0x4c21   :  { %v7623_v37 = vsub.f32 %v17346_v6, %v7621_v15  ;;  %v7626_v48 = vsel %vm129_vm2, %v7624_v42, 0.0 }
0x4c22   :  { %7627 = vadd.xlane.f32.xlu1 %v7626_v48 }
0x4c23   :  { %v7625_v50 = vmul.f32 %v7623_v37, %v7623_v37 }
0x4c25   :  { %v7629_v3 = vsel %vm129_vm2, %v7625_v50, 0.0 }
0x4c26   :  { %7630 = vadd.xlane.f32.xlu0 %v7629_v3 }
0x4cab   :  { %v7628_v11 = vpop.xlane.xlu1 %7627 }
0x4cac   :  { %v7632_v34 = vmul.f32 0.03125, %v7628_v11 }
0x4cae   :  { %v7634_v33 = vadd.f32 1e-06, %v7632_v34 }
0x4caf   :  { %v7631_v51 = vpop.xlane.xlu0 %7630 }
0x4cb0   :  { %15513 = vrsqrt.f32 %v7634_v33  ;;  %v7633_v54 = vmul.f32 0.03125, %v7631_v51 }
0x4cb2   :  { %v7635_v14 = vadd.f32 1e-06, %v7633_v54 }
0x4cb4   :  { %15515 = vrsqrt.f32 %v7635_v14 }
0x4cbd   :  { %v15514_v21 = vpop.eup %15513 }
0x4cbe   :  { %v7638_v35 = vmul.f32 %v15514_v21, %v7622_v19 }
0x4cc0   :  { %v7644_v43 = vmul.f32 %v13108_v26, %v7638_v35 }
0x4cc1   :  { %v15516_v27 = vpop.eup %15515 }
0x4cc2   :  { %v7639_v16 = vmul.f32 %v15516_v27, %v7623_v37  ;;  %v7650_v31 = vadd.f32 %v13109_v28, %v7644_v43  ;;  %v15214_v27 = vld [vmem:[%s18451_s2 + $0x10] sm:$0xff]  }
0x4cc4   :  { %v7645_v13 = vmul.f32 %v13108_v26, %v7639_v16  ;;  %v15213_v26 = vld [vmem:[%s18451_s2 + $0x18] sm:$0xff]  }
0x4cc6   :  { %v7651_v32 = vadd.f32 %v13109_v28, %v7645_v13 }
0x4cc8   :  { %v7657_v36 = vpack.c.bf16 %v7651_v32, %v7650_v31 }
0x4cca   :  { %14628 = vmatmul.mubr.msk.bf16.vlgmr.msra.gmra.mxu1 %vm129_vm2, %v7657_v36 }
0x4ccb   :  { %14647 = vmatprep.mubr.msk.bf16.mxu1 %vm15725_vm0, %v15724_v0  ;;  %14644 = vmatpush3.bf16.msra.mxu1 %v15213_v26 }
0x4ccc   :  { %14645 = vmatprep.subr.bf16.mxu1 %v15724_v0 }
0x4ccf   :  { %14646 = vmatpush3.bf16.msra.mxu1 %v15214_v27 }
0x4d8a   :  { %v7711_v23 = vpop.f32.mrf.mxu1 }
0x4d8b   :  { %v7712_v39 = vadd.f32 %v13110_v41, %v7711_v23  ;;  %v13121_v23 = vld [vmem:[%s18450_s6 + $0x9] ss:$0 sm:$0xff] }
0x4d8c   :  { %v14629_v29 = vpop.f32.mrf.mxu1 }
0x4d8d   :  { %v7718_v25 = vmul.f32 %v7712_v39, %v7712_v39 }
0x4d8e   :  { %v7714_v45 = vpop.f32.mrf.mxu1 }
0x4d8f   :  { %v7720_v46 = vmul.f32 %v7718_v25, %v7712_v39  ;;  %v7715_v49 = vadd.f32 %v13110_v41, %v7714_v45 }
0x4d90   :  { %v14630_v53 = vpop.f32.mrf.mxu1 }
0x4d91   :  { %v7722_v55 = vmul.f32 0.044715, %v7720_v46  ;;  %v7719_v18 = vmul.f32 %v7715_v49, %v7715_v49  ;;  %v13130_v46 = vld [vmem:[%s18450_s6 + $0xa] ss:$0 sm:$0xff] }
0x4d93   :  { %v7724_v12 = vadd.f32 %v7722_v55, %v7712_v39  ;;  %v7721_v56 = vmul.f32 %v7719_v18, %v7715_v49 }
0x4d95   :  { %v7726_v57 = vmul.f32 0.7978846, %v7724_v12  ;;  %v7723_v58 = vmul.f32 0.044715, %v7721_v56 }
0x4d97   :  { %15517 = vtanh.f32 %v7726_v57  ;;  %v7725_v59 = vadd.f32 %v7723_v58, %v7715_v49 }
0x4d99   :  { %v7727_v8 = vmul.f32 0.7978846, %v7725_v59 }
0x4d9b   :  { %15519 = vtanh.f32 %v7727_v8 }
0x4da4   :  { %v15518_v60 = vpop.eup %15517 }
0x4da5   :  { %v7730_v22 = vadd.f32 1.0, %v15518_v60 }
0x4da7   :  { %v7732_v62 = vmul.f32 0.5, %v7730_v22 }
0x4da8   :  { %v15520_v20 = vpop.eup %15519 }
0x4da9   :  { %v7731_v47 = vadd.f32 1.0, %v15520_v20  ;;  %v7734_v2 = vmul.f32 %v7732_v62, %v7712_v39 }
0x4dab   :  { %v7733_v63 = vmul.f32 0.5, %v7731_v47 }
0x4dad   :  { %v7735_v7 = vmul.f32 %v7733_v63, %v7715_v49 }
0x4daf   :  { %v7745_v17 = vpack.c.bf16 %v7735_v7, %v7734_v2 }
0x4db1   :  { %14640 = vmatmul.mubr.msk.bf16.vlgmr.msra.gmra.mxu0 %vm80_vm1, %v7745_v17 }
0x4e71   :  { %v7811_v19 = vpop.f32.mrf.mxu0 }
0x4e72   :  { %v7812_v52 = vadd.f32 %v13114_v40, %v7811_v19 }
0x4e73   :  { %v14641_v15 = vpop.f32.mrf.mxu0 }
0x4e74   :  { %v17394_v42 = vadd.f32 %v7812_v52, %v17341_v61 }
0x4e75   :  { %v7814_v37 = vpop.f32.mrf.mxu0 }
0x4e76   :  { %v7815_v48 = vadd.f32 %v13114_v40, %v7814_v37  ;;  %v7822_v50 = vsel %vm129_vm2, %v17394_v42, 0.0 }
0x4e77   :  { %7823 = vadd.xlane.f32.xlu1 %v7822_v50  ;;  %v14642_v3 = vpop.f32.mrf.mxu0 }
0x4e78   :  { %v17399_v9 = vadd.f32 %v7815_v48, %v17346_v6 }
0x4e7a   :  { %v7825_v10 = vsel %vm129_vm2, %v17399_v9, 0.0 }
0x4e7b   :  { %7826 = vadd.xlane.f32.xlu0 %v7825_v10 }
0x4f00   :  { %v7824_v11 = vpop.xlane.xlu1 %7823 }
0x4f01   :  { %v7828_v34 = vmul.f32 0.03125, %v7824_v11 }
0x4f03   :  { %v7830_v33 = vsub.f32 %v17394_v42, %v7828_v34 }
0x4f04   :  { %v7827_v61 = vpop.xlane.xlu0 %7826 }
0x4f05   :  { %v7829_v51 = vmul.f32 0.03125, %v7827_v61  ;;  %v7832_v54 = vmul.f32 %v7830_v33, %v7830_v33 }
0x4f07   :  { %v7831_v14 = vsub.f32 %v17399_v9, %v7829_v51  ;;  %v7834_v21 = vsel %vm129_vm2, %v7832_v54, 0.0 }
0x4f08   :  { %7835 = vadd.xlane.f32.xlu1 %v7834_v21 }
0x4f09   :  { %v7833_v35 = vmul.f32 %v7831_v14, %v7831_v14 }
0x4f0b   :  { %v7837_v6 = vsel %vm129_vm2, %v7833_v35, 0.0 }
0x4f0c   :  { %7838 = vadd.xlane.f32.xlu0 %v7837_v6 }
0x4f91   :  { %v7836_v43 = vpop.xlane.xlu1 %7835 }
0x4f92   :  { %v7840_v16 = vmul.f32 0.03125, %v7836_v43 }
0x4f94   :  { %v7842_v28 = vadd.f32 1e-06, %v7840_v16 }
0x4f95   :  { %v7839_v13 = vpop.xlane.xlu0 %7838 }
0x4f96   :  { %15521 = vrsqrt.f32 %v7842_v28  ;;  %v7841_v31 = vmul.f32 0.03125, %v7839_v13 }
0x4f98   :  { %v7843_v32 = vadd.f32 1e-06, %v7841_v31 }
0x4f9a   :  { %15523 = vrsqrt.f32 %v7843_v32 }
0x4fa3   :  { %v15522_v36 = vpop.eup %15521 }
0x4fa4   :  { %v7846_v38 = vmul.f32 %v15522_v36, %v7830_v33 }
0x4fa6   :  { %v7852_v24 = vmul.f32 %v13120_v44, %v7846_v38 }
0x4fa7   :  { %v15524_v4 = vpop.eup %15523 }
0x4fa8   :  { %v7847_v41 = vmul.f32 %v15524_v4, %v7831_v14  ;;  %v7858_v29 = vadd.f32 %v13121_v23, %v7852_v24  ;;  %v13126_v14 = vld [vmem:[%s18452_s3 + $0x10] sm:$0xf] }
0x4fa9   :  { %v8134_v21 = vsel %vm444_vm5, %v13126_v14, 0 }
0x4faa   :  { %v7853_v39 = vmul.f32 %v13120_v44, %v7847_v41 }
0x4fac   :  { %v7859_v25 = vadd.f32 %v13121_v23, %v7853_v39 }
0x4fae   :  { %v7870_v45 = vpack.c.bf16 %v7859_v25, %v7858_v29 }
0x4fb0   :  { %14648 = vmatmul.mubr.msk.bf16.vlgmr.msra.gmra.mxu1 %vm129_vm2, %v7870_v45 }
0x5070   :  { %v7924_v49 = vpop.f32.mrf.mxu1 }
0x5071   :  { %v17424_v53 = vadd.f32 %v13130_v46, %v7924_v49 }
0x5072   :  { %v14649_v55 = vpop.f32.mrf.mxu1 }
0x5073   :  { %7933 = vrot.lane.b32.xlu0 %v17424_v53, %s15726_s29  ;;  %14655 = vmatprep.mubr.msk.f32.mxu1 %vm246_vm3, %v17424_v53 }
0x5074   :  { %v7927_v18 = vpop.f32.mrf.mxu1 }
0x5075   :  { %v17430_v12 = vadd.f32 %v13130_v46, %v7927_v18 }
0x5076   :  { %v14650_v56 = vpop.f32.mrf.mxu1 }
0x5077   :  { %7935 = vrot.lane.b32.xlu1 %v17430_v12, %s15726_s29 }
0x50e5   :  { %v7934_v58 = vpop.permute.xlu0 %7933 }
0x50e9   :  { %v7936_v57 = vpop.permute.xlu1 %7935 }
0x50ea   :  { %14651 = vmatprep.subr.msk.mxu1 %vm246_vm3, %v7936_v57 }
0x50eb   :  { %14652 = vmatpush3.xpose.msk.msra.mxu1 %vm246_vm3, %v7936_v57 }
0x50ec   :  { %14653 = vmatprep.subr.msk.mxu1 %vm246_vm3, %v7934_v58 }
0x50ef   :  { %14654 = vmatpush3.xpose.msk.msra.mxu1 %vm246_vm3, %v7934_v58 }
0x50f0   :  { %14665 = vmatprep.subr.bf16.mxu1 %v15724_v0 }
0x50f2   :  { %14656 = vmatmul.mubr.msk.f32.vlgmr.msra.gmra.mxu1 %vm246_vm3, %v17430_v12 }
0x50f3   :  { %14667 = vmatprep.mubr.msk.bf16.mxu1 %vm15725_vm0, %v15724_v0  ;;  %14666 = vmatpush3.bf16.msra.mxu1 %v8134_v21 }
0x51b2   :  { %v14657_v59 = vpop.f32.mrf.mxu1 }
0x51b3   :  { %v8023_v8 = vsel %vm330_vm4, %v14657_v59, -inf }
0x51b4   :  { %8024 = vmax.xlane.f32.xlu0 %v8023_v8  ;;  %v8011_v60 = vpop.f32.mrf.mxu1 }
0x51b5   :  { %v8020_v22 = vsel %vm330_vm4, %v8011_v60, -inf }
0x51b6   :  { %8021 = vmax.xlane.f32.xlu1 %v8020_v22 }
0x51c7   :  { %8044 = vrot.lane.b32.xlu1 %v17430_v12, %s15727_s30 }
0x51cb   :  { %8189 = vrot.lane.b32.xlu1 %v17430_v12, %s15728_s8 }
0x51cf   :  { %8187 = vrot.lane.b32.xlu1 %v17424_v53, %s15728_s8 }
0x523d   :  { %v8025_v20 = vpop.xlane.xlu0 %8024 }
0x523e   :  { %v8027_v62 = vsub.f32 %v14657_v59, %v8025_v20 }
0x523f   :  { %v8022_v47 = vpop.xlane.xlu1 %8021 }
0x5240   :  { %v8030_v63 = vmul.f32 1.442695, %v8027_v62  ;;  %v8026_v2 = vsub.f32 %v8011_v60, %v8022_v47  ;;  %v13127_v62 = vld [vmem:[%s18452_s3 + $0x14] sm:$0xf] }
0x5241   :  { %v8388_v47 = vsel %vm444_vm5, %v13127_v62, 0 }
0x5242   :  { %15525 = vpow2.f32 %v8030_v63  ;;  %v8028_v7 = vmul.f32 1.442695, %v8026_v2 }
0x5243   :  { %v8045_v17 = vpop.permute.xlu1 %8044 }
0x5244   :  { %15527 = vpow2.f32 %v8028_v7  ;;  %14658 = vmatprep.subr.mxu0 %v8045_v17 }
0x5245   :  { %14659 = vmatpush3.msra.mxu0 %v8045_v17 }
0x5247   :  { %v8190_v37 = vpop.permute.xlu1 %8189 }
0x524b   :  { %v8188_v48 = vpop.permute.xlu1 %8187 }
0x524f   :  { %v15526_v40 = vpop.eup %15525 }
0x5250   :  { %v8035_v19 = vsel %vm330_vm4, %v15526_v40, 0.0 }
0x5251   :  { %v15528_v52 = vpop.eup %15527  ;;  %8036 = vadd.xlane.f32.xlu0 %v8035_v19 }
0x5252   :  { %v8032_v15 = vsel %vm330_vm4, %v15528_v52, 0.0 }
0x5253   :  { %8033 = vadd.xlane.f32.xlu1 %v8032_v15 }
0x5264   :  { %8185 = vrot.lane.b32.xlu1 %v17430_v12, %s15729_s9 }
0x5267   :  { %8042 = vrot.lane.b32.xlu0 %v17424_v53, %s15727_s30 }
0x526b   :  { %8183 = vrot.lane.b32.xlu0 %v17424_v53, %s15729_s9 }
0x52da   :  { %v8037_v50 = vpop.xlane.xlu0 %8036 }
0x52db   :  { %15529 = vrcp.f32 %v8037_v50 }
0x52dc   :  { %v8034_v3 = vpop.xlane.xlu1 %8033 }
0x52dd   :  { %15531 = vrcp.f32 %v8034_v3 }
0x52de   :  { %v8043_v10 = vpop.permute.xlu0 %8042 }
0x52df   :  { %14660 = vmatprep.subr.mxu0 %v8043_v10 }
0x52e0   :  { %14661 = vmatpush3.msra.mxu0 %v8043_v10  ;;  %v8186_v54 = vpop.permute.xlu1 %8185 }
0x52e1   :  { %14671 = vmatprep.subr.msk.mxu0 %vm246_vm3, %v8190_v37 }
0x52e2   :  { %v8184_v51 = vpop.permute.xlu0 %8183 }
0x52e8   :  { %v15530_v11 = vpop.eup %15529 }
0x52e9   :  { %v8041_v61 = vmul.f32 %v15530_v11, %v15526_v40 }
0x52ea   :  { %v15532_v34 = vpop.eup %15531 }
0x52eb   :  { %v8039_v33 = vmul.f32 %v15532_v34, %v15528_v52 }
0x52ed   :  { %14662 = vmatprep.mubr.msk.f32.mxu0 %vm330_vm4, %v8039_v33 }
0x52ee   :  { %14663 = vmatmul.mubr.msk.f32.vlgmr.msra.gmra.mxu0 %vm330_vm4, %v8041_v61 }
0x52ef   :  { %14672 = vmatpush3.xpose.msk.msra.mxu0 %vm246_vm3, %v8190_v37  ;;  %14675 = vmatprep.mubr.msk.f32.mxu0 %vm246_vm3, %v8184_v51 }
0x52f0   :  { %14673 = vmatprep.subr.msk.mxu0 %vm246_vm3, %v8188_v48 }
0x52f3   :  { %14674 = vmatpush3.xpose.msk.msra.mxu0 %vm246_vm3, %v8188_v48 }
0x52f4   :  { %14685 = vmatprep.subr.bf16.mxu0 %v15724_v0 }
0x52f6   :  { %14676 = vmatmul.mubr.msk.f32.vlgmr.msra.gmra.mxu0 %vm246_vm3, %v8186_v54  ;;  %v13141_v54 = vld [vmem:[%s18450_s6 + $0xb] ss:$0 sm:$0xff] }
0x52f7   :  { %14687 = vmatprep.mubr.msk.bf16.mxu0 %vm15725_vm0, %v15724_v0  ;;  %14686 = vmatpush3.bf16.msra.mxu0 %v8388_v47 }
0x53ae   :  { %v14664_v35 = vpop.f32.mrf.mxu0 }
0x53b0   :  { %v8120_v6 = vpop.f32.mrf.mxu0 }
0x53b1   :  { %v8129_v26 = vpack.c.bf16 %v14664_v35, %v8120_v6 }
0x53b3   :  { %14668 = vmatmul.mubr.msk.bf16.vlgmr.msra.gmra.mxu1 %vm246_vm3, %v8129_v26 }
0x53b6   :  { %v14677_v27 = vpop.f32.mrf.mxu0 }
0x53b7   :  { %v8277_v43 = vsel %vm330_vm4, %v14677_v27, -inf }
0x53b8   :  { %8278 = vmax.xlane.f32.xlu1 %v8277_v43  ;;  %v8265_v16 = vpop.f32.mrf.mxu0 }
0x53b9   :  { %v8274_v28 = vsel %vm330_vm4, %v8265_v16, -inf }
0x53ba   :  { %8275 = vmax.xlane.f32.xlu0 %v8274_v28 }
0x53c9   :  { %8298 = vrot.lane.b32.xlu1 %v17430_v12, %s15730_s12 }
0x53cd   :  { %8439 = vrot.lane.b32.xlu1 %v17430_v12, %s15731_s13 }
0x53d1   :  { %8437 = vrot.lane.b32.xlu1 %v17424_v53, %s15731_s13 }
0x53d5   :  { %8435 = vrot.lane.b32.xlu1 %v17430_v12, %s15732_s14 }
0x5441   :  { %v8279_v13 = vpop.xlane.xlu1 %8278 }
0x5442   :  { %v8281_v31 = vsub.f32 %v14677_v27, %v8279_v13 }
0x5443   :  { %v8276_v32 = vpop.xlane.xlu0 %8275 }
0x5444   :  { %v8284_v36 = vmul.f32 1.442695, %v8281_v31  ;;  %v8280_v38 = vsub.f32 %v8265_v16, %v8276_v32 }
0x5445   :  { %v8299_v44 = vpop.permute.xlu1 %8298 }
0x5446   :  { %15533 = vpow2.f32 %v8284_v36  ;;  %v8282_v4 = vmul.f32 1.442695, %v8280_v38  ;;  %14678 = vmatprep.subr.mxu1 %v8299_v44 }
0x5447   :  { %14679 = vmatpush3.msra.mxu1 %v8299_v44 }
0x5448   :  { %15535 = vpow2.f32 %v8282_v4 }
0x5449   :  { %v8440_v56 = vpop.permute.xlu1 %8439 }
0x544d   :  { %v8438_v22 = vpop.permute.xlu1 %8437 }
0x5451   :  { %v8436_v20 = vpop.permute.xlu1 %8435 }
0x5453   :  { %v15534_v24 = vpop.eup %15533 }
0x5454   :  { %v8289_v41 = vsel %vm330_vm4, %v15534_v24, 0.0 }
0x5455   :  { %v15536_v23 = vpop.eup %15535  ;;  %8290 = vadd.xlane.f32.xlu0 %v8289_v41 }
0x5456   :  { %v8286_v39 = vsel %vm330_vm4, %v15536_v23, 0.0 }
0x5459   :  { %8287 = vadd.xlane.f32.xlu0 %v8286_v39  ;;  %v13128_v39 = vld [vmem:[%s18452_s3 + $0x18] sm:$0xf] }
0x546f   :  { %8296 = vrot.lane.b32.xlu0 %v17424_v53, %s15730_s12 }
0x5473   :  { %8433 = vrot.lane.b32.xlu0 %v17424_v53, %s15732_s14  ;;  %v17491_v29 = vpop.f32.mrf.mxu1 }
0x5474   :  { %v8181_v14 = vadd.f32 %v13141_v54, %v17491_v29  ;;  %v8638_v29 = vsel %vm444_vm5, %v13128_v39, 0 }
0x5475   :  { %v14669_v25 = vpop.f32.mrf.mxu1 }
0x5477   :  { %v17493_v45 = vpop.f32.mrf.mxu1 }
0x5478   :  { %v8182_v26 = vadd.f32 %v13141_v54, %v17493_v45 }
0x5479   :  { %v14670_v46 = vpop.f32.mrf.mxu1 }
0x54de   :  { %v8291_v49 = vpop.xlane.xlu0 %8290 }
0x54df   :  { %15537 = vrcp.f32 %v8291_v49 }
0x54e2   :  { %v8288_v55 = vpop.xlane.xlu0 %8287 }
0x54e3   :  { %15539 = vrcp.f32 %v8288_v55 }
0x54e6   :  { %v8297_v18 = vpop.permute.xlu0 %8296 }
0x54e7   :  { %14680 = vmatprep.subr.mxu1 %v8297_v18 }
0x54e8   :  { %14681 = vmatpush3.msra.mxu1 %v8297_v18 }
0x54e9   :  { %14691 = vmatprep.subr.msk.mxu1 %vm246_vm3, %v8440_v56 }
0x54ea   :  { %v8434_v60 = vpop.permute.xlu0 %8433 }
0x54ec   :  { %v15538_v57 = vpop.eup %15537 }
0x54ed   :  { %v8295_v8 = vmul.f32 %v15538_v57, %v15534_v24 }
0x54f0   :  { %v15540_v58 = vpop.eup %15539 }
0x54f1   :  { %v8293_v59 = vmul.f32 %v15540_v58, %v15536_v23 }
0x54f3   :  { %14682 = vmatprep.mubr.msk.f32.mxu1 %vm330_vm4, %v8293_v59 }
0x54f4   :  { %14683 = vmatmul.mubr.msk.f32.vlgmr.msra.gmra.mxu1 %vm330_vm4, %v8295_v8 }
0x54f5   :  { %14692 = vmatpush3.xpose.msk.msra.mxu1 %vm246_vm3, %v8440_v56  ;;  %14695 = vmatprep.mubr.msk.f32.mxu1 %vm246_vm3, %v8434_v60 }
0x54f6   :  { %14693 = vmatprep.subr.msk.mxu1 %vm246_vm3, %v8438_v22 }
0x54f9   :  { %14694 = vmatpush3.xpose.msk.msra.mxu1 %vm246_vm3, %v8438_v22 }
0x54fa   :  { %14705 = vmatprep.subr.bf16.mxu1 %v15724_v0 }
0x54fc   :  { %14696 = vmatmul.mubr.msk.f32.vlgmr.msra.gmra.mxu1 %vm246_vm3, %v8436_v20 }
0x54fd   :  { %14707 = vmatprep.mubr.msk.bf16.mxu1 %vm15725_vm0, %v15724_v0  ;;  %14706 = vmatpush3.bf16.msra.mxu1 %v8638_v29 }
0x55b4   :  { %v14684_v63 = vpop.f32.mrf.mxu1 }
0x55b6   :  { %v8374_v2 = vpop.f32.mrf.mxu1 }
0x55b7   :  { %v8383_v7 = vpack.c.bf16 %v14684_v63, %v8374_v2 }
0x55b9   :  { %14688 = vmatmul.mubr.msk.bf16.vlgmr.msra.gmra.mxu0 %vm246_vm3, %v8383_v7 }
0x55bc   :  { %v14697_v17 = vpop.f32.mrf.mxu1 }
0x55bd   :  { %v8527_v40 = vsel %vm330_vm4, %v14697_v17, -inf }
0x55be   :  { %8528 = vmax.xlane.f32.xlu1 %v8527_v40  ;;  %v8515_v19 = vpop.f32.mrf.mxu1 }
0x55bf   :  { %v8524_v52 = vsel %vm330_vm4, %v8515_v19, -inf }
0x55c0   :  { %8525 = vmax.xlane.f32.xlu0 %v8524_v52 }
0x55cf   :  { %8548 = vrot.lane.b32.xlu1 %v17430_v12, %s15733_s17 }
0x55d3   :  { %8689 = vrot.lane.b32.xlu1 %v17430_v12, %s15734_s18 }
0x55d7   :  { %8687 = vrot.lane.b32.xlu1 %v17424_v53, %s15734_s18 }
0x55db   :  { %8685 = vrot.lane.b32.xlu1 %v17430_v12, %s15735_s19 }
0x5647   :  { %v8529_v15 = vpop.xlane.xlu1 %8528 }
0x5648   :  { %v8531_v37 = vsub.f32 %v14697_v17, %v8529_v15 }
0x5649   :  { %v8526_v48 = vpop.xlane.xlu0 %8525 }
0x564a   :  { %v8534_v50 = vmul.f32 1.442695, %v8531_v37  ;;  %v8530_v3 = vsub.f32 %v8515_v19, %v8526_v48 }
0x564b   :  { %v8549_v10 = vpop.permute.xlu1 %8548 }
0x564c   :  { %15541 = vpow2.f32 %v8534_v50  ;;  %v8532_v11 = vmul.f32 1.442695, %v8530_v3  ;;  %14698 = vmatprep.subr.mxu0 %v8549_v10 }
0x564d   :  { %14699 = vmatpush3.msra.mxu0 %v8549_v10 }
0x564e   :  { %15543 = vpow2.f32 %v8532_v11  ;;  %v13129_v11 = vld [vmem:[%s18452_s3 + $0x1c] sm:$0xf] }
0x564f   :  { %v8690_v32 = vpop.permute.xlu1 %8689 }
0x5653   :  { %v8688_v41 = vpop.permute.xlu1 %8687 }
0x5657   :  { %v8686_v23 = vpop.permute.xlu1 %8685 }
0x5659   :  { %v15542_v34 = vpop.eup %15541 }
0x565a   :  { %v8539_v33 = vsel %vm330_vm4, %v15542_v34, 0.0 }
0x565b   :  { %v15544_v61 = vpop.eup %15543  ;;  %8540 = vadd.xlane.f32.xlu0 %v8539_v33 }
0x565c   :  { %v8536_v51 = vsel %vm330_vm4, %v15544_v61, 0.0 }
0x565f   :  { %8537 = vadd.xlane.f32.xlu0 %v8536_v51 }
0x5675   :  { %8546 = vrot.lane.b32.xlu0 %v17424_v53, %s15733_s17 }
0x5679   :  { %8683 = vrot.lane.b32.xlu0 %v17424_v53, %s15735_s19  ;;  %v8424_v21 = vpop.f32.mrf.mxu0 }
0x567a   :  { %v17531_v35 = vadd.f32 %v8424_v21, %v8181_v14 }
0x567b   :  { %v14689_v6 = vpop.f32.mrf.mxu0 }
0x567d   :  { %v8427_v27 = vpop.f32.mrf.mxu0 }
0x567e   :  { %v17534_v43 = vadd.f32 %v8427_v27, %v8182_v26 }
0x567f   :  { %v14690_v16 = vpop.f32.mrf.mxu0 }
0x56e4   :  { %v8541_v28 = vpop.xlane.xlu0 %8540 }
0x56e5   :  { %15545 = vrcp.f32 %v8541_v28 }
0x56e8   :  { %v8538_v13 = vpop.xlane.xlu0 %8537 }
0x56e9   :  { %15547 = vrcp.f32 %v8538_v13 }
0x56ec   :  { %v8547_v31 = vpop.permute.xlu0 %8546 }
0x56ed   :  { %14700 = vmatprep.subr.mxu0 %v8547_v31 }
0x56ee   :  { %14701 = vmatpush3.msra.mxu0 %v8547_v31 }
0x56ef   :  { %14711 = vmatprep.subr.msk.mxu0 %vm246_vm3, %v8690_v32 }
0x56f0   :  { %v8684_v24 = vpop.permute.xlu0 %8683 }
0x56f2   :  { %v15546_v36 = vpop.eup %15545 }
0x56f3   :  { %v8545_v4 = vmul.f32 %v15546_v36, %v15542_v34  ;;  %v8888_v34 = vsel %vm444_vm5, %v13129_v11, 0 }
0x56f6   :  { %v15548_v38 = vpop.eup %15547 }
0x56f7   :  { %v8543_v44 = vmul.f32 %v15548_v38, %v15544_v61 }
0x56f9   :  { %14702 = vmatprep.mubr.msk.f32.mxu0 %vm330_vm4, %v8543_v44 }
0x56fa   :  { %14703 = vmatmul.mubr.msk.f32.vlgmr.msra.gmra.mxu0 %vm330_vm4, %v8545_v4 }
0x56fb   :  { %14712 = vmatpush3.xpose.msk.msra.mxu0 %vm246_vm3, %v8690_v32  ;;  %14715 = vmatprep.mubr.msk.f32.mxu0 %vm246_vm3, %v8684_v24 }
0x56fc   :  { %14713 = vmatprep.subr.msk.mxu0 %vm246_vm3, %v8688_v41 }
0x56ff   :  { %14714 = vmatpush3.xpose.msk.msra.mxu0 %vm246_vm3, %v8688_v41  ;;  %v15215_v41 = vld [vmem:[%s18453_s4 + $0x18] sm:$0xff]  }
0x5700   :  { %14725 = vmatprep.subr.bf16.mxu0 %v15724_v0 }
0x5702   :  { %14716 = vmatmul.mubr.msk.f32.vlgmr.msra.gmra.mxu0 %vm246_vm3, %v8686_v23  ;;  %v15216_v23 = vld [vmem:[%s18453_s4 + $0x10] sm:$0xff]  }
0x5703   :  { %14727 = vmatprep.mubr.msk.bf16.mxu0 %vm15725_vm0, %v15724_v0  ;;  %14726 = vmatpush3.bf16.msra.mxu0 %v8888_v34 }
0x5704   :  { %14739 = vmatprep.subr.bf16.mxu0 %v15724_v0 }
0x57ba   :  { %v14704_v25 = vpop.f32.mrf.mxu0 }
0x57bc   :  { %v8624_v45 = vpop.f32.mrf.mxu0 }
0x57bd   :  { %v8633_v46 = vpack.c.bf16 %v14704_v25, %v8624_v45 }
0x57bf   :  { %14708 = vmatmul.mubr.msk.bf16.vlgmr.msra.gmra.mxu1 %vm246_vm3, %v8633_v46 }
0x57c2   :  { %v14717_v49 = vpop.f32.mrf.mxu0 }
0x57c3   :  { %v8777_v55 = vsel %vm330_vm4, %v14717_v49, -inf }
0x57c4   :  { %8778 = vmax.xlane.f32.xlu1 %v8777_v55  ;;  %v8765_v18 = vpop.f32.mrf.mxu0 }
0x57c5   :  { %v8774_v56 = vsel %vm330_vm4, %v8765_v18, -inf }
0x57c6   :  { %8775 = vmax.xlane.f32.xlu0 %v8774_v56  ;;  %v13163_v56 = vld [vmem:[%s18450_s6 + $0xc] ss:$0 sm:$0xff] }
0x57d5   :  { %8798 = vrot.lane.b32.xlu1 %v17430_v12, %s15736_s24 }
0x584d   :  { %v8779_v57 = vpop.xlane.xlu1 %8778 }
0x584e   :  { %v8781_v58 = vsub.f32 %v14717_v49, %v8779_v57 }
0x584f   :  { %v8776_v59 = vpop.xlane.xlu0 %8775 }
0x5850   :  { %v8784_v8 = vmul.f32 1.442695, %v8781_v58  ;;  %v8780_v60 = vsub.f32 %v8765_v18, %v8776_v59 }
0x5851   :  { %v8799_v22 = vpop.permute.xlu1 %8798 }
0x5852   :  { %15549 = vpow2.f32 %v8784_v8  ;;  %v8782_v20 = vmul.f32 1.442695, %v8780_v60  ;;  %14718 = vmatprep.subr.mxu1 %v8799_v22  ;;  %v13164_v8 = vld [vmem:[%s18450_s6 + $0xd] ss:$0 sm:$0xff] }
0x5853   :  { %14719 = vmatpush3.msra.mxu1 %v8799_v22 }
0x5854   :  { %15551 = vpow2.f32 %v8782_v20 }
0x585f   :  { %v15550_v62 = vpop.eup %15549 }
0x5860   :  { %v8789_v47 = vsel %vm330_vm4, %v15550_v62, 0.0 }
0x5861   :  { %v15552_v63 = vpop.eup %15551  ;;  %8790 = vadd.xlane.f32.xlu0 %v8789_v47  ;;  %v15217_v47 = vld [vmem:[%s18448_s5 + $0x38] sm:$0xff]  }
0x5862   :  { %v8786_v2 = vsel %vm330_vm4, %v15552_v63, 0.0 }
0x5865   :  { %8787 = vadd.xlane.f32.xlu0 %v8786_v2  ;;  %v15219_v2 = vld [vmem:[%s18448_s5 + $0x28] sm:$0xff]  }
0x587b   :  { %8796 = vrot.lane.b32.xlu0 %v17424_v53, %s15736_s24 }
0x587f   :  { %v8674_v12 = vpop.f32.mrf.mxu1 }
0x5880   :  { %v8681_v7 = vadd.f32 %v8674_v12, %v17531_v35  ;;  %v15220_v12 = vld [vmem:[%s18448_s5 + $0x20] sm:$0xff]  }
0x5881   :  { %v14709_v17 = vpop.f32.mrf.mxu1 }
0x5883   :  { %v8677_v40 = vpop.f32.mrf.mxu1 }
0x5884   :  { %v8682_v19 = vadd.f32 %v8677_v40, %v17534_v43 }
0x5885   :  { %v14710_v52 = vpop.f32.mrf.mxu1 }
0x58ea   :  { %v8791_v15 = vpop.xlane.xlu0 %8790 }
0x58eb   :  { %15553 = vrcp.f32 %v8791_v15 }
0x58ee   :  { %v8788_v37 = vpop.xlane.xlu0 %8787 }
0x58ef   :  { %15555 = vrcp.f32 %v8788_v37 }
0x58f2   :  { %v8797_v48 = vpop.permute.xlu0 %8796 }
0x58f3   :  { %14720 = vmatprep.subr.mxu1 %v8797_v48 }
0x58f4   :  { %14721 = vmatpush3.msra.mxu1 %v8797_v48 }
0x58f5   :  { %14731 = vmatprep.subr.bf16.mxu1 %v15724_v0 }
0x58f8   :  { %v15554_v50 = vpop.eup %15553 }
0x58f9   :  { %v8795_v10 = vmul.f32 %v15554_v50, %v15550_v62 }
0x58fc   :  { %v15556_v3 = vpop.eup %15555 }
0x58fd   :  { %v8793_v53 = vmul.f32 %v15556_v3, %v15552_v63  ;;  %v15218_v63 = vld [vmem:[%s18448_s5 + $0x30] sm:$0xff]  }
0x58ff   :  { %14722 = vmatprep.mubr.msk.f32.mxu1 %vm330_vm4, %v8793_v53 }
0x5900   :  { %14723 = vmatmul.mubr.msk.f32.vlgmr.msra.gmra.mxu1 %vm330_vm4, %v8795_v10 }
0x5901   :  { %14735 = vmatprep.mubr.msk.bf16.mxu1 %vm15725_vm0, %v15724_v0  ;;  %14732 = vmatpush3.bf16.msra.mxu1 %v15215_v41 }
0x5902   :  { %14733 = vmatprep.subr.bf16.mxu1 %v15724_v0 }
0x5905   :  { %14734 = vmatpush3.bf16.msra.mxu1 %v15216_v23 }
0x5906   :  { %14751 = vmatprep.subr.bf16.mxu1 %v15724_v0 }
0x59c0   :  { %v14724_v33 = vpop.f32.mrf.mxu1 }
0x59c2   :  { %v8874_v61 = vpop.f32.mrf.mxu1 }
0x59c3   :  { %v8883_v51 = vpack.c.bf16 %v14724_v33, %v8874_v61 }
0x59c5   :  { %14728 = vmatmul.mubr.msk.bf16.vlgmr.msra.gmra.mxu0 %vm246_vm3, %v8883_v51 }
0x59c6   :  { %14747 = vmatprep.mubr.msk.bf16.mxu0 %vm15725_vm0, %v15724_v0  ;;  %14740 = vmatpush3.bf16.msra.mxu0 %v15217_v47 }
0x59c7   :  { %14741 = vmatprep.subr.bf16.mxu0 %v15724_v0 }
0x59ca   :  { %14742 = vmatpush3.bf16.msra.mxu0 %v15218_v63  ;;  %v15223_v63 = vld [vmem:[%s18451_s2 + $0x28] sm:$0xff]  }
0x59cb   :  { %14743 = vmatprep.subr.bf16.mxu0 %v15724_v0 }
0x59ce   :  { %14744 = vmatpush3.bf16.msra.mxu0 %v15219_v2  ;;  %v15224_v2 = vld [vmem:[%s18451_s2 + $0x20] sm:$0xff]  }
0x59cf   :  { %14745 = vmatprep.subr.bf16.mxu0 %v15724_v0 }
0x59d2   :  { %14746 = vmatpush3.bf16.msra.mxu0 %v15220_v12 }
0x59d3   :  { %14767 = vmatprep.subr.mxu0 %v15724_v0 }
0x5a85   :  { %v8924_v54 = vpop.f32.mrf.mxu0 }
0x5a86   :  { %v8931_v14 = vadd.f32 %v8924_v54, %v8681_v7  ;;  %v13169_v7 = vld [vmem:[%s18450_s6 + $0xe] ss:$0 sm:$0xff] }
0x5a87   :  { %v14729_v21 = vpop.f32.mrf.mxu0 }
0x5a88   :  { %v17576_v35 = vadd.f32 %v8931_v14, %v17394_v42 }
0x5a89   :  { %v8927_v6 = vpop.f32.mrf.mxu0 }
0x5a8a   :  { %v8932_v26 = vadd.f32 %v8927_v6, %v8682_v19  ;;  %v8937_v27 = vsel %vm129_vm2, %v17576_v35, 0.0 }
0x5a8b   :  { %8938 = vadd.xlane.f32.xlu1 %v8937_v27  ;;  %v14730_v43 = vpop.f32.mrf.mxu0 }
0x5a8c   :  { %v17581_v16 = vadd.f32 %v8932_v26, %v17399_v9 }
0x5a8e   :  { %v8940_v28 = vsel %vm129_vm2, %v17581_v16, 0.0 }
0x5a8f   :  { %8941 = vadd.xlane.f32.xlu0 %v8940_v28 }
0x5b14   :  { %v8939_v13 = vpop.xlane.xlu1 %8938 }
0x5b15   :  { %v8943_v31 = vmul.f32 0.03125, %v8939_v13 }
0x5b17   :  { %v8945_v32 = vsub.f32 %v17576_v35, %v8943_v31  ;;  %v15221_v31 = vld [vmem:[%s18452_s3 + $0x48] sm:$0xff]  }
0x5b18   :  { %v8942_v42 = vpop.xlane.xlu0 %8941 }
0x5b19   :  { %v8944_v36 = vmul.f32 0.03125, %v8942_v42  ;;  %v8947_v38 = vmul.f32 %v8945_v32, %v8945_v32  ;;  %v13181_v42 = vld [vmem:[%s18450_s6 + $0xf] ss:$0 sm:$0xff] }
0x5b1b   :  { %v8946_v44 = vsub.f32 %v17581_v16, %v8944_v36  ;;  %v8949_v4 = vsel %vm129_vm2, %v8947_v38, 0.0 }
0x5b1c   :  { %8950 = vadd.xlane.f32.xlu1 %v8949_v4 }
0x5b1d   :  { %v8948_v24 = vmul.f32 %v8946_v44, %v8946_v44 }
0x5b1f   :  { %v8952_v9 = vsel %vm129_vm2, %v8948_v24, 0.0 }
0x5b20   :  { %8953 = vadd.xlane.f32.xlu0 %v8952_v9 }
0x5ba5   :  { %v8951_v39 = vpop.xlane.xlu1 %8950 }
0x5ba6   :  { %v8955_v29 = vmul.f32 0.03125, %v8951_v39 }
0x5ba8   :  { %v8957_v25 = vadd.f32 1e-06, %v8955_v29 }
0x5ba9   :  { %v8954_v45 = vpop.xlane.xlu0 %8953 }
0x5baa   :  { %15557 = vrsqrt.f32 %v8957_v25  ;;  %v8956_v46 = vmul.f32 0.03125, %v8954_v45  ;;  %v15714_v25 = vld [vmem:[%s18450_s6 + $0x21] ss:$0 sm:$0xff] }
0x5bac   :  { %v8958_v49 = vadd.f32 1e-06, %v8956_v46 }
0x5bae   :  { %15559 = vrsqrt.f32 %v8958_v49 }
0x5bb7   :  { %v15558_v55 = vpop.eup %15557 }
0x5bb8   :  { %v8961_v18 = vmul.f32 %v15558_v55, %v8945_v32  ;;  %v15222_v32 = vld [vmem:[%s18452_s3 + $0x40] sm:$0xff]  }
0x5bba   :  { %v8967_v58 = vmul.f32 %v13163_v56, %v8961_v18 }
0x5bbb   :  { %v15560_v57 = vpop.eup %15559 }
0x5bbc   :  { %v8962_v59 = vmul.f32 %v15560_v57, %v8946_v44  ;;  %v8973_v22 = vadd.f32 %v13164_v8, %v8967_v58 }
0x5bbe   :  { %v8968_v60 = vmul.f32 %v13163_v56, %v8962_v59 }
0x5bc0   :  { %v8974_v20 = vadd.f32 %v13164_v8, %v8968_v60 }
0x5bc2   :  { %v8980_v62 = vpack.c.bf16 %v8974_v20, %v8973_v22 }
0x5bc4   :  { %14736 = vmatmul.mubr.msk.bf16.vlgmr.msra.gmra.mxu1 %vm129_vm2, %v8980_v62 }
0x5bc5   :  { %14755 = vmatprep.mubr.msk.bf16.mxu1 %vm15725_vm0, %v15724_v0  ;;  %14752 = vmatpush3.bf16.msra.mxu1 %v15221_v31 }
0x5bc6   :  { %14753 = vmatprep.subr.bf16.mxu1 %v15724_v0 }
0x5bc9   :  { %14754 = vmatpush3.bf16.msra.mxu1 %v15222_v32 }
0x5bca   :  { %14759 = vmatprep.subr.bf16.mxu1 %v15223_v63 }
0x5c84   :  { %v9034_v17 = vpop.f32.mrf.mxu1 }
0x5c85   :  { %v9035_v40 = vadd.f32 %v13169_v7, %v9034_v17 }
0x5c86   :  { %v14737_v19 = vpop.f32.mrf.mxu1 }
0x5c87   :  { %v9041_v52 = vmul.f32 %v9035_v40, %v9035_v40 }
0x5c88   :  { %v9037_v15 = vpop.f32.mrf.mxu1 }
0x5c89   :  { %v9043_v37 = vmul.f32 %v9041_v52, %v9035_v40  ;;  %v9038_v48 = vadd.f32 %v13169_v7, %v9037_v15 }
0x5c8a   :  { %v14738_v50 = vpop.f32.mrf.mxu1 }
0x5c8b   :  { %v9045_v3 = vmul.f32 0.044715, %v9043_v37  ;;  %v9042_v53 = vmul.f32 %v9038_v48, %v9038_v48  ;;  %v13194_v37 = vld [vmem:[%s18450_s6 + $0x10] ss:$0 sm:$0xff] }
0x5c8d   :  { %v9047_v10 = vadd.f32 %v9045_v3, %v9035_v40  ;;  %v9044_v11 = vmul.f32 %v9042_v53, %v9038_v48  ;;  %v9238_v3 = vmul.f32 %v13194_v37, %v16330_v30  ;;  %v13195_v53 = vld [vmem:[%s18450_s6 + $0x11] ss:$0 sm:$0xff]  ;;  %v13204_v30 = vld [vmem:[%s18450_s6 + $0x12] ss:$0 sm:$0xff] }
0x5c8f   :  { %v9049_v34 = vmul.f32 0.7978846, %v9047_v10  ;;  %v9046_v33 = vmul.f32 0.044715, %v9044_v11 }
0x5c91   :  { %15561 = vtanh.f32 %v9049_v34  ;;  %v9048_v61 = vadd.f32 %v9046_v33, %v9038_v48  ;;  %v9245_v33 = vadd.f32 %v13195_v53, %v9238_v3 }
0x5c93   :  { %v9050_v51 = vmul.f32 0.7978846, %v9048_v61 }
0x5c95   :  { %15563 = vtanh.f32 %v9050_v51 }
0x5c9e   :  { %v15562_v54 = vpop.eup %15561 }
0x5c9f   :  { %v9053_v14 = vadd.f32 1.0, %v15562_v54 }
0x5ca1   :  { %v9055_v6 = vmul.f32 0.5, %v9053_v14  ;;  %v9257_v14 = vpack.c.bf16 %v9245_v33, %v9245_v33 }
0x5ca2   :  { %v15564_v21 = vpop.eup %15563 }
0x5ca3   :  { %v9054_v26 = vadd.f32 1.0, %v15564_v21  ;;  %v9057_v43 = vmul.f32 %v9055_v6, %v9035_v40 }
0x5ca5   :  { %v9056_v27 = vmul.f32 0.5, %v9054_v26 }
0x5ca7   :  { %v9058_v28 = vmul.f32 %v9056_v27, %v9038_v48 }
0x5ca9   :  { %v9068_v13 = vpack.c.bf16 %v9058_v28, %v9057_v43 }
0x5cab   :  { %14748 = vmatmul.mubr.msk.bf16.vlgmr.msra.gmra.mxu0 %vm80_vm1, %v9068_v13 }
0x5cac   :  { %14773 = vmatprep.mubr.msk.f32.mxu0 %vm15725_vm0, %v15724_v0 }
0x5d6b   :  { %v9134_v36 = vpop.f32.mrf.mxu0 }
0x5d6c   :  { %v9135_v44 = vadd.f32 %v13181_v42, %v9134_v36 }
0x5d6d   :  { %v14749_v38 = vpop.f32.mrf.mxu0 }
0x5d6e   :  { %v9141_v41 = vadd.f32 %v9135_v44, %v17576_v35  ;;  %v17707_v38 = vld [vmem:[%s18450_s6 + $0x2c] ss:$0 sm:$0xff] }
0x5d6f   :  { %v9137_v4 = vpop.f32.mrf.mxu0 }
0x5d70   :  { %v9138_v24 = vadd.f32 %v13181_v42, %v9137_v4 }
0x5d71   :  { %v14750_v9 = vpop.f32.mrf.mxu0 }
0x5d72   :  { %v9142_v23 = vadd.f32 %v9138_v24, %v17581_v16 }
0x5d74   :  { %v9147_v39 = vpack.c.bf16 %v9142_v23, %v9141_v41 }
0x5d76   :  { %14756 = vmatmul.mubr.msk.bf16.vlgmr.msra.gmra.mxu1 %vm129_vm2, %v9147_v39 }
0x5d77   :  { %14760 = vmatpush3.bf16.msra.mxu1 %v15223_v63 }
0x5d78   :  { %14761 = vmatprep.subr.bf16.mxu1 %v15224_v2 }
0x5d7b   :  { %14762 = vmatpush3.bf16.msra.mxu1 %v15224_v2 }
0x5d7c   :  { %14782 = vmatprep.subr.mxu1 %v15724_v0 }
0x5e36   :  { %v9197_v29 = vpop.f32.mrf.mxu1 }
0x5e37   :  { %v17644_v45 = vadd.f32 %v15714_v25, %v9197_v29 }
0x5e38   :  { %v14757_v46 = vpop.f32.mrf.mxu1 }
0x5e39   :  { %v9206_v49 = vsel %vm129_vm2, %v17644_v45, 0.0 }
0x5e3a   :  { %9207 = vadd.xlane.f32.xlu1 %v9206_v49  ;;  %v9200_v55 = vpop.f32.mrf.mxu1 }
0x5e3b   :  { %v17648_v18 = vadd.f32 %v15714_v25, %v9200_v55 }
0x5e3c   :  { %v14758_v35 = vpop.f32.mrf.mxu1 }
0x5e3d   :  { %v9209_v16 = vsel %vm129_vm2, %v17648_v18, 0.0 }
0x5e3e   :  { %9210 = vadd.xlane.f32.xlu0 %v9209_v16 }
0x5ec3   :  { %v9208_v56 = vpop.xlane.xlu1 %9207 }
0x5ec4   :  { %v9212_v57 = vmul.f32 0.03125, %v9208_v56 }
0x5ec6   :  { %v9214_v58 = vsub.f32 %v17644_v45, %v9212_v57 }
0x5ec7   :  { %v9211_v59 = vpop.xlane.xlu0 %9210 }
0x5ec8   :  { %v9213_v8 = vmul.f32 0.03125, %v9211_v59  ;;  %v9216_v60 = vmul.f32 %v9214_v58, %v9214_v58 }
0x5eca   :  { %v9215_v22 = vsub.f32 %v17648_v18, %v9213_v8  ;;  %v9218_v20 = vsel %vm129_vm2, %v9216_v60, 0.0 }
0x5ecb   :  { %9219 = vadd.xlane.f32.xlu1 %v9218_v20 }
0x5ecc   :  { %v9217_v62 = vmul.f32 %v9215_v22, %v9215_v22 }
0x5ece   :  { %v9221_v47 = vsel %vm129_vm2, %v9217_v62, 0.0 }
0x5ecf   :  { %9222 = vadd.xlane.f32.xlu0 %v9221_v47 }
0x5f54   :  { %v9220_v12 = vpop.xlane.xlu1 %9219 }
0x5f55   :  { %v9224_v7 = vmul.f32 0.03125, %v9220_v12 }
0x5f57   :  { %v9226_v17 = vadd.f32 1e-06, %v9224_v7 }
0x5f58   :  { %v9223_v40 = vpop.xlane.xlu0 %9222 }
0x5f59   :  { %15565 = vrsqrt.f32 %v9226_v17  ;;  %v9225_v19 = vmul.f32 0.03125, %v9223_v40 }
0x5f5b   :  { %v9227_v52 = vadd.f32 1e-06, %v9225_v19 }
0x5f5d   :  { %15567 = vrsqrt.f32 %v9227_v52 }
0x5f66   :  { %v15566_v15 = vpop.eup %15565 }
0x5f67   :  { %v9230_v48 = vmul.f32 %v15566_v15, %v9214_v58 }
0x5f69   :  { %v9236_v11 = vmul.f32 %v13194_v37, %v9230_v48 }
0x5f6a   :  { %v15568_v50 = vpop.eup %15567 }
0x5f6b   :  { %v9231_v10 = vmul.f32 %v15568_v50, %v9215_v22  ;;  %v9243_v61 = vadd.f32 %v13195_v53, %v9236_v11 }
0x5f6d   :  { %v9237_v34 = vmul.f32 %v13194_v37, %v9231_v10 }
0x5f6f   :  { %v9244_v51 = vadd.f32 %v13195_v53, %v9237_v34 }
0x5f71   :  { %v9256_v54 = vpack.c.bf16 %v9244_v51, %v9243_v61 }
0x5f73   :  { %14763 = vmatprep.mubr.msk.bf16.mxu1 %vm129_vm2, %v9256_v54  ;;  %v13200_v54 = vld [vmem:[%s18452_s3 + $0x20] sm:$0xf] }
0x5f74   :  { %14764 = vmatmul.mubr.msk.bf16.vlgmr.msra.gmra.mxu1 %vm129_vm2, %v9257_v14  ;;  %v9569_v14 = vsel %vm444_vm5, %v13200_v54, 0 }
0x5f75   :  { %14788 = vmatprep.mubr.msk.f32.mxu1 %vm15725_vm0, %v15724_v0 }
0x6034   :  { %v14765_v21 = vpop.f32.mrf.mxu1 }
0x6035   :  { %v17677_v6 = vadd.f32 %v14765_v21, %v13204_v30 }
0x6036   :  { %v9314_v26 = vpop.f32.mrf.mxu1 }
0x6037   :  { %9335 = vrot.lane.b32.xlu1 %v17677_v6, %s15726_s29  ;;  %v17681_v43 = vadd.f32 %v13204_v30, %v9314_v26 }
0x6038   :  { %v14766_v27 = vpop.f32.mrf.mxu1 }
0x603a   :  { %v9317_v28 = vpop.f32.mrf.mxu1 }
0x603b   :  { %v17683_v13 = vadd.f32 %v13204_v30, %v9317_v28  ;;  %9331 = vrot.lane.b32.xlu1 %v17681_v43, %s15726_s29 }
0x603d   :  { %9333 = vrot.lane.b32.xlu0 %v17683_v13, %s15726_s29 }
0x60a9   :  { %v9336_v31 = vpop.permute.xlu1 %9335 }
0x60aa   :  { %14768 = vmatpush3.xpose.msk.msra.mxu0 %vm246_vm3, %v9336_v31 }
0x60ab   :  { %14769 = vmatprep.subr.mxu0 %v15724_v0 }
0x60ad   :  { %v9332_v42 = vpop.permute.xlu1 %9331 }
0x60af   :  { %v9334_v32 = vpop.permute.xlu0 %9333 }
0x60b0   :  { %14770 = vmatpush3.xpose.msk.msra.mxu0 %vm246_vm3, %v9334_v32 }
0x60b1   :  { %14771 = vmatprep.subr.mxu0 %v15724_v0 }
0x60b4   :  { %14772 = vmatpush3.xpose.msk.msra.mxu0 %vm246_vm3, %v9332_v42 }
0x60b5   :  { %15134 = vmatprep.subr.msk.bf16.mxu0 %vm444_vm5, %v13200_v54 }
0x60b7   :  { %14774 = vmatmul.mubr.msk.f32.vlgmr.msra.gmra.mxu0 %vm246_vm3, %v17681_v43 }
0x60b8   :  { %14776 = vmatprep.mubr.msk.f32.mxu0 %vm15725_vm0, %v15724_v0  ;;  %14798 = vmatpush3.bf16.msra.mxu0 %v9569_v14 }
0x60b9   :  { %14818 = vmatprep.subr.mxu0 %v15724_v0 }
0x60bb   :  { %14777 = vmatmul.mubr.msk.f32.gmra.mxu0 %vm246_vm3, %v17683_v13 }
0x60bc   :  { %14779 = vmatprep.mubr.msk.f32.mxu0 %vm15725_vm0, %v15724_v0 }
0x60bf   :  { %14780 = vmatmul.mubr.msk.f32.gmra.mxu0 %vm246_vm3, %v17677_v6 }
0x6177   :  { %v9415_v36 = vpop.f32.mrf.mxu0 }
0x6178   :  { %v9416_v44 = vadd.f32 %v17707_v38, %v9415_v36 }
0x6179   :  { %v14775_v4 = vpop.f32.mrf.mxu0 }
0x617a   :  { %v9429_v24 = vsel %vm3092_vm6, %v9416_v44, -inf }
0x617b   :  { %9430 = vmax.xlane.f32.xlu1 %v9429_v24  ;;  %v9420_v9 = vpop.f32.mrf.mxu0 }
0x617c   :  { %v9421_v41 = vadd.f32 %v17707_v38, %v9420_v9 }
0x617d   :  { %v14778_v23 = vpop.f32.mrf.mxu0 }
0x617e   :  { %v9432_v39 = vsel %vm3092_vm6, %v9421_v41, -inf }
0x617f   :  { %9433 = vmax.xlane.f32.xlu0 %v9432_v39  ;;  %v9425_v29 = vpop.f32.mrf.mxu0 }
0x6180   :  { %v9426_v25 = vadd.f32 %v17707_v38, %v9425_v29 }
0x6181   :  { %v14781_v46 = vpop.f32.mrf.mxu0 }
0x6182   :  { %v9435_v49 = vsel %vm3092_vm6, %v9426_v25, -inf }
0x6183   :  { %9436 = vmax.xlane.f32.xlu0 %v9435_v49 }
0x618c   :  { %9464 = vrot.lane.b32.xlu1 %v17683_v13, %s15727_s30 }
0x6190   :  { %9462 = vrot.lane.b32.xlu1 %v17681_v43, %s15727_s30 }
0x6199   :  { %9466 = vrot.lane.b32.xlu0 %v17677_v6, %s15727_s30 }
0x6204   :  { %v9431_v55 = vpop.xlane.xlu1 %9430 }
0x6205   :  { %v9438_v35 = vsub.f32 %v9416_v44, %v9431_v55 }
0x6207   :  { %v9441_v16 = vmul.f32 1.442695, %v9438_v35 }
0x6208   :  { %v9434_v56 = vpop.xlane.xlu0 %9433  ;;  %v9465_v8 = vpop.permute.xlu1 %9464 }
0x6209   :  { %15569 = vpow2.f32 %v9441_v16  ;;  %v9439_v57 = vsub.f32 %v9421_v41, %v9434_v56 }
0x620b   :  { %v9443_v58 = vmul.f32 1.442695, %v9439_v57 }
0x620c   :  { %v9437_v59 = vpop.xlane.xlu0 %9436  ;;  %v9463_v22 = vpop.permute.xlu1 %9462 }
0x620d   :  { %15571 = vpow2.f32 %v9443_v58  ;;  %v9440_v2 = vsub.f32 %v9426_v25, %v9437_v59 }
0x620f   :  { %v9445_v12 = vmul.f32 1.442695, %v9440_v2 }
0x6210   :  { %v9467_v60 = vpop.permute.xlu0 %9466 }
0x6211   :  { %14783 = vmatpush3.msra.mxu1 %v9467_v60  ;;  %15573 = vpow2.f32 %v9445_v12 }
0x6212   :  { %14784 = vmatprep.subr.mxu1 %v15724_v0 }
0x6213   :  { %14785 = vmatpush3.msra.mxu1 %v9465_v8 }
0x6214   :  { %14786 = vmatprep.subr.mxu1 %v15724_v0 }
0x6215   :  { %14787 = vmatpush3.msra.mxu1 %v9463_v22 }
0x6216   :  { %v15570_v20 = vpop.eup %15569  ;;  %14803 = vmatprep.subr.mxu1 %v15724_v0 }
0x6217   :  { %v9447_v62 = vsel %vm3092_vm6, %v15570_v20, 0.0 }
0x6218   :  { %9448 = vadd.xlane.f32.xlu1 %v9447_v62 }
0x621a   :  { %v15572_v47 = vpop.eup %15571 }
0x621b   :  { %v9450_v63 = vsel %vm3092_vm6, %v15572_v47, 0.0 }
0x621c   :  { %9451 = vadd.xlane.f32.xlu0 %v9450_v63 }
0x621e   :  { %v15574_v7 = vpop.eup %15573 }
0x621f   :  { %v9453_v17 = vsel %vm3092_vm6, %v15574_v7, 0.0 }
0x6229   :  { %9634 = vrot.lane.b32.xlu1 %v17683_v13, %s15728_s8 }
0x6232   :  { %9636 = vrot.lane.b32.xlu0 %v17677_v6, %s15728_s8 }
0x6236   :  { %9632 = vrot.lane.b32.xlu0 %v17681_v43, %s15728_s8 }
0x623a   :  { %9628 = vrot.lane.b32.xlu0 %v17683_v13, %s15729_s9 }
0x624d   :  { %9454 = vadd.xlane.f32.xlu1 %v9453_v17 }
0x625e   :  { %9626 = vrot.lane.b32.xlu1 %v17681_v43, %s15729_s9 }
0x6262   :  { %9630 = vrot.lane.b32.xlu1 %v17677_v6, %s15729_s9 }
0x62a1   :  { %v9449_v40 = vpop.xlane.xlu1 %9448 }
0x62a2   :  { %15575 = vrcp.f32 %v9449_v40 }
0x62a5   :  { %v9452_v19 = vpop.xlane.xlu0 %9451  ;;  %v9635_v3 = vpop.permute.xlu1 %9634 }
0x62a6   :  { %15577 = vrcp.f32 %v9452_v19 }
0x62a9   :  { %v9637_v37 = vpop.permute.xlu0 %9636 }
0x62ad   :  { %v9633_v53 = vpop.permute.xlu0 %9632 }
0x62af   :  { %v15576_v52 = vpop.eup %15575 }
0x62b0   :  { %v9457_v15 = vmul.f32 %v15576_v52, %v15570_v20 }
0x62b1   :  { %v9629_v61 = vpop.permute.xlu0 %9628 }
0x62b2   :  { %14789 = vmatmul.mubr.msk.f32.vlgmr.msra.gmra.mxu1 %vm3092_vm6, %v9457_v15 }
0x62b3   :  { %v15578_v48 = vpop.eup %15577  ;;  %14804 = vmatpush3.xpose.msk.msra.mxu1 %vm246_vm3, %v9637_v37  ;;  %14791 = vmatprep.mubr.msk.f32.mxu1 %vm15725_vm0, %v15724_v0 }
0x62b4   :  { %14805 = vmatprep.subr.mxu1 %v15724_v0  ;;  %v9459_v50 = vmul.f32 %v15578_v48, %v15572_v47 }
0x62b6   :  { %14792 = vmatmul.mubr.msk.f32.gmra.mxu1 %vm3092_vm6, %v9459_v50 }
0x62b7   :  { %14806 = vmatpush3.xpose.msk.msra.mxu1 %vm246_vm3, %v9635_v3  ;;  %14794 = vmatprep.mubr.msk.f32.mxu1 %vm15725_vm0, %v15724_v0 }
0x62b8   :  { %14807 = vmatprep.subr.mxu1 %v15724_v0 }
0x62bb   :  { %14808 = vmatpush3.xpose.msk.msra.mxu1 %vm246_vm3, %v9633_v53 }
0x62d6   :  { %v9455_v10 = vpop.xlane.xlu1 %9454 }
0x62d7   :  { %15579 = vrcp.f32 %v9455_v10 }
0x62da   :  { %v9627_v33 = vpop.permute.xlu1 %9626 }
0x62de   :  { %v9631_v51 = vpop.permute.xlu1 %9630 }
0x62e4   :  { %v15580_v11 = vpop.eup %15579 }
0x62e5   :  { %v9461_v34 = vmul.f32 %v15580_v11, %v15574_v7 }
0x62e7   :  { %14795 = vmatmul.mubr.msk.f32.gmra.mxu1 %vm3092_vm6, %v9461_v34 }
0x62e8   :  { %14809 = vmatprep.mubr.msk.f32.mxu1 %vm15725_vm0, %v15724_v0 }
0x62eb   :  { %14810 = vmatmul.mubr.msk.f32.vlgmr.msra.gmra.mxu1 %vm246_vm3, %v9627_v33 }
0x62ec   :  { %14812 = vmatprep.mubr.msk.f32.mxu1 %vm15725_vm0, %v15724_v0 }
0x62ef   :  { %14813 = vmatmul.mubr.msk.f32.gmra.mxu1 %vm246_vm3, %v9629_v61 }
0x62f0   :  { %14815 = vmatprep.mubr.msk.f32.mxu1 %vm15725_vm0, %v15724_v0 }
0x62f3   :  { %14816 = vmatmul.mubr.msk.f32.gmra.mxu1 %vm246_vm3, %v9631_v51 }
0x6372   :  { %v9546_v30 = vpop.f32.mrf.mxu1 }
0x6374   :  { %v14790_v21 = vpop.f32.mrf.mxu1 }
0x6375   :  { %v13201_v21 = vld [vmem:[%s18452_s3 + $0x24] sm:$0xf] }
0x6376   :  { %v9551_v26 = vpop.f32.mrf.mxu1  ;;  %15135 = vmatprep.subr.msk.bf16.mxu1 %vm444_vm5, %v13201_v21 }
0x6377   :  { %v9560_v27 = vpack.c.bf16 %v9551_v26, %v9546_v30  ;;  %v9870_v26 = vsel %vm444_vm5, %v13201_v21, 0 }
0x6378   :  { %v14793_v28 = vpop.f32.mrf.mxu1  ;;  %14834 = vmatpush3.bf16.msra.mxu1 %v9870_v26 }
0x6379   :  { %14799 = vmatprep.mubr.msk.bf16.mxu0 %vm246_vm3, %v9560_v27  ;;  %14854 = vmatprep.subr.mxu1 %v15724_v0 }
0x63a7   :  { %v9556_v31 = vpop.f32.mrf.mxu1 }
0x63a8   :  { %v9561_v32 = vpack.c.bf16 %v9556_v31, %v9556_v31 }
0x63a9   :  { %v14796_v42 = vpop.f32.mrf.mxu1 }
0x63aa   :  { %14800 = vmatmul.mubr.msk.bf16.vlgmr.msra.gmra.mxu0 %vm246_vm3, %v9561_v32 }
0x63ab   :  { %v9716_v36 = vpop.f32.mrf.mxu1  ;;  %14824 = vmatprep.mubr.msk.f32.mxu0 %vm15725_vm0, %v15724_v0 }
0x63ac   :  { %v9717_v44 = vadd.f32 %v17707_v38, %v9716_v36 }
0x63ad   :  { %v14811_v4 = vpop.f32.mrf.mxu1 }
0x63ae   :  { %v9730_v24 = vsel %vm3092_vm6, %v9717_v44, -inf }
0x63af   :  { %9731 = vmax.xlane.f32.xlu0 %v9730_v24  ;;  %v9721_v9 = vpop.f32.mrf.mxu1 }
0x63b0   :  { %v9722_v41 = vadd.f32 %v17707_v38, %v9721_v9 }
0x63b1   :  { %v14814_v23 = vpop.f32.mrf.mxu1 }
0x63b2   :  { %v9733_v39 = vsel %vm3092_vm6, %v9722_v41, -inf }
0x63b3   :  { %9734 = vmax.xlane.f32.xlu1 %v9733_v39  ;;  %v9726_v29 = vpop.f32.mrf.mxu1 }
0x63b4   :  { %v9727_v25 = vadd.f32 %v17707_v38, %v9726_v29 }
0x63b5   :  { %v14817_v46 = vpop.f32.mrf.mxu1 }
0x63b6   :  { %v9736_v49 = vsel %vm3092_vm6, %v9727_v25, -inf }
0x63b7   :  { %9737 = vmax.xlane.f32.xlu0 %v9736_v49 }
0x63c4   :  { %9767 = vrot.lane.b32.xlu1 %v17677_v6, %s15730_s12 }
0x63c8   :  { %9763 = vrot.lane.b32.xlu1 %v17681_v43, %s15730_s12 }
0x63cc   :  { %9933 = vrot.lane.b32.xlu1 %v17677_v6, %s15731_s13 }
0x63cd   :  { %9765 = vrot.lane.b32.xlu0 %v17683_v13, %s15730_s12 }
0x6438   :  { %v9732_v55 = vpop.xlane.xlu0 %9731 }
0x6439   :  { %v9739_v35 = vsub.f32 %v9717_v44, %v9732_v55 }
0x643b   :  { %v9742_v16 = vmul.f32 1.442695, %v9739_v35 }
0x643c   :  { %v9735_v56 = vpop.xlane.xlu1 %9734 }
0x643d   :  { %15581 = vpow2.f32 %v9742_v16  ;;  %v9740_v57 = vsub.f32 %v9722_v41, %v9735_v56 }
0x643f   :  { %v9744_v58 = vmul.f32 1.442695, %v9740_v57 }
0x6440   :  { %v9768_v59 = vpop.permute.xlu1 %9767  ;;  %v9738_v8 = vpop.xlane.xlu0 %9737 }
0x6441   :  { %15583 = vpow2.f32 %v9744_v58  ;;  %v9741_v60 = vsub.f32 %v9727_v25, %v9738_v8  ;;  %14819 = vmatpush3.msra.mxu0 %v9768_v59 }
0x6442   :  { %14820 = vmatprep.subr.mxu0 %v15724_v0 }
0x6443   :  { %v9746_v22 = vmul.f32 1.442695, %v9741_v60 }
0x6444   :  { %v9766_v20 = vpop.permute.xlu0 %9765  ;;  %v9764_v62 = vpop.permute.xlu1 %9763 }
0x6445   :  { %15585 = vpow2.f32 %v9746_v22  ;;  %14821 = vmatpush3.msra.mxu0 %v9766_v20 }
0x6446   :  { %14822 = vmatprep.subr.mxu0 %v15724_v0 }
0x6447   :  { %14823 = vmatpush3.msra.mxu0 %v9764_v62 }
0x6448   :  { %14839 = vmatprep.subr.mxu0 %v15724_v0  ;;  %v9934_v15 = vpop.permute.xlu1 %9933 }
0x644a   :  { %v15582_v47 = vpop.eup %15581 }
0x644b   :  { %v9748_v63 = vsel %vm3092_vm6, %v15582_v47, 0.0 }
0x644c   :  { %9749 = vadd.xlane.f32.xlu0 %v9748_v63 }
0x644e   :  { %v15584_v2 = vpop.eup %15583 }
0x644f   :  { %v9751_v12 = vsel %vm3092_vm6, %v15584_v2, 0.0 }
0x6450   :  { %9752 = vadd.xlane.f32.xlu1 %v9751_v12 }
0x6452   :  { %v15586_v7 = vpop.eup %15585 }
0x6453   :  { %v9754_v17 = vsel %vm3092_vm6, %v15586_v7, 0.0 }
0x6454   :  { %9755 = vadd.xlane.f32.xlu0 %v9754_v17 }
0x6461   :  { %9929 = vrot.lane.b32.xlu1 %v17681_v43, %s15731_s13 }
0x6465   :  { %9925 = vrot.lane.b32.xlu1 %v17683_v13, %s15732_s14 }
0x646a   :  { %9931 = vrot.lane.b32.xlu0 %v17683_v13, %s15731_s13  ;;  %v17796_v40 = vpop.f32.mrf.mxu0 }
0x646c   :  { %v17798_v19 = vpop.f32.mrf.mxu0 }
0x646e   :  { %9923 = vrot.lane.b32.xlu0 %v17681_v43, %s15732_s14  ;;  %v14802_v52 = vpop.f32.mrf.mxu0 }
0x646f   :  { %v17859_v52 = vld [vmem:[%s18450_s6 + $0x13] ss:$0 sm:$0xff] }
0x6470   :  { %v17831_v27 = vpop.f32.mrf.mxu0 }
0x6472   :  { %9927 = vrot.lane.b32.xlu0 %v17677_v6, %s15732_s14 }
0x64d5   :  { %v9750_v37 = vpop.xlane.xlu0 %9749 }
0x64d6   :  { %15587 = vrcp.f32 %v9750_v37  ;;  %v9625_v37 = vadd.f32 %v17796_v40, %v17859_v52 }
0x64d9   :  { %v9753_v48 = vpop.xlane.xlu1 %9752 }
0x64da   :  { %15589 = vrcp.f32 %v9753_v48 }
0x64dd   :  { %v9756_v50 = vpop.xlane.xlu0 %9755  ;;  %v9930_v51 = vpop.permute.xlu1 %9929 }
0x64de   :  { %15591 = vrcp.f32 %v9756_v50  ;;  %v9623_v50 = vadd.f32 %v17859_v52, %v17798_v19 }
0x64e1   :  { %v9932_v34 = vpop.permute.xlu0 %9931  ;;  %v9926_v14 = vpop.permute.xlu1 %9925 }
0x64e3   :  { %v15588_v3 = vpop.eup %15587 }
0x64e4   :  { %v9758_v53 = vmul.f32 %v15588_v3, %v15582_v47 }
0x64e5   :  { %v9924_v54 = vpop.permute.xlu0 %9923 }
0x64e6   :  { %14825 = vmatmul.mubr.msk.f32.vlgmr.msra.gmra.mxu0 %vm3092_vm6, %v9758_v53 }
0x64e7   :  { %v15590_v10 = vpop.eup %15589  ;;  %14840 = vmatpush3.xpose.msk.msra.mxu0 %vm246_vm3, %v9934_v15  ;;  %14827 = vmatprep.mubr.msk.f32.mxu0 %vm15725_vm0, %v15724_v0 }
0x64e8   :  { %14841 = vmatprep.subr.mxu0 %v15724_v0  ;;  %v9760_v11 = vmul.f32 %v15590_v10, %v15584_v2 }
0x64e9   :  { %v9928_v30 = vpop.permute.xlu0 %9927 }
0x64ea   :  { %14828 = vmatmul.mubr.msk.f32.gmra.mxu0 %vm3092_vm6, %v9760_v11 }
0x64eb   :  { %v15592_v33 = vpop.eup %15591  ;;  %14842 = vmatpush3.xpose.msk.msra.mxu0 %vm246_vm3, %v9932_v34  ;;  %14830 = vmatprep.mubr.msk.f32.mxu0 %vm15725_vm0, %v15724_v0 }
0x64ec   :  { %14843 = vmatprep.subr.mxu0 %v15724_v0  ;;  %v9762_v61 = vmul.f32 %v15592_v33, %v15586_v7 }
0x64ee   :  { %14831 = vmatmul.mubr.msk.f32.gmra.mxu0 %vm3092_vm6, %v9762_v61 }
0x64ef   :  { %14844 = vmatpush3.xpose.msk.msra.mxu0 %vm246_vm3, %v9930_v51  ;;  %14845 = vmatprep.mubr.msk.f32.mxu0 %vm15725_vm0, %v15724_v0 }
0x64f2   :  { %14846 = vmatmul.mubr.msk.f32.vlgmr.msra.gmra.mxu0 %vm246_vm3, %v9924_v54 }
0x64f3   :  { %14848 = vmatprep.mubr.msk.f32.mxu0 %vm15725_vm0, %v15724_v0 }
0x64f6   :  { %14849 = vmatmul.mubr.msk.f32.gmra.mxu0 %vm246_vm3, %v9926_v14 }
0x64f7   :  { %14851 = vmatprep.mubr.msk.f32.mxu0 %vm15725_vm0, %v15724_v0 }
0x64fa   :  { %14852 = vmatmul.mubr.msk.f32.gmra.mxu0 %vm246_vm3, %v9928_v30 }
0x65a6   :  { %v9847_v28 = vpop.f32.mrf.mxu0 }
0x65a8   :  { %v14826_v31 = vpop.f32.mrf.mxu0 }
0x65aa   :  { %v9852_v32 = vpop.f32.mrf.mxu0 }
0x65ab   :  { %v9861_v42 = vpack.c.bf16 %v9852_v32, %v9847_v28 }
0x65ac   :  { %v14829_v36 = vpop.f32.mrf.mxu0 }
0x65ad   :  { %14835 = vmatprep.mubr.msk.bf16.mxu1 %vm246_vm3, %v9861_v42 }
0x65ae   :  { %v9857_v44 = vpop.f32.mrf.mxu0 }
0x65af   :  { %v9862_v4 = vpack.c.bf16 %v9857_v44, %v9857_v44 }
0x65b0   :  { %v14832_v24 = vpop.f32.mrf.mxu0 }
0x65b1   :  { %14836 = vmatmul.mubr.msk.bf16.vlgmr.msra.gmra.mxu1 %vm246_vm3, %v9862_v4  ;;  %v13202_v24 = vld [vmem:[%s18452_s3 + $0x28] sm:$0xf] }
0x65b2   :  { %v10013_v9 = vpop.f32.mrf.mxu0  ;;  %14860 = vmatprep.mubr.msk.f32.mxu1 %vm15725_vm0, %v15724_v0  ;;  %15136 = vmatprep.subr.msk.bf16.mxu0 %vm444_vm5, %v13202_v24 }
0x65b3   :  { %v10014_v41 = vadd.f32 %v17707_v38, %v10013_v9  ;;  %v10167_v9 = vsel %vm444_vm5, %v13202_v24, 0 }
0x65b4   :  { %v14847_v23 = vpop.f32.mrf.mxu0  ;;  %14870 = vmatpush3.bf16.msra.mxu0 %v10167_v9 }
0x65b5   :  { %v10027_v39 = vsel %vm3092_vm6, %v10014_v41, -inf  ;;  %14890 = vmatprep.subr.mxu0 %v15724_v0 }
0x65b6   :  { %10028 = vmax.xlane.f32.xlu1 %v10027_v39  ;;  %v10018_v29 = vpop.f32.mrf.mxu0 }
0x65b7   :  { %v10019_v25 = vadd.f32 %v17707_v38, %v10018_v29 }
0x65b8   :  { %v14850_v46 = vpop.f32.mrf.mxu0 }
0x65b9   :  { %v10030_v49 = vsel %vm3092_vm6, %v10019_v25, -inf }
0x65ba   :  { %10031 = vmax.xlane.f32.xlu0 %v10030_v49  ;;  %v10023_v55 = vpop.f32.mrf.mxu0 }
0x65bb   :  { %v10024_v35 = vadd.f32 %v17707_v38, %v10023_v55 }
0x65bc   :  { %v14853_v16 = vpop.f32.mrf.mxu0 }
0x65bd   :  { %v10033_v56 = vsel %vm3092_vm6, %v10024_v35, -inf }
0x65be   :  { %10034 = vmax.xlane.f32.xlu0 %v10033_v56 }
0x65c7   :  { %10062 = vrot.lane.b32.xlu1 %v17683_v13, %s15733_s17 }
0x65cb   :  { %10060 = vrot.lane.b32.xlu1 %v17681_v43, %s15733_s17 }
0x65d4   :  { %10064 = vrot.lane.b32.xlu0 %v17677_v6, %s15733_s17 }
0x663f   :  { %v10029_v57 = vpop.xlane.xlu1 %10028 }
0x6640   :  { %v10036_v58 = vsub.f32 %v10014_v41, %v10029_v57 }
0x6642   :  { %v10039_v59 = vmul.f32 1.442695, %v10036_v58 }
0x6643   :  { %v10032_v8 = vpop.xlane.xlu0 %10031  ;;  %v10063_v62 = vpop.permute.xlu1 %10062 }
0x6644   :  { %15593 = vpow2.f32 %v10039_v59  ;;  %v10037_v60 = vsub.f32 %v10019_v25, %v10032_v8 }
0x6646   :  { %v10041_v22 = vmul.f32 1.442695, %v10037_v60 }
0x6647   :  { %v10035_v20 = vpop.xlane.xlu0 %10034  ;;  %v10061_v63 = vpop.permute.xlu1 %10060 }
0x6648   :  { %15595 = vpow2.f32 %v10041_v22  ;;  %v10038_v15 = vsub.f32 %v10024_v35, %v10035_v20 }
0x664a   :  { %v10043_v53 = vmul.f32 1.442695, %v10038_v15 }
0x664b   :  { %v10065_v47 = vpop.permute.xlu0 %10064 }
0x664c   :  { %14855 = vmatpush3.msra.mxu1 %v10065_v47  ;;  %15597 = vpow2.f32 %v10043_v53 }
0x664d   :  { %14856 = vmatprep.subr.mxu1 %v15724_v0 }
0x664e   :  { %14857 = vmatpush3.msra.mxu1 %v10063_v62 }
0x664f   :  { %14858 = vmatprep.subr.mxu1 %v15724_v0 }
0x6650   :  { %14859 = vmatpush3.msra.mxu1 %v10061_v63 }
0x6651   :  { %v15594_v2 = vpop.eup %15593  ;;  %14875 = vmatprep.subr.mxu1 %v15724_v0 }
0x6652   :  { %v10045_v12 = vsel %vm3092_vm6, %v15594_v2, 0.0 }
0x6653   :  { %10046 = vadd.xlane.f32.xlu1 %v10045_v12 }
0x6655   :  { %v15596_v7 = vpop.eup %15595 }
0x6656   :  { %v10048_v17 = vsel %vm3092_vm6, %v15596_v7, 0.0 }
0x6657   :  { %10049 = vadd.xlane.f32.xlu0 %v10048_v17 }
0x6659   :  { %v15598_v33 = vpop.eup %15597 }
0x665a   :  { %v10051_v40 = vsel %vm3092_vm6, %v15598_v33, 0.0 }
0x6664   :  { %10228 = vrot.lane.b32.xlu1 %v17683_v13, %s15734_s18 }
0x666d   :  { %10230 = vrot.lane.b32.xlu0 %v17677_v6, %s15734_s18 }
0x6671   :  { %v14837_v48 = vpop.f32.mrf.mxu1  ;;  %10226 = vrot.lane.b32.xlu0 %v17681_v43, %s15734_s18 }
0x6672   :  { %v17869_v3 = vadd.f32 %v14837_v48, %v9625_v37 }
0x6673   :  { %v9906_v10 = vpop.f32.mrf.mxu1 }
0x6674   :  { %v17871_v11 = vadd.f32 %v9906_v10, %v9623_v50 }
0x6675   :  { %v14838_v34 = vpop.f32.mrf.mxu1  ;;  %10222 = vrot.lane.b32.xlu0 %v17683_v13, %s15735_s19 }
0x6677   :  { %v17907_v41 = vpop.f32.mrf.mxu1 }
0x6688   :  { %10052 = vadd.xlane.f32.xlu1 %v10051_v40 }
0x6699   :  { %10220 = vrot.lane.b32.xlu1 %v17681_v43, %s15735_s19 }
0x669d   :  { %10224 = vrot.lane.b32.xlu1 %v17677_v6, %s15735_s19 }
0x66dc   :  { %v10047_v19 = vpop.xlane.xlu1 %10046 }
0x66dd   :  { %15599 = vrcp.f32 %v10047_v19 }
0x66e0   :  { %v10050_v61 = vpop.xlane.xlu0 %10049  ;;  %v10229_v26 = vpop.permute.xlu1 %10228 }
0x66e1   :  { %15601 = vrcp.f32 %v10050_v61 }
0x66e4   :  { %v10231_v14 = vpop.permute.xlu0 %10230 }
0x66e8   :  { %v10227_v28 = vpop.permute.xlu0 %10226 }
0x66ea   :  { %v15600_v51 = vpop.eup %15599 }
0x66eb   :  { %v10055_v54 = vmul.f32 %v15600_v51, %v15594_v2 }
0x66ec   :  { %v10223_v44 = vpop.permute.xlu0 %10222 }
0x66ed   :  { %14861 = vmatmul.mubr.msk.f32.vlgmr.msra.gmra.mxu1 %vm3092_vm6, %v10055_v54 }
0x66ee   :  { %v15602_v30 = vpop.eup %15601  ;;  %14876 = vmatpush3.xpose.msk.msra.mxu1 %vm246_vm3, %v10231_v14  ;;  %14863 = vmatprep.mubr.msk.f32.mxu1 %vm15725_vm0, %v15724_v0 }
0x66ef   :  { %14877 = vmatprep.subr.mxu1 %v15724_v0  ;;  %v10057_v21 = vmul.f32 %v15602_v30, %v15596_v7 }
0x66f1   :  { %14864 = vmatmul.mubr.msk.f32.gmra.mxu1 %vm3092_vm6, %v10057_v21  ;;  %v13203_v21 = vld [vmem:[%s18452_s3 + $0x2c] sm:$0xf] }
0x66f2   :  { %14878 = vmatpush3.xpose.msk.msra.mxu1 %vm246_vm3, %v10229_v26  ;;  %14866 = vmatprep.mubr.msk.f32.mxu1 %vm15725_vm0, %v15724_v0 }
0x66f3   :  { %14879 = vmatprep.subr.mxu1 %v15724_v0 }
0x66f6   :  { %14880 = vmatpush3.xpose.msk.msra.mxu1 %vm246_vm3, %v10227_v28 }
0x66f7   :  { %15137 = vmatprep.subr.msk.bf16.mxu1 %vm444_vm5, %v13203_v21 }
0x6711   :  { %v10053_v31 = vpop.xlane.xlu1 %10052 }
0x6712   :  { %15603 = vrcp.f32 %v10053_v31 }
0x6715   :  { %v10221_v36 = vpop.permute.xlu1 %10220 }
0x6719   :  { %v10225_v4 = vpop.permute.xlu1 %10224 }
0x671f   :  { %v15604_v32 = vpop.eup %15603 }
0x6720   :  { %v10059_v42 = vmul.f32 %v15604_v32, %v15598_v33 }
0x6722   :  { %14867 = vmatmul.mubr.msk.f32.gmra.mxu1 %vm3092_vm6, %v10059_v42 }
0x6723   :  { %14881 = vmatprep.mubr.msk.f32.mxu1 %vm15725_vm0, %v15724_v0 }
0x6726   :  { %14882 = vmatmul.mubr.msk.f32.vlgmr.msra.gmra.mxu1 %vm246_vm3, %v10221_v36 }
0x6727   :  { %14884 = vmatprep.mubr.msk.f32.mxu1 %vm15725_vm0, %v15724_v0 }
0x672a   :  { %14885 = vmatmul.mubr.msk.f32.gmra.mxu1 %vm246_vm3, %v10223_v44 }
0x672b   :  { %14887 = vmatprep.mubr.msk.f32.mxu1 %vm15725_vm0, %v15724_v0 }
0x672e   :  { %14888 = vmatmul.mubr.msk.f32.gmra.mxu1 %vm246_vm3, %v10225_v4  ;;  %v10464_v4 = vsel %vm444_vm5, %v13203_v21, 0 }
0x672f   :  { %14906 = vmatpush3.bf16.msra.mxu1 %v10464_v4 }
0x67ad   :  { %v10144_v23 = vpop.f32.mrf.mxu1 }
0x67af   :  { %v14862_v39 = vpop.f32.mrf.mxu1 }
0x67b1   :  { %v10149_v29 = vpop.f32.mrf.mxu1 }
0x67b2   :  { %v10158_v25 = vpack.c.bf16 %v10149_v29, %v10144_v23 }
0x67b3   :  { %v14865_v46 = vpop.f32.mrf.mxu1 }
0x67b4   :  { %14871 = vmatprep.mubr.msk.bf16.mxu0 %vm246_vm3, %v10158_v25 }
0x67e2   :  { %v10154_v49 = vpop.f32.mrf.mxu1 }
0x67e3   :  { %v10159_v55 = vpack.c.bf16 %v10154_v49, %v10154_v49 }
0x67e4   :  { %v14868_v35 = vpop.f32.mrf.mxu1 }
0x67e5   :  { %14872 = vmatmul.mubr.msk.bf16.vlgmr.msra.gmra.mxu0 %vm246_vm3, %v10159_v55 }
0x67e6   :  { %v10310_v16 = vpop.f32.mrf.mxu1  ;;  %14896 = vmatprep.mubr.msk.f32.mxu0 %vm15725_vm0, %v15724_v0 }
0x67e7   :  { %v10311_v56 = vadd.f32 %v17707_v38, %v10310_v16  ;;  %v9624_v16 = vadd.f32 %v17859_v52, %v17831_v27  ;;  %v15716_v27 = vld [vmem:[%s18450_s6 + $0x40] sm:$0xff] }
0x67e8   :  { %v14883_v57 = vpop.f32.mrf.mxu1 }
0x67e9   :  { %v10324_v58 = vsel %vm3092_vm6, %v10311_v56, -inf  ;;  %v9921_v57 = vadd.f32 %v17907_v41, %v9624_v16  ;;  %v15230_v16 = vld [vmem:[%s18448_s5 + $0x40] sm:$0xff]  }
0x67ea   :  { %10325 = vmax.xlane.f32.xlu0 %v10324_v58  ;;  %v10315_v59 = vpop.f32.mrf.mxu1 }
0x67eb   :  { %v10316_v8 = vadd.f32 %v17707_v38, %v10315_v59 }
0x67ec   :  { %v14886_v60 = vpop.f32.mrf.mxu1 }
0x67ed   :  { %v10327_v22 = vsel %vm3092_vm6, %v10316_v8, -inf }
0x67ee   :  { %10328 = vmax.xlane.f32.xlu1 %v10327_v22  ;;  %v10320_v20 = vpop.f32.mrf.mxu1 }
0x67ef   :  { %v10321_v62 = vadd.f32 %v17707_v38, %v10320_v20 }
0x67f0   :  { %v14889_v47 = vpop.f32.mrf.mxu1 }
0x67f1   :  { %v10330_v63 = vsel %vm3092_vm6, %v10321_v62, -inf }
0x67f2   :  { %10331 = vmax.xlane.f32.xlu0 %v10330_v63 }
0x67ff   :  { %10361 = vrot.lane.b32.xlu1 %v17677_v6, %s15736_s24 }
0x6873   :  { %v10326_v2 = vpop.xlane.xlu0 %10325 }
0x6874   :  { %v10333_v12 = vsub.f32 %v10311_v56, %v10326_v2 }
0x6876   :  { %v10336_v7 = vmul.f32 1.442695, %v10333_v12 }
0x6877   :  { %v10329_v17 = vpop.xlane.xlu1 %10328 }
0x6878   :  { %15605 = vpow2.f32 %v10336_v7  ;;  %v10334_v15 = vsub.f32 %v10316_v8, %v10329_v17 }
0x687a   :  { %v10338_v37 = vmul.f32 1.442695, %v10334_v15 }
0x687b   :  { %v10362_v48 = vpop.permute.xlu1 %10361  ;;  %v10332_v50 = vpop.xlane.xlu0 %10331 }
0x687c   :  { %15607 = vpow2.f32 %v10338_v37  ;;  %v10335_v53 = vsub.f32 %v10321_v62, %v10332_v50  ;;  %14891 = vmatpush3.msra.mxu0 %v10362_v48 }
0x687d   :  { %14892 = vmatprep.subr.mxu0 %v15724_v0 }
0x687e   :  { %v10340_v38 = vmul.f32 1.442695, %v10335_v53 }
0x6880   :  { %15609 = vpow2.f32 %v10340_v38 }
0x6885   :  { %v15606_v10 = vpop.eup %15605 }
0x6886   :  { %v10342_v34 = vsel %vm3092_vm6, %v15606_v10, 0.0 }
0x6887   :  { %10343 = vadd.xlane.f32.xlu0 %v10342_v34 }
0x6889   :  { %v15608_v6 = vpop.eup %15607 }
0x688a   :  { %v10345_v33 = vsel %vm3092_vm6, %v15608_v6, 0.0 }
0x688b   :  { %10346 = vadd.xlane.f32.xlu1 %v10345_v33 }
0x688d   :  { %v15610_v40 = vpop.eup %15609 }
0x688e   :  { %v10348_v19 = vsel %vm3092_vm6, %v15610_v40, 0.0 }
0x688f   :  { %10349 = vadd.xlane.f32.xlu0 %v10348_v19  ;;  %v15226_v19 = vld [vmem:[%s18453_s4 + $0x20] sm:$0xff]  }
0x689c   :  { %10357 = vrot.lane.b32.xlu1 %v17681_v43, %s15736_s24 }
0x68a5   :  { %10359 = vrot.lane.b32.xlu0 %v17683_v13, %s15736_s24  ;;  %v14873_v61 = vpop.f32.mrf.mxu0 }
0x68a6   :  { %v10219_v51 = vadd.f32 %v14873_v61, %v17869_v3 }
0x68a7   :  { %v10203_v54 = vpop.f32.mrf.mxu0 }
0x68a8   :  { %v10217_v14 = vadd.f32 %v10203_v54, %v17871_v11 }
0x68a9   :  { %v14874_v30 = vpop.f32.mrf.mxu0 }
0x68ab   :  { %v10206_v24 = vpop.f32.mrf.mxu0 }
0x68ac   :  { %v10218_v8 = vadd.f32 %v10206_v24, %v9921_v57 }
0x6910   :  { %v10344_v26 = vpop.xlane.xlu0 %10343 }
0x6911   :  { %15611 = vrcp.f32 %v10344_v26 }
0x6914   :  { %v10347_v28 = vpop.xlane.xlu1 %10346 }
0x6915   :  { %15613 = vrcp.f32 %v10347_v28 }
0x6918   :  { %v10350_v43 = vpop.xlane.xlu0 %10349  ;;  %v10358_v3 = vpop.permute.xlu1 %10357 }
0x6919   :  { %15615 = vrcp.f32 %v10350_v43 }
0x691c   :  { %v10360_v13 = vpop.permute.xlu0 %10359 }
0x691d   :  { %14893 = vmatpush3.msra.mxu0 %v10360_v13 }
0x691e   :  { %v15612_v31 = vpop.eup %15611  ;;  %14894 = vmatprep.subr.mxu0 %v15724_v0 }
0x691f   :  { %v10352_v11 = vmul.f32 %v15612_v31, %v15606_v10  ;;  %14895 = vmatpush3.msra.mxu0 %v10358_v3  ;;  %v13254_v3 = vld [vmem:[%s18450_s6 + $0x14] ss:$0 sm:$0xff] }
0x6921   :  { %14897 = vmatmul.mubr.msk.f32.vlgmr.msra.gmra.mxu0 %vm3092_vm6, %v10352_v11 }
0x6922   :  { %v15614_v32 = vpop.eup %15613  ;;  %14899 = vmatprep.mubr.msk.f32.mxu0 %vm15725_vm0, %v15724_v0 }
0x6923   :  { %v10354_v42 = vmul.f32 %v15614_v32, %v15608_v6 }
0x6925   :  { %14900 = vmatmul.mubr.msk.f32.gmra.mxu0 %vm3092_vm6, %v10354_v42 }
0x6926   :  { %v15616_v36 = vpop.eup %15615  ;;  %14902 = vmatprep.mubr.msk.f32.mxu0 %vm15725_vm0, %v15724_v0 }
0x6927   :  { %v10356_v44 = vmul.f32 %v15616_v36, %v15610_v40  ;;  %v15225_v40 = vld [vmem:[%s18453_s4 + $0x28] sm:$0xff]   ;;  %v13255_v36 = vld [vmem:[%s18450_s6 + $0x15] ss:$0 sm:$0xff] }
0x6928   :  { %14911 = vmatprep.subr.bf16.mxu0 %v15225_v40 }
0x6929   :  { %14903 = vmatmul.mubr.msk.f32.gmra.mxu0 %vm3092_vm6, %v10356_v44 }
0x692a   :  { %14912 = vmatpush3.bf16.msra.mxu0 %v15225_v40 }
0x692b   :  { %14913 = vmatprep.subr.bf16.mxu0 %v15226_v19 }
0x692e   :  { %14914 = vmatpush3.bf16.msra.mxu0 %v15226_v19 }
0x69e1   :  { %v10441_v9 = vpop.f32.mrf.mxu0 }
0x69e3   :  { %v14898_v23 = vpop.f32.mrf.mxu0 }
0x69e5   :  { %v10446_v39 = vpop.f32.mrf.mxu0 }
0x69e6   :  { %v10455_v29 = vpack.c.bf16 %v10446_v39, %v10441_v9 }
0x69e7   :  { %v14901_v25 = vpop.f32.mrf.mxu0 }
0x69e8   :  { %14907 = vmatprep.mubr.msk.bf16.mxu1 %vm246_vm3, %v10455_v29 }
0x69e9   :  { %v10451_v46 = vpop.f32.mrf.mxu0 }
0x69ea   :  { %v10456_v49 = vpack.c.bf16 %v10451_v46, %v10451_v46 }
0x69eb   :  { %v14904_v55 = vpop.f32.mrf.mxu0 }
0x69ec   :  { %14908 = vmatmul.mubr.msk.bf16.vlgmr.msra.gmra.mxu1 %vm246_vm3, %v10456_v49  ;;  %v15227_v49 = vld [vmem:[%s18448_s5 + $0x58] sm:$0xff]   ;;  %v15228_v55 = vld [vmem:[%s18448_s5 + $0x50] sm:$0xff]  }
0x69ed   :  { %14919 = vmatprep.subr.bf16.mxu1 %v15227_v49 }
0x69ee   :  { %14920 = vmatpush3.bf16.msra.mxu1 %v15227_v49 }
0x69ef   :  { %14921 = vmatprep.subr.bf16.mxu1 %v15228_v55 }
0x69f2   :  { %14922 = vmatpush3.bf16.msra.mxu1 %v15228_v55 }
0x6aac   :  { %v14909_v35 = vpop.f32.mrf.mxu1 }
0x6aad   :  { %v10516_v20 = vadd.f32 %v14909_v35, %v10219_v51  ;;  %v15229_v35 = vld [vmem:[%s18448_s5 + $0x48] sm:$0xff]  }
0x6aae   :  { %v10500_v56 = vpop.f32.mrf.mxu1  ;;  %14923 = vmatprep.subr.bf16.mxu1 %v15229_v35 }
0x6aaf   :  { %v10514_v58 = vadd.f32 %v10500_v56, %v10217_v14  ;;  %v17960_v52 = vadd.f32 %v15716_v27, %v10516_v20  ;;  %14924 = vmatpush3.bf16.msra.mxu1 %v15229_v35  ;;  %v13260_v56 = vld [vmem:[%s18450_s6 + $0x16] ss:$0 sm:$0xff] }
0x6ab0   :  { %v14910_v59 = vpop.f32.mrf.mxu1  ;;  %14925 = vmatprep.subr.bf16.mxu1 %v15230_v16 }
0x6ab1   :  { %v17950_v60 = vadd.f32 %v10514_v58, %v17644_v45  ;;  %v10528_v41 = vsel %vm129_vm2, %v17960_v52, 0.0 }
0x6ab2   :  { %v10503_v22 = vpop.f32.mrf.mxu1 }
0x6ab3   :  { %v10515_v62 = vadd.f32 %v10503_v22, %v10218_v8  ;;  %v10522_v47 = vsel %vm129_vm2, %v17950_v60, 0.0  ;;  %14926 = vmatpush3.bf16.msra.mxu1 %v15230_v16 }
0x6ab4   :  { %10523 = vadd.xlane.f32.xlu1 %v10522_v47  ;;  %14954 = vmatprep.subr.mxu1 %v15724_v0 }
0x6ab5   :  { %v17955_v63 = vadd.f32 %v10515_v62, %v17648_v18 }
0x6ab7   :  { %v10525_v45 = vsel %vm129_vm2, %v17955_v63, 0.0 }
0x6ab8   :  { %10526 = vadd.xlane.f32.xlu0 %v10525_v45 }
0x6abc   :  { %10529 = vadd.xlane.f32.xlu0 %v10528_v41 }
0x6b3d   :  { %v10524_v2 = vpop.xlane.xlu1 %10523 }
0x6b3e   :  { %v10531_v12 = vmul.f32 0.03125, %v10524_v2 }
0x6b40   :  { %v10534_v7 = vsub.f32 %v17950_v60, %v10531_v12 }
0x6b41   :  { %v10527_v18 = vpop.xlane.xlu0 %10526 }
0x6b42   :  { %v10532_v17 = vmul.f32 0.03125, %v10527_v18  ;;  %v10537_v15 = vmul.f32 %v10534_v7, %v10534_v7 }
0x6b44   :  { %v10535_v37 = vsub.f32 %v17955_v63, %v10532_v17  ;;  %v10540_v48 = vsel %vm129_vm2, %v10537_v15, 0.0 }
0x6b45   :  { %10541 = vadd.xlane.f32.xlu1 %v10540_v48  ;;  %v10530_v50 = vpop.xlane.xlu0 %10529 }
0x6b46   :  { %v10533_v53 = vmul.f32 0.03125, %v10530_v50  ;;  %v10538_v38 = vmul.f32 %v10535_v37, %v10535_v37 }
0x6b48   :  { %v10536_v10 = vsub.f32 %v17960_v52, %v10533_v53  ;;  %v10543_v34 = vsel %vm129_vm2, %v10538_v38, 0.0 }
0x6b49   :  { %10544 = vadd.xlane.f32.xlu0 %v10543_v34 }
0x6b4a   :  { %v10539_v6 = vmul.f32 %v10536_v10, %v10536_v10 }
0x6b4c   :  { %v10546_v33 = vsel %vm129_vm2, %v10539_v6, 0.0 }
0x6b4d   :  { %10547 = vadd.xlane.f32.xlu1 %v10546_v33 }
0x6bce   :  { %v10542_v61 = vpop.xlane.xlu1 %10541 }
0x6bcf   :  { %v10549_v51 = vmul.f32 0.03125, %v10542_v61 }
0x6bd1   :  { %v10552_v54 = vadd.f32 1e-06, %v10549_v51 }
0x6bd2   :  { %v10545_v14 = vpop.xlane.xlu0 %10544 }
0x6bd3   :  { %15617 = vrsqrt.f32 %v10552_v54  ;;  %v10550_v30 = vmul.f32 0.03125, %v10545_v14 }
0x6bd5   :  { %v10553_v21 = vadd.f32 1e-06, %v10550_v30 }
0x6bd6   :  { %v10548_v26 = vpop.xlane.xlu1 %10547 }
0x6bd7   :  { %15619 = vrsqrt.f32 %v10553_v21  ;;  %v10551_v28 = vmul.f32 0.03125, %v10548_v26 }
0x6bd9   :  { %v10554_v43 = vadd.f32 1e-06, %v10551_v28 }
0x6bdb   :  { %15621 = vrsqrt.f32 %v10554_v43 }
0x6be0   :  { %v15618_v13 = vpop.eup %15617 }
0x6be1   :  { %v10558_v31 = vmul.f32 %v15618_v13, %v10534_v7  ;;  %v13273_v13 = vld [vmem:[%s18450_s6 + $0x17] ss:$0 sm:$0xff] }
0x6be3   :  { %v10565_v42 = vmul.f32 %v13254_v3, %v10558_v31 }
0x6be4   :  { %v15620_v11 = vpop.eup %15619 }
0x6be5   :  { %v10559_v32 = vmul.f32 %v15620_v11, %v10535_v37  ;;  %v10572_v9 = vadd.f32 %v13255_v36, %v10565_v42 }
0x6be7   :  { %v10566_v44 = vmul.f32 %v13254_v3, %v10559_v32 }
0x6be8   :  { %v15622_v4 = vpop.eup %15621 }
0x6be9   :  { %v10560_v24 = vmul.f32 %v15622_v4, %v10536_v10  ;;  %v10573_v23 = vadd.f32 %v13255_v36, %v10566_v44 }
0x6beb   :  { %v10567_v39 = vmul.f32 %v13254_v3, %v10560_v24  ;;  %v10580_v29 = vpack.c.bf16 %v10573_v23, %v10572_v9 }
0x6bed   :  { %v10574_v25 = vadd.f32 %v13255_v36, %v10567_v39  ;;  %14915 = vmatprep.mubr.msk.bf16.mxu0 %vm129_vm2, %v10580_v29 }
0x6bef   :  { %v10581_v46 = vpack.c.bf16 %v10574_v25, %v10574_v25 }
0x6bf1   :  { %14916 = vmatmul.mubr.msk.bf16.vlgmr.msra.gmra.mxu0 %vm129_vm2, %v10581_v46 }
0x6cb1   :  { %v14917_v57 = vpop.f32.mrf.mxu0 }
0x6cb2   :  { %v10647_v58 = vadd.f32 %v14917_v57, %v13260_v56 }
0x6cb3   :  { %v10638_v59 = vpop.f32.mrf.mxu0 }
0x6cb4   :  { %v10654_v8 = vmul.f32 %v10647_v58, %v10647_v58  ;;  %v10639_v22 = vadd.f32 %v13260_v56, %v10638_v59 }
0x6cb5   :  { %v14918_v20 = vpop.f32.mrf.mxu0 }
0x6cb6   :  { %v10657_v62 = vmul.f32 %v10654_v8, %v10647_v58  ;;  %v10652_v47 = vmul.f32 %v10639_v22, %v10639_v22  ;;  %v15232_v20 = vld [vmem:[%s18451_s2 + $0x30] sm:$0xff]  }
0x6cb7   :  { %v10641_v27 = vpop.f32.mrf.mxu0 }
0x6cb8   :  { %v10660_v45 = vmul.f32 0.044715, %v10657_v62  ;;  %v10655_v41 = vmul.f32 %v10652_v47, %v10639_v22  ;;  %v10642_v2 = vadd.f32 %v13260_v56, %v10641_v27 }
0x6cba   :  { %v10663_v12 = vadd.f32 %v10660_v45, %v10647_v58  ;;  %v10658_v7 = vmul.f32 0.044715, %v10655_v41  ;;  %v10653_v18 = vmul.f32 %v10642_v2, %v10642_v2 }
0x6cbc   :  { %v10666_v17 = vmul.f32 0.7978846, %v10663_v12  ;;  %v10661_v15 = vadd.f32 %v10658_v7, %v10639_v22  ;;  %v10656_v37 = vmul.f32 %v10653_v18, %v10642_v2 }
0x6cbe   :  { %15623 = vtanh.f32 %v10666_v17  ;;  %v10664_v48 = vmul.f32 0.7978846, %v10661_v15  ;;  %v10659_v50 = vmul.f32 0.044715, %v10656_v37  ;;  %v13280_v37 = vld [vmem:[%s18450_s6 + $0x18] ss:$0 sm:$0xff] }
0x6cc0   :  { %15625 = vtanh.f32 %v10664_v48  ;;  %v10662_v53 = vadd.f32 %v10659_v50, %v10642_v2 }
0x6cc2   :  { %v10665_v38 = vmul.f32 0.7978846, %v10662_v53 }
0x6cc4   :  { %15627 = vtanh.f32 %v10665_v38 }
0x6ccb   :  { %v15624_v10 = vpop.eup %15623 }
0x6ccc   :  { %v10672_v6 = vadd.f32 1.0, %v15624_v10 }
0x6ccd   :  { %v15626_v34 = vpop.eup %15625 }
0x6cce   :  { %v10670_v33 = vadd.f32 1.0, %v15626_v34  ;;  %v10675_v19 = vmul.f32 0.5, %v10672_v6  ;;  %v13281_v34 = vld [vmem:[%s18450_s6 + $0x19] ss:$0 sm:$0xff] }
0x6cd0   :  { %v10673_v61 = vmul.f32 0.5, %v10670_v33  ;;  %v10678_v14 = vmul.f32 %v10675_v19, %v10647_v58 }
0x6cd1   :  { %v15628_v40 = vpop.eup %15627 }
0x6cd2   :  { %v10671_v51 = vadd.f32 1.0, %v15628_v40  ;;  %v10676_v30 = vmul.f32 %v10673_v61, %v10639_v22  ;;  %v10689_v28 = vpack.c.bf16 %v10678_v14, %v10678_v14  ;;  %v15231_v22 = vld [vmem:[%s18451_s2 + $0x38] sm:$0xff]  }
0x6cd3   :  { %14931 = vmatprep.subr.bf16.mxu0 %v15231_v22  ;;  %v13290_v14 = vld [vmem:[%s18450_s6 + $0x1a] ss:$0 sm:$0xff] }
0x6cd4   :  { %v10674_v54 = vmul.f32 0.5, %v10671_v51  ;;  %14932 = vmatpush3.bf16.msra.mxu0 %v15231_v22 }
0x6cd5   :  { %14933 = vmatprep.subr.bf16.mxu0 %v15232_v20 }
0x6cd6   :  { %v10677_v21 = vmul.f32 %v10674_v54, %v10642_v2 }
0x6cd8   :  { %v10688_v26 = vpack.c.bf16 %v10677_v21, %v10676_v30  ;;  %14934 = vmatpush3.bf16.msra.mxu0 %v15232_v20 }
0x6cd9   :  { %14939 = vmatprep.subr.mxu0 %v15724_v0 }
0x6cda   :  { %14927 = vmatprep.mubr.msk.bf16.mxu1 %vm80_vm1, %v10688_v26 }
0x6cdb   :  { %14928 = vmatmul.mubr.msk.bf16.vlgmr.msra.gmra.mxu1 %vm80_vm1, %v10689_v28 }
0x6cdc   :  { %14960 = vmatprep.mubr.msk.f32.mxu1 %vm15725_vm0, %v15724_v0 }
0x6d9b   :  { %v14929_v43 = vpop.f32.mrf.mxu1 }
0x6d9c   :  { %v10767_v3 = vadd.f32 %v14929_v43, %v13273_v13 }
0x6d9d   :  { %v10758_v31 = vpop.f32.mrf.mxu1 }
0x6d9e   :  { %v10759_v11 = vadd.f32 %v13273_v13, %v10758_v31  ;;  %v18013_v44 = vadd.f32 %v10767_v3, %v17960_v52 }
0x6d9f   :  { %v14930_v32 = vpop.f32.mrf.mxu1 }
0x6da0   :  { %v18010_v42 = vadd.f32 %v10759_v11, %v17950_v60  ;;  %v10783_v39 = vsel %vm129_vm2, %v18013_v44, 0.0 }
0x6da1   :  { %v10761_v36 = vpop.f32.mrf.mxu1 }
0x6da2   :  { %v10762_v4 = vadd.f32 %v13273_v13, %v10761_v36  ;;  %v10777_v24 = vsel %vm129_vm2, %v18010_v42, 0.0 }
0x6da3   :  { %10778 = vadd.xlane.f32.xlu0 %v10777_v24 }
0x6da4   :  { %v18018_v9 = vadd.f32 %v10762_v4, %v17955_v63 }
0x6da6   :  { %v10780_v23 = vsel %vm129_vm2, %v18018_v9, 0.0 }
0x6da7   :  { %10781 = vadd.xlane.f32.xlu1 %v10780_v23  ;;  %10784 = vadd.xlane.f32.xlu0 %v10783_v39 }
0x6e2c   :  { %v10779_v60 = vpop.xlane.xlu0 %10778 }
0x6e2d   :  { %v10786_v29 = vmul.f32 0.03125, %v10779_v60 }
0x6e2f   :  { %v10789_v52 = vsub.f32 %v18010_v42, %v10786_v29 }
0x6e30   :  { %v10782_v25 = vpop.xlane.xlu1 %10781  ;;  %v10785_v46 = vpop.xlane.xlu0 %10784 }
0x6e31   :  { %v10787_v49 = vmul.f32 0.03125, %v10782_v25  ;;  %v10788_v55 = vmul.f32 0.03125, %v10785_v46  ;;  %v10792_v35 = vmul.f32 %v10789_v52, %v10789_v52 }
0x6e33   :  { %v10790_v63 = vsub.f32 %v18018_v9, %v10787_v49  ;;  %v10791_v16 = vsub.f32 %v18013_v44, %v10788_v55  ;;  %v10795_v56 = vsel %vm129_vm2, %v10792_v35, 0.0 }
0x6e34   :  { %10796 = vadd.xlane.f32.xlu1 %v10795_v56 }
0x6e35   :  { %v10793_v57 = vmul.f32 %v10790_v63, %v10790_v63  ;;  %v10794_v58 = vmul.f32 %v10791_v16, %v10791_v16 }
0x6e37   :  { %v10798_v59 = vsel %vm129_vm2, %v10793_v57, 0.0  ;;  %v10801_v8 = vsel %vm129_vm2, %v10794_v58, 0.0 }
0x6e38   :  { %10799 = vadd.xlane.f32.xlu0 %v10798_v59  ;;  %10802 = vadd.xlane.f32.xlu1 %v10801_v8 }
0x6ebd   :  { %v10797_v62 = vpop.xlane.xlu1 %10796 }
0x6ebe   :  { %v10804_v47 = vmul.f32 0.03125, %v10797_v62 }
0x6ec0   :  { %v10807_v27 = vadd.f32 1e-06, %v10804_v47 }
0x6ec1   :  { %v10803_v45 = vpop.xlane.xlu1 %10802  ;;  %v10800_v41 = vpop.xlane.xlu0 %10799 }
0x6ec2   :  { %15629 = vrsqrt.f32 %v10807_v27  ;;  %v10806_v2 = vmul.f32 0.03125, %v10803_v45  ;;  %v10805_v12 = vmul.f32 0.03125, %v10800_v41 }
0x6ec4   :  { %v10809_v7 = vadd.f32 1e-06, %v10806_v2  ;;  %v10808_v18 = vadd.f32 1e-06, %v10805_v12 }
0x6ec6   :  { %15631 = vrsqrt.f32 %v10809_v7 }
0x6ec7   :  { %15633 = vrsqrt.f32 %v10808_v18 }
0x6ecf   :  { %v15630_v17 = vpop.eup %15629 }
0x6ed0   :  { %v10813_v15 = vmul.f32 %v15630_v17, %v10789_v52  ;;  %v18107_v52 = vld [vmem:[%s18450_s6 + $0x2c] ss:$0 sm:$0xff] }
0x6ed2   :  { %v10820_v10 = vmul.f32 %v13280_v37, %v10813_v15 }
0x6ed3   :  { %v15632_v48 = vpop.eup %15631 }
0x6ed4   :  { %v15634_v50 = vpop.eup %15633  ;;  %v10815_v53 = vmul.f32 %v15632_v48, %v10791_v16  ;;  %v10827_v19 = vadd.f32 %v13281_v34, %v10820_v10 }
0x6ed5   :  { %v10814_v38 = vmul.f32 %v15634_v50, %v10790_v63 }
0x6ed6   :  { %v10822_v6 = vmul.f32 %v13280_v37, %v10815_v53 }
0x6ed7   :  { %v10821_v33 = vmul.f32 %v13280_v37, %v10814_v38 }
0x6ed8   :  { %v10829_v40 = vadd.f32 %v13281_v34, %v10822_v6 }
0x6ed9   :  { %v10828_v61 = vadd.f32 %v13281_v34, %v10821_v33 }
0x6eda   :  { %v10841_v51 = vpack.c.bf16 %v10829_v40, %v10829_v40 }
0x6edb   :  { %v10840_v54 = vpack.c.bf16 %v10828_v61, %v10827_v19 }
0x6edd   :  { %14935 = vmatprep.mubr.msk.bf16.mxu0 %vm129_vm2, %v10840_v54 }
0x6ede   :  { %14936 = vmatmul.mubr.msk.bf16.vlgmr.msra.gmra.mxu0 %vm129_vm2, %v10841_v51 }
0x6edf   :  { %14945 = vmatprep.mubr.msk.f32.mxu0 %vm15725_vm0, %v15724_v0 }
0x6f9e   :  { %v14937_v30 = vpop.f32.mrf.mxu0 }
0x6f9f   :  { %v18050_v21 = vadd.f32 %v14937_v30, %v13290_v14 }
0x6fa0   :  { %v10898_v26 = vpop.f32.mrf.mxu0 }
0x6fa1   :  { %10919 = vrot.lane.b32.xlu0 %v18050_v21, %s15726_s29  ;;  %v18058_v31 = vadd.f32 %v13290_v14, %v10898_v26 }
0x6fa2   :  { %v14938_v28 = vpop.f32.mrf.mxu0 }
0x6fa4   :  { %v10901_v43 = vpop.f32.mrf.mxu0 }
0x6fa5   :  { %v18054_v13 = vadd.f32 %v13290_v14, %v10901_v43  ;;  %11220 = vrot.lane.b32.xlu0 %v18050_v21, %s15728_s8 }
0x6fa7   :  { %10917 = vrot.lane.b32.xlu1 %v18054_v13, %s15726_s29 }
0x6fa9   :  { %11216 = vrot.lane.b32.xlu0 %v18058_v31, %s15728_s8 }
0x6fab   :  { %10915 = vrot.lane.b32.xlu1 %v18058_v31, %s15726_s29 }
0x6fad   :  { %11212 = vrot.lane.b32.xlu0 %v18054_v13, %s15729_s9 }
0x6faf   :  { %11218 = vrot.lane.b32.xlu1 %v18054_v13, %s15728_s8 }
0x6fb3   :  { %11210 = vrot.lane.b32.xlu1 %v18058_v31, %s15729_s9 }
0x6fb7   :  { %11214 = vrot.lane.b32.xlu1 %v18050_v21, %s15729_s9 }
0x7013   :  { %v10920_v3 = vpop.permute.xlu0 %10919 }
0x7014   :  { %14940 = vmatpush3.xpose.msk.msra.mxu0 %vm246_vm3, %v10920_v3 }
0x7015   :  { %14941 = vmatprep.subr.mxu0 %v15724_v0 }
0x7017   :  { %v11221_v36 = vpop.permute.xlu0 %11220 }
0x7019   :  { %v10918_v11 = vpop.permute.xlu1 %10917 }
0x701a   :  { %14942 = vmatpush3.xpose.msk.msra.mxu0 %vm246_vm3, %v10918_v11 }
0x701b   :  { %14943 = vmatprep.subr.mxu0 %v15724_v0  ;;  %v11217_v24 = vpop.permute.xlu0 %11216 }
0x701d   :  { %v10916_v32 = vpop.permute.xlu1 %10915 }
0x701e   :  { %14944 = vmatpush3.xpose.msk.msra.mxu0 %vm246_vm3, %v10916_v32 }
0x701f   :  { %14975 = vmatprep.subr.mxu0 %v15724_v0  ;;  %v11213_v39 = vpop.permute.xlu0 %11212 }
0x7021   :  { %14946 = vmatmul.mubr.msk.f32.vlgmr.msra.gmra.mxu0 %vm246_vm3, %v18058_v31  ;;  %v11219_v4 = vpop.permute.xlu1 %11218 }
0x7022   :  { %14976 = vmatpush3.xpose.msk.msra.mxu0 %vm246_vm3, %v11221_v36  ;;  %14948 = vmatprep.mubr.msk.f32.mxu0 %vm15725_vm0, %v15724_v0 }
0x7023   :  { %14977 = vmatprep.subr.mxu0 %v15724_v0 }
0x7025   :  { %14949 = vmatmul.mubr.msk.f32.gmra.mxu0 %vm246_vm3, %v18054_v13  ;;  %v11211_v23 = vpop.permute.xlu1 %11210 }
0x7026   :  { %14978 = vmatpush3.xpose.msk.msra.mxu0 %vm246_vm3, %v11219_v4  ;;  %14951 = vmatprep.mubr.msk.f32.mxu0 %vm15725_vm0, %v15724_v0 }
0x7027   :  { %14979 = vmatprep.subr.mxu0 %v15724_v0 }
0x7029   :  { %14952 = vmatmul.mubr.msk.f32.gmra.mxu0 %vm246_vm3, %v18050_v21  ;;  %v11215_v60 = vpop.permute.xlu1 %11214 }
0x702a   :  { %14980 = vmatpush3.xpose.msk.msra.mxu0 %vm246_vm3, %v11217_v24  ;;  %14981 = vmatprep.mubr.msk.f32.mxu0 %vm15725_vm0, %v15724_v0 }
0x702d   :  { %14982 = vmatmul.mubr.msk.f32.vlgmr.msra.gmra.mxu0 %vm246_vm3, %v11211_v23 }
0x702e   :  { %14984 = vmatprep.mubr.msk.f32.mxu0 %vm15725_vm0, %v15724_v0 }
0x7031   :  { %14985 = vmatmul.mubr.msk.f32.gmra.mxu0 %vm246_vm3, %v11213_v39 }
0x7032   :  { %14987 = vmatprep.mubr.msk.f32.mxu0 %vm15725_vm0, %v15724_v0 }
0x7035   :  { %14988 = vmatmul.mubr.msk.f32.gmra.mxu0 %vm246_vm3, %v11215_v60 }
0x70e1   :  { %v10999_v29 = vpop.f32.mrf.mxu0 }
0x70e2   :  { %v11000_v25 = vadd.f32 %v18107_v52, %v10999_v29 }
0x70e3   :  { %v14947_v46 = vpop.f32.mrf.mxu0 }
0x70e4   :  { %v11013_v49 = vsel %vm3092_vm6, %v11000_v25, -inf }
0x70e5   :  { %11014 = vmax.xlane.f32.xlu0 %v11013_v49  ;;  %v11004_v55 = vpop.f32.mrf.mxu0 }
0x70e6   :  { %v11005_v35 = vadd.f32 %v18107_v52, %v11004_v55 }
0x70e7   :  { %v14950_v63 = vpop.f32.mrf.mxu0 }
0x70e8   :  { %v11016_v16 = vsel %vm3092_vm6, %v11005_v35, -inf }
0x70e9   :  { %11017 = vmax.xlane.f32.xlu1 %v11016_v16  ;;  %v11009_v56 = vpop.f32.mrf.mxu0  ;;  %v13286_v16 = vld [vmem:[%s18452_s3 + $0x30] sm:$0xf] }
0x70ea   :  { %v11010_v57 = vadd.f32 %v18107_v52, %v11009_v56  ;;  %v11153_v56 = vsel %vm444_vm5, %v13286_v16, 0 }
0x70eb   :  { %v14953_v58 = vpop.f32.mrf.mxu0 }
0x70ec   :  { %v11019_v59 = vsel %vm3092_vm6, %v11010_v57, -inf }
0x70ed   :  { %11020 = vmax.xlane.f32.xlu0 %v11019_v59  ;;  %v11300_v8 = vpop.f32.mrf.mxu0 }
0x70ee   :  { %v11301_v33 = vadd.f32 %v18107_v52, %v11300_v8 }
0x70ef   :  { %v14983_v22 = vpop.f32.mrf.mxu0 }
0x70f0   :  { %v11314_v19 = vsel %vm3092_vm6, %v11301_v33, -inf }
0x70f1   :  { %v11305_v20 = vpop.f32.mrf.mxu0 }
0x70f2   :  { %v11306_v40 = vadd.f32 %v18107_v52, %v11305_v20 }
0x70f3   :  { %v14986_v62 = vpop.f32.mrf.mxu0 }
0x70f4   :  { %v11317_v51 = vsel %vm3092_vm6, %v11306_v40, -inf }
0x70f5   :  { %v11310_v47 = vpop.f32.mrf.mxu0 }
0x70f6   :  { %v11311_v61 = vadd.f32 %v18107_v52, %v11310_v47 }
0x70f7   :  { %v14989_v27 = vpop.f32.mrf.mxu0 }
0x70f8   :  { %v11320_v54 = vsel %vm3092_vm6, %v11311_v61, -inf }
0x70fa   :  { %11050 = vrot.lane.b32.xlu1 %v18050_v21, %s15727_s30 }
0x716e   :  { %v11015_v45 = vpop.xlane.xlu0 %11014 }
0x716f   :  { %v11022_v41 = vsub.f32 %v11000_v25, %v11015_v45 }
0x7171   :  { %v11025_v2 = vmul.f32 1.442695, %v11022_v41 }
0x7172   :  { %v11018_v12 = vpop.xlane.xlu1 %11017 }
0x7173   :  { %15635 = vpow2.f32 %v11025_v2  ;;  %v11023_v7 = vsub.f32 %v11005_v35, %v11018_v12 }
0x7175   :  { %v11027_v18 = vmul.f32 1.442695, %v11023_v7 }
0x7176   :  { %v11021_v17 = vpop.xlane.xlu0 %11020  ;;  %v11051_v15 = vpop.permute.xlu1 %11050 }
0x7177   :  { %15637 = vpow2.f32 %v11027_v18  ;;  %v11024_v37 = vsub.f32 %v11010_v57, %v11021_v17  ;;  %14955 = vmatpush3.msra.mxu1 %v11051_v15 }
0x7178   :  { %14956 = vmatprep.subr.mxu1 %v15724_v0 }
0x7179   :  { %v11029_v48 = vmul.f32 1.442695, %v11024_v37 }
0x717b   :  { %15639 = vpow2.f32 %v11029_v48 }
0x7180   :  { %v15636_v50 = vpop.eup %15635 }
0x7181   :  { %v11031_v53 = vsel %vm3092_vm6, %v15636_v50, 0.0 }
0x7182   :  { %11032 = vadd.xlane.f32.xlu0 %v11031_v53 }
0x7184   :  { %v15638_v38 = vpop.eup %15637 }
0x7185   :  { %v11034_v10 = vsel %vm3092_vm6, %v15638_v38, 0.0 }
0x7186   :  { %11035 = vadd.xlane.f32.xlu1 %v11034_v10 }
0x7188   :  { %v15640_v34 = vpop.eup %15639 }
0x7189   :  { %v11037_v6 = vsel %vm3092_vm6, %v15640_v34, 0.0 }
0x718a   :  { %11038 = vadd.xlane.f32.xlu0 %v11037_v6 }
0x7197   :  { %11046 = vrot.lane.b32.xlu1 %v18058_v31, %s15727_s30 }
0x71a0   :  { %11048 = vrot.lane.b32.xlu0 %v18054_v13, %s15727_s30 }
0x71bb   :  { %11315 = vmax.xlane.f32.xlu1 %v11314_v19 }
0x71bf   :  { %11318 = vmax.xlane.f32.xlu0 %v11317_v51 }
0x71c3   :  { %11321 = vmax.xlane.f32.xlu0 %v11320_v54 }
0x71cc   :  { %11349 = vrot.lane.b32.xlu1 %v18054_v13, %s15730_s12 }
0x71d0   :  { %11347 = vrot.lane.b32.xlu1 %v18058_v31, %s15730_s12 }
0x71d9   :  { %11351 = vrot.lane.b32.xlu0 %v18050_v21, %s15730_s12 }
0x720b   :  { %v11033_v14 = vpop.xlane.xlu0 %11032 }
0x720c   :  { %15641 = vrcp.f32 %v11033_v14  ;;  %v13287_v14 = vld [vmem:[%s18452_s3 + $0x34] sm:$0xf] }
0x720d   :  { %15139 = vmatprep.subr.msk.bf16.mxu0 %vm444_vm5, %v13287_v14 }
0x720f   :  { %v11036_v30 = vpop.xlane.xlu1 %11035 }
0x7210   :  { %15643 = vrcp.f32 %v11036_v30  ;;  %v11454_v30 = vsel %vm444_vm5, %v13287_v14, 0 }
0x7211   :  { %15006 = vmatpush3.bf16.msra.mxu0 %v11454_v30 }
0x7212   :  { %15026 = vmatprep.subr.mxu0 %v15724_v0 }
0x7213   :  { %v11039_v26 = vpop.xlane.xlu0 %11038  ;;  %v11047_v3 = vpop.permute.xlu1 %11046 }
0x7214   :  { %15645 = vrcp.f32 %v11039_v26 }
0x7217   :  { %v11049_v28 = vpop.permute.xlu0 %11048 }
0x7218   :  { %14957 = vmatpush3.msra.mxu1 %v11049_v28 }
0x7219   :  { %v15642_v43 = vpop.eup %15641  ;;  %14958 = vmatprep.subr.mxu1 %v15724_v0 }
0x721a   :  { %v11041_v11 = vmul.f32 %v15642_v43, %v15636_v50  ;;  %14959 = vmatpush3.msra.mxu1 %v11047_v3 }
0x721b   :  { %15138 = vmatprep.subr.msk.bf16.mxu1 %vm444_vm5, %v13286_v16 }
0x721c   :  { %14961 = vmatmul.mubr.msk.f32.vlgmr.msra.gmra.mxu1 %vm3092_vm6, %v11041_v11 }
0x721d   :  { %v15644_v32 = vpop.eup %15643  ;;  %14963 = vmatprep.mubr.msk.f32.mxu1 %vm15725_vm0, %v15724_v0  ;;  %14970 = vmatpush3.bf16.msra.mxu1 %v11153_v56 }
0x721e   :  { %v11043_v36 = vmul.f32 %v15644_v32, %v15638_v38  ;;  %14990 = vmatprep.subr.mxu1 %v15724_v0 }
0x7220   :  { %14964 = vmatmul.mubr.msk.f32.gmra.mxu1 %vm3092_vm6, %v11043_v36 }
0x7221   :  { %v15646_v4 = vpop.eup %15645  ;;  %14966 = vmatprep.mubr.msk.f32.mxu1 %vm15725_vm0, %v15724_v0 }
0x7222   :  { %v11045_v24 = vmul.f32 %v15646_v4, %v15640_v34 }
0x7224   :  { %14967 = vmatmul.mubr.msk.f32.gmra.mxu1 %vm3092_vm6, %v11045_v24 }
0x7244   :  { %v11316_v23 = vpop.xlane.xlu1 %11315 }
0x7245   :  { %v11323_v39 = vsub.f32 %v11301_v33, %v11316_v23 }
0x7247   :  { %v11326_v60 = vmul.f32 1.442695, %v11323_v39 }
0x7248   :  { %v11319_v29 = vpop.xlane.xlu0 %11318  ;;  %v11350_v20 = vpop.permute.xlu1 %11349 }
0x7249   :  { %15647 = vpow2.f32 %v11326_v60  ;;  %v11324_v25 = vsub.f32 %v11306_v40, %v11319_v29 }
0x724b   :  { %v11328_v46 = vmul.f32 1.442695, %v11324_v25 }
0x724c   :  { %v11322_v57 = vpop.xlane.xlu0 %11321  ;;  %v11348_v47 = vpop.permute.xlu1 %11347 }
0x724d   :  { %15649 = vpow2.f32 %v11328_v46  ;;  %v11325_v58 = vsub.f32 %v11311_v61, %v11322_v57 }
0x724f   :  { %v11330_v59 = vmul.f32 1.442695, %v11325_v58 }
0x7250   :  { %v11352_v41 = vpop.permute.xlu0 %11351 }
0x7251   :  { %15651 = vpow2.f32 %v11330_v59 }
0x7256   :  { %v15648_v49 = vpop.eup %15647 }
0x7257   :  { %v11332_v55 = vsel %vm3092_vm6, %v15648_v49, 0.0 }
0x7258   :  { %11333 = vadd.xlane.f32.xlu1 %v11332_v55 }
0x725a   :  { %v15650_v35 = vpop.eup %15649 }
0x725b   :  { %v11335_v63 = vsel %vm3092_vm6, %v15650_v35, 0.0 }
0x725c   :  { %11336 = vadd.xlane.f32.xlu0 %v11335_v63 }
0x725e   :  { %v15652_v8 = vpop.eup %15651 }
0x725f   :  { %v11338_v22 = vsel %vm3092_vm6, %v15652_v8, 0.0 }
0x7269   :  { %11515 = vrot.lane.b32.xlu1 %v18054_v13, %s15731_s13 }
0x7272   :  { %11517 = vrot.lane.b32.xlu0 %v18050_v21, %s15731_s13 }
0x7276   :  { %11513 = vrot.lane.b32.xlu0 %v18058_v31, %s15731_s13 }
0x727a   :  { %11509 = vrot.lane.b32.xlu0 %v18054_v13, %s15732_s14 }
0x728d   :  { %11339 = vadd.xlane.f32.xlu1 %v11338_v22 }
0x729e   :  { %11507 = vrot.lane.b32.xlu1 %v18058_v31, %s15732_s14 }
0x72a2   :  { %11511 = vrot.lane.b32.xlu1 %v18050_v21, %s15732_s14 }
0x72dc   :  { %v11130_v62 = vpop.f32.mrf.mxu1 }
0x72de   :  { %v14962_v27 = vpop.f32.mrf.mxu1 }
0x72e0   :  { %v11135_v45 = vpop.f32.mrf.mxu1 }
0x72e1   :  { %v11144_v2 = vpack.c.bf16 %v11135_v45, %v11130_v62  ;;  %v11334_v12 = vpop.xlane.xlu1 %11333 }
0x72e2   :  { %15653 = vrcp.f32 %v11334_v12  ;;  %v14965_v7 = vpop.f32.mrf.mxu1 }
0x72e3   :  { %14971 = vmatprep.mubr.msk.bf16.mxu1 %vm246_vm3, %v11144_v2 }
0x72e4   :  { %v11140_v18 = vpop.f32.mrf.mxu1 }
0x72e5   :  { %v11145_v17 = vpack.c.bf16 %v11140_v18, %v11140_v18  ;;  %v11337_v15 = vpop.xlane.xlu0 %11336  ;;  %v11516_v34 = vpop.permute.xlu1 %11515 }
0x72e6   :  { %15655 = vrcp.f32 %v11337_v15  ;;  %v14968_v37 = vpop.f32.mrf.mxu1 }
0x72e7   :  { %14972 = vmatmul.mubr.msk.bf16.vlgmr.msra.gmra.mxu1 %vm246_vm3, %v11145_v17 }
0x72e8   :  { %14991 = vmatpush3.msra.mxu1 %v11352_v41  ;;  %14996 = vmatprep.mubr.msk.f32.mxu1 %vm15725_vm0, %v15724_v0 }
0x72e9   :  { %14992 = vmatprep.subr.mxu1 %v15724_v0  ;;  %v11518_v53 = vpop.permute.xlu0 %11517 }
0x72ea   :  { %14993 = vmatpush3.msra.mxu1 %v11350_v20 }
0x72eb   :  { %14994 = vmatprep.subr.mxu1 %v15724_v0 }
0x72ec   :  { %14995 = vmatpush3.msra.mxu1 %v11348_v47 }
0x72ed   :  { %15011 = vmatprep.subr.mxu1 %v15724_v0  ;;  %v11514_v6 = vpop.permute.xlu0 %11513 }
0x72ef   :  { %v15654_v48 = vpop.eup %15653 }
0x72f0   :  { %v11342_v50 = vmul.f32 %v15654_v48, %v15648_v49 }
0x72f1   :  { %v11510_v51 = vpop.permute.xlu0 %11509 }
0x72f2   :  { %14997 = vmatmul.mubr.msk.f32.vlgmr.msra.gmra.mxu1 %vm3092_vm6, %v11342_v50 }
0x72f3   :  { %v15656_v38 = vpop.eup %15655  ;;  %15012 = vmatpush3.xpose.msk.msra.mxu1 %vm246_vm3, %v11518_v53  ;;  %14999 = vmatprep.mubr.msk.f32.mxu1 %vm15725_vm0, %v15724_v0 }
0x72f4   :  { %15013 = vmatprep.subr.mxu1 %v15724_v0  ;;  %v11344_v10 = vmul.f32 %v15656_v38, %v15650_v35  ;;  %v18237_v38 = vld [vmem:[%s18450_s6 + $0x1b] ss:$0 sm:$0xff] }
0x72f6   :  { %15000 = vmatmul.mubr.msk.f32.gmra.mxu1 %vm3092_vm6, %v11344_v10 }
0x72f7   :  { %15014 = vmatpush3.xpose.msk.msra.mxu1 %vm246_vm3, %v11516_v34  ;;  %15002 = vmatprep.mubr.msk.f32.mxu1 %vm15725_vm0, %v15724_v0 }
0x72f8   :  { %15015 = vmatprep.subr.mxu1 %v15724_v0 }
0x72fb   :  { %15016 = vmatpush3.xpose.msk.msra.mxu1 %vm246_vm3, %v11514_v6 }
0x7316   :  { %v11340_v33 = vpop.xlane.xlu1 %11339 }
0x7317   :  { %15657 = vrcp.f32 %v11340_v33 }
0x731a   :  { %v11508_v61 = vpop.permute.xlu1 %11507 }
0x731e   :  { %v11512_v54 = vpop.permute.xlu1 %11511 }
0x7324   :  { %v15658_v40 = vpop.eup %15657 }
0x7325   :  { %v11346_v19 = vmul.f32 %v15658_v40, %v15652_v8 }
0x7327   :  { %15003 = vmatmul.mubr.msk.f32.gmra.mxu1 %vm3092_vm6, %v11346_v19 }
0x7328   :  { %15017 = vmatprep.mubr.msk.f32.mxu1 %vm15725_vm0, %v15724_v0 }
0x732b   :  { %15018 = vmatmul.mubr.msk.f32.vlgmr.msra.gmra.mxu1 %vm246_vm3, %v11508_v61 }
0x732c   :  { %15020 = vmatprep.mubr.msk.f32.mxu1 %vm15725_vm0, %v15724_v0 }
0x732f   :  { %15021 = vmatmul.mubr.msk.f32.gmra.mxu1 %vm246_vm3, %v11510_v51 }
0x7330   :  { %15023 = vmatprep.mubr.msk.f32.mxu1 %vm15725_vm0, %v15724_v0 }
0x7333   :  { %15024 = vmatmul.mubr.msk.f32.gmra.mxu1 %vm246_vm3, %v11512_v54 }
0x73a7   :  { %v18200_v26 = vpop.f32.mrf.mxu1 }
0x73a8   :  { %v11209_v10 = vadd.f32 %v18200_v26, %v18237_v38 }
0x73a9   :  { %v18202_v28 = vpop.f32.mrf.mxu1 }
0x73aa   :  { %v11207_v6 = vadd.f32 %v18237_v38, %v18202_v28 }
0x73ab   :  { %v14974_v43 = vpop.f32.mrf.mxu1 }
0x73ad   :  { %v18204_v3 = vpop.f32.mrf.mxu1 }
0x73b2   :  { %v11431_v11 = vpop.f32.mrf.mxu1 }
0x73b4   :  { %v14998_v32 = vpop.f32.mrf.mxu1 }
0x73b6   :  { %v11436_v36 = vpop.f32.mrf.mxu1 }
0x73b7   :  { %v11445_v4 = vpack.c.bf16 %v11436_v36, %v11431_v11 }
0x73b8   :  { %v15001_v24 = vpop.f32.mrf.mxu1 }
0x73b9   :  { %15007 = vmatprep.mubr.msk.bf16.mxu0 %vm246_vm3, %v11445_v4 }
0x73e7   :  { %v11441_v23 = vpop.f32.mrf.mxu1 }
0x73e8   :  { %v11446_v39 = vpack.c.bf16 %v11441_v23, %v11441_v23 }
0x73e9   :  { %v15004_v60 = vpop.f32.mrf.mxu1 }
0x73ea   :  { %15008 = vmatmul.mubr.msk.bf16.vlgmr.msra.gmra.mxu0 %vm246_vm3, %v11446_v39 }
0x73eb   :  { %v11597_v29 = vpop.f32.mrf.mxu1  ;;  %15032 = vmatprep.mubr.msk.f32.mxu0 %vm15725_vm0, %v15724_v0 }
0x73ec   :  { %v11598_v25 = vadd.f32 %v18107_v52, %v11597_v29  ;;  %v13288_v29 = vld [vmem:[%s18452_s3 + $0x38] sm:$0xf] }
0x73ed   :  { %v15019_v46 = vpop.f32.mrf.mxu1  ;;  %15140 = vmatprep.subr.msk.bf16.mxu1 %vm444_vm5, %v13288_v29 }
0x73ee   :  { %v11611_v49 = vsel %vm3092_vm6, %v11598_v25, -inf }
0x73ef   :  { %11612 = vmax.xlane.f32.xlu0 %v11611_v49  ;;  %v11602_v55 = vpop.f32.mrf.mxu1 }
0x73f0   :  { %v11603_v35 = vadd.f32 %v18107_v52, %v11602_v55 }
0x73f1   :  { %v15022_v63 = vpop.f32.mrf.mxu1 }
0x73f2   :  { %v11614_v16 = vsel %vm3092_vm6, %v11603_v35, -inf }
0x73f3   :  { %11615 = vmax.xlane.f32.xlu1 %v11614_v16  ;;  %v11607_v56 = vpop.f32.mrf.mxu1 }
0x73f4   :  { %v11608_v57 = vadd.f32 %v18107_v52, %v11607_v56 }
0x73f5   :  { %v15025_v58 = vpop.f32.mrf.mxu1 }
0x73f6   :  { %v11617_v59 = vsel %vm3092_vm6, %v11608_v57, -inf }
0x73f7   :  { %11618 = vmax.xlane.f32.xlu0 %v11617_v59 }
0x7404   :  { %11648 = vrot.lane.b32.xlu1 %v18050_v21, %s15733_s17 }
0x7408   :  { %11644 = vrot.lane.b32.xlu1 %v18058_v31, %s15733_s17 }
0x740c   :  { %11814 = vrot.lane.b32.xlu1 %v18050_v21, %s15734_s18 }
0x740d   :  { %11646 = vrot.lane.b32.xlu0 %v18054_v13, %s15733_s17 }
0x7478   :  { %v11613_v8 = vpop.xlane.xlu0 %11612 }
0x7479   :  { %v11620_v22 = vsub.f32 %v11598_v25, %v11613_v8  ;;  %v11751_v25 = vsel %vm444_vm5, %v13288_v29, 0 }
0x747a   :  { %15042 = vmatpush3.bf16.msra.mxu1 %v11751_v25 }
0x747b   :  { %v11623_v20 = vmul.f32 1.442695, %v11620_v22  ;;  %15062 = vmatprep.subr.mxu1 %v15724_v0 }
0x747c   :  { %v11616_v62 = vpop.xlane.xlu1 %11615 }
0x747d   :  { %15659 = vpow2.f32 %v11623_v20  ;;  %v11621_v47 = vsub.f32 %v11603_v35, %v11616_v62 }
0x747f   :  { %v11625_v27 = vmul.f32 1.442695, %v11621_v47 }
0x7480   :  { %v11619_v45 = vpop.xlane.xlu0 %11618  ;;  %v11649_v41 = vpop.permute.xlu1 %11648 }
0x7481   :  { %15661 = vpow2.f32 %v11625_v27  ;;  %v11622_v2 = vsub.f32 %v11608_v57, %v11619_v45  ;;  %15027 = vmatpush3.msra.mxu0 %v11649_v41 }
0x7482   :  { %15028 = vmatprep.subr.mxu0 %v15724_v0 }
0x7483   :  { %v11627_v12 = vmul.f32 1.442695, %v11622_v2 }
0x7484   :  { %v11647_v7 = vpop.permute.xlu0 %11646  ;;  %v11645_v18 = vpop.permute.xlu1 %11644 }
0x7485   :  { %15663 = vpow2.f32 %v11627_v12  ;;  %15029 = vmatpush3.msra.mxu0 %v11647_v7 }
0x7486   :  { %15030 = vmatprep.subr.mxu0 %v15724_v0 }
0x7487   :  { %15031 = vmatpush3.msra.mxu0 %v11645_v18 }
0x7488   :  { %15047 = vmatprep.subr.mxu0 %v15724_v0  ;;  %v11815_v51 = vpop.permute.xlu1 %11814 }
0x748a   :  { %v15660_v17 = vpop.eup %15659 }
0x748b   :  { %v11629_v15 = vsel %vm3092_vm6, %v15660_v17, 0.0 }
0x748c   :  { %11630 = vadd.xlane.f32.xlu0 %v11629_v15 }
0x748e   :  { %v15662_v37 = vpop.eup %15661 }
0x748f   :  { %v11632_v48 = vsel %vm3092_vm6, %v15662_v37, 0.0 }
0x7490   :  { %11633 = vadd.xlane.f32.xlu1 %v11632_v48 }
0x7492   :  { %v15664_v50 = vpop.eup %15663 }
0x7493   :  { %v11635_v53 = vsel %vm3092_vm6, %v15664_v50, 0.0 }
0x7494   :  { %11636 = vadd.xlane.f32.xlu0 %v11635_v53 }
0x74a1   :  { %11810 = vrot.lane.b32.xlu1 %v18058_v31, %s15734_s18 }
0x74a5   :  { %11806 = vrot.lane.b32.xlu1 %v18054_v13, %s15735_s19 }
0x74aa   :  { %v15009_v34 = vpop.f32.mrf.mxu0  ;;  %11812 = vrot.lane.b32.xlu0 %v18054_v13, %s15734_s18 }
0x74ab   :  { %v18245_v33 = vadd.f32 %v15009_v34, %v11209_v10 }
0x74ac   :  { %v11490_v40 = vpop.f32.mrf.mxu0 }
0x74ad   :  { %v18247_v19 = vadd.f32 %v11490_v40, %v11207_v6 }
0x74ae   :  { %v15010_v61 = vpop.f32.mrf.mxu0  ;;  %11804 = vrot.lane.b32.xlu0 %v18058_v31, %s15735_s19 }
0x74b0   :  { %v18280_v46 = vpop.f32.mrf.mxu0 }
0x74b2   :  { %11808 = vrot.lane.b32.xlu0 %v18050_v21, %s15735_s19 }
0x7515   :  { %v11631_v54 = vpop.xlane.xlu0 %11630 }
0x7516   :  { %15665 = vrcp.f32 %v11631_v54 }
0x7519   :  { %v11634_v14 = vpop.xlane.xlu1 %11633 }
0x751a   :  { %15667 = vrcp.f32 %v11634_v14 }
0x751d   :  { %v11637_v30 = vpop.xlane.xlu0 %11636  ;;  %v11811_v24 = vpop.permute.xlu1 %11810 }
0x751e   :  { %15669 = vrcp.f32 %v11637_v30 }
0x7521   :  { %v11813_v32 = vpop.permute.xlu0 %11812  ;;  %v11807_v39 = vpop.permute.xlu1 %11806 }
0x7523   :  { %v15666_v26 = vpop.eup %15665 }
0x7524   :  { %v11639_v28 = vmul.f32 %v15666_v26, %v15660_v17 }
0x7525   :  { %v11805_v23 = vpop.permute.xlu0 %11804 }
0x7526   :  { %15033 = vmatmul.mubr.msk.f32.vlgmr.msra.gmra.mxu0 %vm3092_vm6, %v11639_v28 }
0x7527   :  { %v15668_v43 = vpop.eup %15667  ;;  %15048 = vmatpush3.xpose.msk.msra.mxu0 %vm246_vm3, %v11815_v51  ;;  %15035 = vmatprep.mubr.msk.f32.mxu0 %vm15725_vm0, %v15724_v0 }
0x7528   :  { %15049 = vmatprep.subr.mxu0 %v15724_v0  ;;  %v11641_v11 = vmul.f32 %v15668_v43, %v15662_v37 }
0x7529   :  { %v11809_v60 = vpop.permute.xlu0 %11808 }
0x752a   :  { %15036 = vmatmul.mubr.msk.f32.gmra.mxu0 %vm3092_vm6, %v11641_v11 }
0x752b   :  { %v15670_v36 = vpop.eup %15669  ;;  %15050 = vmatpush3.xpose.msk.msra.mxu0 %vm246_vm3, %v11813_v32  ;;  %15038 = vmatprep.mubr.msk.f32.mxu0 %vm15725_vm0, %v15724_v0 }
0x752c   :  { %15051 = vmatprep.subr.mxu0 %v15724_v0  ;;  %v11643_v4 = vmul.f32 %v15670_v36, %v15664_v50 }
0x752e   :  { %15039 = vmatmul.mubr.msk.f32.gmra.mxu0 %vm3092_vm6, %v11643_v4 }
0x752f   :  { %15052 = vmatpush3.xpose.msk.msra.mxu0 %vm246_vm3, %v11811_v24  ;;  %15053 = vmatprep.mubr.msk.f32.mxu0 %vm15725_vm0, %v15724_v0 }
0x7532   :  { %15054 = vmatmul.mubr.msk.f32.vlgmr.msra.gmra.mxu0 %vm246_vm3, %v11805_v23 }
0x7533   :  { %15056 = vmatprep.mubr.msk.f32.mxu0 %vm15725_vm0, %v15724_v0 }
0x7536   :  { %15057 = vmatmul.mubr.msk.f32.gmra.mxu0 %vm246_vm3, %v11807_v39 }
0x7537   :  { %15059 = vmatprep.mubr.msk.f32.mxu0 %vm15725_vm0, %v15724_v0 }
0x753a   :  { %15060 = vmatmul.mubr.msk.f32.gmra.mxu0 %vm246_vm3, %v11809_v60  ;;  %v13289_v60 = vld [vmem:[%s18452_s3 + $0x3c] sm:$0xf] }
0x753b   :  { %15141 = vmatprep.subr.msk.bf16.mxu0 %vm444_vm5, %v13289_v60  ;;  %v12048_v29 = vsel %vm444_vm5, %v13289_v60, 0  ;;  %v13341_v60 = vld [vmem:[%s18450_s6 + $0x1d] ss:$0 sm:$0xff] }
0x753c   :  { %15078 = vmatpush3.bf16.msra.mxu0 %v12048_v29 }
0x75e6   :  { %v11728_v49 = vpop.f32.mrf.mxu0 }
0x75e8   :  { %v15034_v55 = vpop.f32.mrf.mxu0 }
0x75ea   :  { %v11733_v35 = vpop.f32.mrf.mxu0 }
0x75eb   :  { %v11742_v63 = vpack.c.bf16 %v11733_v35, %v11728_v49 }
0x75ec   :  { %v15037_v16 = vpop.f32.mrf.mxu0 }
0x75ed   :  { %15043 = vmatprep.mubr.msk.bf16.mxu1 %vm246_vm3, %v11742_v63 }
0x75ee   :  { %v11738_v56 = vpop.f32.mrf.mxu0 }
0x75ef   :  { %v11743_v57 = vpack.c.bf16 %v11738_v56, %v11738_v56 }
0x75f0   :  { %v15040_v58 = vpop.f32.mrf.mxu0 }
0x75f1   :  { %15044 = vmatmul.mubr.msk.bf16.vlgmr.msra.gmra.mxu1 %vm246_vm3, %v11743_v57 }
0x75f2   :  { %v11894_v59 = vpop.f32.mrf.mxu0  ;;  %15068 = vmatprep.mubr.msk.f32.mxu1 %vm15725_vm0, %v15724_v0 }
0x75f3   :  { %v11895_v8 = vadd.f32 %v18107_v52, %v11894_v59 }
0x75f4   :  { %v15055_v22 = vpop.f32.mrf.mxu0 }
0x75f5   :  { %v11908_v20 = vsel %vm3092_vm6, %v11895_v8, -inf }
0x75f6   :  { %11909 = vmax.xlane.f32.xlu1 %v11908_v20  ;;  %v11899_v62 = vpop.f32.mrf.mxu0 }
0x75f7   :  { %v11900_v47 = vadd.f32 %v18107_v52, %v11899_v62 }
0x75f8   :  { %v15058_v27 = vpop.f32.mrf.mxu0 }
0x75f9   :  { %v11911_v45 = vsel %vm3092_vm6, %v11900_v47, -inf }
0x75fa   :  { %11912 = vmax.xlane.f32.xlu0 %v11911_v45  ;;  %v11904_v41 = vpop.f32.mrf.mxu0 }
0x75fb   :  { %v11905_v2 = vadd.f32 %v18107_v52, %v11904_v41 }
0x75fc   :  { %v15061_v12 = vpop.f32.mrf.mxu0 }
0x75fd   :  { %v11914_v7 = vsel %vm3092_vm6, %v11905_v2, -inf }
0x75fe   :  { %11915 = vmax.xlane.f32.xlu0 %v11914_v7 }
0x767f   :  { %v11910_v18 = vpop.xlane.xlu1 %11909 }
0x7680   :  { %v11917_v17 = vsub.f32 %v11895_v8, %v11910_v18  ;;  %v11208_v8 = vadd.f32 %v18237_v38, %v18204_v3 }
0x7682   :  { %v11920_v15 = vmul.f32 1.442695, %v11917_v17  ;;  %v11505_v20 = vadd.f32 %v18280_v46, %v11208_v8  ;;  %v13346_v8 = vld [vmem:[%s18450_s6 + $0x1e] ss:$0 sm:$0xff] }
0x7683   :  { %v11913_v37 = vpop.xlane.xlu0 %11912 }
0x7684   :  { %15671 = vpow2.f32 %v11920_v15  ;;  %v11918_v48 = vsub.f32 %v11900_v47, %v11913_v37 }
0x7686   :  { %v11922_v50 = vmul.f32 1.442695, %v11918_v48 }
0x7687   :  { %v11916_v52 = vpop.xlane.xlu0 %11915 }
0x7688   :  { %15673 = vpow2.f32 %v11922_v50  ;;  %v11919_v40 = vsub.f32 %v11905_v2, %v11916_v52 }
0x768a   :  { %v11924_v54 = vmul.f32 1.442695, %v11919_v40 }
0x768c   :  { %15675 = vpow2.f32 %v11924_v54  ;;  %v15234_v54 = vld [vmem:[%s18453_s4 + $0x30] sm:$0xff]  }
0x7691   :  { %v15672_v53 = vpop.eup %15671 }
0x7692   :  { %v11926_v10 = vsel %vm3092_vm6, %v15672_v53, 0.0 }
0x7693   :  { %11927 = vadd.xlane.f32.xlu1 %v11926_v10 }
0x7695   :  { %v15674_v34 = vpop.eup %15673 }
0x7696   :  { %v11929_v6 = vsel %vm3092_vm6, %v15674_v34, 0.0 }
0x7697   :  { %11930 = vadd.xlane.f32.xlu0 %v11929_v6 }
0x7699   :  { %v15676_v28 = vpop.eup %15675 }
0x769a   :  { %v11932_v43 = vsel %vm3092_vm6, %v15676_v28, 0.0 }
0x76a4   :  { %11943 = vrot.lane.b32.xlu1 %v18054_v13, %s15736_s24 }
0x76ad   :  { %11945 = vrot.lane.b32.xlu0 %v18050_v21, %s15736_s24 }
0x76b1   :  { %v15045_v61 = vpop.f32.mrf.mxu1 }
0x76b2   :  { %v11803_v51 = vadd.f32 %v15045_v61, %v18245_v33 }
0x76b3   :  { %v11787_v14 = vpop.f32.mrf.mxu1 }
0x76b4   :  { %v11801_v30 = vadd.f32 %v11787_v14, %v18247_v19 }
0x76b5   :  { %v15046_v26 = vpop.f32.mrf.mxu1 }
0x76b7   :  { %v11790_v25 = vpop.f32.mrf.mxu1 }
0x76b8   :  { %v11802_v45 = vadd.f32 %v11790_v25, %v11505_v20 }
0x76c8   :  { %11933 = vadd.xlane.f32.xlu1 %v11932_v43 }
0x76d9   :  { %11941 = vrot.lane.b32.xlu1 %v18058_v31, %s15736_s24 }
0x771c   :  { %v11928_v13 = vpop.xlane.xlu1 %11927 }
0x771d   :  { %15677 = vrcp.f32 %v11928_v13 }
0x7720   :  { %v11931_v11 = vpop.xlane.xlu0 %11930  ;;  %v11944_v32 = vpop.permute.xlu1 %11943 }
0x7721   :  { %15679 = vrcp.f32 %v11931_v11 }
0x7724   :  { %v11946_v21 = vpop.permute.xlu0 %11945 }
0x7725   :  { %15063 = vmatpush3.msra.mxu1 %v11946_v21 }
0x7726   :  { %15064 = vmatprep.subr.mxu1 %v15724_v0 }
0x7727   :  { %15065 = vmatpush3.msra.mxu1 %v11944_v32 }
0x7728   :  { %15066 = vmatprep.subr.mxu1 %v15724_v0 }
0x772a   :  { %v15678_v19 = vpop.eup %15677 }
0x772b   :  { %v11936_v36 = vmul.f32 %v15678_v19, %v15672_v53 }
0x772e   :  { %v15680_v24 = vpop.eup %15679 }
0x772f   :  { %v11938_v31 = vmul.f32 %v15680_v24, %v15674_v34 }
0x7751   :  { %v11934_v33 = vpop.xlane.xlu1 %11933 }
0x7752   :  { %15681 = vrcp.f32 %v11934_v33 }
0x7755   :  { %v11942_v4 = vpop.permute.xlu1 %11941 }
0x7756   :  { %15067 = vmatpush3.msra.mxu1 %v11942_v4 }
0x7757   :  { %15069 = vmatmul.mubr.msk.f32.vlgmr.msra.gmra.mxu1 %vm3092_vm6, %v11936_v36  ;;  %v13340_v36 = vld [vmem:[%s18450_s6 + $0x1c] ss:$0 sm:$0xff] }
0x7758   :  { %15071 = vmatprep.mubr.msk.f32.mxu1 %vm15725_vm0, %v15724_v0 }
0x775b   :  { %15072 = vmatmul.mubr.msk.f32.gmra.mxu1 %vm3092_vm6, %v11938_v31 }
0x775c   :  { %15074 = vmatprep.mubr.msk.f32.mxu1 %vm15725_vm0, %v15724_v0 }
0x775f   :  { %v15682_v23 = vpop.eup %15681 }
0x7760   :  { %v11940_v39 = vmul.f32 %v15682_v23, %v15676_v28 }
0x7762   :  { %15075 = vmatmul.mubr.msk.f32.gmra.mxu1 %vm3092_vm6, %v11940_v39 }
0x7817   :  { %v12025_v49 = vpop.f32.mrf.mxu1 }
0x7819   :  { %v15070_v55 = vpop.f32.mrf.mxu1 }
0x781b   :  { %v12030_v35 = vpop.f32.mrf.mxu1 }
0x781c   :  { %v12039_v63 = vpack.c.bf16 %v12030_v35, %v12025_v49 }
0x781d   :  { %v15073_v16 = vpop.f32.mrf.mxu1 }
0x781e   :  { %15079 = vmatprep.mubr.msk.bf16.mxu0 %vm246_vm3, %v12039_v63 }
0x7822   :  { %v12035_v56 = vpop.f32.mrf.mxu1 }
0x7823   :  { %v12040_v57 = vpack.c.bf16 %v12035_v56, %v12035_v56  ;;  %v15235_v56 = vld [vmem:[%s18448_s5 + $0x78] sm:$0xff]  }
0x7824   :  { %v15076_v58 = vpop.f32.mrf.mxu1  ;;  %15091 = vmatprep.subr.bf16.mxu0 %v15235_v56 }
0x7825   :  { %15080 = vmatmul.mubr.msk.bf16.vlgmr.msra.gmra.mxu0 %vm246_vm3, %v12040_v57  ;;  %v15236_v57 = vld [vmem:[%s18448_s5 + $0x70] sm:$0xff]   ;;  %v15237_v58 = vld [vmem:[%s18448_s5 + $0x68] sm:$0xff]  }
0x7826   :  { %15092 = vmatpush3.bf16.msra.mxu0 %v15235_v56 }
0x7827   :  { %15093 = vmatprep.subr.bf16.mxu0 %v15236_v57 }
0x782a   :  { %15094 = vmatpush3.bf16.msra.mxu0 %v15236_v57 }
0x782b   :  { %15095 = vmatprep.subr.bf16.mxu0 %v15237_v58 }
0x782e   :  { %15096 = vmatpush3.bf16.msra.mxu0 %v15237_v58 }
0x78e5   :  { %v15081_v59 = vpop.f32.mrf.mxu0 }
0x78e6   :  { %v12100_v62 = vadd.f32 %v15081_v59, %v11803_v51  ;;  %v15233_v51 = vld [vmem:[%s18453_s4 + $0x38] sm:$0xff]   ;;  %v15238_v59 = vld [vmem:[%s18448_s5 + $0x60] sm:$0xff]  }
0x78e7   :  { %v12084_v22 = vpop.f32.mrf.mxu0  ;;  %15083 = vmatprep.subr.bf16.mxu1 %v15233_v51  ;;  %15097 = vmatprep.subr.bf16.mxu0 %v15238_v59 }
0x78e8   :  { %v12098_v47 = vadd.f32 %v12084_v22, %v11801_v30  ;;  %v18326_v12 = vadd.f32 %v12100_v62, %v18013_v44  ;;  %15084 = vmatpush3.bf16.msra.mxu1 %v15233_v51  ;;  %15098 = vmatpush3.bf16.msra.mxu0 %v15238_v59 }
0x78e9   :  { %v15082_v27 = vpop.f32.mrf.mxu0  ;;  %15085 = vmatprep.subr.bf16.mxu1 %v15234_v54  ;;  %15119 = vmatprep.subr.mxu0 %v15724_v0 }
0x78ea   :  { %v18323_v41 = vadd.f32 %v12098_v47, %v18010_v42  ;;  %v12112_v38 = vsel %vm129_vm2, %v18326_v12, 0.0 }
0x78eb   :  { %v12087_v2 = vpop.f32.mrf.mxu0 }
0x78ec   :  { %v12099_v7 = vadd.f32 %v12087_v2, %v11802_v45  ;;  %v12106_v18 = vsel %vm129_vm2, %v18323_v41, 0.0  ;;  %15086 = vmatpush3.bf16.msra.mxu1 %v15234_v54 }
0x78ed   :  { %12107 = vadd.xlane.f32.xlu0 %v12106_v18  ;;  %15103 = vmatprep.subr.bf16.mxu1 %v15724_v0 }
0x78ee   :  { %v18331_v3 = vadd.f32 %v12099_v7, %v18018_v9 }
0x78f0   :  { %v12109_v46 = vsel %vm129_vm2, %v18331_v3, 0.0 }
0x78f1   :  { %12113 = vadd.xlane.f32.xlu0 %v12112_v38  ;;  %12110 = vadd.xlane.f32.xlu1 %v12109_v46 }
0x7976   :  { %v12108_v42 = vpop.xlane.xlu0 %12107 }
0x7977   :  { %v12115_v17 = vmul.f32 0.03125, %v12108_v42 }
0x7979   :  { %v12118_v44 = vsub.f32 %v18323_v41, %v12115_v17 }
0x797a   :  { %v12114_v15 = vpop.xlane.xlu0 %12113  ;;  %v12111_v37 = vpop.xlane.xlu1 %12110 }
0x797b   :  { %v12117_v48 = vmul.f32 0.03125, %v12114_v15  ;;  %v12116_v50 = vmul.f32 0.03125, %v12111_v37  ;;  %v12121_v53 = vmul.f32 %v12118_v44, %v12118_v44 }
0x797d   :  { %v12120_v9 = vsub.f32 %v18326_v12, %v12117_v48  ;;  %v12119_v10 = vsub.f32 %v18331_v3, %v12116_v50  ;;  %v12124_v34 = vsel %vm129_vm2, %v12121_v53, 0.0 }
0x797e   :  { %12125 = vadd.xlane.f32.xlu0 %v12124_v34 }
0x797f   :  { %v12123_v6 = vmul.f32 %v12120_v9, %v12120_v9  ;;  %v12122_v52 = vmul.f32 %v12119_v10, %v12119_v10 }
0x7981   :  { %v12130_v40 = vsel %vm129_vm2, %v12123_v6, 0.0  ;;  %v12127_v61 = vsel %vm129_vm2, %v12122_v52, 0.0 }
0x7982   :  { %12131 = vadd.xlane.f32.xlu0 %v12130_v40  ;;  %12128 = vadd.xlane.f32.xlu1 %v12127_v61 }
0x7a07   :  { %v12126_v14 = vpop.xlane.xlu0 %12125 }
0x7a08   :  { %v12133_v30 = vmul.f32 0.03125, %v12126_v14 }
0x7a0a   :  { %v12136_v26 = vadd.f32 1e-06, %v12133_v30 }
0x7a0b   :  { %v12132_v28 = vpop.xlane.xlu0 %12131  ;;  %v12129_v43 = vpop.xlane.xlu1 %12128 }
0x7a0c   :  { %15683 = vrsqrt.f32 %v12136_v26  ;;  %v12135_v13 = vmul.f32 0.03125, %v12132_v28  ;;  %v12134_v11 = vmul.f32 0.03125, %v12129_v43 }
0x7a0e   :  { %v12138_v21 = vadd.f32 1e-06, %v12135_v13  ;;  %v12137_v32 = vadd.f32 1e-06, %v12134_v11 }
0x7a10   :  { %15685 = vrsqrt.f32 %v12138_v21 }
0x7a11   :  { %15687 = vrsqrt.f32 %v12137_v32 }
0x7a19   :  { %v15684_v33 = vpop.eup %15683 }
0x7a1a   :  { %v12142_v19 = vmul.f32 %v15684_v33, %v12118_v44  ;;  %v13359_v33 = vld [vmem:[%s18450_s6 + $0x1f] ss:$0 sm:$0xff] }
0x7a1c   :  { %v12149_v39 = vmul.f32 %v13340_v36, %v12142_v19 }
0x7a1d   :  { %v15686_v4 = vpop.eup %15685 }
0x7a1e   :  { %v15688_v24 = vpop.eup %15687  ;;  %v12144_v31 = vmul.f32 %v15686_v4, %v12120_v9  ;;  %v12156_v55 = vadd.f32 %v13341_v60, %v12149_v39 }
0x7a1f   :  { %v12143_v23 = vmul.f32 %v15688_v24, %v12119_v10 }
0x7a20   :  { %v12151_v29 = vmul.f32 %v13340_v36, %v12144_v31 }
0x7a21   :  { %v12150_v25 = vmul.f32 %v13340_v36, %v12143_v23 }
0x7a22   :  { %v12158_v49 = vadd.f32 %v13341_v60, %v12151_v29 }
0x7a23   :  { %v12157_v35 = vadd.f32 %v13341_v60, %v12150_v25 }
0x7a24   :  { %v12165_v63 = vpack.c.bf16 %v12158_v49, %v12158_v49 }
0x7a25   :  { %v12164_v16 = vpack.c.bf16 %v12157_v35, %v12156_v55 }
0x7a27   :  { %15087 = vmatprep.mubr.msk.bf16.mxu1 %vm129_vm2, %v12164_v16 }
0x7a28   :  { %15088 = vmatmul.mubr.msk.bf16.vlgmr.msra.gmra.mxu1 %vm129_vm2, %v12165_v63 }
0x7a29   :  { %15107 = vmatprep.mubr.msk.bf16.mxu1 %vm15725_vm0, %v15724_v0 }
0x7ae8   :  { %v15089_v22 = vpop.f32.mrf.mxu1 }
0x7ae9   :  { %v12231_v20 = vadd.f32 %v15089_v22, %v13346_v8 }
0x7aea   :  { %v12222_v62 = vpop.f32.mrf.mxu1 }
0x7aeb   :  { %v12238_v47 = vmul.f32 %v12231_v20, %v12231_v20  ;;  %v12223_v27 = vadd.f32 %v13346_v8, %v12222_v62 }
0x7aec   :  { %v15090_v45 = vpop.f32.mrf.mxu1 }
0x7aed   :  { %v12241_v2 = vmul.f32 %v12238_v47, %v12231_v20  ;;  %v12236_v7 = vmul.f32 %v12223_v27, %v12223_v27  ;;  %v15240_v45 = vld [vmem:[%s18452_s3 + $0x50] sm:$0xff]  }
0x7aee   :  { %v12225_v18 = vpop.f32.mrf.mxu1 }
0x7aef   :  { %v12244_v38 = vmul.f32 0.044715, %v12241_v2  ;;  %v12239_v46 = vmul.f32 %v12236_v7, %v12223_v27  ;;  %v12226_v42 = vadd.f32 %v13346_v8, %v12225_v18 }
0x7af1   :  { %v12247_v17 = vadd.f32 %v12244_v38, %v12231_v20  ;;  %v12242_v44 = vmul.f32 0.044715, %v12239_v46  ;;  %v12237_v15 = vmul.f32 %v12226_v42, %v12226_v42 }
0x7af3   :  { %v12250_v37 = vmul.f32 0.7978846, %v12247_v17  ;;  %v12245_v48 = vadd.f32 %v12242_v44, %v12223_v27  ;;  %v12240_v50 = vmul.f32 %v12237_v15, %v12226_v42 }
0x7af5   :  { %15689 = vtanh.f32 %v12250_v37  ;;  %v12248_v53 = vmul.f32 0.7978846, %v12245_v48  ;;  %v12243_v9 = vmul.f32 0.044715, %v12240_v50 }
0x7af7   :  { %15691 = vtanh.f32 %v12248_v53  ;;  %v12246_v10 = vadd.f32 %v12243_v9, %v12226_v42  ;;  %v15718_v9 = vld [vmem:[%s18450_s6 + $0x22] ss:$0 sm:$0xff] }
0x7af9   :  { %v12249_v34 = vmul.f32 0.7978846, %v12246_v10 }
0x7afb   :  { %15693 = vtanh.f32 %v12249_v34 }
0x7b02   :  { %v15690_v6 = vpop.eup %15689 }
0x7b03   :  { %v12256_v40 = vadd.f32 1.0, %v15690_v6 }
0x7b04   :  { %v15692_v52 = vpop.eup %15691 }
0x7b05   :  { %v12254_v61 = vadd.f32 1.0, %v15692_v52  ;;  %v12259_v54 = vmul.f32 0.5, %v12256_v40  ;;  %v15719_v40 = vld [vmem:[%s18450_s6 + $0x23] ss:$0 sm:$0xff] }
0x7b07   :  { %v12257_v14 = vmul.f32 0.5, %v12254_v61  ;;  %v12262_v28 = vmul.f32 %v12259_v54, %v12231_v20  ;;  %v15241_v54 = vld [vmem:[%s18452_s3 + $0x68] sm:$0xff]  }
0x7b08   :  { %v15694_v51 = vpop.eup %15693 }
0x7b09   :  { %v12255_v30 = vadd.f32 1.0, %v15694_v51  ;;  %v12260_v43 = vmul.f32 %v12257_v14, %v12223_v27  ;;  %v12273_v21 = vpack.c.bf16 %v12262_v28, %v12262_v28  ;;  %v15239_v27 = vld [vmem:[%s18452_s3 + $0x58] sm:$0xff]  }
0x7b0a   :  { %15104 = vmatpush3.bf16.msra.mxu1 %v15239_v27 }
0x7b0b   :  { %v12258_v26 = vmul.f32 0.5, %v12255_v30  ;;  %15105 = vmatprep.subr.bf16.mxu1 %v15724_v0 }
0x7b0d   :  { %v12261_v13 = vmul.f32 %v12258_v26, %v12226_v42  ;;  %v15242_v26 = vld [vmem:[%s18452_s3 + $0x60] sm:$0xff]  }
0x7b0e   :  { %15106 = vmatpush3.bf16.msra.mxu1 %v15240_v45 }
0x7b0f   :  { %v12272_v11 = vpack.c.bf16 %v12261_v13, %v12260_v43  ;;  %15111 = vmatprep.subr.bf16.mxu1 %v15724_v0 }
0x7b11   :  { %15099 = vmatprep.mubr.msk.bf16.mxu0 %vm80_vm1, %v12272_v11 }
0x7b12   :  { %15100 = vmatmul.mubr.msk.bf16.vlgmr.msra.gmra.mxu0 %vm80_vm1, %v12273_v21 }
0x7b13   :  { %15123 = vmatprep.mubr.msk.f32.mxu0 %vm15725_vm0, %v15724_v0 }
0x7bd2   :  { %v15101_v32 = vpop.f32.mrf.mxu0 }
0x7bd3   :  { %v12351_v36 = vadd.f32 %v15101_v32, %v13359_v33 }
0x7bd4   :  { %v12342_v19 = vpop.f32.mrf.mxu0 }
0x7bd5   :  { %v12343_v4 = vadd.f32 %v13359_v33, %v12342_v19  ;;  %v12358_v39 = vadd.f32 %v12351_v36, %v18326_v12 }
0x7bd6   :  { %v15102_v24 = vpop.f32.mrf.mxu0 }
0x7bd7   :  { %v12356_v31 = vadd.f32 %v12343_v4, %v18323_v41  ;;  %v12365_v55 = vsel %vm129_vm2, %v12358_v39, 0.0 }
0x7bd8   :  { %v12345_v23 = vpop.f32.mrf.mxu0 }
0x7bd9   :  { %v12346_v60 = vadd.f32 %v13359_v33, %v12345_v23  ;;  %v12359_v29 = vsel %vm129_vm2, %v12356_v31, 0.0 }
0x7bda   :  { %12360 = vadd.xlane.f32.xlu1 %v12359_v29 }
0x7bdb   :  { %v12357_v25 = vadd.f32 %v12346_v60, %v18331_v3 }
0x7bdd   :  { %v12362_v49 = vsel %vm129_vm2, %v12357_v25, 0.0 }
0x7bde   :  { %12363 = vadd.xlane.f32.xlu0 %v12362_v49  ;;  %12366 = vadd.xlane.f32.xlu1 %v12365_v55 }
0x7c63   :  { %v12361_v35 = vpop.xlane.xlu1 %12360 }
0x7c64   :  { %v12368_v63 = vmul.f32 0.03125, %v12361_v35 }
0x7c66   :  { %v12371_v16 = vsub.f32 %v12356_v31, %v12368_v63 }
0x7c67   :  { %v12364_v56 = vpop.xlane.xlu0 %12363  ;;  %v12367_v41 = vpop.xlane.xlu1 %12366 }
0x7c68   :  { %v12369_v57 = vmul.f32 0.03125, %v12364_v56  ;;  %v12370_v58 = vmul.f32 0.03125, %v12367_v41  ;;  %v12374_v12 = vmul.f32 %v12371_v16, %v12371_v16 }
0x7c6a   :  { %v12372_v59 = vsub.f32 %v12357_v25, %v12369_v57  ;;  %v12373_v8 = vsub.f32 %v12358_v39, %v12370_v58  ;;  %v12377_v22 = vsel %vm129_vm2, %v12374_v12, 0.0 }
0x7c6b   :  { %12378 = vadd.xlane.f32.xlu0 %v12377_v22  ;;  %v15721_v22 = vld [vmem:[%s18454_s1 + $0x10] sm:$0xff] }
0x7c6c   :  { %v12375_v3 = vmul.f32 %v12372_v59, %v12372_v59  ;;  %v12376_v20 = vmul.f32 %v12373_v8, %v12373_v8 }
0x7c6e   :  { %v12380_v62 = vsel %vm129_vm2, %v12375_v3, 0.0  ;;  %v12383_v47 = vsel %vm129_vm2, %v12376_v20, 0.0  ;;  %v15722_v3 = vld [vmem:[%s18454_s1 + $0x8] sm:$0xff]  ;;  %v15723_v20 = vld [vmem:[%s18454_s1] sm:$0xff] }
0x7c6f   :  { %12381 = vadd.xlane.f32.xlu1 %v12380_v62  ;;  %12384 = vadd.xlane.f32.xlu0 %v12383_v47 }
0x7cf4   :  { %v12379_v2 = vpop.xlane.xlu0 %12378 }
0x7cf5   :  { %v12386_v7 = vmul.f32 0.03125, %v12379_v2 }
0x7cf7   :  { %v12389_v18 = vadd.f32 1e-06, %v12386_v7 }
0x7cf8   :  { %v12385_v38 = vpop.xlane.xlu0 %12384  ;;  %v12382_v46 = vpop.xlane.xlu1 %12381 }
0x7cf9   :  { %15695 = vrsqrt.f32 %v12389_v18  ;;  %v12388_v42 = vmul.f32 0.03125, %v12385_v38  ;;  %v12387_v17 = vmul.f32 0.03125, %v12382_v46 }
0x7cfb   :  { %v12391_v44 = vadd.f32 1e-06, %v12388_v42  ;;  %v12390_v15 = vadd.f32 1e-06, %v12387_v17 }
0x7cfd   :  { %15697 = vrsqrt.f32 %v12391_v44 }
0x7cfe   :  { %15699 = vrsqrt.f32 %v12390_v15 }
0x7d06   :  { %v15696_v37 = vpop.eup %15695 }
0x7d07   :  { %v12395_v48 = vmul.f32 %v15696_v37, %v12371_v16 }
0x7d09   :  { %v12398_v10 = vmul.f32 %v15718_v9, %v12395_v48 }
0x7d0a   :  { %v15698_v50 = vpop.eup %15697 }
0x7d0b   :  { %v15700_v53 = vpop.eup %15699  ;;  %v12397_v6 = vmul.f32 %v15698_v50, %v12373_v8  ;;  %v12401_v61 = vadd.f32 %v15719_v40, %v12398_v10  ;;  %v15720_v8 = vld [vmem:[%s18454_s1 + $0x18] sm:$0xff] }
0x7d0c   :  { %v12396_v34 = vmul.f32 %v15700_v53, %v12372_v59 }
0x7d0d   :  { %v12400_v14 = vmul.f32 %v15718_v9, %v12397_v6 }
0x7d0e   :  { %v12399_v52 = vmul.f32 %v15718_v9, %v12396_v34 }
0x7d0f   :  { %v12403_v28 = vadd.f32 %v15719_v40, %v12400_v14 }
0x7d10   :  { %v12402_v51 = vadd.f32 %v15719_v40, %v12399_v52 }
0x7d11   :  { %v12483_v43 = vpack.c.bf16 %v12403_v28, %v12403_v28 }
0x7d12   :  { %v12408_v30 = vpack.c.bf16 %v12402_v51, %v12401_v61 }
0x7d14   :  { %15108 = vmatmul.mubr.msk.bf16.vlgmr.msra.gmra.mxu1 %vm129_vm2, %v12408_v30 }
0x7d15   :  { %15112 = vmatpush3.bf16.msra.mxu1 %v15241_v54  ;;  %15115 = vmatprep.mubr.msk.bf16.mxu1 %vm15725_vm0, %v15724_v0 }
0x7d16   :  { %15113 = vmatprep.subr.bf16.mxu1 %v15724_v0 }
0x7d19   :  { %15114 = vmatpush3.bf16.msra.mxu1 %v15242_v26 }
0x7d1c   :  { %15116 = vmatmul.mubr.msk.bf16.vlgmr.msra.gmra.mxu1 %vm129_vm2, %v12483_v43 }
0x7dd4   :  { %v12458_v13 = vpop.f32.mrf.mxu1 }
0x7dd5   :  { %v12465_v11 = vmul.f32 %v12458_v13, %v12458_v13 }
0x7dd6   :  { %v15109_v21 = vpop.f32.mrf.mxu1 }
0x7dd7   :  { %v12467_v32 = vsel %vm129_vm2, %v12465_v11, 0.0 }
0x7dd8   :  { %12468 = vadd.xlane.f32.xlu0 %v12467_v32  ;;  %v12461_v33 = vpop.f32.mrf.mxu1 }
0x7dd9   :  { %v12466_v19 = vmul.f32 %v12461_v33, %v12461_v33 }
0x7dda   :  { %v15110_v36 = vpop.f32.mrf.mxu1 }
0x7ddb   :  { %v12470_v4 = vsel %vm129_vm2, %v12466_v19, 0.0 }
0x7ddc   :  { %12471 = vadd.xlane.f32.xlu1 %v12470_v4  ;;  %v12533_v24 = vpop.f32.mrf.mxu1 }
0x7ddd   :  { %v12539_v31 = vmul.f32 %v12533_v24, %v12533_v24 }
0x7dde   :  { %v15117_v23 = vpop.f32.mrf.mxu1 }
0x7ddf   :  { %v12540_v39 = vsel %vm129_vm2, %v12539_v31, 0.0 }
0x7de0   :  { %12541 = vadd.xlane.f32.xlu1 %v12540_v39  ;;  %v12536_v60 = vpop.f32.mrf.mxu1 }
0x7de2   :  { %v15118_v29 = vpop.f32.mrf.mxu1 }
0x7e61   :  { %v12469_v25 = vpop.xlane.xlu0 %12468 }
0x7e62   :  { %v12473_v55 = vmax.f32 %v12469_v25, 1e-24 }
0x7e65   :  { %v12472_v49 = vpop.xlane.xlu1 %12471 }
0x7e66   :  { %v12474_v35 = vmax.f32 %v12472_v49, 1e-24 }
0x7e68   :  { %15701 = vrsqrt.f32 %v12474_v35 }
0x7e69   :  { %v12542_v63 = vpop.xlane.xlu1 %12541  ;;  %15703 = vrsqrt.f32 %v12473_v55 }
0x7e6a   :  { %v12543_v16 = vmax.f32 %v12542_v63, 1e-24 }
0x7e6c   :  { %15705 = vrsqrt.f32 %v12543_v16 }
0x7e75   :  { %v15702_v56 = vpop.eup %15701 }
0x7e76   :  { %v12478_v41 = vmul.f32 %v15702_v56, %v12461_v33  ;;  %v15704_v57 = vpop.eup %15703 }
0x7e77   :  { %v12477_v12 = vmul.f32 %v15704_v57, %v12458_v13 }
0x7e78   :  { %15120 = vmatpush3.xpose.msk.msra.mxu0 %vm129_vm2, %v12478_v41 }
0x7e79   :  { %15121 = vmatprep.subr.mxu0 %v15724_v0  ;;  %v15706_v58 = vpop.eup %15705 }
0x7e7a   :  { %v12545_v59 = vmul.f32 %v15706_v58, %v12533_v24 }
0x7e7c   :  { %15122 = vmatpush3.xpose.msk.msra.mxu0 %vm129_vm2, %v12477_v12 }
0x7e7d   :  { %12679 = vmatprep.subr.mxu0 %v15720_v8 }
0x7e7f   :  { %15124 = vmatmul.mubr.msk.f32.vlgmr.msra.gmra.mxu0 %vm129_vm2, %v12545_v59 }
0x7e80   :  { %12680 = vmatpush1.msra.mxu0 %v15721_v22  ;;  %12715 = vmatprep.mubr.f32.mxu0 %v15724_v0 }
0x7e81   :  { %12681 = vmatprep.subr.mxu0 %v15722_v3 }
0x7e82   :  { %12682 = vmatpush1.msra.mxu0 %v15723_v20 }
0x7f3f   :  { %v12621_v62 = vpop.f32.mrf.mxu0 }
0x7f40   :  { %v12625_v47 = vsel %vm6305_vm7, %v12621_v62, 0.0 }
0x7f41   :  { %v12626_v27 = vrot.slane %v12625_v47, 4  ;;  %v15125_v45 = vpop.f32.mrf.mxu0 }
0x7f43   :  { %v12627_v2 = vadd.f32 %v12626_v27, %v12625_v47 }
0x7f45   :  { %v12628_v7 = vrot.slane %v12627_v2, 2 }
0x7f47   :  { %v12629_v18 = vadd.f32 %v12628_v7, %v12627_v2 }
0x7f49   :  { %v12630_v38 = vrot.slane %v12629_v18, 1 }
0x7f4b   :  { %v12631_v0 = vadd.f32 %v12630_v38, %v12629_v18 }
0x7f4d   :  { %v12632_v46 = vmul.f32 0.2, %v12631_v0 }
0x7f4f   :  { %v12633_v42 = vsub.f32 %v12621_v62, %v12632_v46 }
0x7f51   :  { %v12634_v17 = vmul.f32 %v12633_v42, %v12633_v42 }
0x7f53   :  { %v12635_v44 = vsel %vm6305_vm7, %v12634_v17, 0.0 }
0x7f54   :  { %v12636_v15 = vrot.slane %v12635_v44, 4 }
0x7f56   :  { %v12637_v37 = vadd.f32 %v12636_v15, %v12635_v44 }
0x7f58   :  { %v12638_v48 = vrot.slane %v12637_v37, 2 }
0x7f5a   :  { %v12639_v50 = vadd.f32 %v12638_v48, %v12637_v37 }
0x7f5c   :  { %v12640_v53 = vrot.slane %v12639_v50, 1 }
0x7f5e   :  { %v12641_v9 = vadd.f32 %v12640_v53, %v12639_v50 }
0x7f60   :  { %v12642_v10 = vmul.f32 0.2, %v12641_v9 }
0x7f62   :  { %v12643_v34 = vadd.f32 1e-06, %v12642_v10 }
0x7f64   :  { %15707 = vrsqrt.f32 %v12643_v34 }
0x7f71   :  { %v15708_v6 = vpop.eup %15707 }
0x7f72   :  { %v12645_v52 = vmul.f32 %v15708_v6, %v12633_v42 }
0x7f74   :  { %v12646_v40 = vmul.f32 %v12645_v52, %v17156_v5 }
0x7f76   :  { %v12647_v61 = vadd.f32 %v12646_v40, %v17158_v1 }
0x7f78   :  { %13383 = vmatmul.mubr.msk.f32.vlgmr.msra.gmra.mxu0 %vm330_vm4, %v12647_v61 }
0x8038   :  { %v12717_v51 = vpop.f32.mrf.mxu0 }
0x8039   :  { %13384 = vst [vmem:[%s18455_s7 + $0x10] sm:$0xff] %v12717_v51 }
0x803a   :  { %v12719_v54 = vpop.f32.mrf.mxu0 }
0x803b   :  { %13385 = vst [vmem:[%s18455_s7 + $0x18] sm:$0xff] %v12719_v54 }

</bundles_post_ra>
